<compile_context>
chip_gen: v7x
topology: tpu7x:2x2x1
jax: 0.10.0
libtpu: 0.0.40
codegen_flags: <defaults>
</compile_context>

<pallas_src>
from functools import partial

import jax
import jax.numpy as jnp
from jax.experimental import pallas as pl
from jax.experimental.pallas import tpu as pltpu

LANE_CHUNK = 512       # voxel columns processed per inner (vreg-friendly) step
MAX_TILE_COLS = 32768  # cap on voxel columns per grid step (well under VMEM on v5e/v6e/v7x)


# ----------------------------- fused Pallas kernel ---------------------------

def _fused_infer_kernel(img_ref, lab_ref, w1t_ref, b1_ref, w2_ref, b2_ref,
                        pred_ref, laboh_ref):
    """Pointwise 2-layer MLP + argmax one-hot (pred) + label one-hot, lane-dense.

    img_ref:   (C_in,  TILE_N) f32   voxels on lanes
    lab_ref:   (1,     TILE_N) i32
    w1t_ref:   (H, C_in) f32, b1_ref: (H, 1) f32
    w2_ref:    (H, C_out) f32, b2_ref: (C_out, 1) f32
    pred_ref:  (C_out, TILE_N) f32   one-hot of channel argmax
    laboh_ref: (NCLS,  TILE_N) f32   one-hot of integer label
    """
    c_in, tile_n = img_ref.shape
    hidden = w1t_ref.shape[0]
    c_out = pred_ref.shape[0]
    n_cls = laboh_ref.shape[0]

    w1t = w1t_ref[...]          # (hidden, c_in)
    b1 = b1_ref[...]            # (hidden, 1)
    w2 = w2_ref[...]            # (hidden, c_out)
    b2 = b2_ref[...]            # (c_out, 1)

    # hoisted constants (JAX does not CSE broadcast/iota inside the loop)
    classes = jax.lax.broadcasted_iota(jnp.int32, (c_out, LANE_CHUNK), 0)
    cls_lab = jax.lax.broadcasted_iota(jnp.int32, (n_cls, LANE_CHUNK), 0)

    n_chunks = tile_n // LANE_CHUNK
    for ci in range(n_chunks):                      # static unroll, static slices (free)
        col = ci * LANE_CHUNK
        x = img_ref[:, col:col + LANE_CHUNK]        # (c_in, chunk) f32

        # ---- layer 1: h = relu(W1^T x + b1) as VPU broadcast MACs (no MXU) ----
        h = w1t[:, 0:1] * x[0:1, :]                 # (hidden, chunk)
        for c in range(1, c_in):
            h = h + w1t[:, c:c + 1] * x[c:c + 1, :]
        h = jnp.maximum(h + b1, 0.0)

        # ---- layer 2 fused with argmax: running (max, first-argmax) over classes ----
        best = jnp.sum(w2[:, 0:1] * h, axis=0, keepdims=True) + b2[0:1, :]   # (1, chunk)
        best_idx = jnp.zeros((1, LANE_CHUNK), jnp.int32)
        for o in range(1, c_out):
            lo = jnp.sum(w2[:, o:o + 1] * h, axis=0, keepdims=True) + b2[o:o + 1, :]
            better = lo > best                       # strict ">" keeps first-index tie-break
            best = jnp.where(better, lo, best)
            best_idx = jnp.where(better, o, best_idx)

        # AsDiscrete(argmax=True, to_onehot=c_out) — one lane-dense (c_out, chunk) store
        pred_ref[:, col:col + LANE_CHUNK] = (classes == best_idx).astype(pred_ref.dtype)

        # AsDiscrete(to_onehot=n_cls) on integer labels — lane-dense store
        lab = lab_ref[:, col:col + LANE_CHUNK]       # (1, chunk) i32
        laboh_ref[:, col:col + LANE_CHUNK] = (cls_lab == lab).astype(laboh_ref.dtype)


# ----------------------------- wrapper ---------------------------------------

def _pick_tile(n_cols):
    """Largest multiple-of-LANE_CHUNK divisor of n_cols (<= MAX_TILE_COLS),
    preferring a grid of >= 2 steps so both v7x TensorCores get work."""
    if n_cols <= 2 * LANE_CHUNK:
        return n_cols
    best = LANE_CHUNK
    t = LANE_CHUNK
    while t <= MAX_TILE_COLS and 2 * t <= n_cols:
        if n_cols % t == 0:
            best = t
        t += LANE_CHUNK
    return best


@partial(jax.jit, static_argnames=("num_classes",))
def fused_inference(image, label, w1, b1, w2, b2, num_classes):
    """image (B,C_in,D,H,W) f32, label (B,1,D,H,W) i32 ->
       pred_onehot (B,C_out,D,H,W) f32, label_onehot (B,num_classes,D,H,W) f32.

    Equivalent to MONAI sliding_window_inference(uniform blending) + AsDiscrete post
    transforms for a pointwise model: overlapping windows produce identical per-voxel
    logits, so their weighted average equals a single full-volume model pass.
    """
    b_sz, c_in, d, h, w = image.shape
    hidden = w1.shape[1]
    c_out = w2.shape[1]
    n = b_sz * d * h * w

    # channels-on-sublanes, voxels-on-lanes layout
    img_cn = jnp.transpose(image, (1, 0, 2, 3, 4)).reshape(c_in, n)
    lab_cn = jnp.transpose(label, (1, 0, 2, 3, 4)).reshape(1, n).astype(jnp.int32)

    w1_t = jnp.transpose(w1)                  # (hidden, c_in)
    b1_c = b1.reshape(hidden, 1)
    b2_c = b2.reshape(c_out, 1)

    # pad voxel axis to a multiple of LANE_CHUNK (lane-dense blocks), slice back after
    n_pad = ((n + LANE_CHUNK - 1) // LANE_CHUNK) * LANE_CHUNK
    if n_pad != n:
        img_cn = jnp.pad(img_cn, ((0, 0), (0, n_pad - n)))
        lab_cn = jnp.pad(lab_cn, ((0, 0), (0, n_pad - n)))

    tile_n = _pick_tile(n_pad)
    grid = (n_pad // tile_n,)

    pred_cn, laboh_cn = pl.pallas_call(
        _fused_infer_kernel,
        out_shape=(jax.ShapeDtypeStruct((c_out, n_pad), jnp.float32),
                   jax.ShapeDtypeStruct((num_classes, n_pad), jnp.float32)),
        grid_spec=pltpu.PrefetchScalarGridSpec(
            num_scalar_prefetch=0,
            grid=grid,
            in_specs=[
                pl.BlockSpec((c_in, tile_n), lambda i: (0, i)),
                pl.BlockSpec((1, tile_n), lambda i: (0, i)),
                pl.BlockSpec((hidden, c_in), lambda i: (0, 0)),
                pl.BlockSpec((hidden, 1), lambda i: (0, 0)),
                pl.BlockSpec((hidden, c_out), lambda i: (0, 0)),
                pl.BlockSpec((c_out, 1), lambda i: (0, 0)),
            ],
            out_specs=[
                pl.BlockSpec((c_out, tile_n), lambda i: (0, i)),
                pl.BlockSpec((num_classes, tile_n), lambda i: (0, i)),
            ],
        ),
        compiler_params=pltpu.CompilerParams(dimension_semantics=("parallel",)),
    )(img_cn, lab_cn, w1_t, b1_c, w2, b2_c)

    pred = jnp.transpose(pred_cn[:, :n].reshape(c_out, b_sz, d, h, w), (1, 0, 2, 3, 4))
    laboh = jnp.transpose(
        laboh_cn[:, :n].reshape(num_classes, b_sz, d, h, w), (1, 0, 2, 3, 4))
    return pred, laboh


# ------------------------------- Inference ----------------------------------

class InferencePallas:
    """JAX/Pallas analogue of Inference.forward(): sliding-window inference + AsDiscrete.

    roi_size / overlap / sw_batch_size are kept for interface fidelity; for the pointwise
    surrogate model the sliding-window + uniform blending result is voxel-wise identical
    to one full-volume model pass, which is what the fused kernel computes.
    """

    def __init__(self, params, roi_size, overlap, to_onehot):
        self.params = params
        self.roi_size = roi_size
        self.overlap = overlap
        self.to_onehot = to_onehot

    def forward(self, image, label):
        w1, b1, w2, b2 = self.params
        pred_onehot, label_onehot = fused_inference(
            image, label, w1, b1, w2, b2, num_classes=self.to_onehot)
        return pred_onehot, label_onehot


# --------------------------------- main --------------------------------------

if __name__ == "__main__":
    B, C_IN, D, H, W = 2, 1, 16, 16, 16       # scaled-down volume (orig uses (96,96,96) ROI)
    ROI = (8, 8, 8)
    OVERLAP = 0.5
    NUM_CLASSES = 4                            # to_onehot
    HIDDEN = 32

    key = jax.random.PRNGKey(0)
    k_img, k_lab, k_w1, k_b1, k_w2, k_b2 = jax.random.split(key, 6)

    image = jax.random.normal(k_img, (B, C_IN, D, H, W), jnp.float32)
    label = jax.random.randint(k_lab, (B, 1, D, H, W), 0, NUM_CLASSES, jnp.int32)

    # deterministic synthetic model parameters (pointwise 2-layer MLP over channels)
    w1 = jax.random.normal(k_w1, (C_IN, HIDDEN), jnp.float32) * 0.5
    b1 = jax.random.normal(k_b1, (1, HIDDEN), jnp.float32) * 0.1
    w2 = jax.random.normal(k_w2, (HIDDEN, NUM_CLASSES), jnp.float32) * 0.5
    b2 = jax.random.normal(k_b2, (1, NUM_CLASSES), jnp.float32) * 0.1

    inf = InferencePallas((w1, b1, w2, b2), ROI, OVERLAP, NUM_CLASSES)
    pred_onehot, label_onehot = inf.forward(image, label)
    jax.block_until_ready((pred_onehot, label_onehot))

    assert pred_onehot.shape == (B, NUM_CLASSES, D, H, W)
    assert label_onehot.shape == (B, NUM_CLASSES, D, H, W)
    # one-hot sanity: exactly one class active per voxel
    assert bool(jnp.all(jnp.sum(pred_onehot, axis=1) == 1.0))
    assert bool(jnp.all(jnp.sum(label_onehot, axis=1) == 1.0))

    # pure-JAX reference (pointwise model == sliding-window w/ uniform blending)
    h_ref = jnp.maximum(
        jnp.einsum("bcdhw,cf->bfdhw", image, w1) + b1.reshape(1, HIDDEN, 1, 1, 1), 0.0)
    logits_ref = (jnp.einsum("bfdhw,fo->bodhw", h_ref, w2)
                  + b2.reshape(1, NUM_CLASSES, 1, 1, 1))
    pred_oh_ref = jax.nn.one_hot(jnp.argmax(logits_ref, axis=1), NUM_CLASSES,
                                 axis=1, dtype=jnp.float32)
    lab_oh_ref = jax.nn.one_hot(label[:, 0], NUM_CLASSES, axis=1, dtype=jnp.float32)

    pred_match = float(jnp.mean((pred_onehot == pred_oh_ref).astype(jnp.float32)))
    assert pred_match > 0.999, f"pred one-hot mismatch fraction {1.0 - pred_match}"
    assert bool(jnp.array_equal(label_onehot, lab_oh_ref))

    print("KERNEL_OK")
</pallas_src>

<mosaic_0001>
module attributes {stable_mosaic.version = 11 : i64} {
  func.func @_fused_infer_kernel(%arg0: i32, %arg1: memref<1x4096xf32, #tpu.memory_space<vmem>>, %arg2: memref<1x4096xi32, #tpu.memory_space<vmem>>, %arg3: memref<32x1xf32, #tpu.memory_space<vmem>>, %arg4: memref<32x1xf32, #tpu.memory_space<vmem>>, %arg5: memref<32x4xf32, #tpu.memory_space<vmem>>, %arg6: memref<4x1xf32, #tpu.memory_space<vmem>>, %arg7: memref<4x4096xf32, #tpu.memory_space<vmem>>, %arg8: memref<4x4096xf32, #tpu.memory_space<vmem>>) attributes {dimension_semantics = [#tpu.dimension_semantics<parallel>], iteration_bounds = array<i64: 2>, scalar_prefetch = 0 : i64, scratch_operands = 0 : i64, tpu.core_type = #tpu.core_type<tc>, window_params = [{transform_indices = @transform_0, window_bounds = array<i64: 1, 4096>}, {transform_indices = @transform_1, window_bounds = array<i64: 1, 4096>}, {pipeline_mode = #tpu.pipeline_mode<synchronous>, transform_indices = @transform_2, window_bounds = array<i64: 32, 1>}, {pipeline_mode = #tpu.pipeline_mode<synchronous>, transform_indices = @transform_3, window_bounds = array<i64: 32, 1>}, {pipeline_mode = #tpu.pipeline_mode<synchronous>, transform_indices = @transform_4, window_bounds = array<i64: 32, 4>}, {pipeline_mode = #tpu.pipeline_mode<synchronous>, transform_indices = @transform_5, window_bounds = array<i64: 4, 1>}, {transform_indices = @transform_6, window_bounds = array<i64: 4, 4096>}, {transform_indices = @transform_7, window_bounds = array<i64: 4, 4096>}]} {
    %c0 = arith.constant 0 : index
    %c0_0 = arith.constant 0 : index
    %0 = vector.load %arg3[%c0, %c0_0] : memref<32x1xf32, #tpu.memory_space<vmem>>, vector<32x1xf32>
    %c0_1 = arith.constant 0 : index
    %c0_2 = arith.constant 0 : index
    %1 = vector.load %arg4[%c0_1, %c0_2] : memref<32x1xf32, #tpu.memory_space<vmem>>, vector<32x1xf32>
    %c0_3 = arith.constant 0 : index
    %c0_4 = arith.constant 0 : index
    %2 = vector.load %arg5[%c0_3, %c0_4] : memref<32x4xf32, #tpu.memory_space<vmem>>, vector<32x4xf32>
    %c0_5 = arith.constant 0 : index
    %c0_6 = arith.constant 0 : index
    %3 = vector.load %arg6[%c0_5, %c0_6] : memref<4x1xf32, #tpu.memory_space<vmem>>, vector<4x1xf32>
    %4 = tpu.iota {dimensions = array<i32: 0>} : vector<4x512xi32>
    %5 = tpu.iota {dimensions = array<i32: 0>} : vector<4x512xi32>
    %c0_7 = arith.constant 0 : index
    %c0_8 = arith.constant 0 : index
    %6 = vector.load %arg1[%c0_7, %c0_8] : memref<1x4096xf32, #tpu.memory_space<vmem>>, vector<1x512xf32>
    %7 = vector.broadcast %0 : vector<32x1xf32> to vector<32x512xf32>
    %8 = vector.broadcast %6 : vector<1x512xf32> to vector<32x512xf32>
    %9 = arith.mulf %7, %8 : vector<32x512xf32>
    %10 = vector.broadcast %1 : vector<32x1xf32> to vector<32x512xf32>
    %11 = arith.addf %9, %10 : vector<32x512xf32>
    %cst = arith.constant 0.000000e+00 : f32
    %12 = vector.broadcast %cst : f32 to vector<32x512xf32>
    %13 = arith.maximumf %11, %12 : vector<32x512xf32>
    %14 = vector.extract_strided_slice %2 {offsets = [0, 0], sizes = [32, 1], strides = [1, 1]} : vector<32x4xf32> to vector<32x1xf32>
    %15 = vector.broadcast %14 : vector<32x1xf32> to vector<32x512xf32>
    %16 = arith.mulf %15, %13 : vector<32x512xf32>
    %cst_9 = arith.constant dense<0.000000e+00> : vector<512xf32>
    %17 = vector.multi_reduction <add>, %16, %cst_9 [0] : vector<32x512xf32> to vector<512xf32>
    %18 = vector.shape_cast %17 : vector<512xf32> to vector<1x512xf32>
    %19 = vector.extract_strided_slice %3 {offsets = [0, 0], sizes = [1, 1], strides = [1, 1]} : vector<4x1xf32> to vector<1x1xf32>
    %20 = vector.broadcast %19 : vector<1x1xf32> to vector<1x512xf32>
    %21 = arith.addf %18, %20 : vector<1x512xf32>
    %c0_i32 = arith.constant 0 : i32
    %22 = vector.broadcast %c0_i32 : i32 to vector<1x512xi32>
    %23 = vector.extract_strided_slice %2 {offsets = [0, 1], sizes = [32, 1], strides = [1, 1]} : vector<32x4xf32> to vector<32x1xf32>
    %24 = vector.broadcast %23 : vector<32x1xf32> to vector<32x512xf32>
    %25 = arith.mulf %24, %13 : vector<32x512xf32>
    %cst_10 = arith.constant dense<0.000000e+00> : vector<512xf32>
    %26 = vector.multi_reduction <add>, %25, %cst_10 [0] : vector<32x512xf32> to vector<512xf32>
    %27 = vector.shape_cast %26 : vector<512xf32> to vector<1x512xf32>
    %28 = vector.extract_strided_slice %3 {offsets = [1, 0], sizes = [1, 1], strides = [1, 1]} : vector<4x1xf32> to vector<1x1xf32>
    %29 = vector.broadcast %28 : vector<1x1xf32> to vector<1x512xf32>
    %30 = arith.addf %27, %29 : vector<1x512xf32>
    %31 = arith.cmpf ogt, %30, %21 : vector<1x512xf32>
    %32 = arith.select %31, %30, %21 : vector<1x512xi1>, vector<1x512xf32>
    %c1_i32 = arith.constant 1 : i32
    %33 = vector.broadcast %c1_i32 : i32 to vector<1x512xi32>
    %34 = arith.select %31, %33, %22 : vector<1x512xi1>, vector<1x512xi32>
    %35 = vector.extract_strided_slice %2 {offsets = [0, 2], sizes = [32, 1], strides = [1, 1]} : vector<32x4xf32> to vector<32x1xf32>
    %36 = vector.broadcast %35 : vector<32x1xf32> to vector<32x512xf32>
    %37 = arith.mulf %36, %13 : vector<32x512xf32>
    %cst_11 = arith.constant dense<0.000000e+00> : vector<512xf32>
    %38 = vector.multi_reduction <add>, %37, %cst_11 [0] : vector<32x512xf32> to vector<512xf32>
    %39 = vector.shape_cast %38 : vector<512xf32> to vector<1x512xf32>
    %40 = vector.extract_strided_slice %3 {offsets = [2, 0], sizes = [1, 1], strides = [1, 1]} : vector<4x1xf32> to vector<1x1xf32>
    %41 = vector.broadcast %40 : vector<1x1xf32> to vector<1x512xf32>
    %42 = arith.addf %39, %41 : vector<1x512xf32>
    %43 = arith.cmpf ogt, %42, %32 : vector<1x512xf32>
    %44 = arith.select %43, %42, %32 : vector<1x512xi1>, vector<1x512xf32>
    %c2_i32 = arith.constant 2 : i32
    %45 = vector.broadcast %c2_i32 : i32 to vector<1x512xi32>
    %46 = arith.select %43, %45, %34 : vector<1x512xi1>, vector<1x512xi32>
    %47 = vector.extract_strided_slice %2 {offsets = [0, 3], sizes = [32, 1], strides = [1, 1]} : vector<32x4xf32> to vector<32x1xf32>
    %48 = vector.broadcast %47 : vector<32x1xf32> to vector<32x512xf32>
    %49 = arith.mulf %48, %13 : vector<32x512xf32>
    %cst_12 = arith.constant dense<0.000000e+00> : vector<512xf32>
    %50 = vector.multi_reduction <add>, %49, %cst_12 [0] : vector<32x512xf32> to vector<512xf32>
    %51 = vector.shape_cast %50 : vector<512xf32> to vector<1x512xf32>
    %52 = vector.extract_strided_slice %3 {offsets = [3, 0], sizes = [1, 1], strides = [1, 1]} : vector<4x1xf32> to vector<1x1xf32>
    %53 = vector.broadcast %52 : vector<1x1xf32> to vector<1x512xf32>
    %54 = arith.addf %51, %53 : vector<1x512xf32>
    %55 = arith.cmpf ogt, %54, %44 : vector<1x512xf32>
    %c3_i32 = arith.constant 3 : i32
    %56 = vector.broadcast %c3_i32 : i32 to vector<1x512xi32>
    %57 = arith.select %55, %56, %46 : vector<1x512xi1>, vector<1x512xi32>
    %58 = vector.broadcast %57 : vector<1x512xi32> to vector<4x512xi32>
    %59 = arith.cmpi eq, %4, %58 : vector<4x512xi32>
    %60 = arith.extui %59 : vector<4x512xi1> to vector<4x512xi32>
    %61 = arith.sitofp %60 : vector<4x512xi32> to vector<4x512xf32>
    %c0_13 = arith.constant 0 : index
    %c0_14 = arith.constant 0 : index
    %62 = vector.load %arg7[%c0_13, %c0_14] : memref<4x4096xf32, #tpu.memory_space<vmem>>, vector<4x512xf32>
    tpu.vector_store %arg7[%c0_13, %c0_14], %61 {strides = array<i32>} : memref<4x4096xf32, #tpu.memory_space<vmem>>, vector<4x512xf32>,
    %c0_15 = arith.constant 0 : index
    %c0_16 = arith.constant 0 : index
    %63 = vector.load %arg2[%c0_15, %c0_16] : memref<1x4096xi32, #tpu.memory_space<vmem>>, vector<1x512xi32>
    %64 = vector.broadcast %63 : vector<1x512xi32> to vector<4x512xi32>
    %65 = arith.cmpi eq, %5, %64 : vector<4x512xi32>
    %66 = arith.extui %65 : vector<4x512xi1> to vector<4x512xi32>
    %67 = arith.sitofp %66 : vector<4x512xi32> to vector<4x512xf32>
    %c0_17 = arith.constant 0 : index
    %c0_18 = arith.constant 0 : index
    %68 = vector.load %arg8[%c0_17, %c0_18] : memref<4x4096xf32, #tpu.memory_space<vmem>>, vector<4x512xf32>
    tpu.vector_store %arg8[%c0_17, %c0_18], %67 {strides = array<i32>} : memref<4x4096xf32, #tpu.memory_space<vmem>>, vector<4x512xf32>,
    %c0_19 = arith.constant 0 : index
    %c512 = arith.constant 512 : index
    %69 = vector.load %arg1[%c0_19, %c512] : memref<1x4096xf32, #tpu.memory_space<vmem>>, vector<1x512xf32>
    %70 = vector.broadcast %0 : vector<32x1xf32> to vector<32x512xf32>
    %71 = vector.broadcast %69 : vector<1x512xf32> to vector<32x512xf32>
    %72 = arith.mulf %70, %71 : vector<32x512xf32>
    %73 = vector.broadcast %1 : vector<32x1xf32> to vector<32x512xf32>
    %74 = arith.addf %72, %73 : vector<32x512xf32>
    %cst_20 = arith.constant 0.000000e+00 : f32
    %75 = vector.broadcast %cst_20 : f32 to vector<32x512xf32>
    %76 = arith.maximumf %74, %75 : vector<32x512xf32>
    %77 = vector.extract_strided_slice %2 {offsets = [0, 0], sizes = [32, 1], strides = [1, 1]} : vector<32x4xf32> to vector<32x1xf32>
    %78 = vector.broadcast %77 : vector<32x1xf32> to vector<32x512xf32>
    %79 = arith.mulf %78, %76 : vector<32x512xf32>
    %cst_21 = arith.constant dense<0.000000e+00> : vector<512xf32>
    %80 = vector.multi_reduction <add>, %79, %cst_21 [0] : vector<32x512xf32> to vector<512xf32>
    %81 = vector.shape_cast %80 : vector<512xf32> to vector<1x512xf32>
    %82 = vector.extract_strided_slice %3 {offsets = [0, 0], sizes = [1, 1], strides = [1, 1]} : vector<4x1xf32> to vector<1x1xf32>
    %83 = vector.broadcast %82 : vector<1x1xf32> to vector<1x512xf32>
    %84 = arith.addf %81, %83 : vector<1x512xf32>
    %c0_i32_22 = arith.constant 0 : i32
    %85 = vector.broadcast %c0_i32_22 : i32 to vector<1x512xi32>
    %86 = vector.extract_strided_slice %2 {offsets = [0, 1], sizes = [32, 1], strides = [1, 1]} : vector<32x4xf32> to vector<32x1xf32>
    %87 = vector.broadcast %86 : vector<32x1xf32> to vector<32x512xf32>
    %88 = arith.mulf %87, %76 : vector<32x512xf32>
    %cst_23 = arith.constant dense<0.000000e+00> : vector<512xf32>
    %89 = vector.multi_reduction <add>, %88, %cst_23 [0] : vector<32x512xf32> to vector<512xf32>
    %90 = vector.shape_cast %89 : vector<512xf32> to vector<1x512xf32>
    %91 = vector.extract_strided_slice %3 {offsets = [1, 0], sizes = [1, 1], strides = [1, 1]} : vector<4x1xf32> to vector<1x1xf32>
    %92 = vector.broadcast %91 : vector<1x1xf32> to vector<1x512xf32>
    %93 = arith.addf %90, %92 : vector<1x512xf32>
    %94 = arith.cmpf ogt, %93, %84 : vector<1x512xf32>
    %95 = arith.select %94, %93, %84 : vector<1x512xi1>, vector<1x512xf32>
    %c1_i32_24 = arith.constant 1 : i32
    %96 = vector.broadcast %c1_i32_24 : i32 to vector<1x512xi32>
    %97 = arith.select %94, %96, %85 : vector<1x512xi1>, vector<1x512xi32>
    %98 = vector.extract_strided_slice %2 {offsets = [0, 2], sizes = [32, 1], strides = [1, 1]} : vector<32x4xf32> to vector<32x1xf32>
    %99 = vector.broadcast %98 : vector<32x1xf32> to vector<32x512xf32>
    %100 = arith.mulf %99, %76 : vector<32x512xf32>
    %cst_25 = arith.constant dense<0.000000e+00> : vector<512xf32>
    %101 = vector.multi_reduction <add>, %100, %cst_25 [0] : vector<32x512xf32> to vector<512xf32>
    %102 = vector.shape_cast %101 : vector<512xf32> to vector<1x512xf32>
    %103 = vector.extract_strided_slice %3 {offsets = [2, 0], sizes = [1, 1], strides = [1, 1]} : vector<4x1xf32> to vector<1x1xf32>
    %104 = vector.broadcast %103 : vector<1x1xf32> to vector<1x512xf32>
    %105 = arith.addf %102, %104 : vector<1x512xf32>
    %106 = arith.cmpf ogt, %105, %95 : vector<1x512xf32>
    %107 = arith.select %106, %105, %95 : vector<1x512xi1>, vector<1x512xf32>
    %c2_i32_26 = arith.constant 2 : i32
    %108 = vector.broadcast %c2_i32_26 : i32 to vector<1x512xi32>
    %109 = arith.select %106, %108, %97 : vector<1x512xi1>, vector<1x512xi32>
    %110 = vector.extract_strided_slice %2 {offsets = [0, 3], sizes = [32, 1], strides = [1, 1]} : vector<32x4xf32> to vector<32x1xf32>
    %111 = vector.broadcast %110 : vector<32x1xf32> to vector<32x512xf32>
    %112 = arith.mulf %111, %76 : vector<32x512xf32>
    %cst_27 = arith.constant dense<0.000000e+00> : vector<512xf32>
    %113 = vector.multi_reduction <add>, %112, %cst_27 [0] : vector<32x512xf32> to vector<512xf32>
    %114 = vector.shape_cast %113 : vector<512xf32> to vector<1x512xf32>
    %115 = vector.extract_strided_slice %3 {offsets = [3, 0], sizes = [1, 1], strides = [1, 1]} : vector<4x1xf32> to vector<1x1xf32>
    %116 = vector.broadcast %115 : vector<1x1xf32> to vector<1x512xf32>
    %117 = arith.addf %114, %116 : vector<1x512xf32>
    %118 = arith.cmpf ogt, %117, %107 : vector<1x512xf32>
    %c3_i32_28 = arith.constant 3 : i32
    %119 = vector.broadcast %c3_i32_28 : i32 to vector<1x512xi32>
    %120 = arith.select %118, %119, %109 : vector<1x512xi1>, vector<1x512xi32>
    %121 = vector.broadcast %120 : vector<1x512xi32> to vector<4x512xi32>
    %122 = arith.cmpi eq, %4, %121 : vector<4x512xi32>
    %123 = arith.extui %122 : vector<4x512xi1> to vector<4x512xi32>
    %124 = arith.sitofp %123 : vector<4x512xi32> to vector<4x512xf32>
    %c0_29 = arith.constant 0 : index
    %c512_30 = arith.constant 512 : index
    %125 = vector.load %arg7[%c0_29, %c512_30] : memref<4x4096xf32, #tpu.memory_space<vmem>>, vector<4x512xf32>
    tpu.vector_store %arg7[%c0_29, %c512_30], %124 {strides = array<i32>} : memref<4x4096xf32, #tpu.memory_space<vmem>>, vector<4x512xf32>,
    %c0_31 = arith.constant 0 : index
    %c512_32 = arith.constant 512 : index
    %126 = vector.load %arg2[%c0_31, %c512_32] : memref<1x4096xi32, #tpu.memory_space<vmem>>, vector<1x512xi32>
    %127 = vector.broadcast %126 : vector<1x512xi32> to vector<4x512xi32>
    %128 = arith.cmpi eq, %5, %127 : vector<4x512xi32>
    %129 = arith.extui %128 : vector<4x512xi1> to vector<4x512xi32>
    %130 = arith.sitofp %129 : vector<4x512xi32> to vector<4x512xf32>
    %c0_33 = arith.constant 0 : index
    %c512_34 = arith.constant 512 : index
    %131 = vector.load %arg8[%c0_33, %c512_34] : memref<4x4096xf32, #tpu.memory_space<vmem>>, vector<4x512xf32>
    tpu.vector_store %arg8[%c0_33, %c512_34], %130 {strides = array<i32>} : memref<4x4096xf32, #tpu.memory_space<vmem>>, vector<4x512xf32>,
    %c0_35 = arith.constant 0 : index
    %c1024 = arith.constant 1024 : index
    %132 = vector.load %arg1[%c0_35, %c1024] : memref<1x4096xf32, #tpu.memory_space<vmem>>, vector<1x512xf32>
    %133 = vector.broadcast %0 : vector<32x1xf32> to vector<32x512xf32>
    %134 = vector.broadcast %132 : vector<1x512xf32> to vector<32x512xf32>
    %135 = arith.mulf %133, %134 : vector<32x512xf32>
    %136 = vector.broadcast %1 : vector<32x1xf32> to vector<32x512xf32>
    %137 = arith.addf %135, %136 : vector<32x512xf32>
    %cst_36 = arith.constant 0.000000e+00 : f32
    %138 = vector.broadcast %cst_36 : f32 to vector<32x512xf32>
    %139 = arith.maximumf %137, %138 : vector<32x512xf32>
    %140 = vector.extract_strided_slice %2 {offsets = [0, 0], sizes = [32, 1], strides = [1, 1]} : vector<32x4xf32> to vector<32x1xf32>
    %141 = vector.broadcast %140 : vector<32x1xf32> to vector<32x512xf32>
    %142 = arith.mulf %141, %139 : vector<32x512xf32>
    %cst_37 = arith.constant dense<0.000000e+00> : vector<512xf32>
    %143 = vector.multi_reduction <add>, %142, %cst_37 [0] : vector<32x512xf32> to vector<512xf32>
    %144 = vector.shape_cast %143 : vector<512xf32> to vector<1x512xf32>
    %145 = vector.extract_strided_slice %3 {offsets = [0, 0], sizes = [1, 1], strides = [1, 1]} : vector<4x1xf32> to vector<1x1xf32>
    %146 = vector.broadcast %145 : vector<1x1xf32> to vector<1x512xf32>
    %147 = arith.addf %144, %146 : vector<1x512xf32>
    %c0_i32_38 = arith.constant 0 : i32
    %148 = vector.broadcast %c0_i32_38 : i32 to vector<1x512xi32>
    %149 = vector.extract_strided_slice %2 {offsets = [0, 1], sizes = [32, 1], strides = [1, 1]} : vector<32x4xf32> to vector<32x1xf32>
    %150 = vector.broadcast %149 : vector<32x1xf32> to vector<32x512xf32>
    %151 = arith.mulf %150, %139 : vector<32x512xf32>
    %cst_39 = arith.constant dense<0.000000e+00> : vector<512xf32>
    %152 = vector.multi_reduction <add>, %151, %cst_39 [0] : vector<32x512xf32> to vector<512xf32>
    %153 = vector.shape_cast %152 : vector<512xf32> to vector<1x512xf32>
    %154 = vector.extract_strided_slice %3 {offsets = [1, 0], sizes = [1, 1], strides = [1, 1]} : vector<4x1xf32> to vector<1x1xf32>
    %155 = vector.broadcast %154 : vector<1x1xf32> to vector<1x512xf32>
    %156 = arith.addf %153, %155 : vector<1x512xf32>
    %157 = arith.cmpf ogt, %156, %147 : vector<1x512xf32>
    %158 = arith.select %157, %156, %147 : vector<1x512xi1>, vector<1x512xf32>
    %c1_i32_40 = arith.constant 1 : i32
    %159 = vector.broadcast %c1_i32_40 : i32 to vector<1x512xi32>
    %160 = arith.select %157, %159, %148 : vector<1x512xi1>, vector<1x512xi32>
    %161 = vector.extract_strided_slice %2 {offsets = [0, 2], sizes = [32, 1], strides = [1, 1]} : vector<32x4xf32> to vector<32x1xf32>
    %162 = vector.broadcast %161 : vector<32x1xf32> to vector<32x512xf32>
    %163 = arith.mulf %162, %139 : vector<32x512xf32>
    %cst_41 = arith.constant dense<0.000000e+00> : vector<512xf32>
    %164 = vector.multi_reduction <add>, %163, %cst_41 [0] : vector<32x512xf32> to vector<512xf32>
    %165 = vector.shape_cast %164 : vector<512xf32> to vector<1x512xf32>
    %166 = vector.extract_strided_slice %3 {offsets = [2, 0], sizes = [1, 1], strides = [1, 1]} : vector<4x1xf32> to vector<1x1xf32>
    %167 = vector.broadcast %166 : vector<1x1xf32> to vector<1x512xf32>
    %168 = arith.addf %165, %167 : vector<1x512xf32>
    %169 = arith.cmpf ogt, %168, %158 : vector<1x512xf32>
    %170 = arith.select %169, %168, %158 : vector<1x512xi1>, vector<1x512xf32>
    %c2_i32_42 = arith.constant 2 : i32
    %171 = vector.broadcast %c2_i32_42 : i32 to vector<1x512xi32>
    %172 = arith.select %169, %171, %160 : vector<1x512xi1>, vector<1x512xi32>
    %173 = vector.extract_strided_slice %2 {offsets = [0, 3], sizes = [32, 1], strides = [1, 1]} : vector<32x4xf32> to vector<32x1xf32>
    %174 = vector.broadcast %173 : vector<32x1xf32> to vector<32x512xf32>
    %175 = arith.mulf %174, %139 : vector<32x512xf32>
    %cst_43 = arith.constant dense<0.000000e+00> : vector<512xf32>
    %176 = vector.multi_reduction <add>, %175, %cst_43 [0] : vector<32x512xf32> to vector<512xf32>
    %177 = vector.shape_cast %176 : vector<512xf32> to vector<1x512xf32>
    %178 = vector.extract_strided_slice %3 {offsets = [3, 0], sizes = [1, 1], strides = [1, 1]} : vector<4x1xf32> to vector<1x1xf32>
    %179 = vector.broadcast %178 : vector<1x1xf32> to vector<1x512xf32>
    %180 = arith.addf %177, %179 : vector<1x512xf32>
    %181 = arith.cmpf ogt, %180, %170 : vector<1x512xf32>
    %c3_i32_44 = arith.constant 3 : i32
    %182 = vector.broadcast %c3_i32_44 : i32 to vector<1x512xi32>
    %183 = arith.select %181, %182, %172 : vector<1x512xi1>, vector<1x512xi32>
    %184 = vector.broadcast %183 : vector<1x512xi32> to vector<4x512xi32>
    %185 = arith.cmpi eq, %4, %184 : vector<4x512xi32>
    %186 = arith.extui %185 : vector<4x512xi1> to vector<4x512xi32>
    %187 = arith.sitofp %186 : vector<4x512xi32> to vector<4x512xf32>
    %c0_45 = arith.constant 0 : index
    %c1024_46 = arith.constant 1024 : index
    %188 = vector.load %arg7[%c0_45, %c1024_46] : memref<4x4096xf32, #tpu.memory_space<vmem>>, vector<4x512xf32>
    tpu.vector_store %arg7[%c0_45, %c1024_46], %187 {strides = array<i32>} : memref<4x4096xf32, #tpu.memory_space<vmem>>, vector<4x512xf32>,
    %c0_47 = arith.constant 0 : index
    %c1024_48 = arith.constant 1024 : index
    %189 = vector.load %arg2[%c0_47, %c1024_48] : memref<1x4096xi32, #tpu.memory_space<vmem>>, vector<1x512xi32>
    %190 = vector.broadcast %189 : vector<1x512xi32> to vector<4x512xi32>
    %191 = arith.cmpi eq, %5, %190 : vector<4x512xi32>
    %192 = arith.extui %191 : vector<4x512xi1> to vector<4x512xi32>
    %193 = arith.sitofp %192 : vector<4x512xi32> to vector<4x512xf32>
    %c0_49 = arith.constant 0 : index
    %c1024_50 = arith.constant 1024 : index
    %194 = vector.load %arg8[%c0_49, %c1024_50] : memref<4x4096xf32, #tpu.memory_space<vmem>>, vector<4x512xf32>
    tpu.vector_store %arg8[%c0_49, %c1024_50], %193 {strides = array<i32>} : memref<4x4096xf32, #tpu.memory_space<vmem>>, vector<4x512xf32>,
    %c0_51 = arith.constant 0 : index
    %c1536 = arith.constant 1536 : index
    %195 = vector.load %arg1[%c0_51, %c1536] : memref<1x4096xf32, #tpu.memory_space<vmem>>, vector<1x512xf32>
    %196 = vector.broadcast %0 : vector<32x1xf32> to vector<32x512xf32>
    %197 = vector.broadcast %195 : vector<1x512xf32> to vector<32x512xf32>
    %198 = arith.mulf %196, %197 : vector<32x512xf32>
    %199 = vector.broadcast %1 : vector<32x1xf32> to vector<32x512xf32>
    %200 = arith.addf %198, %199 : vector<32x512xf32>
    %cst_52 = arith.constant 0.000000e+00 : f32
    %201 = vector.broadcast %cst_52 : f32 to vector<32x512xf32>
    %202 = arith.maximumf %200, %201 : vector<32x512xf32>
    %203 = vector.extract_strided_slice %2 {offsets = [0, 0], sizes = [32, 1], strides = [1, 1]} : vector<32x4xf32> to vector<32x1xf32>
    %204 = vector.broadcast %203 : vector<32x1xf32> to vector<32x512xf32>
    %205 = arith.mulf %204, %202 : vector<32x512xf32>
    %cst_53 = arith.constant dense<0.000000e+00> : vector<512xf32>
    %206 = vector.multi_reduction <add>, %205, %cst_53 [0] : vector<32x512xf32> to vector<512xf32>
    %207 = vector.shape_cast %206 : vector<512xf32> to vector<1x512xf32>
    %208 = vector.extract_strided_slice %3 {offsets = [0, 0], sizes = [1, 1], strides = [1, 1]} : vector<4x1xf32> to vector<1x1xf32>
    %209 = vector.broadcast %208 : vector<1x1xf32> to vector<1x512xf32>
    %210 = arith.addf %207, %209 : vector<1x512xf32>
    %c0_i32_54 = arith.constant 0 : i32
    %211 = vector.broadcast %c0_i32_54 : i32 to vector<1x512xi32>
    %212 = vector.extract_strided_slice %2 {offsets = [0, 1], sizes = [32, 1], strides = [1, 1]} : vector<32x4xf32> to vector<32x1xf32>
    %213 = vector.broadcast %212 : vector<32x1xf32> to vector<32x512xf32>
    %214 = arith.mulf %213, %202 : vector<32x512xf32>
    %cst_55 = arith.constant dense<0.000000e+00> : vector<512xf32>
    %215 = vector.multi_reduction <add>, %214, %cst_55 [0] : vector<32x512xf32> to vector<512xf32>
    %216 = vector.shape_cast %215 : vector<512xf32> to vector<1x512xf32>
    %217 = vector.extract_strided_slice %3 {offsets = [1, 0], sizes = [1, 1], strides = [1, 1]} : vector<4x1xf32> to vector<1x1xf32>
    %218 = vector.broadcast %217 : vector<1x1xf32> to vector<1x512xf32>
    %219 = arith.addf %216, %218 : vector<1x512xf32>
    %220 = arith.cmpf ogt, %219, %210 : vector<1x512xf32>
    %221 = arith.select %220, %219, %210 : vector<1x512xi1>, vector<1x512xf32>
    %c1_i32_56 = arith.constant 1 : i32
    %222 = vector.broadcast %c1_i32_56 : i32 to vector<1x512xi32>
    %223 = arith.select %220, %222, %211 : vector<1x512xi1>, vector<1x512xi32>
    %224 = vector.extract_strided_slice %2 {offsets = [0, 2], sizes = [32, 1], strides = [1, 1]} : vector<32x4xf32> to vector<32x1xf32>
    %225 = vector.broadcast %224 : vector<32x1xf32> to vector<32x512xf32>
    %226 = arith.mulf %225, %202 : vector<32x512xf32>
    %cst_57 = arith.constant dense<0.000000e+00> : vector<512xf32>
    %227 = vector.multi_reduction <add>, %226, %cst_57 [0] : vector<32x512xf32> to vector<512xf32>
    %228 = vector.shape_cast %227 : vector<512xf32> to vector<1x512xf32>
    %229 = vector.extract_strided_slice %3 {offsets = [2, 0], sizes = [1, 1], strides = [1, 1]} : vector<4x1xf32> to vector<1x1xf32>
    %230 = vector.broadcast %229 : vector<1x1xf32> to vector<1x512xf32>
    %231 = arith.addf %228, %230 : vector<1x512xf32>
    %232 = arith.cmpf ogt, %231, %221 : vector<1x512xf32>
    %233 = arith.select %232, %231, %221 : vector<1x512xi1>, vector<1x512xf32>
    %c2_i32_58 = arith.constant 2 : i32
    %234 = vector.broadcast %c2_i32_58 : i32 to vector<1x512xi32>
    %235 = arith.select %232, %234, %223 : vector<1x512xi1>, vector<1x512xi32>
    %236 = vector.extract_strided_slice %2 {offsets = [0, 3], sizes = [32, 1], strides = [1, 1]} : vector<32x4xf32> to vector<32x1xf32>
    %237 = vector.broadcast %236 : vector<32x1xf32> to vector<32x512xf32>
    %238 = arith.mulf %237, %202 : vector<32x512xf32>
    %cst_59 = arith.constant dense<0.000000e+00> : vector<512xf32>
    %239 = vector.multi_reduction <add>, %238, %cst_59 [0] : vector<32x512xf32> to vector<512xf32>
    %240 = vector.shape_cast %239 : vector<512xf32> to vector<1x512xf32>
    %241 = vector.extract_strided_slice %3 {offsets = [3, 0], sizes = [1, 1], strides = [1, 1]} : vector<4x1xf32> to vector<1x1xf32>
    %242 = vector.broadcast %241 : vector<1x1xf32> to vector<1x512xf32>
    %243 = arith.addf %240, %242 : vector<1x512xf32>
    %244 = arith.cmpf ogt, %243, %233 : vector<1x512xf32>
    %c3_i32_60 = arith.constant 3 : i32
    %245 = vector.broadcast %c3_i32_60 : i32 to vector<1x512xi32>
    %246 = arith.select %244, %245, %235 : vector<1x512xi1>, vector<1x512xi32>
    %247 = vector.broadcast %246 : vector<1x512xi32> to vector<4x512xi32>
    %248 = arith.cmpi eq, %4, %247 : vector<4x512xi32>
    %249 = arith.extui %248 : vector<4x512xi1> to vector<4x512xi32>
    %250 = arith.sitofp %249 : vector<4x512xi32> to vector<4x512xf32>
    %c0_61 = arith.constant 0 : index
    %c1536_62 = arith.constant 1536 : index
    %251 = vector.load %arg7[%c0_61, %c1536_62] : memref<4x4096xf32, #tpu.memory_space<vmem>>, vector<4x512xf32>
    tpu.vector_store %arg7[%c0_61, %c1536_62], %250 {strides = array<i32>} : memref<4x4096xf32, #tpu.memory_space<vmem>>, vector<4x512xf32>,
    %c0_63 = arith.constant 0 : index
    %c1536_64 = arith.constant 1536 : index
    %252 = vector.load %arg2[%c0_63, %c1536_64] : memref<1x4096xi32, #tpu.memory_space<vmem>>, vector<1x512xi32>
    %253 = vector.broadcast %252 : vector<1x512xi32> to vector<4x512xi32>
    %254 = arith.cmpi eq, %5, %253 : vector<4x512xi32>
    %255 = arith.extui %254 : vector<4x512xi1> to vector<4x512xi32>
    %256 = arith.sitofp %255 : vector<4x512xi32> to vector<4x512xf32>
    %c0_65 = arith.constant 0 : index
    %c1536_66 = arith.constant 1536 : index
    %257 = vector.load %arg8[%c0_65, %c1536_66] : memref<4x4096xf32, #tpu.memory_space<vmem>>, vector<4x512xf32>
    tpu.vector_store %arg8[%c0_65, %c1536_66], %256 {strides = array<i32>} : memref<4x4096xf32, #tpu.memory_space<vmem>>, vector<4x512xf32>,
    %c0_67 = arith.constant 0 : index
    %c2048 = arith.constant 2048 : index
    %258 = vector.load %arg1[%c0_67, %c2048] : memref<1x4096xf32, #tpu.memory_space<vmem>>, vector<1x512xf32>
    %259 = vector.broadcast %0 : vector<32x1xf32> to vector<32x512xf32>
    %260 = vector.broadcast %258 : vector<1x512xf32> to vector<32x512xf32>
    %261 = arith.mulf %259, %260 : vector<32x512xf32>
    %262 = vector.broadcast %1 : vector<32x1xf32> to vector<32x512xf32>
    %263 = arith.addf %261, %262 : vector<32x512xf32>
    %cst_68 = arith.constant 0.000000e+00 : f32
    %264 = vector.broadcast %cst_68 : f32 to vector<32x512xf32>
    %265 = arith.maximumf %263, %264 : vector<32x512xf32>
    %266 = vector.extract_strided_slice %2 {offsets = [0, 0], sizes = [32, 1], strides = [1, 1]} : vector<32x4xf32> to vector<32x1xf32>
    %267 = vector.broadcast %266 : vector<32x1xf32> to vector<32x512xf32>
    %268 = arith.mulf %267, %265 : vector<32x512xf32>
    %cst_69 = arith.constant dense<0.000000e+00> : vector<512xf32>
    %269 = vector.multi_reduction <add>, %268, %cst_69 [0] : vector<32x512xf32> to vector<512xf32>
    %270 = vector.shape_cast %269 : vector<512xf32> to vector<1x512xf32>
    %271 = vector.extract_strided_slice %3 {offsets = [0, 0], sizes = [1, 1], strides = [1, 1]} : vector<4x1xf32> to vector<1x1xf32>
    %272 = vector.broadcast %271 : vector<1x1xf32> to vector<1x512xf32>
    %273 = arith.addf %270, %272 : vector<1x512xf32>
    %c0_i32_70 = arith.constant 0 : i32
    %274 = vector.broadcast %c0_i32_70 : i32 to vector<1x512xi32>
    %275 = vector.extract_strided_slice %2 {offsets = [0, 1], sizes = [32, 1], strides = [1, 1]} : vector<32x4xf32> to vector<32x1xf32>
    %276 = vector.broadcast %275 : vector<32x1xf32> to vector<32x512xf32>
    %277 = arith.mulf %276, %265 : vector<32x512xf32>
    %cst_71 = arith.constant dense<0.000000e+00> : vector<512xf32>
    %278 = vector.multi_reduction <add>, %277, %cst_71 [0] : vector<32x512xf32> to vector<512xf32>
    %279 = vector.shape_cast %278 : vector<512xf32> to vector<1x512xf32>
    %280 = vector.extract_strided_slice %3 {offsets = [1, 0], sizes = [1, 1], strides = [1, 1]} : vector<4x1xf32> to vector<1x1xf32>
    %281 = vector.broadcast %280 : vector<1x1xf32> to vector<1x512xf32>
    %282 = arith.addf %279, %281 : vector<1x512xf32>
    %283 = arith.cmpf ogt, %282, %273 : vector<1x512xf32>
    %284 = arith.select %283, %282, %273 : vector<1x512xi1>, vector<1x512xf32>
    %c1_i32_72 = arith.constant 1 : i32
    %285 = vector.broadcast %c1_i32_72 : i32 to vector<1x512xi32>
    %286 = arith.select %283, %285, %274 : vector<1x512xi1>, vector<1x512xi32>
    %287 = vector.extract_strided_slice %2 {offsets = [0, 2], sizes = [32, 1], strides = [1, 1]} : vector<32x4xf32> to vector<32x1xf32>
    %288 = vector.broadcast %287 : vector<32x1xf32> to vector<32x512xf32>
    %289 = arith.mulf %288, %265 : vector<32x512xf32>
    %cst_73 = arith.constant dense<0.000000e+00> : vector<512xf32>
    %290 = vector.multi_reduction <add>, %289, %cst_73 [0] : vector<32x512xf32> to vector<512xf32>
    %291 = vector.shape_cast %290 : vector<512xf32> to vector<1x512xf32>
    %292 = vector.extract_strided_slice %3 {offsets = [2, 0], sizes = [1, 1], strides = [1, 1]} : vector<4x1xf32> to vector<1x1xf32>
    %293 = vector.broadcast %292 : vector<1x1xf32> to vector<1x512xf32>
    %294 = arith.addf %291, %293 : vector<1x512xf32>
    %295 = arith.cmpf ogt, %294, %284 : vector<1x512xf32>
    %296 = arith.select %295, %294, %284 : vector<1x512xi1>, vector<1x512xf32>
    %c2_i32_74 = arith.constant 2 : i32
    %297 = vector.broadcast %c2_i32_74 : i32 to vector<1x512xi32>
    %298 = arith.select %295, %297, %286 : vector<1x512xi1>, vector<1x512xi32>
    %299 = vector.extract_strided_slice %2 {offsets = [0, 3], sizes = [32, 1], strides = [1, 1]} : vector<32x4xf32> to vector<32x1xf32>
    %300 = vector.broadcast %299 : vector<32x1xf32> to vector<32x512xf32>
    %301 = arith.mulf %300, %265 : vector<32x512xf32>
    %cst_75 = arith.constant dense<0.000000e+00> : vector<512xf32>
    %302 = vector.multi_reduction <add>, %301, %cst_75 [0] : vector<32x512xf32> to vector<512xf32>
    %303 = vector.shape_cast %302 : vector<512xf32> to vector<1x512xf32>
    %304 = vector.extract_strided_slice %3 {offsets = [3, 0], sizes = [1, 1], strides = [1, 1]} : vector<4x1xf32> to vector<1x1xf32>
    %305 = vector.broadcast %304 : vector<1x1xf32> to vector<1x512xf32>
    %306 = arith.addf %303, %305 : vector<1x512xf32>
    %307 = arith.cmpf ogt, %306, %296 : vector<1x512xf32>
    %c3_i32_76 = arith.constant 3 : i32
    %308 = vector.broadcast %c3_i32_76 : i32 to vector<1x512xi32>
    %309 = arith.select %307, %308, %298 : vector<1x512xi1>, vector<1x512xi32>
    %310 = vector.broadcast %309 : vector<1x512xi32> to vector<4x512xi32>
    %311 = arith.cmpi eq, %4, %310 : vector<4x512xi32>
    %312 = arith.extui %311 : vector<4x512xi1> to vector<4x512xi32>
    %313 = arith.sitofp %312 : vector<4x512xi32> to vector<4x512xf32>
    %c0_77 = arith.constant 0 : index
    %c2048_78 = arith.constant 2048 : index
    %314 = vector.load %arg7[%c0_77, %c2048_78] : memref<4x4096xf32, #tpu.memory_space<vmem>>, vector<4x512xf32>
    tpu.vector_store %arg7[%c0_77, %c2048_78], %313 {strides = array<i32>} : memref<4x4096xf32, #tpu.memory_space<vmem>>, vector<4x512xf32>,
    %c0_79 = arith.constant 0 : index
    %c2048_80 = arith.constant 2048 : index
    %315 = vector.load %arg2[%c0_79, %c2048_80] : memref<1x4096xi32, #tpu.memory_space<vmem>>, vector<1x512xi32>
    %316 = vector.broadcast %315 : vector<1x512xi32> to vector<4x512xi32>
    %317 = arith.cmpi eq, %5, %316 : vector<4x512xi32>
    %318 = arith.extui %317 : vector<4x512xi1> to vector<4x512xi32>
    %319 = arith.sitofp %318 : vector<4x512xi32> to vector<4x512xf32>
    %c0_81 = arith.constant 0 : index
    %c2048_82 = arith.constant 2048 : index
    %320 = vector.load %arg8[%c0_81, %c2048_82] : memref<4x4096xf32, #tpu.memory_space<vmem>>, vector<4x512xf32>
    tpu.vector_store %arg8[%c0_81, %c2048_82], %319 {strides = array<i32>} : memref<4x4096xf32, #tpu.memory_space<vmem>>, vector<4x512xf32>,
    %c0_83 = arith.constant 0 : index
    %c2560 = arith.constant 2560 : index
    %321 = vector.load %arg1[%c0_83, %c2560] : memref<1x4096xf32, #tpu.memory_space<vmem>>, vector<1x512xf32>
    %322 = vector.broadcast %0 : vector<32x1xf32> to vector<32x512xf32>
    %323 = vector.broadcast %321 : vector<1x512xf32> to vector<32x512xf32>
    %324 = arith.mulf %322, %323 : vector<32x512xf32>
    %325 = vector.broadcast %1 : vector<32x1xf32> to vector<32x512xf32>
    %326 = arith.addf %324, %325 : vector<32x512xf32>
    %cst_84 = arith.constant 0.000000e+00 : f32
    %327 = vector.broadcast %cst_84 : f32 to vector<32x512xf32>
    %328 = arith.maximumf %326, %327 : vector<32x512xf32>
    %329 = vector.extract_strided_slice %2 {offsets = [0, 0], sizes = [32, 1], strides = [1, 1]} : vector<32x4xf32> to vector<32x1xf32>
    %330 = vector.broadcast %329 : vector<32x1xf32> to vector<32x512xf32>
    %331 = arith.mulf %330, %328 : vector<32x512xf32>
    %cst_85 = arith.constant dense<0.000000e+00> : vector<512xf32>
    %332 = vector.multi_reduction <add>, %331, %cst_85 [0] : vector<32x512xf32> to vector<512xf32>
    %333 = vector.shape_cast %332 : vector<512xf32> to vector<1x512xf32>
    %334 = vector.extract_strided_slice %3 {offsets = [0, 0], sizes = [1, 1], strides = [1, 1]} : vector<4x1xf32> to vector<1x1xf32>
    %335 = vector.broadcast %334 : vector<1x1xf32> to vector<1x512xf32>
    %336 = arith.addf %333, %335 : vector<1x512xf32>
    %c0_i32_86 = arith.constant 0 : i32
    %337 = vector.broadcast %c0_i32_86 : i32 to vector<1x512xi32>
    %338 = vector.extract_strided_slice %2 {offsets = [0, 1], sizes = [32, 1], strides = [1, 1]} : vector<32x4xf32> to vector<32x1xf32>
    %339 = vector.broadcast %338 : vector<32x1xf32> to vector<32x512xf32>
    %340 = arith.mulf %339, %328 : vector<32x512xf32>
    %cst_87 = arith.constant dense<0.000000e+00> : vector<512xf32>
    %341 = vector.multi_reduction <add>, %340, %cst_87 [0] : vector<32x512xf32> to vector<512xf32>
    %342 = vector.shape_cast %341 : vector<512xf32> to vector<1x512xf32>
    %343 = vector.extract_strided_slice %3 {offsets = [1, 0], sizes = [1, 1], strides = [1, 1]} : vector<4x1xf32> to vector<1x1xf32>
    %344 = vector.broadcast %343 : vector<1x1xf32> to vector<1x512xf32>
    %345 = arith.addf %342, %344 : vector<1x512xf32>
    %346 = arith.cmpf ogt, %345, %336 : vector<1x512xf32>
    %347 = arith.select %346, %345, %336 : vector<1x512xi1>, vector<1x512xf32>
    %c1_i32_88 = arith.constant 1 : i32
    %348 = vector.broadcast %c1_i32_88 : i32 to vector<1x512xi32>
    %349 = arith.select %346, %348, %337 : vector<1x512xi1>, vector<1x512xi32>
    %350 = vector.extract_strided_slice %2 {offsets = [0, 2], sizes = [32, 1], strides = [1, 1]} : vector<32x4xf32> to vector<32x1xf32>
    %351 = vector.broadcast %350 : vector<32x1xf32> to vector<32x512xf32>
    %352 = arith.mulf %351, %328 : vector<32x512xf32>
    %cst_89 = arith.constant dense<0.000000e+00> : vector<512xf32>
    %353 = vector.multi_reduction <add>, %352, %cst_89 [0] : vector<32x512xf32> to vector<512xf32>
    %354 = vector.shape_cast %353 : vector<512xf32> to vector<1x512xf32>
    %355 = vector.extract_strided_slice %3 {offsets = [2, 0], sizes = [1, 1], strides = [1, 1]} : vector<4x1xf32> to vector<1x1xf32>
    %356 = vector.broadcast %355 : vector<1x1xf32> to vector<1x512xf32>
    %357 = arith.addf %354, %356 : vector<1x512xf32>
    %358 = arith.cmpf ogt, %357, %347 : vector<1x512xf32>
    %359 = arith.select %358, %357, %347 : vector<1x512xi1>, vector<1x512xf32>
    %c2_i32_90 = arith.constant 2 : i32
    %360 = vector.broadcast %c2_i32_90 : i32 to vector<1x512xi32>
    %361 = arith.select %358, %360, %349 : vector<1x512xi1>, vector<1x512xi32>
    %362 = vector.extract_strided_slice %2 {offsets = [0, 3], sizes = [32, 1], strides = [1, 1]} : vector<32x4xf32> to vector<32x1xf32>
    %363 = vector.broadcast %362 : vector<32x1xf32> to vector<32x512xf32>
    %364 = arith.mulf %363, %328 : vector<32x512xf32>
    %cst_91 = arith.constant dense<0.000000e+00> : vector<512xf32>
    %365 = vector.multi_reduction <add>, %364, %cst_91 [0] : vector<32x512xf32> to vector<512xf32>
    %366 = vector.shape_cast %365 : vector<512xf32> to vector<1x512xf32>
    %367 = vector.extract_strided_slice %3 {offsets = [3, 0], sizes = [1, 1], strides = [1, 1]} : vector<4x1xf32> to vector<1x1xf32>
    %368 = vector.broadcast %367 : vector<1x1xf32> to vector<1x512xf32>
    %369 = arith.addf %366, %368 : vector<1x512xf32>
    %370 = arith.cmpf ogt, %369, %359 : vector<1x512xf32>
    %c3_i32_92 = arith.constant 3 : i32
    %371 = vector.broadcast %c3_i32_92 : i32 to vector<1x512xi32>
    %372 = arith.select %370, %371, %361 : vector<1x512xi1>, vector<1x512xi32>
    %373 = vector.broadcast %372 : vector<1x512xi32> to vector<4x512xi32>
    %374 = arith.cmpi eq, %4, %373 : vector<4x512xi32>
    %375 = arith.extui %374 : vector<4x512xi1> to vector<4x512xi32>
    %376 = arith.sitofp %375 : vector<4x512xi32> to vector<4x512xf32>
    %c0_93 = arith.constant 0 : index
    %c2560_94 = arith.constant 2560 : index
    %377 = vector.load %arg7[%c0_93, %c2560_94] : memref<4x4096xf32, #tpu.memory_space<vmem>>, vector<4x512xf32>
    tpu.vector_store %arg7[%c0_93, %c2560_94], %376 {strides = array<i32>} : memref<4x4096xf32, #tpu.memory_space<vmem>>, vector<4x512xf32>,
    %c0_95 = arith.constant 0 : index
    %c2560_96 = arith.constant 2560 : index
    %378 = vector.load %arg2[%c0_95, %c2560_96] : memref<1x4096xi32, #tpu.memory_space<vmem>>, vector<1x512xi32>
    %379 = vector.broadcast %378 : vector<1x512xi32> to vector<4x512xi32>
    %380 = arith.cmpi eq, %5, %379 : vector<4x512xi32>
    %381 = arith.extui %380 : vector<4x512xi1> to vector<4x512xi32>
    %382 = arith.sitofp %381 : vector<4x512xi32> to vector<4x512xf32>
    %c0_97 = arith.constant 0 : index
    %c2560_98 = arith.constant 2560 : index
    %383 = vector.load %arg8[%c0_97, %c2560_98] : memref<4x4096xf32, #tpu.memory_space<vmem>>, vector<4x512xf32>
    tpu.vector_store %arg8[%c0_97, %c2560_98], %382 {strides = array<i32>} : memref<4x4096xf32, #tpu.memory_space<vmem>>, vector<4x512xf32>,
    %c0_99 = arith.constant 0 : index
    %c3072 = arith.constant 3072 : index
    %384 = vector.load %arg1[%c0_99, %c3072] : memref<1x4096xf32, #tpu.memory_space<vmem>>, vector<1x512xf32>
    %385 = vector.broadcast %0 : vector<32x1xf32> to vector<32x512xf32>
    %386 = vector.broadcast %384 : vector<1x512xf32> to vector<32x512xf32>
    %387 = arith.mulf %385, %386 : vector<32x512xf32>
    %388 = vector.broadcast %1 : vector<32x1xf32> to vector<32x512xf32>
    %389 = arith.addf %387, %388 : vector<32x512xf32>
    %cst_100 = arith.constant 0.000000e+00 : f32
    %390 = vector.broadcast %cst_100 : f32 to vector<32x512xf32>
    %391 = arith.maximumf %389, %390 : vector<32x512xf32>
    %392 = vector.extract_strided_slice %2 {offsets = [0, 0], sizes = [32, 1], strides = [1, 1]} : vector<32x4xf32> to vector<32x1xf32>
    %393 = vector.broadcast %392 : vector<32x1xf32> to vector<32x512xf32>
    %394 = arith.mulf %393, %391 : vector<32x512xf32>
    %cst_101 = arith.constant dense<0.000000e+00> : vector<512xf32>
    %395 = vector.multi_reduction <add>, %394, %cst_101 [0] : vector<32x512xf32> to vector<512xf32>
    %396 = vector.shape_cast %395 : vector<512xf32> to vector<1x512xf32>
    %397 = vector.extract_strided_slice %3 {offsets = [0, 0], sizes = [1, 1], strides = [1, 1]} : vector<4x1xf32> to vector<1x1xf32>
    %398 = vector.broadcast %397 : vector<1x1xf32> to vector<1x512xf32>
    %399 = arith.addf %396, %398 : vector<1x512xf32>
    %c0_i32_102 = arith.constant 0 : i32
    %400 = vector.broadcast %c0_i32_102 : i32 to vector<1x512xi32>
    %401 = vector.extract_strided_slice %2 {offsets = [0, 1], sizes = [32, 1], strides = [1, 1]} : vector<32x4xf32> to vector<32x1xf32>
    %402 = vector.broadcast %401 : vector<32x1xf32> to vector<32x512xf32>
    %403 = arith.mulf %402, %391 : vector<32x512xf32>
    %cst_103 = arith.constant dense<0.000000e+00> : vector<512xf32>
    %404 = vector.multi_reduction <add>, %403, %cst_103 [0] : vector<32x512xf32> to vector<512xf32>
    %405 = vector.shape_cast %404 : vector<512xf32> to vector<1x512xf32>
    %406 = vector.extract_strided_slice %3 {offsets = [1, 0], sizes = [1, 1], strides = [1, 1]} : vector<4x1xf32> to vector<1x1xf32>
    %407 = vector.broadcast %406 : vector<1x1xf32> to vector<1x512xf32>
    %408 = arith.addf %405, %407 : vector<1x512xf32>
    %409 = arith.cmpf ogt, %408, %399 : vector<1x512xf32>
    %410 = arith.select %409, %408, %399 : vector<1x512xi1>, vector<1x512xf32>
    %c1_i32_104 = arith.constant 1 : i32
    %411 = vector.broadcast %c1_i32_104 : i32 to vector<1x512xi32>
    %412 = arith.select %409, %411, %400 : vector<1x512xi1>, vector<1x512xi32>
    %413 = vector.extract_strided_slice %2 {offsets = [0, 2], sizes = [32, 1], strides = [1, 1]} : vector<32x4xf32> to vector<32x1xf32>
    %414 = vector.broadcast %413 : vector<32x1xf32> to vector<32x512xf32>
    %415 = arith.mulf %414, %391 : vector<32x512xf32>
    %cst_105 = arith.constant dense<0.000000e+00> : vector<512xf32>
    %416 = vector.multi_reduction <add>, %415, %cst_105 [0] : vector<32x512xf32> to vector<512xf32>
    %417 = vector.shape_cast %416 : vector<512xf32> to vector<1x512xf32>
    %418 = vector.extract_strided_slice %3 {offsets = [2, 0], sizes = [1, 1], strides = [1, 1]} : vector<4x1xf32> to vector<1x1xf32>
    %419 = vector.broadcast %418 : vector<1x1xf32> to vector<1x512xf32>
    %420 = arith.addf %417, %419 : vector<1x512xf32>
    %421 = arith.cmpf ogt, %420, %410 : vector<1x512xf32>
    %422 = arith.select %421, %420, %410 : vector<1x512xi1>, vector<1x512xf32>
    %c2_i32_106 = arith.constant 2 : i32
    %423 = vector.broadcast %c2_i32_106 : i32 to vector<1x512xi32>
    %424 = arith.select %421, %423, %412 : vector<1x512xi1>, vector<1x512xi32>
    %425 = vector.extract_strided_slice %2 {offsets = [0, 3], sizes = [32, 1], strides = [1, 1]} : vector<32x4xf32> to vector<32x1xf32>
    %426 = vector.broadcast %425 : vector<32x1xf32> to vector<32x512xf32>
    %427 = arith.mulf %426, %391 : vector<32x512xf32>
    %cst_107 = arith.constant dense<0.000000e+00> : vector<512xf32>
    %428 = vector.multi_reduction <add>, %427, %cst_107 [0] : vector<32x512xf32> to vector<512xf32>
    %429 = vector.shape_cast %428 : vector<512xf32> to vector<1x512xf32>
    %430 = vector.extract_strided_slice %3 {offsets = [3, 0], sizes = [1, 1], strides = [1, 1]} : vector<4x1xf32> to vector<1x1xf32>
    %431 = vector.broadcast %430 : vector<1x1xf32> to vector<1x512xf32>
    %432 = arith.addf %429, %431 : vector<1x512xf32>
    %433 = arith.cmpf ogt, %432, %422 : vector<1x512xf32>
    %c3_i32_108 = arith.constant 3 : i32
    %434 = vector.broadcast %c3_i32_108 : i32 to vector<1x512xi32>
    %435 = arith.select %433, %434, %424 : vector<1x512xi1>, vector<1x512xi32>
    %436 = vector.broadcast %435 : vector<1x512xi32> to vector<4x512xi32>
    %437 = arith.cmpi eq, %4, %436 : vector<4x512xi32>
    %438 = arith.extui %437 : vector<4x512xi1> to vector<4x512xi32>
    %439 = arith.sitofp %438 : vector<4x512xi32> to vector<4x512xf32>
    %c0_109 = arith.constant 0 : index
    %c3072_110 = arith.constant 3072 : index
    %440 = vector.load %arg7[%c0_109, %c3072_110] : memref<4x4096xf32, #tpu.memory_space<vmem>>, vector<4x512xf32>
    tpu.vector_store %arg7[%c0_109, %c3072_110], %439 {strides = array<i32>} : memref<4x4096xf32, #tpu.memory_space<vmem>>, vector<4x512xf32>,
    %c0_111 = arith.constant 0 : index
    %c3072_112 = arith.constant 3072 : index
    %441 = vector.load %arg2[%c0_111, %c3072_112] : memref<1x4096xi32, #tpu.memory_space<vmem>>, vector<1x512xi32>
    %442 = vector.broadcast %441 : vector<1x512xi32> to vector<4x512xi32>
    %443 = arith.cmpi eq, %5, %442 : vector<4x512xi32>
    %444 = arith.extui %443 : vector<4x512xi1> to vector<4x512xi32>
    %445 = arith.sitofp %444 : vector<4x512xi32> to vector<4x512xf32>
    %c0_113 = arith.constant 0 : index
    %c3072_114 = arith.constant 3072 : index
    %446 = vector.load %arg8[%c0_113, %c3072_114] : memref<4x4096xf32, #tpu.memory_space<vmem>>, vector<4x512xf32>
    tpu.vector_store %arg8[%c0_113, %c3072_114], %445 {strides = array<i32>} : memref<4x4096xf32, #tpu.memory_space<vmem>>, vector<4x512xf32>,
    %c0_115 = arith.constant 0 : index
    %c3584 = arith.constant 3584 : index
    %447 = vector.load %arg1[%c0_115, %c3584] : memref<1x4096xf32, #tpu.memory_space<vmem>>, vector<1x512xf32>
    %448 = vector.broadcast %0 : vector<32x1xf32> to vector<32x512xf32>
    %449 = vector.broadcast %447 : vector<1x512xf32> to vector<32x512xf32>
    %450 = arith.mulf %448, %449 : vector<32x512xf32>
    %451 = vector.broadcast %1 : vector<32x1xf32> to vector<32x512xf32>
    %452 = arith.addf %450, %451 : vector<32x512xf32>
    %cst_116 = arith.constant 0.000000e+00 : f32
    %453 = vector.broadcast %cst_116 : f32 to vector<32x512xf32>
    %454 = arith.maximumf %452, %453 : vector<32x512xf32>
    %455 = vector.extract_strided_slice %2 {offsets = [0, 0], sizes = [32, 1], strides = [1, 1]} : vector<32x4xf32> to vector<32x1xf32>
    %456 = vector.broadcast %455 : vector<32x1xf32> to vector<32x512xf32>
    %457 = arith.mulf %456, %454 : vector<32x512xf32>
    %cst_117 = arith.constant dense<0.000000e+00> : vector<512xf32>
    %458 = vector.multi_reduction <add>, %457, %cst_117 [0] : vector<32x512xf32> to vector<512xf32>
    %459 = vector.shape_cast %458 : vector<512xf32> to vector<1x512xf32>
    %460 = vector.extract_strided_slice %3 {offsets = [0, 0], sizes = [1, 1], strides = [1, 1]} : vector<4x1xf32> to vector<1x1xf32>
    %461 = vector.broadcast %460 : vector<1x1xf32> to vector<1x512xf32>
    %462 = arith.addf %459, %461 : vector<1x512xf32>
    %c0_i32_118 = arith.constant 0 : i32
    %463 = vector.broadcast %c0_i32_118 : i32 to vector<1x512xi32>
    %464 = vector.extract_strided_slice %2 {offsets = [0, 1], sizes = [32, 1], strides = [1, 1]} : vector<32x4xf32> to vector<32x1xf32>
    %465 = vector.broadcast %464 : vector<32x1xf32> to vector<32x512xf32>
    %466 = arith.mulf %465, %454 : vector<32x512xf32>
    %cst_119 = arith.constant dense<0.000000e+00> : vector<512xf32>
    %467 = vector.multi_reduction <add>, %466, %cst_119 [0] : vector<32x512xf32> to vector<512xf32>
    %468 = vector.shape_cast %467 : vector<512xf32> to vector<1x512xf32>
    %469 = vector.extract_strided_slice %3 {offsets = [1, 0], sizes = [1, 1], strides = [1, 1]} : vector<4x1xf32> to vector<1x1xf32>
    %470 = vector.broadcast %469 : vector<1x1xf32> to vector<1x512xf32>
    %471 = arith.addf %468, %470 : vector<1x512xf32>
    %472 = arith.cmpf ogt, %471, %462 : vector<1x512xf32>
    %473 = arith.select %472, %471, %462 : vector<1x512xi1>, vector<1x512xf32>
    %c1_i32_120 = arith.constant 1 : i32
    %474 = vector.broadcast %c1_i32_120 : i32 to vector<1x512xi32>
    %475 = arith.select %472, %474, %463 : vector<1x512xi1>, vector<1x512xi32>
    %476 = vector.extract_strided_slice %2 {offsets = [0, 2], sizes = [32, 1], strides = [1, 1]} : vector<32x4xf32> to vector<32x1xf32>
    %477 = vector.broadcast %476 : vector<32x1xf32> to vector<32x512xf32>
    %478 = arith.mulf %477, %454 : vector<32x512xf32>
    %cst_121 = arith.constant dense<0.000000e+00> : vector<512xf32>
    %479 = vector.multi_reduction <add>, %478, %cst_121 [0] : vector<32x512xf32> to vector<512xf32>
    %480 = vector.shape_cast %479 : vector<512xf32> to vector<1x512xf32>
    %481 = vector.extract_strided_slice %3 {offsets = [2, 0], sizes = [1, 1], strides = [1, 1]} : vector<4x1xf32> to vector<1x1xf32>
    %482 = vector.broadcast %481 : vector<1x1xf32> to vector<1x512xf32>
    %483 = arith.addf %480, %482 : vector<1x512xf32>
    %484 = arith.cmpf ogt, %483, %473 : vector<1x512xf32>
    %485 = arith.select %484, %483, %473 : vector<1x512xi1>, vector<1x512xf32>
    %c2_i32_122 = arith.constant 2 : i32
    %486 = vector.broadcast %c2_i32_122 : i32 to vector<1x512xi32>
    %487 = arith.select %484, %486, %475 : vector<1x512xi1>, vector<1x512xi32>
    %488 = vector.extract_strided_slice %2 {offsets = [0, 3], sizes = [32, 1], strides = [1, 1]} : vector<32x4xf32> to vector<32x1xf32>
    %489 = vector.broadcast %488 : vector<32x1xf32> to vector<32x512xf32>
    %490 = arith.mulf %489, %454 : vector<32x512xf32>
    %cst_123 = arith.constant dense<0.000000e+00> : vector<512xf32>
    %491 = vector.multi_reduction <add>, %490, %cst_123 [0] : vector<32x512xf32> to vector<512xf32>
    %492 = vector.shape_cast %491 : vector<512xf32> to vector<1x512xf32>
    %493 = vector.extract_strided_slice %3 {offsets = [3, 0], sizes = [1, 1], strides = [1, 1]} : vector<4x1xf32> to vector<1x1xf32>
    %494 = vector.broadcast %493 : vector<1x1xf32> to vector<1x512xf32>
    %495 = arith.addf %492, %494 : vector<1x512xf32>
    %496 = arith.cmpf ogt, %495, %485 : vector<1x512xf32>
    %c3_i32_124 = arith.constant 3 : i32
    %497 = vector.broadcast %c3_i32_124 : i32 to vector<1x512xi32>
    %498 = arith.select %496, %497, %487 : vector<1x512xi1>, vector<1x512xi32>
    %499 = vector.broadcast %498 : vector<1x512xi32> to vector<4x512xi32>
    %500 = arith.cmpi eq, %4, %499 : vector<4x512xi32>
    %501 = arith.extui %500 : vector<4x512xi1> to vector<4x512xi32>
    %502 = arith.sitofp %501 : vector<4x512xi32> to vector<4x512xf32>
    %c0_125 = arith.constant 0 : index
    %c3584_126 = arith.constant 3584 : index
    %503 = vector.load %arg7[%c0_125, %c3584_126] : memref<4x4096xf32, #tpu.memory_space<vmem>>, vector<4x512xf32>
    tpu.vector_store %arg7[%c0_125, %c3584_126], %502 {strides = array<i32>} : memref<4x4096xf32, #tpu.memory_space<vmem>>, vector<4x512xf32>,
    %c0_127 = arith.constant 0 : index
    %c3584_128 = arith.constant 3584 : index
    %504 = vector.load %arg2[%c0_127, %c3584_128] : memref<1x4096xi32, #tpu.memory_space<vmem>>, vector<1x512xi32>
    %505 = vector.broadcast %504 : vector<1x512xi32> to vector<4x512xi32>
    %506 = arith.cmpi eq, %5, %505 : vector<4x512xi32>
    %507 = arith.extui %506 : vector<4x512xi1> to vector<4x512xi32>
    %508 = arith.sitofp %507 : vector<4x512xi32> to vector<4x512xf32>
    %c0_129 = arith.constant 0 : index
    %c3584_130 = arith.constant 3584 : index
    %509 = vector.load %arg8[%c0_129, %c3584_130] : memref<4x4096xf32, #tpu.memory_space<vmem>>, vector<4x512xf32>
    tpu.vector_store %arg8[%c0_129, %c3584_130], %508 {strides = array<i32>} : memref<4x4096xf32, #tpu.memory_space<vmem>>, vector<4x512xf32>,
    return
  }
  func.func @transform_0(%arg0: i32) -> (i32, i32) {
    %c0_i32 = arith.constant 0 : i32
    %c0_i32_0 = arith.constant 0 : i32
    return %c0_i32, %arg0 : i32, i32
  }
  func.func @transform_1(%arg0: i32) -> (i32, i32) {
    %c0_i32 = arith.constant 0 : i32
    %c0_i32_0 = arith.constant 0 : i32
    return %c0_i32, %arg0 : i32, i32
  }
  func.func @transform_2(%arg0: i32) -> (i32, i32) {
    %c0_i32 = arith.constant 0 : i32
    %c0_i32_0 = arith.constant 0 : i32
    %c0_i32_1 = arith.constant 0 : i32
    return %c0_i32, %c0_i32_0 : i32, i32
  }
  func.func @transform_3(%arg0: i32) -> (i32, i32) {
    %c0_i32 = arith.constant 0 : i32
    %c0_i32_0 = arith.constant 0 : i32
    %c0_i32_1 = arith.constant 0 : i32
    return %c0_i32, %c0_i32_0 : i32, i32
  }
  func.func @transform_4(%arg0: i32) -> (i32, i32) {
    %c0_i32 = arith.constant 0 : i32
    %c0_i32_0 = arith.constant 0 : i32
    %c0_i32_1 = arith.constant 0 : i32
    return %c0_i32, %c0_i32_0 : i32, i32
  }
  func.func @transform_5(%arg0: i32) -> (i32, i32) {
    %c0_i32 = arith.constant 0 : i32
    %c0_i32_0 = arith.constant 0 : i32
    %c0_i32_1 = arith.constant 0 : i32
    return %c0_i32, %c0_i32_0 : i32, i32
  }
  func.func @transform_6(%arg0: i32) -> (i32, i32) {
    %c0_i32 = arith.constant 0 : i32
    %c0_i32_0 = arith.constant 0 : i32
    return %c0_i32, %arg0 : i32, i32
  }
  func.func @transform_7(%arg0: i32) -> (i32, i32) {
    %c0_i32 = arith.constant 0 : i32
    %c0_i32_0 = arith.constant 0 : i32
    return %c0_i32, %arg0 : i32, i32
  }
}

</mosaic_0001>

<bundles_post_ra>
// kernel: fused_inference.1
= control target key start
LH: loop header
LB: loop body
LE: loop exit
PB: predicated region body
PF: predicated region fallthrough
CT: control target
= control target key end

     0   :  { %s4266_s24 = smov 0   ;;  %s7709_s0 = inlined_call_operand.vmem [shape: f32[1,8192], index: 0, kind: input, shape index: {}]   ;;  %s7710_s1 = inlined_call_operand.vmem [shape: s32[1,8192], index: 1, kind: input, shape index: {}]   ;;  %s7711_s2 = inlined_call_operand.vmem [shape: f32[32,1], index: 2, kind: input, shape index: {}]   ;;  %s7712_s3 = inlined_call_operand.vmem [shape: f32[32,1], index: 3, kind: input, shape index: {}]   ;;  %s7713_s4 = inlined_call_operand.vmem [shape: f32[32,4], index: 4, kind: input, shape index: {}]   ;;  %s7714_s5 = inlined_call_operand.vmem [shape: f32[4,1], index: 5, kind: input, shape index: {}]   ;;  %s7715_s6 = inlined_call_operand.vmem [shape: f32[4,8192], index: 6, kind: output, shape index: {0}]   ;;  %s7716_s7 = inlined_call_operand.vmem [shape: f32[4,8192], index: 7, kind: output, shape index: {1}]  }
   0x1 LB: > { %s4112_s25 = sadd.s32 4294967295, %s4219_s24   ;;  %p4116_p0 = scmp.ge.s32.totalorder %s4219_s24, 1  ;;  %s4219_s24 = sphi %s4266_s24, %s18_s24  }
   0x2   : > { %p250_p1 = scmp.lt.s32.totalorder %s4219_s24, 3 }
   0x4   : > { %p251_p2 = pnand %p4116_p0, %p250_p1 }
   0x6   : > { %254 = sbr.rel (%p251_p2) target bundleno = 871 (0x367), region = 44 }
   0xd   : > { %v314_v0 = vld [vmem:[%s7711_s2 + $0x10] sm:$0xff]  ;;  %v312_v1 = vld [vmem:[%s7711_s2] sm:$0xff]  ;;  %v7719_v2 = vmov 0   ;;  %v313_v4 = vld [vmem:[%s7711_s2 + $0x8] sm:$0xff]  ;;  %v4222_v12 = vmov 1   ;;  %v4223_v14 = vmov 2   ;;  %v325_v17 = vlaneseq }
   0xe   : > { %4203 = vset.pattern.permute.xlu1 %v7719_v2  ;;  %4202 = vset.pattern.permute.xlu0 %v7719_v2  ;;  %v316_v3 = vld [vmem:[%s7712_s3] sm:$0xff]  ;;  %v315_v5 = vld [vmem:[%s7711_s2 + $0x18] sm:$0xff]  ;;  %v317_v6 = vld [vmem:[%s7712_s3 + $0x8] sm:$0xff]  ;;  %v4224_v15 = vmov 3   ;;  %s4117_s8 = sshll.u32 %s4112_s25, 5  ;;  %v7717_v33 = vmov 0.0  }
   0xf   : > { %340 = vperm.xlu1 %4203, %v314_v0   ;;  %330 = vperm.xlu0 %4202, %v312_v1   ;;  %v319_v7 = vld [vmem:[%s7712_s3 + $0x18] sm:$0xff]  ;;  %v318_v8 = vld [vmem:[%s7712_s3 + $0x10] sm:$0xff]  ;;  %v321_v9 = vld [vmem:[%s7713_s4 + $0x8] sm:$0xff]  ;;  %p291_p3 = scmp.lt.s32.totalorder %s4117_s8, 63  ;;  %v4319_v18 = vshrl.u32 %v325_v17, 7 }
  0x10   : > { %v320_v10 = vld [vmem:[%s7713_s4] sm:$0xff]  ;;  %v322_v11 = vld [vmem:[%s7713_s4 + $0x10] sm:$0xff]  ;;  %v323_v13 = vld [vmem:[%s7713_s4 + $0x18] sm:$0xff] }
  0x11   : > { %v324_v16 = vld [vmem:[%s7714_s5] sm:$0xf]  ;;  %7955 = vst [vmem:[#allocation2_spill] sm:$0xff] %v4319_v18  ;;  %s9034_s8 = smov (!%p291_p3, %s4117_s8), 63  ;;  %v4324_v19 = vsub.s32 0, %v4319_v18  ;;  %v4327_v20 = vsub.s32 1, %v4319_v18 }
  0x12   : > { %v4330_v21 = vsub.s32 2, %v4319_v18  ;;  %v4333_v22 = vsub.s32 3, %v4319_v18  ;;  %s4339_s10 = scalar_lea.vmem %s7710_s1, %s9034_s8  ;;  %s4120_s11 = sshll.u32 %s9034_s8, 2 }
  0x13   : > { %387 = vperm.xlu1 %4203, %v316_v3   ;;  %335 = vperm.xlu0 %4202, %v313_v4   ;;  %v848_v23 = vld [vmem:[%s4339_s10] sm:$0xf]  ;;  %v1295_v28 = vld [vmem:[%s4339_s10 + $0x4] sm:$0xf]  ;;  %s4361_s14 = scalar_lea.vmem %s7716_s7, %s4120_s11  ;;  %v1742_v38 = vld [vmem:[%s4339_s10 + $0x8] sm:$0xf]  ;;  %s293_s17 = scalar_lea.vmem %s7709_s0, %s9034_s8 }
  0x14   : > { %7956 = vst [vmem:[#allocation3_spill] sm:$0xff] %v4333_v22  ;;  %v852_v24 = vrot.slane %v848_v23, %v4324_v19  ;;  %v856_v25 = vrot.slane %v848_v23, %v4327_v20  ;;  %v860_v26 = vrot.slane %v848_v23, %v4330_v21  ;;  %v864_v27 = vrot.slane %v848_v23, %v4333_v22  ;;  %v2189_v43 = vld [vmem:[%s4339_s10 + $0xc] sm:$0xf]  ;;  %v2636_v60 = vld [vmem:[%s4339_s10 + $0x10] sm:$0xf]  ;;  %s7356_s20 = scalar_lea.vmem %s7715_s6, %s4120_s11 }
  0x15   : > { %v1299_v29 = vrot.slane %v1295_v28, %v4324_v19  ;;  %v1303_v30 = vrot.slane %v1295_v28, %v4327_v20  ;;  %v1307_v31 = vrot.slane %v1295_v28, %v4330_v21  ;;  %v1311_v32 = vrot.slane %v1295_v28, %v4333_v22  ;;  %v3083_v1 = vld [vmem:[%s4339_s10 + $0x14] sm:$0xf] }
  0x16   : > { %vm865_vm0 = vcmp.eq.s32.totalorder %v4319_v18, %v852_v24  ;;  %vm866_vm1 = vcmp.eq.s32.totalorder %v4319_v18, %v856_v25  ;;  %vm867_vm2 = vcmp.eq.s32.totalorder %v4319_v18, %v860_v26  ;;  %vm868_vm3 = vcmp.eq.s32.totalorder %v4319_v18, %v864_v27  ;;  %v3530_v24 = vld [vmem:[%s4339_s10 + $0x18] sm:$0xf] }
  0x17   : > { %345 = vperm.xlu1 %4203, %v315_v5   ;;  %392 = vperm.xlu0 %4202, %v317_v6   ;;  %v4127_v34 = vsel %vm865_vm0, 1.0, %v7717_v33  ;;  %v4128_v35 = vsel %vm866_vm1, 1.0, %v7717_v33  ;;  %v4129_v36 = vsel %vm867_vm2, 1.0, %v7717_v33  ;;  %v4130_v37 = vsel %vm868_vm3, 1.0, %v7717_v33 }
  0x18   : > { %v881_v39 = vcombine.low %v4127_v34, %v4128_v35  ;;  %v882_v40 = vcombine.low %v4129_v36, %v4130_v37  ;;  %vm1312_vm4 = vcmp.eq.s32.totalorder %v4319_v18, %v1299_v29  ;;  %vm1313_vm5 = vcmp.eq.s32.totalorder %v4319_v18, %v1303_v30  ;;  %v3977_v29 = vld [vmem:[%s4339_s10 + $0x1c] sm:$0xf] }
  0x19   : > { %vm1314_vm6 = vcmp.eq.s32.totalorder %v4319_v18, %v1307_v31  ;;  %vm1315_vm7 = vcmp.eq.s32.totalorder %v4319_v18, %v1311_v32  ;;  %v4135_v41 = vsel %vm1312_vm4, 1.0, %v7717_v33  ;;  %v4136_v42 = vsel %vm1313_vm5, 1.0, %v7717_v33 }
  0x1a   : > { %885 = vst [vmem:[%s4361_s14] sm:$0xff] %v881_v39  ;;  %886 = vst [vmem:[%s4361_s14 + $0x8] sm:$0xff] %v882_v40  ;;  %v4137_v44 = vsel %vm1314_vm6, 1.0, %v7717_v33  ;;  %v4138_v45 = vsel %vm1315_vm7, 1.0, %v7717_v33  ;;  %v1328_v46 = vcombine.low %v4135_v41, %v4136_v42  ;;  %v1746_v47 = vrot.slane %v1742_v38, %v4324_v19 }
  0x1b   : > { %402 = vperm.xlu1 %4203, %v319_v7   ;;  %397 = vperm.xlu0 %4202, %v318_v8   ;;  %v1329_v48 = vcombine.low %v4137_v44, %v4138_v45  ;;  %v1750_v49 = vrot.slane %v1742_v38, %v4327_v20  ;;  %v1754_v50 = vrot.slane %v1742_v38, %v4330_v21 }
  0x1c   : > { %v1758_v51 = vrot.slane %v1742_v38, %v4333_v22  ;;  %1332 = vst [vmem:[%s4361_s14 + $0x10] sm:$0xff] %v1328_v46  ;;  %vm1759_vm8 = vcmp.eq.s32.totalorder %v4319_v18, %v1746_v47  ;;  %v2193_v52 = vrot.slane %v2189_v43, %v4324_v19  ;;  %v2197_v53 = vrot.slane %v2189_v43, %v4327_v20 }
  0x1d   : > { %v2201_v54 = vrot.slane %v2189_v43, %v4330_v21  ;;  %1333 = vst [vmem:[%s4361_s14 + $0x18] sm:$0xff] %v1329_v48  ;;  %vm1760_vm9 = vcmp.eq.s32.totalorder %v4319_v18, %v1750_v49  ;;  %vm1761_vm10 = vcmp.eq.s32.totalorder %v4319_v18, %v1754_v50  ;;  %v4143_v55 = vsel %vm1759_vm8, 1.0, %v7717_v33 }
  0x1e   : > { %vm1762_vm11 = vcmp.eq.s32.totalorder %v4319_v18, %v1758_v51  ;;  %v4144_v56 = vsel %vm1760_vm9, 1.0, %v7717_v33  ;;  %v4145_v57 = vsel %vm1761_vm10, 1.0, %v7717_v33  ;;  %v2205_v59 = vrot.slane %v2189_v43, %v4333_v22 }
  0x1f   : > { %444 = vperm.xlu1 %4203, %v321_v9   ;;  %439 = vperm.xlu0 %4202, %v320_v10   ;;  %v4146_v58 = vsel %vm1762_vm11, 1.0, %v7717_v33  ;;  %v1775_v61 = vcombine.low %v4143_v55, %v4144_v56  ;;  %vm2206_vm12 = vcmp.eq.s32.totalorder %v4319_v18, %v2193_v52  ;;  %vm2207_vm13 = vcmp.eq.s32.totalorder %v4319_v18, %v2197_v53  ;;  %v327_v55 = vld [vmem:[%s293_s17] sm:$0xf]  ;;  %v887_v56 = vld [vmem:[%s293_s17 + $0x4] sm:$0xf] }
  0x20   : > { %v1776_v62 = vcombine.low %v4145_v57, %v4146_v58  ;;  %vm2208_vm14 = vcmp.eq.s32.totalorder %v4319_v18, %v2201_v54  ;;  %vm2209_vm15 = vcmp.eq.s32.totalorder %v4319_v18, %v2205_v59  ;;  %v4151_v63 = vsel %vm2206_vm12, 1.0, %v7717_v33  ;;  %v1334_v57 = vld [vmem:[%s293_s17 + $0x8] sm:$0xf] }
  0x21   : > { %v4152_v0 = vsel %vm2207_vm13, 1.0, %v7717_v33  ;;  %1779 = vst [vmem:[%s4361_s14 + $0x20] sm:$0xff] %v1775_v61  ;;  %v4153_v3 = vsel %vm2208_vm14, 1.0, %v7717_v33  ;;  %v4154_v4 = vsel %vm2209_vm15, 1.0, %v7717_v33  ;;  %v2640_v6 = vrot.slane %v2636_v60, %v4324_v19 }
  0x22   : > { %1780 = vst [vmem:[%s4361_s14 + $0x28] sm:$0xff] %v1776_v62  ;;  %v2222_v5 = vcombine.low %v4151_v63, %v4152_v0  ;;  %v2223_v7 = vcombine.low %v4153_v3, %v4154_v4  ;;  %v2644_v8 = vrot.slane %v2636_v60, %v4327_v20  ;;  %v3099_v23 = vrot.slane %v3083_v1, %v4333_v22  ;;  %v1781_v62 = vld [vmem:[%s293_s17 + $0xc] sm:$0xf]  ;;  %v2228_v4 = vld [vmem:[%s293_s17 + $0x10] sm:$0xf] }
  0x23   : > { %4204 = vset.pattern.permute.xlu1 %v4222_v12  ;;  %449 = vperm.xlu0 %4202, %v322_v11   ;;  %vm2653_vm0 = vcmp.eq.s32.totalorder %v4319_v18, %v2640_v6  ;;  %v3534_v34 = vrot.slane %v3530_v24, %v4324_v19  ;;  %v3538_v36 = vrot.slane %v3530_v24, %v4327_v20 }
  0x24   : > { %519 = vperm.xlu1 %4204, %v320_v10   ;;  %2226 = vst [vmem:[%s4361_s14 + $0x30] sm:$0xff] %v2222_v5  ;;  %2227 = vst [vmem:[%s4361_s14 + $0x38] sm:$0xff] %v2223_v7  ;;  %vm2654_vm1 = vcmp.eq.s32.totalorder %v4319_v18, %v2644_v8  ;;  %vm3103_vm7 = vcmp.eq.s32.totalorder %v4319_v18, %v3099_v23  ;;  %v3542_v37 = vrot.slane %v3530_v24, %v4330_v21 }
  0x25   : > { %v4170_v31 = vsel %vm3103_vm7, 1.0, %v7717_v33  ;;  %v3546_v38 = vrot.slane %v3530_v24, %v4333_v22  ;;  %vm3547_vm8 = vcmp.eq.s32.totalorder %v4319_v18, %v3534_v34  ;;  %v3981_v39 = vrot.slane %v3977_v29, %v4324_v19  ;;  %v3569_v24 = vld [vmem:[%s293_s17 + $0x1c] sm:$0xf] }
  0x26   : > { %v3985_v40 = vrot.slane %v3977_v29, %v4327_v20  ;;  %v3989_v41 = vrot.slane %v3977_v29, %v4330_v21  ;;  %vm3548_vm9 = vcmp.eq.s32.totalorder %v4319_v18, %v3538_v36  ;;  %vm3549_vm10 = vcmp.eq.s32.totalorder %v4319_v18, %v3542_v37 }
  0x27   : > { %4205 = vset.pattern.permute.xlu0 %v4222_v12  ;;  %vm3550_vm11 = vcmp.eq.s32.totalorder %v4319_v18, %v3546_v38  ;;  %v4175_v42 = vsel %vm3547_vm8, 1.0, %v7717_v33  ;;  %v4176_v43 = vsel %vm3548_vm9, 1.0, %v7717_v33  ;;  %v4177_v44 = vsel %vm3549_vm10, 1.0, %v7717_v33 }
  0x28   : > { %4206 = vset.pattern.permute.xlu1 %v7719_v2  ;;  %523 = vperm.xlu0 %4205, %v321_v9   ;;  %v4178_v45 = vsel %vm3550_vm11, 1.0, %v7717_v33  ;;  %v3993_v46 = vrot.slane %v3977_v29, %v4333_v22  ;;  %v3563_v47 = vcombine.low %v4175_v42, %v4176_v43  ;;  %vm3994_vm12 = vcmp.eq.s32.totalorder %v4319_v18, %v3981_v39 }
  0x29   : > { %454 = vperm.xlu1 %4206, %v323_v13   ;;  %v3564_v48 = vcombine.low %v4177_v44, %v4178_v45  ;;  %vm3995_vm13 = vcmp.eq.s32.totalorder %v4319_v18, %v3985_v40  ;;  %vm3996_vm14 = vcmp.eq.s32.totalorder %v4319_v18, %v3989_v41  ;;  %v4183_v49 = vsel %vm3994_vm12, 1.0, %v7717_v33 }
  0x2a   : > { %vm3997_vm15 = vcmp.eq.s32.totalorder %v4319_v18, %v3993_v46  ;;  %v4184_v50 = vsel %vm3995_vm13, 1.0, %v7717_v33  ;;  %3567 = vst [vmem:[%s4361_s14 + $0x60] sm:$0xff] %v3563_v47  ;;  %v4185_v51 = vsel %vm3996_vm14, 1.0, %v7717_v33  ;;  %v4474_v58 = vrot.slane %v327_v55, %v4324_v19 }
  0x2b   : > { %3568 = vst [vmem:[%s4361_s14 + $0x68] sm:$0xff] %v3564_v48  ;;  %v4186_v52 = vsel %vm3997_vm15, 1.0, %v7717_v33  ;;  %v4010_v53 = vcombine.low %v4183_v49, %v4184_v50  ;;  %v4477_v59 = vrot.slane %v327_v55, %v4327_v20  ;;  %v4483_v61 = vrot.slane %v327_v55, %v4333_v22 }
  0x2c   : > { %531 = vperm.xlu0 %4205, %v323_v13   ;;  %v4011_v54 = vcombine.low %v4185_v51, %v4186_v52  ;;  %7957 = vst [vmem:[#allocation4_spill] sm:$0xff] %v4474_v58  ;;  %v4486_v63 = vrot.slane %v887_v56, %v4324_v19  ;;  %v4489_v0 = vrot.slane %v887_v56, %v4327_v20 }
  0x2d   : > { %4207 = vset.pattern.permute.xlu1 %v4222_v12  ;;  %v3091_v12 = vrot.slane %v3083_v1, %v4327_v20  ;;  %4014 = vst [vmem:[%s4361_s14 + $0x70] sm:$0xff] %v4010_v53  ;;  %7958 = vst [vmem:[#allocation5_spill] sm:$0xff] %v4477_v59  ;;  %v4495_v3 = vrot.slane %v887_v56, %v4333_v22  ;;  %v4498_v5 = vrot.slane %v1334_v57, %v4324_v19 }
  0x2e   : > { %527 = vperm.xlu1 %4207, %v322_v11   ;;  %4015 = vst [vmem:[%s4361_s14 + $0x78] sm:$0xff] %v4011_v54  ;;  %7960 = vst [vmem:[#allocation7_spill] sm:$0xff] %v4483_v61  ;;  %v4501_v6 = vrot.slane %v1334_v57, %v4327_v20  ;;  %v4504_v7 = vrot.slane %v1334_v57, %v4330_v21  ;;  %v4507_v8 = vrot.slane %v1334_v57, %v4333_v22 }
  0x2f   : > { %vm3101_vm5 = vcmp.eq.s32.totalorder %v4319_v18, %v3091_v12  ;;  %7961 = vst [vmem:[#allocation8_spill] sm:$0xff] %v4486_v63  ;;  %7962 = vst [vmem:[#allocation9_spill] sm:$0xff] %v4489_v0  ;;  %v4516_v12 = vrot.slane %v1781_v62, %v4330_v21  ;;  %v4531_v23 = vrot.slane %v2228_v4, %v4333_v22 }
  0x30   : > { %4209 = vset.pattern.permute.xlu0 %v4223_v14  ;;  %v4168_v28 = vsel %vm3101_vm5, 1.0, %v7717_v33  ;;  %7964 = vst [vmem:[#allocation11_spill] sm:$0xff] %v4495_v3  ;;  %7965 = vst [vmem:[#allocation12_spill] sm:$0xff] %v4498_v5  ;;  %v4561_v36 = vrot.slane %v3569_v24, %v4327_v20  ;;  %v4564_v37 = vrot.slane %v3569_v24, %v4330_v21 }
  0x31   : > { %619 = vperm.xlu0 %4209, %v321_v9   ;;  %7966 = vst [vmem:[#allocation13_spill] sm:$0xff] %v4501_v6  ;;  %7967 = vst [vmem:[#allocation14_spill] sm:$0xff] %v4504_v7  ;;  %v4567_v38 = vrot.slane %v3569_v24, %v4333_v22 }
  0x32   : > { %4208 = vset.pattern.permute.xlu1 %v4223_v14  ;;  %v4159_v14 = vsel %vm2653_vm0, 1.0, %v7717_v33  ;;  %7968 = vst [vmem:[#allocation15_spill] sm:$0xff] %v4507_v8  ;;  %7971 = vst [vmem:[#allocation18_spill] sm:$0xff] %v4516_v12 }
  0x33   : > { %615 = vperm.xlu1 %4208, %v320_v10   ;;  %7976 = vst [vmem:[#allocation23_spill] sm:$0xff] %v4531_v23  ;;  %7986 = vst [vmem:[#allocation33_spill] sm:$0xff] %v4561_v36 }
  0x34   : > { %7987 = vst [vmem:[#allocation34_spill] sm:$0xff] %v4564_v37  ;;  %7988 = vst [vmem:[#allocation35_spill] sm:$0xff] %v4567_v38 }
  0x35   : > { %4210 = vset.pattern.permute.xlu0 %v4224_v15 }
  0x36   : > { %715 = vperm.xlu0 %4210, %v320_v10   ;;  %v2652_v10 = vrot.slane %v2636_v60, %v4333_v22 }
  0x37   : > { %623 = vperm.xlu1 %4208, %v322_v11  }
  0x38   : > { %vm2656_vm3 = vcmp.eq.s32.totalorder %v4319_v18, %v2652_v10  ;;  %v4510_v10 = vrot.slane %v1781_v62, %v4324_v19 }
  0x39   : > { %v4162_v17 = vsel %vm2656_vm3, 1.0, %v7717_v33 }
  0x3a   : > { %727 = vperm.xlu0 %4210, %v323_v13   ;;  %7969 = vst [vmem:[#allocation16_spill] sm:$0xff] %v4510_v10 }
  0x3b   : > { %627 = vperm.xlu1 %4208, %v323_v13   ;;  %v3095_v13 = vrot.slane %v3083_v1, %v4330_v21 }
  0x3d   : > { %vm3102_vm6 = vcmp.eq.s32.totalorder %v4319_v18, %v3095_v13  ;;  %v4519_v13 = vrot.slane %v1781_v62, %v4333_v22 }
  0x3e   : > { %v4169_v30 = vsel %vm3102_vm6, 1.0, %v7717_v33 }
  0x3f   : > { %4211 = vset.pattern.permute.xlu1 %v4224_v15  ;;  %v4160_v15 = vsel %vm2654_vm1, 1.0, %v7717_v33  ;;  %v3117_v35 = vcombine.low %v4169_v30, %v4170_v31  ;;  %7972 = vst [vmem:[#allocation19_spill] sm:$0xff] %v4519_v13 }
  0x40   : > { %719 = vperm.xlu1 %4211, %v321_v9   ;;  %v2648_v9 = vrot.slane %v2636_v60, %v4330_v21  ;;  %v2669_v25 = vcombine.low %v4159_v14, %v4160_v15  ;;  %v4480_v60 = vrot.slane %v327_v55, %v4330_v21  ;;  %v3122_v14 = vld [vmem:[%s293_s17 + $0x18] sm:$0xf]  ;;  %v4522_v15 = vrot.slane %v2228_v4, %v4324_v19 }
  0x41   : > { %3121 = vst [vmem:[%s4361_s14 + $0x58] sm:$0xff] %v3117_v35  ;;  %v4546_v29 = vrot.slane %v3122_v14, %v4324_v19  ;;  %v4549_v30 = vrot.slane %v3122_v14, %v4327_v20  ;;  %v4552_v31 = vrot.slane %v3122_v14, %v4330_v21  ;;  %v4558_v35 = vrot.slane %v3569_v24, %v4324_v19 }
  0x42   : > { %vm2655_vm2 = vcmp.eq.s32.totalorder %v4319_v18, %v2648_v9  ;;  %2673 = vst [vmem:[%s4361_s14 + $0x40] sm:$0xff] %v2669_v25  ;;  %7959 = vst [vmem:[#allocation6_spill] sm:$0xff] %v4480_v60  ;;  %v2675_v9 = vld [vmem:[%s293_s17 + $0x14] sm:$0xf] }
  0x43   : > { %7973 = vst [vmem:[#allocation20_spill] sm:$0xff] %v4522_v15  ;;  %v4534_v25 = vrot.slane %v2675_v9, %v4324_v19  ;;  %7981 = vst [vmem:[#allocation28_spill] sm:$0xff] %v4546_v29 }
  0x44   : > { %723 = vperm.xlu1 %4211, %v322_v11   ;;  %v3087_v11 = vrot.slane %v3083_v1, %v4324_v19  ;;  %v4492_v1 = vrot.slane %v887_v56, %v4330_v21  ;;  %7982 = vst [vmem:[#allocation29_spill] sm:$0xff] %v4549_v30  ;;  %7983 = vst [vmem:[#allocation30_spill] sm:$0xff] %v4552_v31 }
  0x45   : > { %7977 = vst [vmem:[#allocation24_spill] sm:$0xff] %v4534_v25  ;;  %7985 = vst [vmem:[#allocation32_spill] sm:$0xff] %v4558_v35 }
  0x46   : > { %vm3100_vm4 = vcmp.eq.s32.totalorder %v4319_v18, %v3087_v11  ;;  %7963 = vst [vmem:[#allocation10_spill] sm:$0xff] %v4492_v1  ;;  %v4513_v11 = vrot.slane %v1781_v62, %v4327_v20 }
  0x47   : > { %v4167_v27 = vsel %vm3100_vm4, 1.0, %v7717_v33 }
  0x48   : > { %4212 = vset.pattern.permute.xlu1 %v7719_v2  ;;  %v3116_v32 = vcombine.low %v4167_v27, %v4168_v28  ;;  %7970 = vst [vmem:[#allocation17_spill] sm:$0xff] %v4513_v11  ;;  %v4540_v27 = vrot.slane %v2675_v9, %v4330_v21  ;;  %v4543_v28 = vrot.slane %v2675_v9, %v4333_v22 }
  0x49   : > { %511 = vperm.xlu1 %4212, %v324_v16   ;;  %v4161_v16 = vsel %vm2655_vm2, 1.0, %v7717_v33 }
  0x4a   : > { %v2670_v26 = vcombine.low %v4161_v16, %v4162_v17  ;;  %3120 = vst [vmem:[%s4361_s14 + $0x50] sm:$0xff] %v3116_v32  ;;  %v4525_v16 = vrot.slane %v2228_v4, %v4327_v20  ;;  %v4528_v17 = vrot.slane %v2228_v4, %v4330_v21  ;;  %7979 = vst [vmem:[#allocation26_spill] sm:$0xff] %v4540_v27 }
  0x4b   : > { %7980 = vst [vmem:[#allocation27_spill] sm:$0xff] %v4543_v28  ;;  %v4555_v32 = vrot.slane %v3122_v14, %v4333_v22 }
  0x4c   : > { %2674 = vst [vmem:[%s4361_s14 + $0x48] sm:$0xff] %v2670_v26  ;;  %7974 = vst [vmem:[#allocation21_spill] sm:$0xff] %v4525_v16  ;;  %v4537_v26 = vrot.slane %v2675_v9, %v4327_v20 }
  0x4d   : > { %7975 = vst [vmem:[#allocation22_spill] sm:$0xff] %v4528_v17  ;;  %7984 = vst [vmem:[#allocation31_spill] sm:$0xff] %v4555_v32 }
  0x4e   : > { %7978 = vst [vmem:[#allocation25_spill] sm:$0xff] %v4537_v26 }
  0x8e   : > { %v341_v34 = vpop.permute.xlu1 %340 }
  0x8f   : > { %v4570_v39 = vmul.f32 %v4474_v58, %v341_v34  ;;  %v4573_v40 = vmul.f32 %v4477_v59, %v341_v34  ;;  %v4576_v41 = vmul.f32 %v4480_v60, %v341_v34  ;;  %v4579_v19 = vmul.f32 %v4483_v61, %v341_v34 }
  0x90   : > { %v4582_v20 = vmul.f32 %v4486_v63, %v341_v34  ;;  %v4585_v21 = vmul.f32 %v4489_v0, %v341_v34  ;;  %v4588_v42 = vmul.f32 %v4492_v1, %v341_v34  ;;  %v4591_v43 = vmul.f32 %v4495_v3, %v341_v34 }
  0x91   : > { %7989 = vst [vmem:[#allocation36_spill] sm:$0xff] %v4570_v39  ;;  %7990 = vst [vmem:[#allocation37_spill] sm:$0xff] %v4573_v40  ;;  %v4594_v44 = vmul.f32 %v4498_v5, %v341_v34  ;;  %v4597_v45 = vmul.f32 %v4501_v6, %v341_v34  ;;  %v4600_v46 = vmul.f32 %v4504_v7, %v341_v34 }
  0x92   : > { %7991 = vst [vmem:[#allocation38_spill] sm:$0xff] %v4576_v41  ;;  %7992 = vst [vmem:[#allocation39_spill] sm:$0xff] %v4579_v19  ;;  %v4603_v47 = vmul.f32 %v4507_v8, %v341_v34  ;;  %v4606_v48 = vmul.f32 %v4510_v10, %v341_v34  ;;  %v4609_v49 = vmul.f32 %v4513_v11, %v341_v34 }
  0x93   : > { %7993 = vst [vmem:[#allocation40_spill] sm:$0xff] %v4582_v20  ;;  %7994 = vst [vmem:[#allocation41_spill] sm:$0xff] %v4585_v21  ;;  %v4612_v50 = vmul.f32 %v4516_v12, %v341_v34  ;;  %v4615_v51 = vmul.f32 %v4519_v13, %v341_v34  ;;  %v4618_v52 = vmul.f32 %v4522_v15, %v341_v34 }
  0x94   : > { %7995 = vst [vmem:[#allocation42_spill] sm:$0xff] %v4588_v42  ;;  %7996 = vst [vmem:[#allocation43_spill] sm:$0xff] %v4591_v43  ;;  %v4621_v53 = vmul.f32 %v4525_v16, %v341_v34  ;;  %v4624_v54 = vmul.f32 %v4528_v17, %v341_v34  ;;  %v4627_v55 = vmul.f32 %v4531_v23, %v341_v34  ;;  %v4689_v42 = vpop.permute.xlu1 %387 }
  0x95   : > { %7997 = vst [vmem:[#allocation44_spill] sm:$0xff] %v4594_v44  ;;  %7998 = vst [vmem:[#allocation45_spill] sm:$0xff] %v4597_v45  ;;  %v4630_v56 = vmul.f32 %v4534_v25, %v341_v34  ;;  %v4633_v57 = vmul.f32 %v4537_v26, %v341_v34  ;;  %v4636_v62 = vmul.f32 %v4540_v27, %v341_v34 }
  0x96   : > { %7999 = vst [vmem:[#allocation46_spill] sm:$0xff] %v4600_v46  ;;  %8000 = vst [vmem:[#allocation47_spill] sm:$0xff] %v4603_v47  ;;  %v4639_v4 = vmul.f32 %v4543_v28, %v341_v34  ;;  %v4642_v9 = vmul.f32 %v4546_v29, %v341_v34  ;;  %v4645_v14 = vmul.f32 %v4549_v30, %v341_v34 }
  0x97   : > { %8001 = vst [vmem:[#allocation48_spill] sm:$0xff] %v4606_v48  ;;  %8002 = vst [vmem:[#allocation49_spill] sm:$0xff] %v4609_v49  ;;  %v4648_v24 = vmul.f32 %v4552_v31, %v341_v34  ;;  %v4651_v33 = vmul.f32 %v4555_v32, %v341_v34  ;;  %v4654_v2 = vmul.f32 %v4558_v35, %v341_v34 }
  0x98   : > { %8003 = vst [vmem:[#allocation50_spill] sm:$0xff] %v4612_v50  ;;  %8004 = vst [vmem:[#allocation51_spill] sm:$0xff] %v4615_v51  ;;  %v4657_v18 = vmul.f32 %v4561_v36, %v341_v34  ;;  %v4660_v22 = vmul.f32 %v4564_v37, %v341_v34 }
  0x99   : > { %8005 = vst [vmem:[#allocation52_spill] sm:$0xff] %v4618_v52  ;;  %8006 = vst [vmem:[#allocation53_spill] sm:$0xff] %v4621_v53 }
  0x9a   : > { %8007 = vst [vmem:[#allocation54_spill] sm:$0xff] %v4624_v54  ;;  %8008 = vst [vmem:[#allocation55_spill] sm:$0xff] %v4627_v55 }
  0x9b   : > { %8009 = vst [vmem:[#allocation56_spill] sm:$0xff] %v4630_v56  ;;  %8010 = vst [vmem:[#allocation57_spill] sm:$0xff] %v4633_v57 }
  0x9c   : > { %8011 = vst [vmem:[#allocation58_spill] sm:$0xff] %v4636_v62  ;;  %8012 = vst [vmem:[#allocation59_spill] sm:$0xff] %v4639_v4  ;;  %v331_v4 = vpop.permute.xlu0 %330 }
  0x9d   : > { %8013 = vst [vmem:[#allocation60_spill] sm:$0xff] %v4642_v9  ;;  %8014 = vst [vmem:[#allocation61_spill] sm:$0xff] %v4645_v14  ;;  %v4663_v9 = vmul.f32 %v4567_v38, %v341_v34  ;;  %v369_v14 = vmul.f32 %v4474_v58, %v331_v4  ;;  %v371_v62 = vmul.f32 %v4480_v60, %v331_v4 }
  0x9e   : > { %8015 = vst [vmem:[#allocation62_spill] sm:$0xff] %v4648_v24  ;;  %8016 = vst [vmem:[#allocation63_spill] sm:$0xff] %v4651_v33  ;;  %v370_v24 = vmul.f32 %v4477_v59, %v331_v4  ;;  %v372_v33 = vmul.f32 %v4483_v61, %v331_v4  ;;  %v910_v57 = vmul.f32 %v4489_v0, %v331_v4 }
  0x9f   : > { %8017 = vst [vmem:[#allocation64_spill] sm:$0xff] %v4654_v2  ;;  %8018 = vst [vmem:[#allocation65_spill] sm:$0xff] %v4657_v18  ;;  %v909_v2 = vmul.f32 %v4486_v63, %v331_v4  ;;  %v911_v18 = vmul.f32 %v4492_v1, %v331_v4  ;;  %v1356_v34 = vmul.f32 %v4498_v5, %v331_v4 }
  0xa0   : > { %8019 = vst [vmem:[#allocation66_spill] sm:$0xff] %v4660_v22  ;;  %8020 = vst [vmem:[#allocation67_spill] sm:$0xff] %v4663_v9  ;;  %v912_v22 = vmul.f32 %v4495_v3, %v331_v4  ;;  %v1357_v9 = vmul.f32 %v4501_v6, %v331_v4  ;;  %v1358_v56 = vmul.f32 %v4504_v7, %v331_v4 }
  0xa1   : > { %v1359_v55 = vmul.f32 %v4507_v8, %v331_v4  ;;  %v1803_v54 = vmul.f32 %v4510_v10, %v331_v4  ;;  %v1804_v53 = vmul.f32 %v4513_v11, %v331_v4  ;;  %v1805_v52 = vmul.f32 %v4516_v12, %v331_v4 }
  0xa2   : > { %v1806_v51 = vmul.f32 %v4519_v13, %v331_v4  ;;  %v2250_v50 = vmul.f32 %v4522_v15, %v331_v4  ;;  %v2251_v49 = vmul.f32 %v4525_v16, %v331_v4  ;;  %v2252_v48 = vmul.f32 %v4528_v17, %v331_v4 }
  0xa3   : > { %v2253_v47 = vmul.f32 %v4531_v23, %v331_v4  ;;  %v2697_v46 = vmul.f32 %v4534_v25, %v331_v4  ;;  %v2698_v45 = vmul.f32 %v4537_v26, %v331_v4  ;;  %v2699_v44 = vmul.f32 %v4540_v27, %v331_v4 }
  0xa4   : > { %v2700_v43 = vmul.f32 %v4543_v28, %v331_v4  ;;  %v3144_v21 = vmul.f32 %v4546_v29, %v331_v4  ;;  %v3145_v20 = vmul.f32 %v4549_v30, %v331_v4  ;;  %v3146_v19 = vmul.f32 %v4552_v31, %v331_v4 }
  0xa5   : > { %v3147_v41 = vmul.f32 %v4555_v32, %v331_v4  ;;  %v3591_v40 = vmul.f32 %v4558_v35, %v331_v4  ;;  %v3592_v39 = vmul.f32 %v4561_v36, %v331_v4  ;;  %v3593_v26 = vmul.f32 %v4564_v37, %v331_v4 }
  0xa6   : > { %v3594_v27 = vmul.f32 %v4567_v38, %v331_v4  ;;  %v405_v28 = vadd.f32 %v4689_v42, %v369_v14  ;;  %v406_v25 = vadd.f32 %v4689_v42, %v370_v24  ;;  %v407_v29 = vadd.f32 %v4689_v42, %v371_v62 }
  0xa7   : > { %v408_v30 = vadd.f32 %v4689_v42, %v372_v33  ;;  %v925_v31 = vadd.f32 %v909_v2, %v4689_v42  ;;  %v926_v32 = vadd.f32 %v910_v57, %v4689_v42  ;;  %v927_v35 = vadd.f32 %v911_v18, %v4689_v42 }
  0xa8   : > { %v928_v36 = vadd.f32 %v912_v22, %v4689_v42  ;;  %v4707_v23 = vmax.f32 %v405_v28, 0.0  ;;  %v4709_v37 = vmax.f32 %v406_v25, 0.0  ;;  %v4711_v4 = vmax.f32 %v407_v29, 0.0 }
  0xa9   : > { %v4713_v14 = vmax.f32 %v408_v30, 0.0  ;;  %v4715_v24 = vmax.f32 %v925_v31, 0.0  ;;  %v4717_v62 = vmax.f32 %v926_v32, 0.0  ;;  %v4719_v33 = vmax.f32 %v927_v35, 0.0 }
  0xaa   : > { %8021 = vst [vmem:[#allocation68_spill] sm:$0xff] %v4707_v23  ;;  %8022 = vst [vmem:[#allocation69_spill] sm:$0xff] %v4709_v37  ;;  %v4721_v2 = vmax.f32 %v928_v36, 0.0  ;;  %v1372_v18 = vadd.f32 %v1356_v34, %v4689_v42  ;;  %v1373_v22 = vadd.f32 %v1357_v9, %v4689_v42  ;;  %v1374_v28 = vadd.f32 %v1358_v56, %v4689_v42 }
  0xab   : > { %8023 = vst [vmem:[#allocation70_spill] sm:$0xff] %v4711_v4  ;;  %8024 = vst [vmem:[#allocation71_spill] sm:$0xff] %v4713_v14  ;;  %v1375_v25 = vadd.f32 %v1359_v55, %v4689_v42  ;;  %v1819_v29 = vadd.f32 %v1803_v54, %v4689_v42  ;;  %v1820_v30 = vadd.f32 %v1804_v53, %v4689_v42 }
  0xac   : > { %8025 = vst [vmem:[#allocation72_spill] sm:$0xff] %v4715_v24  ;;  %8026 = vst [vmem:[#allocation73_spill] sm:$0xff] %v4717_v62  ;;  %v1821_v31 = vadd.f32 %v1805_v52, %v4689_v42  ;;  %v1822_v32 = vadd.f32 %v1806_v51, %v4689_v42  ;;  %v4731_v35 = vmax.f32 %v1372_v18, 0.0  ;;  %v4733_v36 = vmax.f32 %v1373_v22, 0.0 }
  0xad   : > { %8027 = vst [vmem:[#allocation74_spill] sm:$0xff] %v4719_v33  ;;  %8028 = vst [vmem:[#allocation75_spill] sm:$0xff] %v4721_v2  ;;  %v4735_v57 = vmax.f32 %v1374_v28, 0.0  ;;  %v4737_v34 = vmax.f32 %v1375_v25, 0.0  ;;  %v4739_v9 = vmax.f32 %v1819_v29, 0.0  ;;  %v4741_v56 = vmax.f32 %v1820_v30, 0.0 }
  0xae   : > { %8029 = vst [vmem:[#allocation76_spill] sm:$0xff] %v4731_v35  ;;  %8030 = vst [vmem:[#allocation77_spill] sm:$0xff] %v4733_v36  ;;  %v4743_v55 = vmax.f32 %v1821_v31, 0.0  ;;  %v4745_v54 = vmax.f32 %v1822_v32, 0.0  ;;  %v2266_v52 = vadd.f32 %v2250_v50, %v4689_v42  ;;  %v2267_v51 = vadd.f32 %v2251_v49, %v4689_v42 }
  0xaf   : > { %8031 = vst [vmem:[#allocation78_spill] sm:$0xff] %v4735_v57  ;;  %8032 = vst [vmem:[#allocation79_spill] sm:$0xff] %v4737_v34  ;;  %v2268_v53 = vadd.f32 %v2252_v48, %v4689_v42  ;;  %v2269_v18 = vadd.f32 %v2253_v47, %v4689_v42  ;;  %v2713_v22 = vadd.f32 %v2697_v46, %v4689_v42 }
  0xb0   : > { %8033 = vst [vmem:[#allocation80_spill] sm:$0xff] %v4739_v9  ;;  %8034 = vst [vmem:[#allocation81_spill] sm:$0xff] %v4741_v56  ;;  %v2714_v28 = vadd.f32 %v2698_v45, %v4689_v42  ;;  %v2715_v25 = vadd.f32 %v2699_v44, %v4689_v42  ;;  %v2716_v29 = vadd.f32 %v2700_v43, %v4689_v42  ;;  %v4755_v30 = vmax.f32 %v2266_v52, 0.0 }
  0xb1   : > { %8035 = vst [vmem:[#allocation82_spill] sm:$0xff] %v4743_v55  ;;  %8036 = vst [vmem:[#allocation83_spill] sm:$0xff] %v4745_v54  ;;  %v4757_v31 = vmax.f32 %v2267_v51, 0.0  ;;  %v4759_v32 = vmax.f32 %v2268_v53, 0.0  ;;  %v4761_v50 = vmax.f32 %v2269_v18, 0.0  ;;  %v4763_v49 = vmax.f32 %v2713_v22, 0.0 }
  0xb2   : > { %8037 = vst [vmem:[#allocation84_spill] sm:$0xff] %v4755_v30  ;;  %v4765_v48 = vmax.f32 %v2714_v28, 0.0  ;;  %v4767_v47 = vmax.f32 %v2715_v25, 0.0  ;;  %v4769_v46 = vmax.f32 %v2716_v29, 0.0  ;;  %v3160_v44 = vadd.f32 %v3144_v21, %v4689_v42 }
  0xb3   : > { %8038 = vst [vmem:[#allocation85_spill] sm:$0xff] %v4757_v31  ;;  %8039 = vst [vmem:[#allocation86_spill] sm:$0xff] %v4759_v32  ;;  %v3161_v43 = vadd.f32 %v3145_v20, %v4689_v42  ;;  %v3162_v45 = vadd.f32 %v3146_v19, %v4689_v42  ;;  %v3163_v52 = vadd.f32 %v3147_v41, %v4689_v42 }
  0xb4   : > { %8040 = vst [vmem:[#allocation87_spill] sm:$0xff] %v4761_v50  ;;  %8041 = vst [vmem:[#allocation88_spill] sm:$0xff] %v4763_v49  ;;  %v3607_v51 = vadd.f32 %v3591_v40, %v4689_v42  ;;  %v3608_v53 = vadd.f32 %v3592_v39, %v4689_v42  ;;  %v3609_v18 = vadd.f32 %v3593_v26, %v4689_v42  ;;  %v4779_v28 = vmax.f32 %v3160_v44, 0.0  ;;  %v336_v39 = vpop.permute.xlu0 %335 }
  0xb5   : > { %8042 = vst [vmem:[#allocation89_spill] sm:$0xff] %v4765_v48  ;;  %8043 = vst [vmem:[#allocation90_spill] sm:$0xff] %v4767_v47  ;;  %v3610_v22 = vadd.f32 %v3594_v27, %v4689_v42  ;;  %v4781_v25 = vmax.f32 %v3161_v43, 0.0  ;;  %v4783_v29 = vmax.f32 %v3162_v45, 0.0  ;;  %v4785_v21 = vmax.f32 %v3163_v52, 0.0  ;;  %v8063_v47 = vld [vmem:[#allocation33_spill] sm:$0xff] }
  0xb6   : > { %8044 = vst [vmem:[#allocation91_spill] sm:$0xff] %v4769_v46  ;;  %8045 = vst [vmem:[#allocation92_spill] sm:$0xff] %v4779_v28  ;;  %v4787_v20 = vmax.f32 %v3607_v51, 0.0  ;;  %v4789_v19 = vmax.f32 %v3608_v53, 0.0  ;;  %v4791_v41 = vmax.f32 %v3609_v18, 0.0  ;;  %v373_v26 = vmul.f32 %v4474_v58, %v336_v39  ;;  %v8053_v58 = vld [vmem:[#allocation23_spill] sm:$0xff] }
  0xb7   : > { %8046 = vst [vmem:[#allocation93_spill] sm:$0xff] %v4781_v25  ;;  %8047 = vst [vmem:[#allocation94_spill] sm:$0xff] %v4783_v29  ;;  %v4793_v40 = vmax.f32 %v3610_v22, 0.0  ;;  %v374_v27 = vmul.f32 %v4477_v59, %v336_v39  ;;  %v375_v42 = vmul.f32 %v4480_v60, %v336_v39  ;;  %v376_v44 = vmul.f32 %v4483_v61, %v336_v39  ;;  %v8059_v29 = vld [vmem:[#allocation29_spill] sm:$0xff]  ;;  %v8060_v25 = vld [vmem:[#allocation30_spill] sm:$0xff] }
  0xb8   : > { %8048 = vst [vmem:[#allocation95_spill] sm:$0xff] %v4785_v21  ;;  %8049 = vst [vmem:[#allocation96_spill] sm:$0xff] %v4787_v20  ;;  %v913_v43 = vmul.f32 %v4486_v63, %v336_v39  ;;  %v914_v45 = vmul.f32 %v4489_v0, %v336_v39  ;;  %v915_v52 = vmul.f32 %v4492_v1, %v336_v39  ;;  %v8057_v20 = vld [vmem:[#allocation27_spill] sm:$0xff]  ;;  %v8058_v21 = vld [vmem:[#allocation28_spill] sm:$0xff]  ;;  %v393_v49 = vpop.permute.xlu0 %392 }
  0xb9   : > { %8050 = vst [vmem:[#allocation97_spill] sm:$0xff] %v4789_v19  ;;  %8051 = vst [vmem:[#allocation98_spill] sm:$0xff] %v4791_v41  ;;  %v916_v51 = vmul.f32 %v4495_v3, %v336_v39  ;;  %v1360_v53 = vmul.f32 %v4498_v5, %v336_v39  ;;  %v1361_v18 = vmul.f32 %v4501_v6, %v336_v39  ;;  %v8055_v41 = vld [vmem:[#allocation25_spill] sm:$0xff]  ;;  %v8056_v19 = vld [vmem:[#allocation26_spill] sm:$0xff] }
  0xba   : > { %8052 = vst [vmem:[#allocation99_spill] sm:$0xff] %v4793_v40  ;;  %v1362_v22 = vmul.f32 %v4504_v7, %v336_v39  ;;  %v1363_v59 = vmul.f32 %v4507_v8, %v336_v39  ;;  %v1807_v60 = vmul.f32 %v4510_v10, %v336_v39  ;;  %v1808_v61 = vmul.f32 %v4513_v11, %v336_v39  ;;  %v8054_v40 = vld [vmem:[#allocation24_spill] sm:$0xff]  ;;  %v8061_v28 = vld [vmem:[#allocation31_spill] sm:$0xff]  ;;  %v8064_v48 = vld [vmem:[#allocation34_spill] sm:$0xff] }
  0xbb   : > { %v1809_v63 = vmul.f32 %v4516_v12, %v336_v39  ;;  %v1810_v0 = vmul.f32 %v4519_v13, %v336_v39  ;;  %v2254_v1 = vmul.f32 %v4522_v15, %v336_v39  ;;  %v2255_v3 = vmul.f32 %v4525_v16, %v336_v39  ;;  %v8062_v46 = vld [vmem:[#allocation32_spill] sm:$0xff] }
  0xbc   : > { %v2256_v5 = vmul.f32 %v4528_v17, %v336_v39  ;;  %v2257_v6 = vmul.f32 %v8053_v58, %v336_v39  ;;  %v2701_v7 = vmul.f32 %v8054_v40, %v336_v39  ;;  %v2702_v8 = vmul.f32 %v8055_v41, %v336_v39 }
  0xbd   : > { %v2703_v10 = vmul.f32 %v8056_v19, %v336_v39  ;;  %v2704_v11 = vmul.f32 %v8057_v20, %v336_v39  ;;  %v3148_v12 = vmul.f32 %v8058_v21, %v336_v39  ;;  %v3149_v13 = vmul.f32 %v8059_v29, %v336_v39 }
  0xbe   : > { %v3150_v15 = vmul.f32 %v8060_v25, %v336_v39  ;;  %v3151_v16 = vmul.f32 %v8061_v28, %v336_v39  ;;  %v3595_v17 = vmul.f32 %v8062_v46, %v336_v39  ;;  %v3596_v58 = vmul.f32 %v8063_v47, %v336_v39 }
  0xbf   : > { %v3597_v40 = vmul.f32 %v8064_v48, %v336_v39  ;;  %v3598_v41 = vmul.f32 %v4567_v38, %v336_v39  ;;  %v409_v19 = vadd.f32 %v393_v49, %v373_v26  ;;  %v410_v50 = vadd.f32 %v393_v49, %v374_v27  ;;  %v8105_v38 = vld [vmem:[#allocation43_spill] sm:$0xff] }
  0xc0   : > { %v411_v20 = vadd.f32 %v393_v49, %v375_v42  ;;  %v412_v32 = vadd.f32 %v393_v49, %v376_v44  ;;  %v929_v21 = vadd.f32 %v913_v43, %v393_v49  ;;  %v930_v31 = vadd.f32 %v914_v45, %v393_v49 }
  0xc1   : > { %v931_v29 = vadd.f32 %v915_v52, %v393_v49  ;;  %v932_v30 = vadd.f32 %v916_v51, %v393_v49  ;;  %v4827_v25 = vmax.f32 %v409_v19, 0.0  ;;  %v4829_v28 = vmax.f32 %v410_v50, 0.0 }
  0xc2   : > { %v4831_v46 = vmax.f32 %v411_v20, 0.0  ;;  %v4833_v47 = vmax.f32 %v412_v32, 0.0  ;;  %v4835_v48 = vmax.f32 %v929_v21, 0.0  ;;  %v4837_v39 = vmax.f32 %v930_v31, 0.0 }
  0xc3   : > { %8065 = vst [vmem:[#allocation100_spill] sm:$0xff] %v4827_v25  ;;  %8066 = vst [vmem:[#allocation101_spill] sm:$0xff] %v4829_v28  ;;  %v4839_v26 = vmax.f32 %v931_v29, 0.0  ;;  %v4841_v27 = vmax.f32 %v932_v30, 0.0  ;;  %v1376_v42 = vadd.f32 %v1360_v53, %v393_v49  ;;  %v1377_v44 = vadd.f32 %v1361_v18, %v393_v49 }
  0xc4   : > { %8067 = vst [vmem:[#allocation102_spill] sm:$0xff] %v4831_v46  ;;  %8068 = vst [vmem:[#allocation103_spill] sm:$0xff] %v4833_v47  ;;  %v1378_v43 = vadd.f32 %v1362_v22, %v393_v49  ;;  %v1379_v45 = vadd.f32 %v1363_v59, %v393_v49  ;;  %v1823_v19 = vadd.f32 %v1807_v60, %v393_v49 }
  0xc5   : > { %8069 = vst [vmem:[#allocation104_spill] sm:$0xff] %v4835_v48  ;;  %8070 = vst [vmem:[#allocation105_spill] sm:$0xff] %v4837_v39  ;;  %v1824_v52 = vadd.f32 %v1808_v61, %v393_v49  ;;  %v1825_v50 = vadd.f32 %v1809_v63, %v393_v49  ;;  %v1826_v51 = vadd.f32 %v1810_v0, %v393_v49  ;;  %v4843_v20 = vmax.f32 %v1376_v42, 0.0 }
  0xc6   : > { %8071 = vst [vmem:[#allocation106_spill] sm:$0xff] %v4839_v26  ;;  %8072 = vst [vmem:[#allocation107_spill] sm:$0xff] %v4841_v27  ;;  %v4845_v32 = vmax.f32 %v1377_v44, 0.0  ;;  %v4847_v21 = vmax.f32 %v1378_v43, 0.0  ;;  %v4849_v31 = vmax.f32 %v1379_v45, 0.0  ;;  %v4851_v29 = vmax.f32 %v1823_v19, 0.0 }
  0xc7   : > { %8073 = vst [vmem:[#allocation108_spill] sm:$0xff] %v4843_v20  ;;  %v4853_v30 = vmax.f32 %v1824_v52, 0.0  ;;  %v4855_v53 = vmax.f32 %v1825_v50, 0.0  ;;  %v4857_v18 = vmax.f32 %v1826_v51, 0.0  ;;  %v2270_v59 = vadd.f32 %v2254_v1, %v393_v49 }
  0xc8   : > { %8074 = vst [vmem:[#allocation109_spill] sm:$0xff] %v4845_v32  ;;  %8075 = vst [vmem:[#allocation110_spill] sm:$0xff] %v4847_v21  ;;  %v2271_v60 = vadd.f32 %v2255_v3, %v393_v49  ;;  %v2272_v61 = vadd.f32 %v2256_v5, %v393_v49  ;;  %v2273_v63 = vadd.f32 %v2257_v6, %v393_v49 }
  0xc9   : > { %8076 = vst [vmem:[#allocation111_spill] sm:$0xff] %v4849_v31  ;;  %8077 = vst [vmem:[#allocation112_spill] sm:$0xff] %v4851_v29  ;;  %v2717_v0 = vadd.f32 %v2701_v7, %v393_v49  ;;  %v2718_v22 = vadd.f32 %v2702_v8, %v393_v49  ;;  %v2719_v42 = vadd.f32 %v2703_v10, %v393_v49  ;;  %v4859_v43 = vmax.f32 %v2270_v59, 0.0 }
  0xca   : > { %8078 = vst [vmem:[#allocation113_spill] sm:$0xff] %v4853_v30  ;;  %8079 = vst [vmem:[#allocation114_spill] sm:$0xff] %v4855_v53  ;;  %v2720_v44 = vadd.f32 %v2704_v11, %v393_v49  ;;  %v4861_v45 = vmax.f32 %v2271_v60, 0.0  ;;  %v4863_v19 = vmax.f32 %v2272_v61, 0.0  ;;  %v4865_v52 = vmax.f32 %v2273_v63, 0.0  ;;  %v4875_v61 = vpop.permute.xlu0 %397 }
  0xcb   : > { %8080 = vst [vmem:[#allocation115_spill] sm:$0xff] %v4857_v18  ;;  %8081 = vst [vmem:[#allocation116_spill] sm:$0xff] %v4859_v43  ;;  %v4867_v50 = vmax.f32 %v2717_v0, 0.0  ;;  %v4869_v51 = vmax.f32 %v2718_v22, 0.0  ;;  %v4871_v1 = vmax.f32 %v2719_v42, 0.0  ;;  %v3164_v5 = vadd.f32 %v3148_v12, %v393_v49 }
  0xcc   : > { %8082 = vst [vmem:[#allocation117_spill] sm:$0xff] %v4861_v45  ;;  %8083 = vst [vmem:[#allocation118_spill] sm:$0xff] %v4863_v19  ;;  %v4873_v3 = vmax.f32 %v2720_v44, 0.0  ;;  %v3165_v6 = vadd.f32 %v3149_v13, %v393_v49  ;;  %v3166_v7 = vadd.f32 %v3150_v15, %v393_v49  ;;  %v3167_v8 = vadd.f32 %v3151_v16, %v393_v49 }
  0xcd   : > { %8084 = vst [vmem:[#allocation119_spill] sm:$0xff] %v4865_v52  ;;  %8085 = vst [vmem:[#allocation120_spill] sm:$0xff] %v4867_v50  ;;  %v3611_v10 = vadd.f32 %v3595_v17, %v393_v49  ;;  %v3612_v11 = vadd.f32 %v3596_v58, %v393_v49  ;;  %v3613_v59 = vadd.f32 %v3597_v40, %v393_v49  ;;  %v4877_v63 = vmax.f32 %v3164_v5, 0.0  ;;  %v8097_v58 = vld [vmem:[#allocation36_spill] sm:$0xff]  ;;  %v8098_v17 = vld [vmem:[#allocation37_spill] sm:$0xff] }
  0xce   : > { %8086 = vst [vmem:[#allocation121_spill] sm:$0xff] %v4869_v51  ;;  %8087 = vst [vmem:[#allocation122_spill] sm:$0xff] %v4871_v1  ;;  %v3614_v60 = vadd.f32 %v3598_v41, %v393_v49  ;;  %v4879_v0 = vmax.f32 %v3165_v6, 0.0  ;;  %v4881_v22 = vmax.f32 %v3166_v7, 0.0  ;;  %v4883_v42 = vmax.f32 %v3167_v8, 0.0  ;;  %v8099_v41 = vld [vmem:[#allocation38_spill] sm:$0xff]  ;;  %v4901_v7 = vpop.permute.xlu1 %345 }
  0xcf   : > { %8088 = vst [vmem:[#allocation123_spill] sm:$0xff] %v4873_v3  ;;  %8089 = vst [vmem:[#allocation124_spill] sm:$0xff] %v4877_v63  ;;  %v4885_v44 = vmax.f32 %v3611_v10, 0.0  ;;  %v4887_v12 = vmax.f32 %v3612_v11, 0.0  ;;  %v4889_v13 = vmax.f32 %v3613_v59, 0.0  ;;  %v413_v16 = vadd.f32 %v4875_v61, %v8097_v58  ;;  %v8100_v5 = vld [vmem:[#allocation39_spill] sm:$0xff] }
  0xd0   : > { %8090 = vst [vmem:[#allocation125_spill] sm:$0xff] %v4879_v0  ;;  %8091 = vst [vmem:[#allocation126_spill] sm:$0xff] %v4881_v22  ;;  %v4891_v15 = vmax.f32 %v3614_v60, 0.0  ;;  %v414_v49 = vadd.f32 %v4875_v61, %v8098_v17  ;;  %v415_v40 = vadd.f32 %v4875_v61, %v8099_v41  ;;  %v416_v6 = vadd.f32 %v4875_v61, %v8100_v5  ;;  %v8102_v8 = vld [vmem:[#allocation40_spill] sm:$0xff]  ;;  %v8103_v11 = vld [vmem:[#allocation41_spill] sm:$0xff] }
  0xd1   : > { %8092 = vst [vmem:[#allocation127_spill] sm:$0xff] %v4883_v42  ;;  %8093 = vst [vmem:[#allocation128_spill] sm:$0xff] %v4885_v44  ;;  %v933_v10 = vadd.f32 %v8102_v8, %v4875_v61  ;;  %v934_v59 = vadd.f32 %v8103_v11, %v4875_v61  ;;  %v8104_v60 = vld [vmem:[#allocation42_spill] sm:$0xff]  ;;  %v936_v17 = vadd.f32 %v8105_v38, %v4875_v61  ;;  %v4911_v54 = vmax.f32 %v413_v16, 0.0  ;;  %v8115_v38 = vld [vmem:[#allocation45_spill] sm:$0xff] }
  0xd2   : > { %8094 = vst [vmem:[#allocation129_spill] sm:$0xff] %v4887_v12  ;;  %8095 = vst [vmem:[#allocation130_spill] sm:$0xff] %v4889_v13  ;;  %v935_v58 = vadd.f32 %v8104_v60, %v4875_v61  ;;  %v4913_v41 = vmax.f32 %v414_v49, 0.0  ;;  %v4915_v55 = vmax.f32 %v415_v40, 0.0  ;;  %v4917_v5 = vmax.f32 %v416_v6, 0.0  ;;  %v8114_v60 = vld [vmem:[#allocation44_spill] sm:$0xff] }
  0xd3   : > { %8096 = vst [vmem:[#allocation131_spill] sm:$0xff] %v4891_v15  ;;  %8101 = vst [vmem:[#allocation36_spill] sm:$0xff] %v4901_v7  ;;  %v4919_v7 = vmax.f32 %v933_v10, 0.0  ;;  %v4921_v8 = vmax.f32 %v934_v59, 0.0  ;;  %v4925_v11 = vmax.f32 %v936_v17, 0.0  ;;  %v1380_v9 = vadd.f32 %v8114_v60, %v4875_v61  ;;  %v8116_v49 = vld [vmem:[#allocation46_spill] sm:$0xff] }
  0xd4   : > { %8106 = vst [vmem:[#allocation37_spill] sm:$0xff] %v4911_v54  ;;  %8107 = vst [vmem:[#allocation38_spill] sm:$0xff] %v4913_v41  ;;  %v4923_v56 = vmax.f32 %v935_v58, 0.0  ;;  %v1381_v16 = vadd.f32 %v8115_v38, %v4875_v61  ;;  %v1382_v40 = vadd.f32 %v8116_v49, %v4875_v61  ;;  %v8117_v6 = vld [vmem:[#allocation47_spill] sm:$0xff]  ;;  %v8118_v10 = vld [vmem:[#allocation48_spill] sm:$0xff] }
  0xd5   : > { %8108 = vst [vmem:[#allocation39_spill] sm:$0xff] %v4915_v55  ;;  %8109 = vst [vmem:[#allocation40_spill] sm:$0xff] %v4917_v5  ;;  %v1383_v5 = vadd.f32 %v8117_v6, %v4875_v61  ;;  %v1827_v59 = vadd.f32 %v8118_v10, %v4875_v61  ;;  %v8119_v58 = vld [vmem:[#allocation49_spill] sm:$0xff]  ;;  %v8120_v17 = vld [vmem:[#allocation50_spill] sm:$0xff]  ;;  %v4951_v6 = vpop.permute.xlu1 %402 }
  0xd6   : > { %8110 = vst [vmem:[#allocation41_spill] sm:$0xff] %v4919_v7  ;;  %8111 = vst [vmem:[#allocation42_spill] sm:$0xff] %v4921_v8  ;;  %v8121_v60 = vld [vmem:[#allocation51_spill] sm:$0xff]  ;;  %v4943_v7 = vmax.f32 %v1380_v9, 0.0  ;;  %v4945_v38 = vmax.f32 %v1381_v16, 0.0  ;;  %v4947_v49 = vmax.f32 %v1382_v40, 0.0 }
  0xd7   : > { %8112 = vst [vmem:[#allocation43_spill] sm:$0xff] %v4923_v56  ;;  %8113 = vst [vmem:[#allocation132_spill] sm:$0xff] %v4925_v11  ;;  %v1828_v56 = vadd.f32 %v8119_v58, %v4875_v61  ;;  %v1829_v11 = vadd.f32 %v8120_v17, %v4875_v61  ;;  %v1830_v8 = vadd.f32 %v8121_v60, %v4875_v61  ;;  %v4949_v55 = vmax.f32 %v1383_v5, 0.0  ;;  %v8131_v60 = vld [vmem:[#allocation52_spill] sm:$0xff]  ;;  %v8132_v16 = vld [vmem:[#allocation53_spill] sm:$0xff] }
  0xd8   : > { %8122 = vst [vmem:[#allocation44_spill] sm:$0xff] %v4943_v7  ;;  %8123 = vst [vmem:[#allocation45_spill] sm:$0xff] %v4945_v38  ;;  %v4953_v10 = vmax.f32 %v1827_v59, 0.0  ;;  %v2274_v9 = vadd.f32 %v8131_v60, %v4875_v61  ;;  %v2275_v38 = vadd.f32 %v8132_v16, %v4875_v61  ;;  %v8133_v40 = vld [vmem:[#allocation54_spill] sm:$0xff]  ;;  %v8135_v59 = vld [vmem:[#allocation56_spill] sm:$0xff] }
  0xd9   : > { %8124 = vst [vmem:[#allocation46_spill] sm:$0xff] %v4947_v49  ;;  %8125 = vst [vmem:[#allocation47_spill] sm:$0xff] %v4949_v55  ;;  %v4955_v41 = vmax.f32 %v1828_v56, 0.0  ;;  %v4957_v58 = vmax.f32 %v1829_v11, 0.0  ;;  %v4959_v17 = vmax.f32 %v1830_v8, 0.0  ;;  %v2276_v5 = vadd.f32 %v8133_v40, %v4875_v61  ;;  %v8134_v55 = vld [vmem:[#allocation55_spill] sm:$0xff] }
  0xda   : > { %8126 = vst [vmem:[#allocation48_spill] sm:$0xff] %v4951_v6  ;;  %8127 = vst [vmem:[#allocation49_spill] sm:$0xff] %v4953_v10  ;;  %v2277_v6 = vadd.f32 %v8134_v55, %v4875_v61  ;;  %v2721_v56 = vadd.f32 %v8135_v59, %v4875_v61  ;;  %v8136_v11 = vld [vmem:[#allocation57_spill] sm:$0xff]  ;;  %v8137_v8 = vld [vmem:[#allocation58_spill] sm:$0xff]  ;;  %v4977_v10 = vmax.f32 %v2274_v9, 0.0  ;;  %v4979_v16 = vmax.f32 %v2275_v38, 0.0 }
  0xdb   : > { %8128 = vst [vmem:[#allocation50_spill] sm:$0xff] %v4955_v41  ;;  %8129 = vst [vmem:[#allocation51_spill] sm:$0xff] %v4957_v58  ;;  %v2722_v58 = vadd.f32 %v8136_v11, %v4875_v61  ;;  %v8138_v60 = vld [vmem:[#allocation59_spill] sm:$0xff]  ;;  %v4981_v40 = vmax.f32 %v2276_v5, 0.0  ;;  %v8148_v9 = vld [vmem:[#allocation61_spill] sm:$0xff] }
  0xdc   : > { %8130 = vst [vmem:[#allocation133_spill] sm:$0xff] %v4959_v17  ;;  %v2723_v17 = vadd.f32 %v8137_v8, %v4875_v61  ;;  %v2724_v41 = vadd.f32 %v8138_v60, %v4875_v61  ;;  %8139 = vst [vmem:[#allocation52_spill] sm:$0xff] %v4977_v10  ;;  %v4983_v49 = vmax.f32 %v2277_v6, 0.0  ;;  %v4985_v55 = vmax.f32 %v2721_v56, 0.0  ;;  %v8147_v8 = vld [vmem:[#allocation60_spill] sm:$0xff]  ;;  %v8149_v38 = vld [vmem:[#allocation62_spill] sm:$0xff] }
  0xdd   : > { %8140 = vst [vmem:[#allocation53_spill] sm:$0xff] %v4979_v16  ;;  %8141 = vst [vmem:[#allocation54_spill] sm:$0xff] %v4981_v40  ;;  %v4987_v59 = vmax.f32 %v2722_v58, 0.0  ;;  %v3168_v54 = vadd.f32 %v8147_v8, %v4875_v61  ;;  %v3169_v60 = vadd.f32 %v8148_v9, %v4875_v61  ;;  %v3170_v5 = vadd.f32 %v8149_v38, %v4875_v61  ;;  %v8150_v6 = vld [vmem:[#allocation63_spill] sm:$0xff]  ;;  %v8151_v56 = vld [vmem:[#allocation64_spill] sm:$0xff] }
  0xde   : > { %8142 = vst [vmem:[#allocation55_spill] sm:$0xff] %v4983_v49  ;;  %8143 = vst [vmem:[#allocation56_spill] sm:$0xff] %v4985_v55  ;;  %v4989_v7 = vmax.f32 %v2723_v17, 0.0  ;;  %v4991_v11 = vmax.f32 %v2724_v41, 0.0  ;;  %v3171_v49 = vadd.f32 %v8150_v6, %v4875_v61  ;;  %v3615_v58 = vadd.f32 %v8151_v56, %v4875_v61  ;;  %v8152_v17 = vld [vmem:[#allocation65_spill] sm:$0xff]  ;;  %v8153_v41 = vld [vmem:[#allocation66_spill] sm:$0xff]  ;;  %v445_v55 = vpop.permute.xlu1 %444 }
  0xdf   : > { %8144 = vst [vmem:[#allocation57_spill] sm:$0xff] %v4987_v59  ;;  %v8154_v8 = vld [vmem:[#allocation67_spill] sm:$0xff]  ;;  %v5009_v9 = vmax.f32 %v3168_v54, 0.0  ;;  %v5011_v40 = vmax.f32 %v3169_v60, 0.0  ;;  %v5013_v38 = vmax.f32 %v3170_v5, 0.0  ;;  %v463_v54 = vmul.f32 %v445_v55, %v4831_v46 }
  0xe0   : > { %8145 = vst [vmem:[#allocation58_spill] sm:$0xff] %v4989_v7  ;;  %8146 = vst [vmem:[#allocation59_spill] sm:$0xff] %v4991_v11  ;;  %v3616_v7 = vadd.f32 %v8152_v17, %v4875_v61  ;;  %v3617_v11 = vadd.f32 %v8153_v41, %v4875_v61  ;;  %v3618_v59 = vadd.f32 %v8154_v8, %v4875_v61  ;;  %v5015_v6 = vmax.f32 %v3171_v49, 0.0 }
  0xe1   : > { %8155 = vst [vmem:[#allocation60_spill] sm:$0xff] %v5009_v9  ;;  %8156 = vst [vmem:[#allocation61_spill] sm:$0xff] %v5011_v40  ;;  %v5017_v16 = vmax.f32 %v3615_v58, 0.0  ;;  %v461_v41 = vmul.f32 %v445_v55, %v4827_v25  ;;  %v462_v61 = vmul.f32 %v445_v55, %v4829_v28  ;;  %v464_v60 = vmul.f32 %v445_v55, %v4833_v47  ;;  %v5049_v25 = vpop.permute.xlu0 %439 }
  0xe2   : > { %8157 = vst [vmem:[#allocation62_spill] sm:$0xff] %v5013_v38  ;;  %8158 = vst [vmem:[#allocation63_spill] sm:$0xff] %v5015_v6  ;;  %v5019_v56 = vmax.f32 %v3616_v7, 0.0  ;;  %v5021_v17 = vmax.f32 %v3617_v11, 0.0  ;;  %v5023_v10 = vmax.f32 %v3618_v59, 0.0  ;;  %v961_v5 = vmul.f32 %v4835_v48, %v445_v55 }
  0xe3   : > { %8159 = vst [vmem:[#allocation64_spill] sm:$0xff] %v5017_v16  ;;  %v962_v49 = vmul.f32 %v4837_v39, %v445_v55  ;;  %v963_v58 = vmul.f32 %v4839_v26, %v445_v55  ;;  %v964_v7 = vmul.f32 %v4841_v27, %v445_v55  ;;  %v1408_v11 = vmul.f32 %v4843_v20, %v445_v55 }
  0xe4   : > { %8160 = vst [vmem:[#allocation65_spill] sm:$0xff] %v5019_v56  ;;  %8161 = vst [vmem:[#allocation66_spill] sm:$0xff] %v5021_v17  ;;  %v1409_v59 = vmul.f32 %v4845_v32, %v445_v55  ;;  %v1410_v8 = vmul.f32 %v4847_v21, %v445_v55  ;;  %v1411_v28 = vmul.f32 %v4849_v31, %v445_v55 }
  0xe5   : > { %8162 = vst [vmem:[#allocation67_spill] sm:$0xff] %v5023_v10  ;;  %v1855_v46 = vmul.f32 %v4851_v29, %v445_v55  ;;  %v1856_v47 = vmul.f32 %v4853_v30, %v445_v55  ;;  %v1857_v48 = vmul.f32 %v4855_v53, %v445_v55  ;;  %v1858_v39 = vmul.f32 %v4857_v18, %v445_v55 }
  0xe6   : > { %v2302_v26 = vmul.f32 %v4859_v43, %v445_v55  ;;  %v2303_v27 = vmul.f32 %v4861_v45, %v445_v55  ;;  %v2304_v20 = vmul.f32 %v4863_v19, %v445_v55  ;;  %v2305_v32 = vmul.f32 %v4865_v52, %v445_v55 }
  0xe7   : > { %v2749_v21 = vmul.f32 %v4867_v50, %v445_v55  ;;  %v2750_v31 = vmul.f32 %v4869_v51, %v445_v55  ;;  %v2751_v29 = vmul.f32 %v4871_v1, %v445_v55  ;;  %v2752_v30 = vmul.f32 %v4873_v3, %v445_v55 }
  0xe8   : > { %v5052_v18 = vmul.f32 %v4877_v63, %v445_v55  ;;  %v5055_v43 = vmul.f32 %v4879_v0, %v445_v55  ;;  %v5058_v19 = vmul.f32 %v4881_v22, %v445_v55  ;;  %v5061_v52 = vmul.f32 %v4883_v42, %v445_v55 }
  0xe9   : > { %v5064_v51 = vmul.f32 %v4885_v44, %v445_v55  ;;  %v5067_v1 = vmul.f32 %v4887_v12, %v445_v55  ;;  %v5070_v3 = vmul.f32 %v4889_v13, %v445_v55  ;;  %v5073_v63 = vmul.f32 %v4891_v15, %v445_v55 }
  0xea   : > { %v457_v0 = vmul.f32 %v5049_v25, %v4707_v23  ;;  %v458_v22 = vmul.f32 %v5049_v25, %v4709_v37  ;;  %v459_v42 = vmul.f32 %v5049_v25, %v4711_v4  ;;  %v460_v44 = vmul.f32 %v5049_v25, %v4713_v14 }
  0xeb   : > { %v957_v12 = vmul.f32 %v4715_v24, %v5049_v25  ;;  %v958_v13 = vmul.f32 %v4717_v62, %v5049_v25  ;;  %v959_v55 = vmul.f32 %v4719_v33, %v5049_v25  ;;  %v960_v15 = vmul.f32 %v4721_v2, %v5049_v25 }
  0xec   : > { %v5091_v50 = vadd.f32 %v461_v41, %v457_v0  ;;  %v5093_v45 = vadd.f32 %v462_v61, %v458_v22  ;;  %v5095_v53 = vadd.f32 %v463_v54, %v459_v42  ;;  %v5097_v4 = vadd.f32 %v464_v60, %v460_v44  ;;  %v8163_v44 = vld [vmem:[#allocation80_spill] sm:$0xff]  ;;  %v8166_v54 = vld [vmem:[#allocation83_spill] sm:$0xff] }
  0xed   : > { %v5099_v14 = vadd.f32 %v961_v5, %v957_v12  ;;  %v5101_v24 = vadd.f32 %v962_v49, %v958_v13  ;;  %v5103_v37 = vadd.f32 %v963_v58, %v959_v55  ;;  %v5105_v62 = vadd.f32 %v964_v7, %v960_v15  ;;  %v8164_v13 = vld [vmem:[#allocation81_spill] sm:$0xff]  ;;  %v8165_v15 = vld [vmem:[#allocation82_spill] sm:$0xff] }
  0xee   : > { %v1404_v33 = vmul.f32 %v4731_v35, %v5049_v25  ;;  %v1405_v0 = vmul.f32 %v4733_v36, %v5049_v25  ;;  %v1406_v22 = vmul.f32 %v4735_v57, %v5049_v25  ;;  %v1407_v42 = vmul.f32 %v4737_v34, %v5049_v25 }
  0xef   : > { %v1851_v12 = vmul.f32 %v8163_v44, %v5049_v25  ;;  %v1852_v41 = vmul.f32 %v8164_v13, %v5049_v25  ;;  %v1853_v61 = vmul.f32 %v8165_v15, %v5049_v25  ;;  %v1854_v60 = vmul.f32 %v8166_v54, %v5049_v25  ;;  %v8167_v15 = vld [vmem:[#allocation84_spill] sm:$0xff] }
  0xf0   : > { %v5123_v5 = vadd.f32 %v1408_v11, %v1404_v33  ;;  %v5125_v49 = vadd.f32 %v1409_v59, %v1405_v0  ;;  %v5127_v58 = vadd.f32 %v1410_v8, %v1406_v22  ;;  %v5129_v7 = vadd.f32 %v1411_v28, %v1407_v42  ;;  %v8168_v33 = vld [vmem:[#allocation85_spill] sm:$0xff]  ;;  %v8169_v59 = vld [vmem:[#allocation86_spill] sm:$0xff]  ;;  %v8170_v28 = vld [vmem:[#allocation87_spill] sm:$0xff] }
  0xf1   : > { %v5131_v55 = vadd.f32 %v1855_v46, %v1851_v12  ;;  %v5133_v44 = vadd.f32 %v1856_v47, %v1852_v41  ;;  %v5135_v34 = vadd.f32 %v1857_v48, %v1853_v61  ;;  %v5137_v13 = vadd.f32 %v1858_v39, %v1854_v60  ;;  %v8171_v46 = vld [vmem:[#allocation88_spill] sm:$0xff]  ;;  %v8172_v48 = vld [vmem:[#allocation89_spill] sm:$0xff]  ;;  %v8173_v39 = vld [vmem:[#allocation90_spill] sm:$0xff] }
  0xf2   : > { %v2298_v57 = vmul.f32 %v8167_v15, %v5049_v25  ;;  %v2299_v11 = vmul.f32 %v8168_v33, %v5049_v25  ;;  %v2300_v8 = vmul.f32 %v8169_v59, %v5049_v25  ;;  %v2301_v0 = vmul.f32 %v8170_v28, %v5049_v25  ;;  %v8174_v12 = vld [vmem:[#allocation91_spill] sm:$0xff] }
  0xf3   : > { %v2745_v47 = vmul.f32 %v8171_v46, %v5049_v25  ;;  %v2746_v22 = vmul.f32 %v8172_v48, %v5049_v25  ;;  %v2747_v42 = vmul.f32 %v8173_v39, %v5049_v25  ;;  %v2748_v41 = vmul.f32 %v8174_v12, %v5049_v25  ;;  %v8175_v39 = vld [vmem:[#allocation92_spill] sm:$0xff] }
  0xf4   : > { %v5155_v61 = vadd.f32 %v2302_v26, %v2298_v57  ;;  %v5157_v60 = vadd.f32 %v2303_v27, %v2299_v11  ;;  %v5159_v59 = vadd.f32 %v2304_v20, %v2300_v8  ;;  %v5161_v33 = vadd.f32 %v2305_v32, %v2301_v0  ;;  %v8176_v57 = vld [vmem:[#allocation93_spill] sm:$0xff]  ;;  %v8177_v27 = vld [vmem:[#allocation94_spill] sm:$0xff]  ;;  %v8178_v32 = vld [vmem:[#allocation95_spill] sm:$0xff] }
  0xf5   : > { %v5163_v28 = vadd.f32 %v2749_v21, %v2745_v47  ;;  %v5165_v46 = vadd.f32 %v2750_v31, %v2746_v22  ;;  %v5167_v15 = vadd.f32 %v2751_v29, %v2747_v42  ;;  %v5169_v48 = vadd.f32 %v2752_v30, %v2748_v41  ;;  %v8179_v21 = vld [vmem:[#allocation96_spill] sm:$0xff]  ;;  %v8180_v29 = vld [vmem:[#allocation97_spill] sm:$0xff]  ;;  %v8181_v30 = vld [vmem:[#allocation98_spill] sm:$0xff]  ;;  %v5187_v42 = vpop.permute.xlu0 %449 }
  0xf6   : > { %v3192_v54 = vmul.f32 %v8175_v39, %v5049_v25  ;;  %v3193_v26 = vmul.f32 %v8176_v57, %v5049_v25  ;;  %v3194_v20 = vmul.f32 %v8177_v27, %v5049_v25  ;;  %v3195_v11 = vmul.f32 %v8178_v32, %v5049_v25  ;;  %v8182_v47 = vld [vmem:[#allocation99_spill] sm:$0xff] }
  0xf7   : > { %v3639_v31 = vmul.f32 %v8179_v21, %v5049_v25  ;;  %v3640_v8 = vmul.f32 %v8180_v29, %v5049_v25  ;;  %v3641_v0 = vmul.f32 %v8181_v30, %v5049_v25  ;;  %v3642_v22 = vmul.f32 %v8182_v47, %v5049_v25 }
  0xf8   : > { %v5190_v41 = vadd.f32 %v5052_v18, %v3192_v54  ;;  %v5193_v27 = vadd.f32 %v5055_v43, %v3193_v26  ;;  %v5196_v32 = vadd.f32 %v5058_v19, %v3194_v20  ;;  %v5199_v21 = vadd.f32 %v5061_v52, %v3195_v11  ;;  %v8183_v43 = vld [vmem:[#allocation37_spill] sm:$0xff]  ;;  %v8184_v19 = vld [vmem:[#allocation38_spill] sm:$0xff]  ;;  %v8185_v52 = vld [vmem:[#allocation39_spill] sm:$0xff] }
  0xf9   : > { %v5202_v29 = vadd.f32 %v5064_v51, %v3639_v31  ;;  %v5205_v30 = vadd.f32 %v5067_v1, %v3640_v8  ;;  %v5208_v25 = vadd.f32 %v5070_v3, %v3641_v0  ;;  %v5211_v18 = vadd.f32 %v5073_v63, %v3642_v22  ;;  %v8186_v51 = vld [vmem:[#allocation40_spill] sm:$0xff]  ;;  %v8187_v1 = vld [vmem:[#allocation41_spill] sm:$0xff]  ;;  %v8188_v3 = vld [vmem:[#allocation42_spill] sm:$0xff] }
  0xfa   : > { %v465_v54 = vmul.f32 %v5187_v42, %v8183_v43  ;;  %v466_v26 = vmul.f32 %v5187_v42, %v8184_v19  ;;  %v467_v20 = vmul.f32 %v5187_v42, %v8185_v52  ;;  %v468_v11 = vmul.f32 %v5187_v42, %v8186_v51  ;;  %v8189_v63 = vld [vmem:[#allocation43_spill] sm:$0xff]  ;;  %v8190_v22 = vld [vmem:[#allocation132_spill] sm:$0xff] }
  0xfb   : > { %v965_v31 = vmul.f32 %v8187_v1, %v5187_v42  ;;  %v966_v8 = vmul.f32 %v8188_v3, %v5187_v42  ;;  %v967_v0 = vmul.f32 %v8189_v63, %v5187_v42  ;;  %v968_v43 = vmul.f32 %v8190_v22, %v5187_v42 }
  0xfc   : > { %v5230_v19 = vadd.f32 %v5091_v50, %v465_v54  ;;  %v5233_v52 = vadd.f32 %v5093_v45, %v466_v26  ;;  %v5236_v51 = vadd.f32 %v5095_v53, %v467_v20  ;;  %v5239_v1 = vadd.f32 %v5097_v4, %v468_v11  ;;  %v8199_v45 = vld [vmem:[#allocation44_spill] sm:$0xff]  ;;  %v8200_v53 = vld [vmem:[#allocation45_spill] sm:$0xff]  ;;  %v8201_v4 = vld [vmem:[#allocation46_spill] sm:$0xff] }
  0xfd   : > { %v5242_v3 = vadd.f32 %v5099_v14, %v965_v31  ;;  %v5245_v63 = vadd.f32 %v5101_v24, %v966_v8  ;;  %v5248_v22 = vadd.f32 %v5103_v37, %v967_v0  ;;  %v5251_v50 = vadd.f32 %v5105_v62, %v968_v43  ;;  %v8202_v14 = vld [vmem:[#allocation47_spill] sm:$0xff]  ;;  %v8203_v24 = vld [vmem:[#allocation49_spill] sm:$0xff]  ;;  %v8204_v37 = vld [vmem:[#allocation50_spill] sm:$0xff] }
  0xfe   : > { %8191 = vst [vmem:[#allocation134_spill] sm:$0xff] %v5230_v19  ;;  %8192 = vst [vmem:[#allocation135_spill] sm:$0xff] %v5233_v52  ;;  %v1412_v54 = vmul.f32 %v8199_v45, %v5187_v42  ;;  %v1413_v26 = vmul.f32 %v8200_v53, %v5187_v42  ;;  %v1414_v20 = vmul.f32 %v8201_v4, %v5187_v42  ;;  %v8205_v62 = vld [vmem:[#allocation51_spill] sm:$0xff]  ;;  %v8206_v0 = vld [vmem:[#allocation133_spill] sm:$0xff] }
  0xff   : > { %8193 = vst [vmem:[#allocation136_spill] sm:$0xff] %v5236_v51  ;;  %8194 = vst [vmem:[#allocation137_spill] sm:$0xff] %v5239_v1  ;;  %v1415_v11 = vmul.f32 %v8202_v14, %v5187_v42  ;;  %v1859_v31 = vmul.f32 %v8203_v24, %v5187_v42  ;;  %v1860_v8 = vmul.f32 %v8204_v37, %v5187_v42 }
 0x100   : > { %8195 = vst [vmem:[#allocation138_spill] sm:$0xff] %v5242_v3  ;;  %8196 = vst [vmem:[#allocation139_spill] sm:$0xff] %v5245_v63  ;;  %v1861_v43 = vmul.f32 %v8205_v62, %v5187_v42  ;;  %v5273_v63 = vadd.f32 %v5125_v49, %v1413_v26  ;;  %v5276_v3 = vadd.f32 %v5127_v58, %v1414_v20  ;;  %v8215_v49 = vld [vmem:[#allocation52_spill] sm:$0xff]  ;;  %v8216_v58 = vld [vmem:[#allocation53_spill] sm:$0xff] }
 0x101   : > { %8197 = vst [vmem:[#allocation140_spill] sm:$0xff] %v5248_v22  ;;  %8198 = vst [vmem:[#allocation141_spill] sm:$0xff] %v5251_v50  ;;  %v1862_v50 = vmul.f32 %v8206_v0, %v5187_v42  ;;  %v5270_v22 = vadd.f32 %v5123_v5, %v1412_v54  ;;  %v5279_v1 = vadd.f32 %v5129_v7, %v1415_v11  ;;  %v8217_v7 = vld [vmem:[#allocation54_spill] sm:$0xff] }
 0x102   : > { %8208 = vst [vmem:[#allocation143_spill] sm:$0xff] %v5273_v63  ;;  %8209 = vst [vmem:[#allocation144_spill] sm:$0xff] %v5276_v3  ;;  %v5282_v51 = vadd.f32 %v5131_v55, %v1859_v31  ;;  %v5285_v52 = vadd.f32 %v5133_v44, %v1860_v8  ;;  %v5288_v19 = vadd.f32 %v5135_v34, %v1861_v43  ;;  %v8218_v55 = vld [vmem:[#allocation55_spill] sm:$0xff]  ;;  %v8219_v44 = vld [vmem:[#allocation56_spill] sm:$0xff] }
 0x103   : > { %8207 = vst [vmem:[#allocation142_spill] sm:$0xff] %v5270_v22  ;;  %8210 = vst [vmem:[#allocation145_spill] sm:$0xff] %v5279_v1  ;;  %v5291_v5 = vadd.f32 %v5137_v13, %v1862_v50  ;;  %v2306_v54 = vmul.f32 %v8215_v49, %v5187_v42  ;;  %v2307_v26 = vmul.f32 %v8216_v58, %v5187_v42  ;;  %v8220_v34 = vld [vmem:[#allocation57_spill] sm:$0xff]  ;;  %v8221_v13 = vld [vmem:[#allocation58_spill] sm:$0xff] }
 0x104   : > { %8211 = vst [vmem:[#allocation146_spill] sm:$0xff] %v5282_v51  ;;  %8212 = vst [vmem:[#allocation147_spill] sm:$0xff] %v5285_v52  ;;  %v2308_v20 = vmul.f32 %v8217_v7, %v5187_v42  ;;  %v2309_v11 = vmul.f32 %v8218_v55, %v5187_v42  ;;  %v2753_v31 = vmul.f32 %v8219_v44, %v5187_v42  ;;  %v8222_v43 = vld [vmem:[#allocation59_spill] sm:$0xff] }
 0x105   : > { %8213 = vst [vmem:[#allocation148_spill] sm:$0xff] %v5288_v19  ;;  %8214 = vst [vmem:[#allocation149_spill] sm:$0xff] %v5291_v5  ;;  %v2754_v8 = vmul.f32 %v8220_v34, %v5187_v42  ;;  %v2755_v50 = vmul.f32 %v8221_v13, %v5187_v42  ;;  %v2756_v5 = vmul.f32 %v8222_v43, %v5187_v42 }
 0x106   : > { %v5310_v19 = vadd.f32 %v5155_v61, %v2306_v54  ;;  %v5313_v52 = vadd.f32 %v5157_v60, %v2307_v26  ;;  %v5316_v51 = vadd.f32 %v5159_v59, %v2308_v20  ;;  %v5319_v1 = vadd.f32 %v5161_v33, %v2309_v11  ;;  %v520_v54 = vpop.permute.xlu1 %519 }
 0x107   : > { %v5322_v3 = vadd.f32 %v5163_v28, %v2753_v31  ;;  %v5325_v63 = vadd.f32 %v5165_v46, %v2754_v8  ;;  %v5328_v22 = vadd.f32 %v5167_v15, %v2755_v50  ;;  %v5331_v61 = vadd.f32 %v5169_v48, %v2756_v5 }
 0x108   : > { %8223 = vst [vmem:[#allocation150_spill] sm:$0xff] %v5310_v19  ;;  %8224 = vst [vmem:[#allocation151_spill] sm:$0xff] %v5313_v52  ;;  %v3200_v60 = vmul.f32 %v5009_v9, %v5187_v42  ;;  %v3201_v59 = vmul.f32 %v5011_v40, %v5187_v42  ;;  %v3202_v33 = vmul.f32 %v5013_v38, %v5187_v42  ;;  %v8252_v19 = vld [vmem:[#allocation85_spill] sm:$0xff] }
 0x109   : > { %8225 = vst [vmem:[#allocation152_spill] sm:$0xff] %v5316_v51  ;;  %8226 = vst [vmem:[#allocation153_spill] sm:$0xff] %v5319_v1  ;;  %v3203_v28 = vmul.f32 %v5015_v6, %v5187_v42  ;;  %v3647_v46 = vmul.f32 %v5017_v16, %v5187_v42  ;;  %v3648_v15 = vmul.f32 %v5019_v56, %v5187_v42  ;;  %v8251_v51 = vld [vmem:[#allocation84_spill] sm:$0xff] }
 0x10a   : > { %8227 = vst [vmem:[#allocation154_spill] sm:$0xff] %v5322_v3  ;;  %8228 = vst [vmem:[#allocation155_spill] sm:$0xff] %v5325_v63  ;;  %v3649_v48 = vmul.f32 %v5021_v17, %v5187_v42  ;;  %v3650_v5 = vmul.f32 %v5023_v10, %v5187_v42  ;;  %v5350_v26 = vadd.f32 %v5190_v41, %v3200_v60  ;;  %v8239_v60 = vld [vmem:[#allocation69_spill] sm:$0xff]  ;;  %v8250_v3 = vld [vmem:[#allocation83_spill] sm:$0xff] }
 0x10b   : > { %8229 = vst [vmem:[#allocation156_spill] sm:$0xff] %v5328_v22  ;;  %8230 = vst [vmem:[#allocation157_spill] sm:$0xff] %v5331_v61  ;;  %v5353_v20 = vadd.f32 %v5193_v27, %v3201_v59  ;;  %v5356_v11 = vadd.f32 %v5196_v32, %v3202_v33  ;;  %v5359_v31 = vadd.f32 %v5199_v21, %v3203_v28  ;;  %v8240_v59 = vld [vmem:[#allocation70_spill] sm:$0xff]  ;;  %v8241_v21 = vld [vmem:[#allocation71_spill] sm:$0xff] }
 0x10c   : > { %8231 = vst [vmem:[#allocation158_spill] sm:$0xff] %v5350_v26  ;;  %v5362_v8 = vadd.f32 %v5202_v29, %v3647_v46  ;;  %v5365_v50 = vadd.f32 %v5205_v30, %v3648_v15  ;;  %v5368_v42 = vadd.f32 %v5208_v25, %v3649_v48  ;;  %v5371_v41 = vadd.f32 %v5211_v18, %v3650_v5  ;;  %v8243_v46 = vld [vmem:[#allocation73_spill] sm:$0xff]  ;;  %v8244_v30 = vld [vmem:[#allocation74_spill] sm:$0xff] }
 0x10d   : > { %8232 = vst [vmem:[#allocation159_spill] sm:$0xff] %v5353_v20  ;;  %8233 = vst [vmem:[#allocation160_spill] sm:$0xff] %v5356_v11  ;;  %v534_v27 = vmul.f32 %v520_v54, %v4707_v23  ;;  %v535_v32 = vmul.f32 %v520_v54, %v8239_v60  ;;  %v536_v33 = vmul.f32 %v520_v54, %v8240_v59  ;;  %v8245_v5 = vld [vmem:[#allocation78_spill] sm:$0xff]  ;;  %v8247_v11 = vld [vmem:[#allocation80_spill] sm:$0xff]  ;;  %v5397_v60 = vpop.permute.xlu0 %523 }
 0x10e   : > { %8234 = vst [vmem:[#allocation161_spill] sm:$0xff] %v5359_v31  ;;  %8235 = vst [vmem:[#allocation162_spill] sm:$0xff] %v5362_v8  ;;  %v537_v28 = vmul.f32 %v520_v54, %v8241_v21  ;;  %v8242_v31 = vld [vmem:[#allocation72_spill] sm:$0xff]  ;;  %v1014_v8 = vmul.f32 %v8243_v46, %v520_v54  ;;  %v1015_v15 = vmul.f32 %v8244_v30, %v520_v54  ;;  %v8248_v26 = vld [vmem:[#allocation81_spill] sm:$0xff] }
 0x10f   : > { %8236 = vst [vmem:[#allocation163_spill] sm:$0xff] %v5365_v50  ;;  %8237 = vst [vmem:[#allocation164_spill] sm:$0xff] %v5368_v42  ;;  %v1013_v29 = vmul.f32 %v8242_v31, %v520_v54  ;;  %v1016_v25 = vmul.f32 %v4721_v2, %v520_v54  ;;  %v1460_v48 = vmul.f32 %v4731_v35, %v520_v54  ;;  %v8246_v42 = vld [vmem:[#allocation79_spill] sm:$0xff]  ;;  %v8249_v22 = vld [vmem:[#allocation82_spill] sm:$0xff] }
 0x110   : > { %8238 = vst [vmem:[#allocation165_spill] sm:$0xff] %v5371_v41  ;;  %v1461_v18 = vmul.f32 %v4733_v36, %v520_v54  ;;  %v1462_v41 = vmul.f32 %v8245_v5, %v520_v54  ;;  %v1463_v50 = vmul.f32 %v8246_v42, %v520_v54  ;;  %v1907_v20 = vmul.f32 %v8247_v11, %v520_v54  ;;  %v8253_v30 = vld [vmem:[#allocation86_spill] sm:$0xff]  ;;  %v8254_v46 = vld [vmem:[#allocation87_spill] sm:$0xff]  ;;  %v8255_v31 = vld [vmem:[#allocation88_spill] sm:$0xff] }
 0x111   : > { %v1908_v61 = vmul.f32 %v8248_v26, %v520_v54  ;;  %v1909_v63 = vmul.f32 %v8249_v22, %v520_v54  ;;  %v1910_v1 = vmul.f32 %v8250_v3, %v520_v54  ;;  %v2354_v52 = vmul.f32 %v8251_v51, %v520_v54  ;;  %v8256_v21 = vld [vmem:[#allocation89_spill] sm:$0xff]  ;;  %v8257_v59 = vld [vmem:[#allocation90_spill] sm:$0xff] }
 0x112   : > { %v2355_v2 = vmul.f32 %v8252_v19, %v520_v54  ;;  %v2356_v35 = vmul.f32 %v8253_v30, %v520_v54  ;;  %v2357_v36 = vmul.f32 %v8254_v46, %v520_v54  ;;  %v2801_v5 = vmul.f32 %v8255_v31, %v520_v54  ;;  %v8258_v19 = vld [vmem:[#allocation94_spill] sm:$0xff]  ;;  %v8259_v46 = vld [vmem:[#allocation95_spill] sm:$0xff]  ;;  %v8260_v31 = vld [vmem:[#allocation96_spill] sm:$0xff] }
 0x113   : > { %v2802_v42 = vmul.f32 %v8256_v21, %v520_v54  ;;  %v2803_v11 = vmul.f32 %v8257_v59, %v520_v54  ;;  %v2804_v26 = vmul.f32 %v8174_v12, %v520_v54  ;;  %v5400_v3 = vmul.f32 %v8175_v39, %v520_v54  ;;  %v8261_v59 = vld [vmem:[#allocation97_spill] sm:$0xff]  ;;  %v8262_v12 = vld [vmem:[#allocation98_spill] sm:$0xff] }
 0x114   : > { %v5403_v51 = vmul.f32 %v8176_v57, %v520_v54  ;;  %v5406_v30 = vmul.f32 %v8258_v19, %v520_v54  ;;  %v5409_v22 = vmul.f32 %v8259_v46, %v520_v54  ;;  %v5412_v21 = vmul.f32 %v8260_v31, %v520_v54  ;;  %v8263_v57 = vld [vmem:[#allocation100_spill] sm:$0xff]  ;;  %v8264_v19 = vld [vmem:[#allocation101_spill] sm:$0xff]  ;;  %v8265_v46 = vld [vmem:[#allocation102_spill] sm:$0xff] }
 0x115   : > { %v5415_v23 = vmul.f32 %v8261_v59, %v520_v54  ;;  %v5418_v10 = vmul.f32 %v8262_v12, %v520_v54  ;;  %v5421_v39 = vmul.f32 %v8182_v47, %v520_v54  ;;  %v538_v17 = vmul.f32 %v5397_v60, %v8263_v57  ;;  %v8266_v31 = vld [vmem:[#allocation103_spill] sm:$0xff]  ;;  %v8267_v59 = vld [vmem:[#allocation104_spill] sm:$0xff]  ;;  %v8268_v12 = vld [vmem:[#allocation105_spill] sm:$0xff] }
 0x116   : > { %v539_v56 = vmul.f32 %v5397_v60, %v8264_v19  ;;  %v540_v16 = vmul.f32 %v5397_v60, %v8265_v46  ;;  %v541_v6 = vmul.f32 %v5397_v60, %v8266_v31  ;;  %v1017_v38 = vmul.f32 %v8267_v59, %v5397_v60  ;;  %v8269_v54 = vld [vmem:[#allocation106_spill] sm:$0xff]  ;;  %v8270_v57 = vld [vmem:[#allocation107_spill] sm:$0xff] }
 0x117   : > { %v1018_v40 = vmul.f32 %v8268_v12, %v5397_v60  ;;  %v1019_v47 = vmul.f32 %v8269_v54, %v5397_v60  ;;  %v1020_v9 = vmul.f32 %v8270_v57, %v5397_v60  ;;  %v5439_v43 = vadd.f32 %v538_v17, %v534_v27  ;;  %v8271_v54 = vld [vmem:[#allocation108_spill] sm:$0xff]  ;;  %v8272_v17 = vld [vmem:[#allocation109_spill] sm:$0xff] }
 0x118   : > { %v5441_v19 = vadd.f32 %v539_v56, %v535_v32  ;;  %v5443_v46 = vadd.f32 %v540_v16, %v536_v33  ;;  %v5445_v13 = vadd.f32 %v541_v6, %v537_v28  ;;  %v5447_v31 = vadd.f32 %v1017_v38, %v1013_v29  ;;  %v8273_v56 = vld [vmem:[#allocation110_spill] sm:$0xff]  ;;  %v8274_v6 = vld [vmem:[#allocation111_spill] sm:$0xff]  ;;  %v8275_v38 = vld [vmem:[#allocation112_spill] sm:$0xff] }
 0x119   : > { %v5449_v59 = vadd.f32 %v1018_v40, %v1014_v8  ;;  %v5451_v34 = vadd.f32 %v1019_v47, %v1015_v15  ;;  %v5453_v12 = vadd.f32 %v1020_v9, %v1016_v25  ;;  %v1464_v44 = vmul.f32 %v8271_v54, %v5397_v60  ;;  %v8276_v47 = vld [vmem:[#allocation113_spill] sm:$0xff]  ;;  %v8277_v9 = vld [vmem:[#allocation114_spill] sm:$0xff]  ;;  %v8278_v28 = vld [vmem:[#allocation115_spill] sm:$0xff] }
 0x11a   : > { %v1465_v27 = vmul.f32 %v8272_v17, %v5397_v60  ;;  %v1466_v16 = vmul.f32 %v8273_v56, %v5397_v60  ;;  %v1467_v32 = vmul.f32 %v8274_v6, %v5397_v60  ;;  %v1911_v40 = vmul.f32 %v8275_v38, %v5397_v60 }
 0x11b   : > { %v1912_v8 = vmul.f32 %v8276_v47, %v5397_v60  ;;  %v1913_v33 = vmul.f32 %v8277_v9, %v5397_v60  ;;  %v1914_v29 = vmul.f32 %v8278_v28, %v5397_v60  ;;  %v5471_v15 = vadd.f32 %v1464_v44, %v1460_v48  ;;  %v5487_v9 = vpop.permute.xlu1 %454  ;;  %v8280_v28 = vld [vmem:[#allocation116_spill] sm:$0xff]  ;;  %v8281_v48 = vld [vmem:[#allocation117_spill] sm:$0xff] }
 0x11c   : > { %v5473_v25 = vadd.f32 %v1465_v27, %v1461_v18  ;;  %v5475_v56 = vadd.f32 %v1466_v16, %v1462_v41  ;;  %v5477_v17 = vadd.f32 %v1467_v32, %v1463_v50  ;;  %v5479_v6 = vadd.f32 %v1911_v40, %v1907_v20  ;;  %8279 = vst [vmem:[#allocation166_spill] sm:$0xff] %v5487_v9  ;;  %v8282_v41 = vld [vmem:[#allocation118_spill] sm:$0xff]  ;;  %v8283_v20 = vld [vmem:[#allocation119_spill] sm:$0xff] }
 0x11d   : > { %v5481_v38 = vadd.f32 %v1912_v8, %v1908_v61  ;;  %v5483_v54 = vadd.f32 %v1913_v33, %v1909_v63  ;;  %v5485_v47 = vadd.f32 %v1914_v29, %v1910_v1  ;;  %v2358_v44 = vmul.f32 %v8280_v28, %v5397_v60  ;;  %v8284_v61 = vld [vmem:[#allocation120_spill] sm:$0xff]  ;;  %v8285_v1 = vld [vmem:[#allocation121_spill] sm:$0xff]  ;;  %v8286_v32 = vld [vmem:[#allocation122_spill] sm:$0xff] }
 0x11e   : > { %v2359_v18 = vmul.f32 %v8281_v48, %v5397_v60  ;;  %v2360_v50 = vmul.f32 %v8282_v41, %v5397_v60  ;;  %v2361_v27 = vmul.f32 %v8283_v20, %v5397_v60  ;;  %v2805_v63 = vmul.f32 %v8284_v61, %v5397_v60  ;;  %v8287_v8 = vld [vmem:[#allocation123_spill] sm:$0xff] }
 0x11f   : > { %v2806_v16 = vmul.f32 %v8285_v1, %v5397_v60  ;;  %v2807_v40 = vmul.f32 %v8286_v32, %v5397_v60  ;;  %v2808_v33 = vmul.f32 %v8287_v8, %v5397_v60  ;;  %v5505_v29 = vadd.f32 %v2358_v44, %v2354_v52  ;;  %v8288_v32 = vld [vmem:[#allocation124_spill] sm:$0xff]  ;;  %v8289_v52 = vld [vmem:[#allocation125_spill] sm:$0xff] }
 0x120   : > { %v5507_v9 = vadd.f32 %v2359_v18, %v2355_v2  ;;  %v5509_v41 = vadd.f32 %v2360_v50, %v2356_v35  ;;  %v5511_v48 = vadd.f32 %v2361_v27, %v2357_v36  ;;  %v5513_v20 = vadd.f32 %v2805_v63, %v2801_v5  ;;  %v8290_v2 = vld [vmem:[#allocation126_spill] sm:$0xff]  ;;  %v8291_v36 = vld [vmem:[#allocation127_spill] sm:$0xff]  ;;  %v8292_v5 = vld [vmem:[#allocation128_spill] sm:$0xff] }
 0x121   : > { %v5515_v61 = vadd.f32 %v2806_v16, %v2802_v42  ;;  %v5517_v28 = vadd.f32 %v2807_v40, %v2803_v11  ;;  %v5519_v1 = vadd.f32 %v2808_v33, %v2804_v26  ;;  %v3252_v57 = vmul.f32 %v8288_v32, %v5397_v60  ;;  %v8293_v11 = vld [vmem:[#allocation129_spill] sm:$0xff]  ;;  %v8294_v26 = vld [vmem:[#allocation130_spill] sm:$0xff]  ;;  %v8295_v63 = vld [vmem:[#allocation131_spill] sm:$0xff]  ;;  %v5537_v40 = vpop.permute.xlu1 %527 }
 0x122   : > { %v3253_v44 = vmul.f32 %v8289_v52, %v5397_v60  ;;  %v3254_v35 = vmul.f32 %v8290_v2, %v5397_v60  ;;  %v3255_v18 = vmul.f32 %v8291_v36, %v5397_v60  ;;  %v3699_v42 = vmul.f32 %v8292_v5, %v5397_v60 }
 0x123   : > { %v3700_v50 = vmul.f32 %v8293_v11, %v5397_v60  ;;  %v3701_v27 = vmul.f32 %v8294_v26, %v5397_v60  ;;  %v3702_v16 = vmul.f32 %v8295_v63, %v5397_v60  ;;  %v5540_v33 = vadd.f32 %v3252_v57, %v5400_v3 }
 0x124   : > { %v5543_v2 = vadd.f32 %v3253_v44, %v5403_v51  ;;  %v5546_v36 = vadd.f32 %v3254_v35, %v5406_v30  ;;  %v5549_v5 = vadd.f32 %v3255_v18, %v5409_v22  ;;  %v5552_v11 = vadd.f32 %v3699_v42, %v5412_v21  ;;  %v8296_v51 = vld [vmem:[#allocation37_spill] sm:$0xff]  ;;  %v8297_v30 = vld [vmem:[#allocation38_spill] sm:$0xff]  ;;  %v8298_v22 = vld [vmem:[#allocation39_spill] sm:$0xff] }
 0x125   : > { %v5555_v26 = vadd.f32 %v3700_v50, %v5415_v23  ;;  %v5558_v60 = vadd.f32 %v3701_v27, %v5418_v10  ;;  %v5561_v57 = vadd.f32 %v3702_v16, %v5421_v39  ;;  %v542_v3 = vmul.f32 %v5537_v40, %v8296_v51  ;;  %v8299_v21 = vld [vmem:[#allocation40_spill] sm:$0xff]  ;;  %v8300_v23 = vld [vmem:[#allocation41_spill] sm:$0xff]  ;;  %v8301_v10 = vld [vmem:[#allocation42_spill] sm:$0xff] }
 0x126   : > { %v543_v44 = vmul.f32 %v5537_v40, %v8297_v30  ;;  %v544_v35 = vmul.f32 %v5537_v40, %v8298_v22  ;;  %v545_v18 = vmul.f32 %v5537_v40, %v8299_v21  ;;  %v1021_v42 = vmul.f32 %v8300_v23, %v5537_v40  ;;  %v8302_v39 = vld [vmem:[#allocation43_spill] sm:$0xff]  ;;  %v8303_v16 = vld [vmem:[#allocation132_spill] sm:$0xff] }
 0x127   : > { %v1022_v50 = vmul.f32 %v8301_v10, %v5537_v40  ;;  %v1023_v27 = vmul.f32 %v8302_v39, %v5537_v40  ;;  %v1024_v51 = vmul.f32 %v8303_v16, %v5537_v40  ;;  %v5580_v30 = vadd.f32 %v5439_v43, %v542_v3 }
 0x128   : > { %v5583_v22 = vadd.f32 %v5441_v19, %v543_v44  ;;  %v5586_v21 = vadd.f32 %v5443_v46, %v544_v35  ;;  %v5589_v23 = vadd.f32 %v5445_v13, %v545_v18  ;;  %v5592_v10 = vadd.f32 %v5447_v31, %v1021_v42  ;;  %v5631_v42 = vpop.permute.xlu0 %531 }
 0x129   : > { %8304 = vst [vmem:[#allocation167_spill] sm:$0xff] %v5580_v30  ;;  %v5595_v39 = vadd.f32 %v5449_v59, %v1022_v50  ;;  %v5598_v16 = vadd.f32 %v5451_v34, %v1023_v27  ;;  %v5601_v43 = vadd.f32 %v5453_v12, %v1024_v51  ;;  %v1468_v19 = vmul.f32 %v8199_v45, %v5537_v40  ;;  %v5749_v30 = vpop.permute.xlu1 %615 }
 0x12a   : > { %8305 = vst [vmem:[#allocation168_spill] sm:$0xff] %v5583_v22  ;;  %8306 = vst [vmem:[#allocation169_spill] sm:$0xff] %v5586_v21  ;;  %v1469_v46 = vmul.f32 %v8200_v53, %v5537_v40  ;;  %v1470_v13 = vmul.f32 %v8201_v4, %v5537_v40  ;;  %v1471_v31 = vmul.f32 %v8202_v14, %v5537_v40  ;;  %v8370_v21 = vld [vmem:[#allocation121_spill] sm:$0xff]  ;;  %v8371_v22 = vld [vmem:[#allocation122_spill] sm:$0xff] }
 0x12b   : > { %8307 = vst [vmem:[#allocation170_spill] sm:$0xff] %v5589_v23  ;;  %8308 = vst [vmem:[#allocation171_spill] sm:$0xff] %v5592_v10  ;;  %v1915_v59 = vmul.f32 %v8203_v24, %v5537_v40  ;;  %v1916_v34 = vmul.f32 %v8204_v37, %v5537_v40  ;;  %v1917_v12 = vmul.f32 %v8205_v62, %v5537_v40  ;;  %v8368_v10 = vld [vmem:[#allocation119_spill] sm:$0xff]  ;;  %v8369_v23 = vld [vmem:[#allocation120_spill] sm:$0xff] }
 0x12c   : > { %8309 = vst [vmem:[#allocation172_spill] sm:$0xff] %v5595_v39  ;;  %8310 = vst [vmem:[#allocation173_spill] sm:$0xff] %v5598_v16  ;;  %v1918_v51 = vmul.f32 %v8206_v0, %v5537_v40  ;;  %v5620_v3 = vadd.f32 %v5471_v15, %v1468_v19  ;;  %v5623_v44 = vadd.f32 %v5473_v25, %v1469_v46  ;;  %v8366_v16 = vld [vmem:[#allocation117_spill] sm:$0xff]  ;;  %v8367_v39 = vld [vmem:[#allocation118_spill] sm:$0xff] }
 0x12d   : > { %8311 = vst [vmem:[#allocation174_spill] sm:$0xff] %v5601_v43  ;;  %v5626_v35 = vadd.f32 %v5475_v56, %v1470_v13  ;;  %v5629_v18 = vadd.f32 %v5477_v17, %v1471_v31  ;;  %8316 = vst [vmem:[#allocation179_spill] sm:$0xff] %v5631_v42  ;;  %v5634_v50 = vadd.f32 %v5479_v6, %v1915_v59  ;;  %v8324_v59 = vld [vmem:[#allocation59_spill] sm:$0xff]  ;;  %v8365_v43 = vld [vmem:[#allocation116_spill] sm:$0xff] }
 0x12e   : > { %8312 = vst [vmem:[#allocation175_spill] sm:$0xff] %v5620_v3  ;;  %8313 = vst [vmem:[#allocation176_spill] sm:$0xff] %v5623_v44  ;;  %v5637_v27 = vadd.f32 %v5481_v38, %v1916_v34  ;;  %v5640_v15 = vadd.f32 %v5483_v54, %v1917_v12  ;;  %v5643_v25 = vadd.f32 %v5485_v47, %v1918_v51  ;;  %v8321_v38 = vld [vmem:[#allocation56_spill] sm:$0xff]  ;;  %v8322_v54 = vld [vmem:[#allocation57_spill] sm:$0xff] }
 0x12f   : > { %8314 = vst [vmem:[#allocation177_spill] sm:$0xff] %v5626_v35  ;;  %8315 = vst [vmem:[#allocation178_spill] sm:$0xff] %v5629_v18  ;;  %v2362_v56 = vmul.f32 %v8215_v49, %v5537_v40  ;;  %v2363_v17 = vmul.f32 %v8216_v58, %v5537_v40  ;;  %v2364_v19 = vmul.f32 %v8217_v7, %v5537_v40  ;;  %v8323_v47 = vld [vmem:[#allocation58_spill] sm:$0xff]  ;;  %v8362_v35 = vld [vmem:[#allocation113_spill] sm:$0xff] }
 0x130   : > { %8317 = vst [vmem:[#allocation180_spill] sm:$0xff] %v5634_v50  ;;  %8318 = vst [vmem:[#allocation181_spill] sm:$0xff] %v5637_v27  ;;  %v2365_v6 = vmul.f32 %v8218_v55, %v5537_v40  ;;  %v2809_v46 = vmul.f32 %v8321_v38, %v5537_v40  ;;  %v2810_v13 = vmul.f32 %v8322_v54, %v5537_v40  ;;  %v8363_v44 = vld [vmem:[#allocation114_spill] sm:$0xff]  ;;  %v8364_v3 = vld [vmem:[#allocation115_spill] sm:$0xff] }
 0x131   : > { %8319 = vst [vmem:[#allocation182_spill] sm:$0xff] %v5640_v15  ;;  %8320 = vst [vmem:[#allocation183_spill] sm:$0xff] %v5643_v25  ;;  %v2811_v31 = vmul.f32 %v8323_v47, %v5537_v40  ;;  %v2812_v34 = vmul.f32 %v8324_v59, %v5537_v40  ;;  %v5662_v12 = vadd.f32 %v5505_v29, %v2362_v56  ;;  %v8388_v62 = vld [vmem:[#allocation76_spill] sm:$0xff] }
 0x132   : > { %v5665_v51 = vadd.f32 %v5507_v9, %v2363_v17  ;;  %v5668_v25 = vadd.f32 %v5509_v41, %v2364_v19  ;;  %v5671_v15 = vadd.f32 %v5511_v48, %v2365_v6  ;;  %v5674_v27 = vadd.f32 %v5513_v20, %v2809_v46  ;;  %v8333_v9 = vld [vmem:[#allocation60_spill] sm:$0xff]  ;;  %v8334_v41 = vld [vmem:[#allocation61_spill] sm:$0xff]  ;;  %v8335_v48 = vld [vmem:[#allocation62_spill] sm:$0xff] }
 0x133   : > { %8325 = vst [vmem:[#allocation184_spill] sm:$0xff] %v5662_v12  ;;  %v5677_v50 = vadd.f32 %v5515_v61, %v2810_v13  ;;  %v5680_v18 = vadd.f32 %v5517_v28, %v2811_v31  ;;  %v5683_v29 = vadd.f32 %v5519_v1, %v2812_v34  ;;  %v3256_v56 = vmul.f32 %v8333_v9, %v5537_v40  ;;  %v8336_v20 = vld [vmem:[#allocation63_spill] sm:$0xff]  ;;  %v8337_v61 = vld [vmem:[#allocation64_spill] sm:$0xff]  ;;  %v8338_v28 = vld [vmem:[#allocation65_spill] sm:$0xff] }
 0x134   : > { %8326 = vst [vmem:[#allocation185_spill] sm:$0xff] %v5665_v51  ;;  %8327 = vst [vmem:[#allocation186_spill] sm:$0xff] %v5668_v25  ;;  %v3257_v17 = vmul.f32 %v8334_v41, %v5537_v40  ;;  %v3258_v19 = vmul.f32 %v8335_v48, %v5537_v40  ;;  %v3259_v6 = vmul.f32 %v8336_v20, %v5537_v40  ;;  %v8339_v1 = vld [vmem:[#allocation66_spill] sm:$0xff]  ;;  %v8340_v34 = vld [vmem:[#allocation67_spill] sm:$0xff] }
 0x135   : > { %8328 = vst [vmem:[#allocation187_spill] sm:$0xff] %v5671_v15  ;;  %8329 = vst [vmem:[#allocation188_spill] sm:$0xff] %v5674_v27  ;;  %v3703_v46 = vmul.f32 %v8337_v61, %v5537_v40  ;;  %v3704_v13 = vmul.f32 %v8338_v28, %v5537_v40  ;;  %v3705_v31 = vmul.f32 %v8339_v1, %v5537_v40  ;;  %v8384_v9 = vld [vmem:[#allocation75_spill] sm:$0xff] }
 0x136   : > { %8330 = vst [vmem:[#allocation189_spill] sm:$0xff] %v5677_v50  ;;  %8331 = vst [vmem:[#allocation190_spill] sm:$0xff] %v5680_v18  ;;  %v620_v18 = vpop.permute.xlu0 %619  ;;  %v5702_v50 = vadd.f32 %v5540_v33, %v3256_v56  ;;  %v5705_v27 = vadd.f32 %v5543_v2, %v3257_v17  ;;  %v5708_v15 = vadd.f32 %v5546_v36, %v3258_v19  ;;  %v8349_v2 = vld [vmem:[#allocation100_spill] sm:$0xff]  ;;  %v8350_v17 = vld [vmem:[#allocation101_spill] sm:$0xff] }
 0x137   : > { %8332 = vst [vmem:[#allocation191_spill] sm:$0xff] %v5683_v29  ;;  %v3706_v29 = vmul.f32 %v8340_v34, %v5537_v40  ;;  %v5711_v25 = vadd.f32 %v5549_v5, %v3259_v6  ;;  %v5714_v51 = vadd.f32 %v5552_v11, %v3703_v46  ;;  %v5717_v12 = vadd.f32 %v5555_v26, %v3704_v13  ;;  %v8351_v19 = vld [vmem:[#allocation102_spill] sm:$0xff]  ;;  %v8352_v5 = vld [vmem:[#allocation103_spill] sm:$0xff]  ;;  %v8354_v46 = vld [vmem:[#allocation105_spill] sm:$0xff] }
 0x138   : > { %8341 = vst [vmem:[#allocation192_spill] sm:$0xff] %v5702_v50  ;;  %8342 = vst [vmem:[#allocation193_spill] sm:$0xff] %v5705_v27  ;;  %v5720_v40 = vadd.f32 %v5558_v60, %v3705_v31  ;;  %v634_v56 = vmul.f32 %v620_v18, %v8349_v2  ;;  %v635_v36 = vmul.f32 %v620_v18, %v8350_v17  ;;  %v8355_v26 = vld [vmem:[#allocation106_spill] sm:$0xff]  ;;  %v8357_v31 = vld [vmem:[#allocation108_spill] sm:$0xff] }
 0x139   : > { %8343 = vst [vmem:[#allocation194_spill] sm:$0xff] %v5708_v15  ;;  %8344 = vst [vmem:[#allocation195_spill] sm:$0xff] %v5711_v25  ;;  %v5723_v33 = vadd.f32 %v5561_v57, %v3706_v29  ;;  %v636_v15 = vmul.f32 %v620_v18, %v8351_v19  ;;  %v637_v6 = vmul.f32 %v620_v18, %v8352_v5  ;;  %v8353_v25 = vld [vmem:[#allocation104_spill] sm:$0xff]  ;;  %v8358_v57 = vld [vmem:[#allocation109_spill] sm:$0xff] }
 0x13a   : > { %8345 = vst [vmem:[#allocation196_spill] sm:$0xff] %v5714_v51  ;;  %8346 = vst [vmem:[#allocation197_spill] sm:$0xff] %v5717_v12  ;;  %v1097_v11 = vmul.f32 %v8353_v25, %v620_v18  ;;  %v1098_v51 = vmul.f32 %v8354_v46, %v620_v18  ;;  %v1099_v13 = vmul.f32 %v8355_v26, %v620_v18  ;;  %v8356_v12 = vld [vmem:[#allocation107_spill] sm:$0xff]  ;;  %v8361_v50 = vld [vmem:[#allocation112_spill] sm:$0xff] }
 0x13b   : > { %8347 = vst [vmem:[#allocation198_spill] sm:$0xff] %v5720_v40  ;;  %8348 = vst [vmem:[#allocation199_spill] sm:$0xff] %v5723_v33  ;;  %v1100_v60 = vmul.f32 %v8356_v12, %v620_v18  ;;  %v1544_v40 = vmul.f32 %v8357_v31, %v620_v18  ;;  %v1545_v29 = vmul.f32 %v8358_v57, %v620_v18  ;;  %v8359_v33 = vld [vmem:[#allocation110_spill] sm:$0xff]  ;;  %v8360_v27 = vld [vmem:[#allocation111_spill] sm:$0xff] }
 0x13c   : > { %v1546_v2 = vmul.f32 %v8359_v33, %v620_v18  ;;  %v1547_v17 = vmul.f32 %v8360_v27, %v620_v18  ;;  %v1991_v19 = vmul.f32 %v8361_v50, %v620_v18  ;;  %v1992_v5 = vmul.f32 %v8362_v35, %v620_v18 }
 0x13d   : > { %v1993_v25 = vmul.f32 %v8363_v44, %v620_v18  ;;  %v1994_v46 = vmul.f32 %v8364_v3, %v620_v18  ;;  %v2438_v26 = vmul.f32 %v8365_v43, %v620_v18  ;;  %v2439_v12 = vmul.f32 %v8366_v16, %v620_v18  ;;  %v8372_v16 = vld [vmem:[#allocation126_spill] sm:$0xff] }
 0x13e   : > { %v2440_v31 = vmul.f32 %v8367_v39, %v620_v18  ;;  %v2441_v57 = vmul.f32 %v8368_v10, %v620_v18  ;;  %v2885_v33 = vmul.f32 %v8369_v23, %v620_v18  ;;  %v2886_v27 = vmul.f32 %v8370_v21, %v620_v18  ;;  %v8373_v10 = vld [vmem:[#allocation127_spill] sm:$0xff]  ;;  %v8374_v23 = vld [vmem:[#allocation128_spill] sm:$0xff] }
 0x13f   : > { %v2887_v50 = vmul.f32 %v8371_v22, %v620_v18  ;;  %v2888_v35 = vmul.f32 %v8287_v8, %v620_v18  ;;  %v5752_v3 = vmul.f32 %v8288_v32, %v620_v18  ;;  %v5755_v43 = vmul.f32 %v8289_v52, %v620_v18  ;;  %v8375_v22 = vld [vmem:[#allocation129_spill] sm:$0xff]  ;;  %v8376_v8 = vld [vmem:[#allocation130_spill] sm:$0xff]  ;;  %v8377_v52 = vld [vmem:[#allocation68_spill] sm:$0xff] }
 0x140   : > { %v5758_v39 = vmul.f32 %v8372_v16, %v620_v18  ;;  %v5761_v44 = vmul.f32 %v8373_v10, %v620_v18  ;;  %v5764_v21 = vmul.f32 %v8374_v23, %v620_v18  ;;  %v5767_v42 = vmul.f32 %v8375_v22, %v620_v18  ;;  %v8378_v16 = vld [vmem:[#allocation69_spill] sm:$0xff]  ;;  %v8379_v10 = vld [vmem:[#allocation70_spill] sm:$0xff]  ;;  %v8380_v23 = vld [vmem:[#allocation71_spill] sm:$0xff] }
 0x141   : > { %v5770_v34 = vmul.f32 %v8376_v8, %v620_v18  ;;  %v5773_v32 = vmul.f32 %v8295_v63, %v620_v18  ;;  %v630_v1 = vmul.f32 %v5749_v30, %v8377_v52  ;;  %v631_v28 = vmul.f32 %v5749_v30, %v8378_v16  ;;  %v8381_v22 = vld [vmem:[#allocation72_spill] sm:$0xff]  ;;  %v8382_v8 = vld [vmem:[#allocation73_spill] sm:$0xff]  ;;  %v8383_v18 = vld [vmem:[#allocation74_spill] sm:$0xff] }
 0x142   : > { %v632_v61 = vmul.f32 %v5749_v30, %v8379_v10  ;;  %v633_v20 = vmul.f32 %v5749_v30, %v8380_v23  ;;  %v1093_v48 = vmul.f32 %v8381_v22, %v5749_v30  ;;  %v1094_v41 = vmul.f32 %v8382_v8, %v5749_v30 }
 0x143   : > { %v1095_v63 = vmul.f32 %v8383_v18, %v5749_v30  ;;  %v1096_v59 = vmul.f32 %v8384_v9, %v5749_v30  ;;  %v5791_v47 = vadd.f32 %v634_v56, %v630_v1  ;;  %v5793_v54 = vadd.f32 %v635_v36, %v631_v28  ;;  %v8389_v1 = vld [vmem:[#allocation77_spill] sm:$0xff]  ;;  %v8390_v28 = vld [vmem:[#allocation78_spill] sm:$0xff] }
 0x144   : > { %v5795_v38 = vadd.f32 %v636_v15, %v632_v61  ;;  %v5797_v55 = vadd.f32 %v637_v6, %v633_v20  ;;  %v5799_v7 = vadd.f32 %v1097_v11, %v1093_v48  ;;  %v5801_v58 = vadd.f32 %v1098_v51, %v1094_v41  ;;  %v8391_v20 = vld [vmem:[#allocation79_spill] sm:$0xff]  ;;  %v8392_v48 = vld [vmem:[#allocation80_spill] sm:$0xff] }
 0x145   : > { %v5803_v49 = vadd.f32 %v1099_v13, %v1095_v63  ;;  %v5805_v0 = vadd.f32 %v1100_v60, %v1096_v59  ;;  %v1540_v37 = vmul.f32 %v8388_v62, %v5749_v30  ;;  %v1541_v56 = vmul.f32 %v8389_v1, %v5749_v30  ;;  %v8393_v63 = vld [vmem:[#allocation81_spill] sm:$0xff]  ;;  %v8394_v59 = vld [vmem:[#allocation82_spill] sm:$0xff]  ;;  %v8395_v6 = vld [vmem:[#allocation83_spill] sm:$0xff] }
 0x146   : > { %8385 = vst [vmem:[#allocation68_spill] sm:$0xff] %v5801_v58  ;;  %v1542_v15 = vmul.f32 %v8390_v28, %v5749_v30  ;;  %v1543_v61 = vmul.f32 %v8391_v20, %v5749_v30  ;;  %v1987_v51 = vmul.f32 %v8392_v48, %v5749_v30  ;;  %v1988_v41 = vmul.f32 %v8393_v63, %v5749_v30 }
 0x147   : > { %8386 = vst [vmem:[#allocation69_spill] sm:$0xff] %v5803_v49  ;;  %8387 = vst [vmem:[#allocation70_spill] sm:$0xff] %v5805_v0  ;;  %v1989_v36 = vmul.f32 %v8394_v59, %v5749_v30  ;;  %v1990_v11 = vmul.f32 %v8395_v6, %v5749_v30  ;;  %v5823_v13 = vadd.f32 %v1544_v40, %v1540_v37  ;;  %v8404_v49 = vld [vmem:[#allocation84_spill] sm:$0xff]  ;;  %v8405_v37 = vld [vmem:[#allocation85_spill] sm:$0xff] }
 0x148   : > { %v5825_v60 = vadd.f32 %v1545_v29, %v1541_v56  ;;  %v5827_v24 = vadd.f32 %v1546_v2, %v1542_v15  ;;  %v5829_v14 = vadd.f32 %v1547_v17, %v1543_v61  ;;  %v5831_v4 = vadd.f32 %v1991_v19, %v1987_v51  ;;  %v8406_v29 = vld [vmem:[#allocation86_spill] sm:$0xff]  ;;  %v8407_v17 = vld [vmem:[#allocation87_spill] sm:$0xff]  ;;  %v8408_v19 = vld [vmem:[#allocation88_spill] sm:$0xff] }
 0x149   : > { %8396 = vst [vmem:[#allocation71_spill] sm:$0xff] %v5823_v13  ;;  %v5833_v53 = vadd.f32 %v1992_v5, %v1988_v41  ;;  %v5835_v45 = vadd.f32 %v1993_v25, %v1989_v36  ;;  %v5837_v0 = vadd.f32 %v1994_v46, %v1990_v11  ;;  %v2434_v58 = vmul.f32 %v8404_v49, %v5749_v30  ;;  %v8409_v25 = vld [vmem:[#allocation89_spill] sm:$0xff]  ;;  %v8410_v46 = vld [vmem:[#allocation90_spill] sm:$0xff]  ;;  %v8411_v51 = vld [vmem:[#allocation91_spill] sm:$0xff] }
 0x14a   : > { %8397 = vst [vmem:[#allocation72_spill] sm:$0xff] %v5825_v60  ;;  %8398 = vst [vmem:[#allocation73_spill] sm:$0xff] %v5827_v24  ;;  %v2435_v40 = vmul.f32 %v8405_v37, %v5749_v30  ;;  %v2436_v2 = vmul.f32 %v8406_v29, %v5749_v30  ;;  %v2437_v56 = vmul.f32 %v8407_v17, %v5749_v30  ;;  %v8417_v60 = vld [vmem:[#allocation92_spill] sm:$0xff] }
 0x14b   : > { %8399 = vst [vmem:[#allocation74_spill] sm:$0xff] %v5829_v14  ;;  %8400 = vst [vmem:[#allocation75_spill] sm:$0xff] %v5831_v4  ;;  %v2881_v5 = vmul.f32 %v8408_v19, %v5749_v30  ;;  %v2882_v15 = vmul.f32 %v8409_v25, %v5749_v30  ;;  %v2883_v61 = vmul.f32 %v8410_v46, %v5749_v30 }
 0x14c   : > { %8401 = vst [vmem:[#allocation76_spill] sm:$0xff] %v5833_v53  ;;  %8402 = vst [vmem:[#allocation77_spill] sm:$0xff] %v5835_v45  ;;  %v2884_v41 = vmul.f32 %v8411_v51, %v5749_v30  ;;  %v5855_v36 = vadd.f32 %v2438_v26, %v2434_v58  ;;  %v5857_v11 = vadd.f32 %v2439_v12, %v2435_v40  ;;  %v8418_v58 = vld [vmem:[#allocation93_spill] sm:$0xff]  ;;  %v8419_v12 = vld [vmem:[#allocation94_spill] sm:$0xff] }
 0x14d   : > { %8403 = vst [vmem:[#allocation78_spill] sm:$0xff] %v5837_v0  ;;  %v5859_v0 = vadd.f32 %v2440_v31, %v2436_v2  ;;  %v5861_v45 = vadd.f32 %v2441_v57, %v2437_v56  ;;  %v5863_v53 = vadd.f32 %v2885_v33, %v2881_v5  ;;  %v5865_v4 = vadd.f32 %v2886_v27, %v2882_v15  ;;  %v8420_v57 = vld [vmem:[#allocation95_spill] sm:$0xff]  ;;  %v8421_v33 = vld [vmem:[#allocation96_spill] sm:$0xff] }
 0x14e   : > { %v5867_v14 = vadd.f32 %v2887_v50, %v2883_v61  ;;  %v5869_v24 = vadd.f32 %v2888_v35, %v2884_v41  ;;  %v3328_v13 = vmul.f32 %v8417_v60, %v5749_v30  ;;  %v3329_v26 = vmul.f32 %v8418_v58, %v5749_v30  ;;  %v8422_v50 = vld [vmem:[#allocation97_spill] sm:$0xff]  ;;  %v8423_v35 = vld [vmem:[#allocation98_spill] sm:$0xff]  ;;  %v8424_v5 = vld [vmem:[#allocation99_spill] sm:$0xff]  ;;  %v716_v61 = vpop.permute.xlu0 %715 }
 0x14f   : > { %8412 = vst [vmem:[#allocation79_spill] sm:$0xff] %v5861_v45  ;;  %8413 = vst [vmem:[#allocation80_spill] sm:$0xff] %v5863_v53  ;;  %v3330_v31 = vmul.f32 %v8419_v12, %v5749_v30  ;;  %v3331_v40 = vmul.f32 %v8420_v57, %v5749_v30  ;;  %v3775_v27 = vmul.f32 %v8421_v33, %v5749_v30 }
 0x150   : > { %8414 = vst [vmem:[#allocation81_spill] sm:$0xff] %v5865_v4  ;;  %8415 = vst [vmem:[#allocation82_spill] sm:$0xff] %v5867_v14  ;;  %v3776_v2 = vmul.f32 %v8422_v50, %v5749_v30  ;;  %v3777_v56 = vmul.f32 %v8423_v35, %v5749_v30  ;;  %v3778_v15 = vmul.f32 %v8424_v5, %v5749_v30 }
 0x151   : > { %8416 = vst [vmem:[#allocation83_spill] sm:$0xff] %v5869_v24  ;;  %v5888_v41 = vadd.f32 %v5752_v3, %v3328_v13  ;;  %v5891_v24 = vadd.f32 %v5755_v43, %v3329_v26  ;;  %v5894_v14 = vadd.f32 %v5758_v39, %v3330_v31  ;;  %v5897_v4 = vadd.f32 %v5761_v44, %v3331_v40  ;;  %v5983_v13 = vpop.permute.xlu1 %623 }
 0x152   : > { %v5900_v53 = vadd.f32 %v5764_v21, %v3775_v27  ;;  %v5903_v45 = vadd.f32 %v5767_v42, %v3776_v2  ;;  %v5906_v30 = vadd.f32 %v5770_v34, %v3777_v56  ;;  %v5909_v3 = vadd.f32 %v5773_v32, %v3778_v15 }
 0x153   : > { %v5912_v43 = vmul.f32 %v716_v61, %v8377_v52  ;;  %v5915_v39 = vmul.f32 %v716_v61, %v8378_v16  ;;  %v5918_v44 = vmul.f32 %v716_v61, %v8379_v10  ;;  %v5921_v21 = vmul.f32 %v716_v61, %v8380_v23 }
 0x154   : > { %v5924_v42 = vmul.f32 %v8381_v22, %v716_v61  ;;  %v5927_v34 = vmul.f32 %v8382_v8, %v716_v61  ;;  %v5930_v32 = vmul.f32 %v8383_v18, %v716_v61  ;;  %v5933_v52 = vmul.f32 %v8384_v9, %v716_v61 }
 0x155   : > { %8425 = vst [vmem:[#allocation84_spill] sm:$0xff] %v5912_v43  ;;  %8426 = vst [vmem:[#allocation85_spill] sm:$0xff] %v5915_v39  ;;  %v5936_v16 = vmul.f32 %v8388_v62, %v716_v61  ;;  %v5939_v10 = vmul.f32 %v8389_v1, %v716_v61  ;;  %v5942_v23 = vmul.f32 %v8390_v28, %v716_v61  ;;  %v8547_v39 = vld [vmem:[#allocation168_spill] sm:$0xff] }
 0x156   : > { %8427 = vst [vmem:[#allocation86_spill] sm:$0xff] %v5918_v44  ;;  %8428 = vst [vmem:[#allocation87_spill] sm:$0xff] %v5921_v21  ;;  %v5945_v22 = vmul.f32 %v8391_v20, %v716_v61  ;;  %v5948_v8 = vmul.f32 %v8392_v48, %v716_v61  ;;  %v5951_v18 = vmul.f32 %v8393_v63, %v716_v61  ;;  %v8546_v21 = vld [vmem:[#allocation167_spill] sm:$0xff] }
 0x157   : > { %8429 = vst [vmem:[#allocation88_spill] sm:$0xff] %v5924_v42  ;;  %8430 = vst [vmem:[#allocation89_spill] sm:$0xff] %v5927_v34  ;;  %v5954_v9 = vmul.f32 %v8394_v59, %v716_v61  ;;  %v5957_v62 = vmul.f32 %v8395_v6, %v716_v61  ;;  %v5960_v1 = vmul.f32 %v8404_v49, %v716_v61  ;;  %v8545_v34 = vld [vmem:[#allocation137_spill] sm:$0xff] }
 0x158   : > { %8431 = vst [vmem:[#allocation90_spill] sm:$0xff] %v5930_v32  ;;  %8432 = vst [vmem:[#allocation91_spill] sm:$0xff] %v5933_v52  ;;  %v5963_v28 = vmul.f32 %v8405_v37, %v716_v61  ;;  %v5966_v20 = vmul.f32 %v8406_v29, %v716_v61  ;;  %v5969_v48 = vmul.f32 %v8407_v17, %v716_v61  ;;  %v8544_v52 = vld [vmem:[#allocation136_spill] sm:$0xff] }
 0x159   : > { %8433 = vst [vmem:[#allocation92_spill] sm:$0xff] %v5936_v16  ;;  %8434 = vst [vmem:[#allocation93_spill] sm:$0xff] %v5939_v10  ;;  %v5972_v63 = vmul.f32 %v8408_v19, %v716_v61  ;;  %v5975_v59 = vmul.f32 %v8409_v25, %v716_v61  ;;  %v5978_v6 = vmul.f32 %v8410_v46, %v716_v61  ;;  %v8543_v10 = vld [vmem:[#allocation135_spill] sm:$0xff] }
 0x15a   : > { %8435 = vst [vmem:[#allocation94_spill] sm:$0xff] %v5942_v23  ;;  %8436 = vst [vmem:[#allocation95_spill] sm:$0xff] %v5945_v22  ;;  %v5981_v49 = vmul.f32 %v8411_v51, %v716_v61  ;;  %v5986_v37 = vmul.f32 %v8417_v60, %v716_v61  ;;  %v5989_v29 = vmul.f32 %v8418_v58, %v716_v61  ;;  %v8457_v58 = vld [vmem:[#allocation37_spill] sm:$0xff] }
 0x15b   : > { %8437 = vst [vmem:[#allocation96_spill] sm:$0xff] %v5948_v8  ;;  %8438 = vst [vmem:[#allocation97_spill] sm:$0xff] %v5951_v18  ;;  %v5992_v17 = vmul.f32 %v8419_v12, %v716_v61  ;;  %v5995_v19 = vmul.f32 %v8420_v57, %v716_v61  ;;  %v5998_v25 = vmul.f32 %v8421_v33, %v716_v61  ;;  %v8458_v12 = vld [vmem:[#allocation38_spill] sm:$0xff]  ;;  %v8459_v57 = vld [vmem:[#allocation39_spill] sm:$0xff] }
 0x15c   : > { %8439 = vst [vmem:[#allocation98_spill] sm:$0xff] %v5954_v9  ;;  %8440 = vst [vmem:[#allocation99_spill] sm:$0xff] %v5957_v62  ;;  %v6001_v46 = vmul.f32 %v8422_v50, %v716_v61  ;;  %v6004_v51 = vmul.f32 %v8423_v35, %v716_v61  ;;  %v6007_v60 = vmul.f32 %v8424_v5, %v716_v61  ;;  %v8460_v33 = vld [vmem:[#allocation40_spill] sm:$0xff]  ;;  %v8461_v50 = vld [vmem:[#allocation41_spill] sm:$0xff] }
 0x15d   : > { %8441 = vst [vmem:[#allocation200_spill] sm:$0xff] %v5960_v1  ;;  %8442 = vst [vmem:[#allocation201_spill] sm:$0xff] %v5963_v28  ;;  %v638_v26 = vmul.f32 %v5983_v13, %v8457_v58  ;;  %v639_v31 = vmul.f32 %v5983_v13, %v8458_v12  ;;  %v640_v40 = vmul.f32 %v5983_v13, %v8459_v57  ;;  %v8462_v35 = vld [vmem:[#allocation42_spill] sm:$0xff]  ;;  %v8463_v5 = vld [vmem:[#allocation43_spill] sm:$0xff] }
 0x15e   : > { %8443 = vst [vmem:[#allocation202_spill] sm:$0xff] %v5966_v20  ;;  %8444 = vst [vmem:[#allocation203_spill] sm:$0xff] %v5969_v48  ;;  %v641_v27 = vmul.f32 %v5983_v13, %v8460_v33  ;;  %v1101_v2 = vmul.f32 %v8461_v50, %v5983_v13  ;;  %v1102_v56 = vmul.f32 %v8462_v35, %v5983_v13  ;;  %v8464_v61 = vld [vmem:[#allocation132_spill] sm:$0xff]  ;;  %v8508_v20 = vld [vmem:[#allocation81_spill] sm:$0xff] }
 0x15f   : > { %8445 = vst [vmem:[#allocation204_spill] sm:$0xff] %v5972_v63  ;;  %8446 = vst [vmem:[#allocation205_spill] sm:$0xff] %v5975_v59  ;;  %v1103_v15 = vmul.f32 %v8463_v5, %v5983_v13  ;;  %v1104_v58 = vmul.f32 %v8464_v61, %v5983_v13  ;;  %v6026_v12 = vadd.f32 %v5791_v47, %v638_v26  ;;  %v8467_v47 = vld [vmem:[#allocation70_spill] sm:$0xff]  ;;  %v8504_v63 = vld [vmem:[#allocation79_spill] sm:$0xff] }
 0x160   : > { %8447 = vst [vmem:[#allocation206_spill] sm:$0xff] %v5978_v6  ;;  %8448 = vst [vmem:[#allocation207_spill] sm:$0xff] %v5981_v49  ;;  %v6029_v57 = vadd.f32 %v5793_v54, %v639_v31  ;;  %v6032_v33 = vadd.f32 %v5795_v38, %v640_v40  ;;  %v6035_v50 = vadd.f32 %v5797_v55, %v641_v27  ;;  %v8469_v54 = vld [vmem:[#allocation44_spill] sm:$0xff]  ;;  %v8470_v38 = vld [vmem:[#allocation45_spill] sm:$0xff] }
 0x161   : > { %8449 = vst [vmem:[#allocation208_spill] sm:$0xff] %v5986_v37  ;;  %8450 = vst [vmem:[#allocation209_spill] sm:$0xff] %v5989_v29  ;;  %v6038_v35 = vadd.f32 %v5799_v7, %v1101_v2  ;;  %v6047_v26 = vadd.f32 %v8467_v47, %v1104_v58  ;;  %v1548_v31 = vmul.f32 %v8469_v54, %v5983_v13  ;;  %v8471_v55 = vld [vmem:[#allocation46_spill] sm:$0xff]  ;;  %v8472_v7 = vld [vmem:[#allocation47_spill] sm:$0xff] }
 0x162   : > { %8451 = vst [vmem:[#allocation210_spill] sm:$0xff] %v5992_v17  ;;  %8452 = vst [vmem:[#allocation211_spill] sm:$0xff] %v5995_v19  ;;  %v1549_v40 = vmul.f32 %v8470_v38, %v5983_v13  ;;  %v1550_v27 = vmul.f32 %v8471_v55, %v5983_v13  ;;  %v1551_v2 = vmul.f32 %v8472_v7, %v5983_v13  ;;  %v8475_v58 = vld [vmem:[#allocation51_spill] sm:$0xff]  ;;  %v8476_v54 = vld [vmem:[#allocation133_spill] sm:$0xff] }
 0x163   : > { %8453 = vst [vmem:[#allocation212_spill] sm:$0xff] %v5998_v25  ;;  %8454 = vst [vmem:[#allocation213_spill] sm:$0xff] %v6001_v46  ;;  %v1997_v47 = vmul.f32 %v8475_v58, %v5983_v13  ;;  %v1998_v46 = vmul.f32 %v8476_v54, %v5983_v13  ;;  %v8477_v25 = vld [vmem:[#allocation71_spill] sm:$0xff]  ;;  %v8479_v19 = vld [vmem:[#allocation72_spill] sm:$0xff] }
 0x164   : > { %8455 = vst [vmem:[#allocation214_spill] sm:$0xff] %v6004_v51  ;;  %8456 = vst [vmem:[#allocation215_spill] sm:$0xff] %v6007_v60  ;;  %v8465_v60 = vld [vmem:[#allocation68_spill] sm:$0xff]  ;;  %v8466_v51 = vld [vmem:[#allocation69_spill] sm:$0xff]  ;;  %v6066_v38 = vadd.f32 %v8477_v25, %v1548_v31  ;;  %v6069_v55 = vadd.f32 %v8479_v19, %v1549_v40 }
 0x165   : > { %v6041_v5 = vadd.f32 %v8465_v60, %v1102_v56  ;;  %v6044_v61 = vadd.f32 %v8466_v51, %v1103_v15  ;;  %8468 = vst [vmem:[#allocation68_spill] sm:$0xff] %v6047_v26  ;;  %v8473_v60 = vld [vmem:[#allocation49_spill] sm:$0xff]  ;;  %v8474_v51 = vld [vmem:[#allocation50_spill] sm:$0xff]  ;;  %v8485_v37 = vld [vmem:[#allocation75_spill] sm:$0xff] }
 0x166   : > { %v1995_v56 = vmul.f32 %v8473_v60, %v5983_v13  ;;  %v1996_v15 = vmul.f32 %v8474_v51, %v5983_v13  ;;  %8478 = vst [vmem:[#allocation69_spill] sm:$0xff] %v6066_v38  ;;  %8480 = vst [vmem:[#allocation70_spill] sm:$0xff] %v6069_v55  ;;  %v8481_v17 = vld [vmem:[#allocation73_spill] sm:$0xff]  ;;  %v8483_v29 = vld [vmem:[#allocation74_spill] sm:$0xff] }
 0x167   : > { %v6072_v7 = vadd.f32 %v8481_v17, %v1550_v27  ;;  %v6075_v60 = vadd.f32 %v8483_v29, %v1551_v2  ;;  %v8487_v49 = vld [vmem:[#allocation76_spill] sm:$0xff]  ;;  %v8489_v6 = vld [vmem:[#allocation77_spill] sm:$0xff]  ;;  %v8491_v25 = vld [vmem:[#allocation78_spill] sm:$0xff] }
 0x168   : > { %v6078_v51 = vadd.f32 %v8485_v37, %v1995_v56  ;;  %v6081_v58 = vadd.f32 %v8487_v49, %v1996_v15  ;;  %v6084_v54 = vadd.f32 %v8489_v6, %v1997_v47  ;;  %v6087_v31 = vadd.f32 %v8491_v25, %v1998_v46  ;;  %v8493_v19 = vld [vmem:[#allocation52_spill] sm:$0xff]  ;;  %v8494_v17 = vld [vmem:[#allocation53_spill] sm:$0xff]  ;;  %v8495_v29 = vld [vmem:[#allocation54_spill] sm:$0xff] }
 0x169   : > { %8482 = vst [vmem:[#allocation71_spill] sm:$0xff] %v6072_v7  ;;  %8484 = vst [vmem:[#allocation72_spill] sm:$0xff] %v6075_v60  ;;  %v2442_v40 = vmul.f32 %v8493_v19, %v5983_v13  ;;  %v2443_v27 = vmul.f32 %v8494_v17, %v5983_v13  ;;  %v2444_v2 = vmul.f32 %v8495_v29, %v5983_v13  ;;  %v8496_v37 = vld [vmem:[#allocation55_spill] sm:$0xff]  ;;  %v8497_v49 = vld [vmem:[#allocation56_spill] sm:$0xff] }
 0x16a   : > { %8486 = vst [vmem:[#allocation73_spill] sm:$0xff] %v6078_v51  ;;  %8488 = vst [vmem:[#allocation74_spill] sm:$0xff] %v6081_v58  ;;  %v2445_v56 = vmul.f32 %v8496_v37, %v5983_v13  ;;  %v2889_v15 = vmul.f32 %v8497_v49, %v5983_v13  ;;  %v8498_v6 = vld [vmem:[#allocation57_spill] sm:$0xff]  ;;  %v8499_v46 = vld [vmem:[#allocation58_spill] sm:$0xff] }
 0x16b   : > { %8490 = vst [vmem:[#allocation75_spill] sm:$0xff] %v6084_v54  ;;  %8492 = vst [vmem:[#allocation76_spill] sm:$0xff] %v6087_v31  ;;  %v2890_v47 = vmul.f32 %v8498_v6, %v5983_v13  ;;  %v2891_v25 = vmul.f32 %v8499_v46, %v5983_v13  ;;  %v8500_v19 = vld [vmem:[#allocation59_spill] sm:$0xff]  ;;  %v6106_v17 = vadd.f32 %v5855_v36, %v2442_v40  ;;  %v8506_v48 = vld [vmem:[#allocation80_spill] sm:$0xff] }
 0x16c   : > { %v2892_v59 = vmul.f32 %v8500_v19, %v5983_v13  ;;  %v6109_v29 = vadd.f32 %v5857_v11, %v2443_v27  ;;  %v6112_v37 = vadd.f32 %v5859_v0, %v2444_v2  ;;  %v6115_v49 = vadd.f32 %v8504_v63, %v2445_v56  ;;  %v8510_v28 = vld [vmem:[#allocation82_spill] sm:$0xff]  ;;  %v8512_v36 = vld [vmem:[#allocation83_spill] sm:$0xff]  ;;  %v8514_v11 = vld [vmem:[#allocation60_spill] sm:$0xff] }
 0x16d   : > { %8501 = vst [vmem:[#allocation77_spill] sm:$0xff] %v6106_v17  ;;  %v6118_v6 = vadd.f32 %v8506_v48, %v2889_v15  ;;  %v6121_v46 = vadd.f32 %v8508_v20, %v2890_v47  ;;  %v6124_v19 = vadd.f32 %v8510_v28, %v2891_v25  ;;  %v3336_v27 = vmul.f32 %v8514_v11, %v5983_v13  ;;  %v8515_v0 = vld [vmem:[#allocation61_spill] sm:$0xff]  ;;  %v8516_v63 = vld [vmem:[#allocation62_spill] sm:$0xff]  ;;  %v8517_v48 = vld [vmem:[#allocation63_spill] sm:$0xff] }
 0x16e   : > { %8502 = vst [vmem:[#allocation78_spill] sm:$0xff] %v6109_v29  ;;  %8503 = vst [vmem:[#allocation216_spill] sm:$0xff] %v6112_v37  ;;  %v6127_v40 = vadd.f32 %v8512_v36, %v2892_v59  ;;  %v3337_v2 = vmul.f32 %v8515_v0, %v5983_v13  ;;  %v3338_v56 = vmul.f32 %v8516_v63, %v5983_v13  ;;  %v8518_v20 = vld [vmem:[#allocation64_spill] sm:$0xff]  ;;  %v8519_v28 = vld [vmem:[#allocation65_spill] sm:$0xff] }
 0x16f   : > { %8505 = vst [vmem:[#allocation79_spill] sm:$0xff] %v6115_v49  ;;  %8507 = vst [vmem:[#allocation80_spill] sm:$0xff] %v6118_v6  ;;  %v3339_v15 = vmul.f32 %v8517_v48, %v5983_v13  ;;  %v3783_v47 = vmul.f32 %v8518_v20, %v5983_v13  ;;  %v3784_v25 = vmul.f32 %v8519_v28, %v5983_v13  ;;  %v8520_v59 = vld [vmem:[#allocation66_spill] sm:$0xff]  ;;  %v8521_v11 = vld [vmem:[#allocation67_spill] sm:$0xff] }
 0x170   : > { %8509 = vst [vmem:[#allocation81_spill] sm:$0xff] %v6121_v46  ;;  %8511 = vst [vmem:[#allocation82_spill] sm:$0xff] %v6124_v19  ;;  %v3785_v36 = vmul.f32 %v8520_v59, %v5983_v13  ;;  %v3786_v1 = vmul.f32 %v8521_v11, %v5983_v13  ;;  %v6146_v0 = vadd.f32 %v5888_v41, %v3336_v27  ;;  %v8531_v27 = vld [vmem:[#allocation4_spill] sm:$0xff] }
 0x171   : > { %8513 = vst [vmem:[#allocation83_spill] sm:$0xff] %v6127_v40  ;;  %v6149_v63 = vadd.f32 %v5891_v24, %v3337_v2  ;;  %v6152_v48 = vadd.f32 %v5894_v14, %v3338_v56  ;;  %v6155_v20 = vadd.f32 %v5897_v4, %v3339_v15  ;;  %v6158_v28 = vadd.f32 %v5900_v53, %v3783_v47  ;;  %v8530_v24 = vld [vmem:[#allocation36_spill] sm:$0xff]  ;;  %v8532_v14 = vld [vmem:[#allocation5_spill] sm:$0xff]  ;;  %v8533_v4 = vld [vmem:[#allocation6_spill] sm:$0xff] }
 0x172   : > { %8522 = vst [vmem:[#allocation217_spill] sm:$0xff] %v6146_v0  ;;  %v6161_v59 = vadd.f32 %v5903_v45, %v3784_v25  ;;  %v6164_v13 = vadd.f32 %v5906_v30, %v3785_v36  ;;  %v6167_v41 = vadd.f32 %v5909_v3, %v3786_v1  ;;  %v381_v2 = vmul.f32 %v8531_v27, %v8530_v24  ;;  %v8534_v53 = vld [vmem:[#allocation7_spill] sm:$0xff]  ;;  %v8535_v45 = vld [vmem:[#allocation8_spill] sm:$0xff]  ;;  %v8536_v30 = vld [vmem:[#allocation9_spill] sm:$0xff] }
 0x173   : > { %8523 = vst [vmem:[#allocation218_spill] sm:$0xff] %v6149_v63  ;;  %8524 = vst [vmem:[#allocation219_spill] sm:$0xff] %v6152_v48  ;;  %v382_v56 = vmul.f32 %v8532_v14, %v8530_v24  ;;  %v383_v15 = vmul.f32 %v8533_v4, %v8530_v24  ;;  %v384_v47 = vmul.f32 %v8534_v53, %v8530_v24  ;;  %v8537_v3 = vld [vmem:[#allocation10_spill] sm:$0xff]  ;;  %v8538_v27 = vld [vmem:[#allocation11_spill] sm:$0xff] }
 0x174   : > { %8525 = vst [vmem:[#allocation220_spill] sm:$0xff] %v6155_v20  ;;  %8526 = vst [vmem:[#allocation221_spill] sm:$0xff] %v6158_v28  ;;  %v921_v25 = vmul.f32 %v8535_v45, %v8530_v24  ;;  %v922_v36 = vmul.f32 %v8536_v30, %v8530_v24  ;;  %v923_v1 = vmul.f32 %v8537_v3, %v8530_v24  ;;  %v8539_v62 = vld [vmem:[#allocation48_spill] sm:$0xff] }
 0x175   : > { %8527 = vst [vmem:[#allocation222_spill] sm:$0xff] %v6161_v59  ;;  %8528 = vst [vmem:[#allocation223_spill] sm:$0xff] %v6164_v13  ;;  %v924_v11 = vmul.f32 %v8538_v27, %v8530_v24  ;;  %v417_v14 = vadd.f32 %v8539_v62, %v381_v2  ;;  %v418_v9 = vadd.f32 %v8539_v62, %v382_v56  ;;  %v8549_v59 = vld [vmem:[#allocation170_spill] sm:$0xff] }
 0x176   : > { %8529 = vst [vmem:[#allocation224_spill] sm:$0xff] %v6167_v41  ;;  %v419_v4 = vadd.f32 %v8539_v62, %v383_v15  ;;  %v420_v53 = vadd.f32 %v8539_v62, %v384_v47  ;;  %v937_v18 = vadd.f32 %v921_v25, %v8539_v62  ;;  %v938_v45 = vadd.f32 %v922_v36, %v8539_v62  ;;  %v8540_v36 = vld [vmem:[#allocation166_spill] sm:$0xff]  ;;  %v8548_v41 = vld [vmem:[#allocation169_spill] sm:$0xff] }
 0x177   : > { %v939_v30 = vadd.f32 %v923_v1, %v8539_v62  ;;  %v940_v8 = vadd.f32 %v924_v11, %v8539_v62  ;;  %v6193_v3 = vmax.f32 %v417_v14, 0.0  ;;  %v6195_v22 = vmax.f32 %v418_v9, 0.0 }
 0x178   : > { %v6197_v27 = vmax.f32 %v419_v4, 0.0  ;;  %v6199_v2 = vmax.f32 %v420_v53, 0.0  ;;  %v6201_v56 = vmax.f32 %v937_v18, 0.0  ;;  %v6203_v15 = vmax.f32 %v938_v45, 0.0  ;;  %v8541_v18 = vld [vmem:[#allocation179_spill] sm:$0xff] }
 0x179   : > { %v6205_v47 = vmax.f32 %v939_v30, 0.0  ;;  %v6207_v25 = vmax.f32 %v940_v8, 0.0  ;;  %v469_v1 = vmul.f32 %v8540_v36, %v6193_v3  ;;  %v470_v11 = vmul.f32 %v8540_v36, %v6195_v22  ;;  %v8542_v30 = vld [vmem:[#allocation134_spill] sm:$0xff] }
 0x17a   : > { %v471_v9 = vmul.f32 %v8540_v36, %v6197_v27  ;;  %v472_v14 = vmul.f32 %v8540_v36, %v6199_v2  ;;  %v546_v4 = vmul.f32 %v8541_v18, %v6193_v3  ;;  %v547_v53 = vmul.f32 %v8541_v18, %v6195_v22 }
 0x17b   : > { %v548_v8 = vmul.f32 %v8541_v18, %v6197_v27  ;;  %v549_v45 = vmul.f32 %v8541_v18, %v6199_v2  ;;  %v475_v23 = vadd.f32 %v8542_v30, %v469_v1  ;;  %v484_v16 = vadd.f32 %v8543_v10, %v470_v11 }
 0x17c   : > { %v493_v32 = vadd.f32 %v8544_v52, %v471_v9  ;;  %v502_v42 = vadd.f32 %v8545_v34, %v472_v14  ;;  %v552_v44 = vadd.f32 %v8546_v21, %v546_v4  ;;  %v561_v43 = vadd.f32 %v8547_v39, %v547_v53 }
 0x17d   : > { %v570_v13 = vadd.f32 %v8548_v41, %v548_v8  ;;  %v579_v28 = vadd.f32 %v8549_v59, %v549_v45  ;;  %v476_v20 = vrot.slane %v475_v23, 4  ;;  %v485_v48 = vrot.slane %v484_v16, 4 }
 0x17e   : > { %v494_v63 = vrot.slane %v493_v32, 4  ;;  %v503_v0 = vrot.slane %v502_v42, 4  ;;  %v553_v40 = vrot.slane %v552_v44, 4  ;;  %v562_v1 = vrot.slane %v561_v43, 4 }
 0x17f   : > { %v571_v30 = vrot.slane %v570_v13, 4  ;;  %v580_v10 = vrot.slane %v579_v28, 4  ;;  %v477_v11 = vadd.f32 %v476_v20, %v475_v23  ;;  %v486_v52 = vadd.f32 %v485_v48, %v484_v16 }
 0x180   : > { %v495_v9 = vadd.f32 %v494_v63, %v493_v32  ;;  %v504_v34 = vadd.f32 %v503_v0, %v502_v42  ;;  %v554_v14 = vadd.f32 %v553_v40, %v552_v44  ;;  %v563_v21 = vadd.f32 %v562_v1, %v561_v43  ;;  %v6233_v63 = vpop.permute.xlu0 %727 }
 0x181   : > { %v572_v4 = vadd.f32 %v571_v30, %v570_v13  ;;  %v581_v39 = vadd.f32 %v580_v10, %v579_v28  ;;  %v478_v53 = vrot.slane %v477_v11, 2  ;;  %v487_v41 = vrot.slane %v486_v52, 2 }
 0x182   : > { %v496_v8 = vrot.slane %v495_v9, 2  ;;  %v505_v59 = vrot.slane %v504_v34, 2  ;;  %v555_v45 = vrot.slane %v554_v14, 2  ;;  %v564_v19 = vrot.slane %v563_v21, 2 }
 0x183   : > { %v573_v46 = vrot.slane %v572_v4, 2  ;;  %v582_v6 = vrot.slane %v581_v39, 2  ;;  %v479_v49 = vadd.f32 %v478_v53, %v477_v11  ;;  %v488_v37 = vadd.f32 %v487_v41, %v486_v52 }
 0x184   : > { %v497_v29 = vadd.f32 %v496_v8, %v495_v9  ;;  %v506_v17 = vadd.f32 %v505_v59, %v504_v34  ;;  %v556_v23 = vadd.f32 %v555_v45, %v554_v14  ;;  %v565_v16 = vadd.f32 %v564_v19, %v563_v21  ;;  %v8562_v8 = vld [vmem:[#allocation138_spill] sm:$0xff]  ;;  %v8563_v45 = vld [vmem:[#allocation139_spill] sm:$0xff] }
 0x185   : > { %v574_v32 = vadd.f32 %v573_v46, %v572_v4  ;;  %v583_v42 = vadd.f32 %v582_v6, %v581_v39  ;;  %v480_v44 = vrot.slane %v479_v49, 1  ;;  %v489_v43 = vrot.slane %v488_v37, 1 }
 0x186   : > { %v498_v40 = vrot.slane %v497_v29, 1  ;;  %v507_v0 = vrot.slane %v506_v17, 1  ;;  %v557_v48 = vrot.slane %v556_v23, 1  ;;  %v566_v20 = vrot.slane %v565_v16, 1 }
 0x187   : > { %v575_v28 = vrot.slane %v574_v32, 1  ;;  %v584_v13 = vrot.slane %v583_v42, 1  ;;  %v6235_v1 = vadd.f32 %v480_v44, %v479_v49  ;;  %v6237_v30 = vadd.f32 %v489_v43, %v488_v37  ;;  %v8566_v43 = vld [vmem:[#allocation171_spill] sm:$0xff] }
 0x188   : > { %v6239_v10 = vadd.f32 %v498_v40, %v497_v29  ;;  %v6241_v11 = vadd.f32 %v507_v0, %v506_v17  ;;  %v6243_v19 = vadd.f32 %v557_v48, %v556_v23  ;;  %v6245_v6 = vadd.f32 %v566_v20, %v565_v16  ;;  %v8564_v16 = vld [vmem:[#allocation140_spill] sm:$0xff]  ;;  %v8568_v20 = vld [vmem:[#allocation173_spill] sm:$0xff] }
 0x189   : > { %8550 = vst [vmem:[#allocation36_spill] sm:$0xff] %v6235_v1  ;;  %8551 = vst [vmem:[#allocation4_spill] sm:$0xff] %v6237_v30  ;;  %v6247_v46 = vadd.f32 %v575_v28, %v574_v32  ;;  %v6249_v52 = vadd.f32 %v584_v13, %v583_v42  ;;  %v6253_v9 = vmul.f32 %v6233_v63, %v6193_v3  ;;  %v8565_v42 = vld [vmem:[#allocation141_spill] sm:$0xff]  ;;  %v8567_v0 = vld [vmem:[#allocation172_spill] sm:$0xff] }
 0x18a   : > { %8552 = vst [vmem:[#allocation5_spill] sm:$0xff] %v6239_v10  ;;  %8553 = vst [vmem:[#allocation6_spill] sm:$0xff] %v6241_v11  ;;  %v6257_v37 = vmul.f32 %v6233_v63, %v6195_v22  ;;  %v6261_v17 = vmul.f32 %v6233_v63, %v6197_v27  ;;  %v6265_v29 = vmul.f32 %v6233_v63, %v6199_v2  ;;  %v8569_v13 = vld [vmem:[#allocation174_spill] sm:$0xff] }
 0x18b   : > { %8554 = vst [vmem:[#allocation7_spill] sm:$0xff] %v6243_v19  ;;  %8555 = vst [vmem:[#allocation8_spill] sm:$0xff] %v6245_v6  ;;  %v969_v49 = vmul.f32 %v6201_v56, %v8540_v36  ;;  %v970_v34 = vmul.f32 %v6203_v15, %v8540_v36  ;;  %v971_v14 = vmul.f32 %v6205_v47, %v8540_v36 }
 0x18c   : > { %8556 = vst [vmem:[#allocation9_spill] sm:$0xff] %v6247_v46  ;;  %8557 = vst [vmem:[#allocation10_spill] sm:$0xff] %v6249_v52  ;;  %v972_v21 = vmul.f32 %v6207_v25, %v8540_v36  ;;  %v1025_v4 = vmul.f32 %v6201_v56, %v8541_v18  ;;  %v1026_v39 = vmul.f32 %v6203_v15, %v8541_v18 }
 0x18d   : > { %8558 = vst [vmem:[#allocation11_spill] sm:$0xff] %v6253_v9  ;;  %8559 = vst [vmem:[#allocation48_spill] sm:$0xff] %v6257_v37  ;;  %v1027_v53 = vmul.f32 %v6205_v47, %v8541_v18  ;;  %v1028_v41 = vmul.f32 %v6207_v25, %v8541_v18  ;;  %v975_v59 = vadd.f32 %v8562_v8, %v969_v49 }
 0x18e   : > { %8560 = vst [vmem:[#allocation166_spill] sm:$0xff] %v6261_v17  ;;  %8561 = vst [vmem:[#allocation179_spill] sm:$0xff] %v6265_v29  ;;  %v984_v23 = vadd.f32 %v8563_v45, %v970_v34  ;;  %v993_v32 = vadd.f32 %v8564_v16, %v971_v14  ;;  %v1002_v44 = vadd.f32 %v8565_v42, %v972_v21 }
 0x18f   : > { %v1031_v40 = vadd.f32 %v8566_v43, %v1025_v4  ;;  %v1040_v48 = vadd.f32 %v8567_v0, %v1026_v39  ;;  %v1049_v28 = vadd.f32 %v8568_v20, %v1027_v53  ;;  %v1058_v52 = vadd.f32 %v8569_v13, %v1028_v41 }
 0x190   : > { %v976_v46 = vrot.slane %v975_v59, 4  ;;  %v985_v6 = vrot.slane %v984_v23, 4  ;;  %v994_v19 = vrot.slane %v993_v32, 4  ;;  %v1003_v11 = vrot.slane %v1002_v44, 4 }
 0x191   : > { %v1032_v10 = vrot.slane %v1031_v40, 4  ;;  %v1041_v49 = vrot.slane %v1040_v48, 4  ;;  %v1050_v8 = vrot.slane %v1049_v28, 4  ;;  %v1059_v34 = vrot.slane %v1058_v52, 4 }
 0x192   : > { %v977_v45 = vadd.f32 %v976_v46, %v975_v59  ;;  %v986_v14 = vadd.f32 %v985_v6, %v984_v23  ;;  %v995_v16 = vadd.f32 %v994_v19, %v993_v32  ;;  %v1004_v21 = vadd.f32 %v1003_v11, %v1002_v44 }
 0x193   : > { %v1033_v42 = vadd.f32 %v1032_v10, %v1031_v40  ;;  %v1042_v4 = vadd.f32 %v1041_v49, %v1040_v48  ;;  %v1051_v43 = vadd.f32 %v1050_v8, %v1049_v28  ;;  %v1060_v39 = vadd.f32 %v1059_v34, %v1058_v52 }
 0x194   : > { %v978_v0 = vrot.slane %v977_v45, 2  ;;  %v987_v53 = vrot.slane %v986_v14, 2  ;;  %v996_v20 = vrot.slane %v995_v16, 2  ;;  %v1005_v41 = vrot.slane %v1004_v21, 2 }
 0x195   : > { %v1034_v13 = vrot.slane %v1033_v42, 2  ;;  %v1043_v30 = vrot.slane %v1042_v4, 2  ;;  %v1052_v1 = vrot.slane %v1051_v43, 2  ;;  %v1061_v29 = vrot.slane %v1060_v39, 2 }
 0x196   : > { %v979_v17 = vadd.f32 %v978_v0, %v977_v45  ;;  %v988_v37 = vadd.f32 %v987_v53, %v986_v14  ;;  %v997_v9 = vadd.f32 %v996_v20, %v995_v16  ;;  %v1006_v31 = vadd.f32 %v1005_v41, %v1004_v21  ;;  %v8583_v21 = vld [vmem:[#allocation13_spill] sm:$0xff]  ;;  %v8586_v53 = vld [vmem:[#allocation16_spill] sm:$0xff] }
 0x197   : > { %v1035_v46 = vadd.f32 %v1034_v13, %v1033_v42  ;;  %v1044_v6 = vadd.f32 %v1043_v30, %v1042_v4  ;;  %v1053_v19 = vadd.f32 %v1052_v1, %v1051_v43  ;;  %v1062_v11 = vadd.f32 %v1061_v29, %v1060_v39  ;;  %v8584_v4 = vld [vmem:[#allocation14_spill] sm:$0xff]  ;;  %v8585_v39 = vld [vmem:[#allocation15_spill] sm:$0xff]  ;;  %v8587_v41 = vld [vmem:[#allocation17_spill] sm:$0xff] }
 0x198   : > { %v980_v10 = vrot.slane %v979_v17, 1  ;;  %v989_v59 = vrot.slane %v988_v37, 1  ;;  %v998_v23 = vrot.slane %v997_v9, 1  ;;  %v1007_v52 = vrot.slane %v1006_v31, 1 }
 0x199   : > { %v1036_v32 = vrot.slane %v1035_v46, 1  ;;  %v1045_v44 = vrot.slane %v1044_v6, 1  ;;  %v1054_v40 = vrot.slane %v1053_v19, 1  ;;  %v1063_v48 = vrot.slane %v1062_v11, 1 }
 0x19a   : > { %v6291_v28 = vadd.f32 %v980_v10, %v979_v17  ;;  %v6293_v49 = vadd.f32 %v989_v59, %v988_v37  ;;  %v6295_v8 = vadd.f32 %v998_v23, %v997_v9  ;;  %v6297_v34 = vadd.f32 %v1007_v52, %v1006_v31  ;;  %v8582_v17 = vld [vmem:[#allocation12_spill] sm:$0xff] }
 0x19b   : > { %v6299_v45 = vadd.f32 %v1036_v32, %v1035_v46  ;;  %v6301_v1 = vadd.f32 %v1045_v44, %v1044_v6  ;;  %v6303_v30 = vadd.f32 %v1054_v40, %v1053_v19  ;;  %v6305_v29 = vadd.f32 %v1063_v48, %v1062_v11  ;;  %v8588_v46 = vld [vmem:[#allocation18_spill] sm:$0xff]  ;;  %v8589_v19 = vld [vmem:[#allocation19_spill] sm:$0xff] }
 0x19c   : > { %8570 = vst [vmem:[#allocation134_spill] sm:$0xff] %v6291_v28  ;;  %8571 = vst [vmem:[#allocation135_spill] sm:$0xff] %v6293_v49  ;;  %v6309_v14 = vmul.f32 %v6201_v56, %v6233_v63  ;;  %v6313_v37 = vmul.f32 %v6203_v15, %v6233_v63  ;;  %v6317_v31 = vmul.f32 %v6205_v47, %v6233_v63  ;;  %v8605_v49 = vld [vmem:[#allocation178_spill] sm:$0xff] }
 0x19d   : > { %8572 = vst [vmem:[#allocation136_spill] sm:$0xff] %v6295_v8  ;;  %8573 = vst [vmem:[#allocation137_spill] sm:$0xff] %v6297_v34  ;;  %v6321_v9 = vmul.f32 %v6207_v25, %v6233_v63  ;;  %v1368_v16 = vmul.f32 %v8582_v17, %v8530_v24  ;;  %v1369_v42 = vmul.f32 %v8583_v21, %v8530_v24  ;;  %v8604_v34 = vld [vmem:[#allocation177_spill] sm:$0xff] }
 0x19e   : > { %8574 = vst [vmem:[#allocation167_spill] sm:$0xff] %v6299_v45  ;;  %8575 = vst [vmem:[#allocation168_spill] sm:$0xff] %v6301_v1  ;;  %v1370_v43 = vmul.f32 %v8584_v4, %v8530_v24  ;;  %v1371_v0 = vmul.f32 %v8585_v39, %v8530_v24  ;;  %v1815_v20 = vmul.f32 %v8586_v53, %v8530_v24  ;;  %v8603_v1 = vld [vmem:[#allocation176_spill] sm:$0xff] }
 0x19f   : > { %8576 = vst [vmem:[#allocation169_spill] sm:$0xff] %v6303_v30  ;;  %8577 = vst [vmem:[#allocation170_spill] sm:$0xff] %v6305_v29  ;;  %v1816_v13 = vmul.f32 %v8587_v41, %v8530_v24  ;;  %v1817_v6 = vmul.f32 %v8588_v46, %v8530_v24  ;;  %v1818_v11 = vmul.f32 %v8589_v19, %v8530_v24  ;;  %v8602_v29 = vld [vmem:[#allocation175_spill] sm:$0xff] }
 0x1a0   : > { %8578 = vst [vmem:[#allocation138_spill] sm:$0xff] %v6309_v14  ;;  %8579 = vst [vmem:[#allocation139_spill] sm:$0xff] %v6313_v37  ;;  %v1384_v10 = vadd.f32 %v1368_v16, %v8539_v62  ;;  %v1385_v59 = vadd.f32 %v1369_v42, %v8539_v62  ;;  %v1386_v23 = vadd.f32 %v1370_v43, %v8539_v62 }
 0x1a1   : > { %8580 = vst [vmem:[#allocation140_spill] sm:$0xff] %v6317_v31  ;;  %8581 = vst [vmem:[#allocation141_spill] sm:$0xff] %v6321_v9  ;;  %v1387_v52 = vadd.f32 %v1371_v0, %v8539_v62  ;;  %v1831_v32 = vadd.f32 %v1815_v20, %v8539_v62  ;;  %v1832_v44 = vadd.f32 %v1816_v13, %v8539_v62 }
 0x1a2   : > { %v1833_v40 = vadd.f32 %v1817_v6, %v8539_v62  ;;  %v1834_v48 = vadd.f32 %v1818_v11, %v8539_v62  ;;  %v6347_v17 = vmax.f32 %v1384_v10, 0.0  ;;  %v6349_v21 = vmax.f32 %v1385_v59, 0.0  ;;  %v8598_v10 = vld [vmem:[#allocation142_spill] sm:$0xff] }
 0x1a3   : > { %v6351_v4 = vmax.f32 %v1386_v23, 0.0  ;;  %v6353_v16 = vmax.f32 %v1387_v52, 0.0  ;;  %v6355_v42 = vmax.f32 %v1831_v32, 0.0  ;;  %v6357_v43 = vmax.f32 %v1832_v44, 0.0  ;;  %v8599_v23 = vld [vmem:[#allocation143_spill] sm:$0xff]  ;;  %v8600_v32 = vld [vmem:[#allocation144_spill] sm:$0xff] }
 0x1a4   : > { %8590 = vst [vmem:[#allocation171_spill] sm:$0xff] %v6347_v17  ;;  %8591 = vst [vmem:[#allocation172_spill] sm:$0xff] %v6349_v21  ;;  %v6359_v39 = vmax.f32 %v1833_v40, 0.0  ;;  %v6361_v0 = vmax.f32 %v1834_v48, 0.0  ;;  %v1416_v53 = vmul.f32 %v6347_v17, %v8540_v36  ;;  %v1417_v20 = vmul.f32 %v6349_v21, %v8540_v36  ;;  %v8601_v40 = vld [vmem:[#allocation145_spill] sm:$0xff] }
 0x1a5   : > { %8592 = vst [vmem:[#allocation173_spill] sm:$0xff] %v6351_v4  ;;  %8593 = vst [vmem:[#allocation174_spill] sm:$0xff] %v6353_v16  ;;  %v1418_v41 = vmul.f32 %v6351_v4, %v8540_v36  ;;  %v1419_v13 = vmul.f32 %v6353_v16, %v8540_v36  ;;  %v1472_v46 = vmul.f32 %v6347_v17, %v8541_v18 }
 0x1a6   : > { %8594 = vst [vmem:[#allocation12_spill] sm:$0xff] %v6355_v42  ;;  %8595 = vst [vmem:[#allocation13_spill] sm:$0xff] %v6357_v43  ;;  %v1473_v6 = vmul.f32 %v6349_v21, %v8541_v18  ;;  %v1474_v19 = vmul.f32 %v6351_v4, %v8541_v18  ;;  %v1475_v11 = vmul.f32 %v6353_v16, %v8541_v18 }
 0x1a7   : > { %8596 = vst [vmem:[#allocation14_spill] sm:$0xff] %v6359_v39  ;;  %8597 = vst [vmem:[#allocation15_spill] sm:$0xff] %v6361_v0  ;;  %v1422_v59 = vadd.f32 %v8598_v10, %v1416_v53  ;;  %v1431_v52 = vadd.f32 %v8599_v23, %v1417_v20  ;;  %v1440_v44 = vadd.f32 %v8600_v32, %v1418_v41 }
 0x1a8   : > { %v1449_v48 = vadd.f32 %v8601_v40, %v1419_v13  ;;  %v1478_v30 = vadd.f32 %v8602_v29, %v1472_v46  ;;  %v1487_v45 = vadd.f32 %v8603_v1, %v1473_v6  ;;  %v1496_v8 = vadd.f32 %v8604_v34, %v1474_v19 }
 0x1a9   : > { %v1505_v28 = vadd.f32 %v8605_v49, %v1475_v11  ;;  %v1423_v9 = vrot.slane %v1422_v59, 4  ;;  %v1432_v31 = vrot.slane %v1431_v52, 4  ;;  %v1441_v37 = vrot.slane %v1440_v44, 4 }
 0x1aa   : > { %v1450_v14 = vrot.slane %v1449_v48, 4  ;;  %v1479_v54 = vrot.slane %v1478_v30, 4  ;;  %v1488_v53 = vrot.slane %v1487_v45, 4  ;;  %v1497_v10 = vrot.slane %v1496_v8, 4 }
 0x1ab   : > { %v1506_v20 = vrot.slane %v1505_v28, 4  ;;  %v1424_v23 = vadd.f32 %v1423_v9, %v1422_v59  ;;  %v1433_v41 = vadd.f32 %v1432_v31, %v1431_v52  ;;  %v1442_v32 = vadd.f32 %v1441_v37, %v1440_v44 }
 0x1ac   : > { %v1451_v13 = vadd.f32 %v1450_v14, %v1449_v48  ;;  %v1480_v40 = vadd.f32 %v1479_v54, %v1478_v30  ;;  %v1489_v29 = vadd.f32 %v1488_v53, %v1487_v45  ;;  %v1498_v46 = vadd.f32 %v1497_v10, %v1496_v8 }
 0x1ad   : > { %v1507_v1 = vadd.f32 %v1506_v20, %v1505_v28  ;;  %v1425_v6 = vrot.slane %v1424_v23, 2  ;;  %v1434_v34 = vrot.slane %v1433_v41, 2  ;;  %v1443_v19 = vrot.slane %v1442_v32, 2 }
 0x1ae   : > { %v1452_v49 = vrot.slane %v1451_v13, 2  ;;  %v1481_v11 = vrot.slane %v1480_v40, 2  ;;  %v1490_v58 = vrot.slane %v1489_v29, 2  ;;  %v1499_v51 = vrot.slane %v1498_v46, 2 }
 0x1af   : > { %v1508_v60 = vrot.slane %v1507_v1, 2  ;;  %v1426_v7 = vadd.f32 %v1425_v6, %v1424_v23  ;;  %v1435_v55 = vadd.f32 %v1434_v34, %v1433_v41  ;;  %v1444_v38 = vadd.f32 %v1443_v19, %v1442_v32  ;;  %v8618_v34 = vld [vmem:[#allocation146_spill] sm:$0xff] }
 0x1b0   : > { %v1453_v26 = vadd.f32 %v1452_v49, %v1451_v13  ;;  %v1482_v9 = vadd.f32 %v1481_v11, %v1480_v40  ;;  %v1491_v31 = vadd.f32 %v1490_v58, %v1489_v29  ;;  %v1500_v37 = vadd.f32 %v1499_v51, %v1498_v46  ;;  %v8619_v49 = vld [vmem:[#allocation147_spill] sm:$0xff] }
 0x1b1   : > { %v1509_v14 = vadd.f32 %v1508_v60, %v1507_v1  ;;  %v1427_v54 = vrot.slane %v1426_v7, 1  ;;  %v1436_v45 = vrot.slane %v1435_v55, 1  ;;  %v1445_v8 = vrot.slane %v1444_v38, 1 }
 0x1b2   : > { %v1454_v28 = vrot.slane %v1453_v26, 1  ;;  %v1483_v30 = vrot.slane %v1482_v9, 1  ;;  %v1492_v59 = vrot.slane %v1491_v31, 1  ;;  %v1501_v52 = vrot.slane %v1500_v37, 1 }
 0x1b3   : > { %v1510_v44 = vrot.slane %v1509_v14, 1  ;;  %v6387_v48 = vadd.f32 %v1427_v54, %v1426_v7  ;;  %v6389_v53 = vadd.f32 %v1436_v45, %v1435_v55  ;;  %v6391_v10 = vadd.f32 %v1445_v8, %v1444_v38  ;;  %v8622_v54 = vld [vmem:[#allocation180_spill] sm:$0xff]  ;;  %v8623_v8 = vld [vmem:[#allocation181_spill] sm:$0xff] }
 0x1b4   : > { %v6393_v20 = vadd.f32 %v1454_v28, %v1453_v26  ;;  %v6395_v23 = vadd.f32 %v1483_v30, %v1482_v9  ;;  %v6397_v51 = vadd.f32 %v1492_v59, %v1491_v31  ;;  %v6399_v60 = vadd.f32 %v1501_v52, %v1500_v37  ;;  %v8620_v9 = vld [vmem:[#allocation148_spill] sm:$0xff]  ;;  %v8621_v37 = vld [vmem:[#allocation149_spill] sm:$0xff]  ;;  %v8624_v30 = vld [vmem:[#allocation182_spill] sm:$0xff] }
 0x1b5   : > { %8606 = vst [vmem:[#allocation16_spill] sm:$0xff] %v6387_v48  ;;  %8607 = vst [vmem:[#allocation17_spill] sm:$0xff] %v6389_v53  ;;  %v6401_v58 = vadd.f32 %v1510_v44, %v1509_v14  ;;  %v6405_v41 = vmul.f32 %v6347_v17, %v6233_v63  ;;  %v6409_v55 = vmul.f32 %v6349_v21, %v6233_v63  ;;  %v8625_v52 = vld [vmem:[#allocation183_spill] sm:$0xff] }
 0x1b6   : > { %8608 = vst [vmem:[#allocation18_spill] sm:$0xff] %v6391_v10  ;;  %8609 = vst [vmem:[#allocation19_spill] sm:$0xff] %v6393_v20  ;;  %v6413_v26 = vmul.f32 %v6351_v4, %v6233_v63  ;;  %v6417_v38 = vmul.f32 %v6353_v16, %v6233_v63  ;;  %v1863_v7 = vmul.f32 %v6355_v42, %v8540_v36 }
 0x1b7   : > { %8610 = vst [vmem:[#allocation142_spill] sm:$0xff] %v6395_v23  ;;  %8611 = vst [vmem:[#allocation143_spill] sm:$0xff] %v6397_v51  ;;  %v1864_v32 = vmul.f32 %v6357_v43, %v8540_v36  ;;  %v1865_v13 = vmul.f32 %v6359_v39, %v8540_v36  ;;  %v1866_v40 = vmul.f32 %v6361_v0, %v8540_v36 }
 0x1b8   : > { %8612 = vst [vmem:[#allocation144_spill] sm:$0xff] %v6399_v60  ;;  %8613 = vst [vmem:[#allocation145_spill] sm:$0xff] %v6401_v58  ;;  %v1919_v29 = vmul.f32 %v6355_v42, %v8541_v18  ;;  %v1920_v46 = vmul.f32 %v6357_v43, %v8541_v18  ;;  %v1921_v1 = vmul.f32 %v6359_v39, %v8541_v18 }
 0x1b9   : > { %8614 = vst [vmem:[#allocation175_spill] sm:$0xff] %v6405_v41  ;;  %8615 = vst [vmem:[#allocation176_spill] sm:$0xff] %v6409_v55  ;;  %v1922_v6 = vmul.f32 %v6361_v0, %v8541_v18  ;;  %v1869_v19 = vadd.f32 %v8618_v34, %v1863_v7  ;;  %v1878_v11 = vadd.f32 %v8619_v49, %v1864_v32 }
 0x1ba   : > { %8616 = vst [vmem:[#allocation177_spill] sm:$0xff] %v6413_v26  ;;  %8617 = vst [vmem:[#allocation178_spill] sm:$0xff] %v6417_v38  ;;  %v1887_v31 = vadd.f32 %v8620_v9, %v1865_v13  ;;  %v1896_v14 = vadd.f32 %v8621_v37, %v1866_v40  ;;  %v1925_v45 = vadd.f32 %v8622_v54, %v1919_v29 }
 0x1bb   : > { %v1934_v28 = vadd.f32 %v8623_v8, %v1920_v46  ;;  %v1943_v59 = vadd.f32 %v8624_v30, %v1921_v1  ;;  %v1952_v44 = vadd.f32 %v8625_v52, %v1922_v6  ;;  %v1870_v58 = vrot.slane %v1869_v19, 4 }
 0x1bc   : > { %v1879_v60 = vrot.slane %v1878_v11, 4  ;;  %v1888_v51 = vrot.slane %v1887_v31, 4  ;;  %v1897_v23 = vrot.slane %v1896_v14, 4  ;;  %v1926_v20 = vrot.slane %v1925_v45, 4 }
 0x1bd   : > { %v1935_v7 = vrot.slane %v1934_v28, 4  ;;  %v1944_v34 = vrot.slane %v1943_v59, 4  ;;  %v1953_v32 = vrot.slane %v1952_v44, 4  ;;  %v1871_v49 = vadd.f32 %v1870_v58, %v1869_v19 }
 0x1be   : > { %v1880_v13 = vadd.f32 %v1879_v60, %v1878_v11  ;;  %v1889_v9 = vadd.f32 %v1888_v51, %v1887_v31  ;;  %v1898_v40 = vadd.f32 %v1897_v23, %v1896_v14  ;;  %v1927_v37 = vadd.f32 %v1926_v20, %v1925_v45 }
 0x1bf   : > { %v1936_v29 = vadd.f32 %v1935_v7, %v1934_v28  ;;  %v1945_v54 = vadd.f32 %v1944_v34, %v1943_v59  ;;  %v1954_v46 = vadd.f32 %v1953_v32, %v1952_v44  ;;  %v1872_v8 = vrot.slane %v1871_v49, 2 }
 0x1c0   : > { %v1881_v1 = vrot.slane %v1880_v13, 2  ;;  %v1890_v30 = vrot.slane %v1889_v9, 2  ;;  %v1899_v6 = vrot.slane %v1898_v40, 2  ;;  %v1928_v52 = vrot.slane %v1927_v37, 2 }
 0x1c1   : > { %v1937_v10 = vrot.slane %v1936_v29, 2  ;;  %v1946_v53 = vrot.slane %v1945_v54, 2  ;;  %v1955_v48 = vrot.slane %v1954_v46, 2  ;;  %v1873_v38 = vadd.f32 %v1872_v8, %v1871_v49 }
 0x1c2   : > { %v1882_v26 = vadd.f32 %v1881_v1, %v1880_v13  ;;  %v1891_v55 = vadd.f32 %v1890_v30, %v1889_v9  ;;  %v1900_v41 = vadd.f32 %v1899_v6, %v1898_v40  ;;  %v1929_v58 = vadd.f32 %v1928_v52, %v1927_v37  ;;  %v8639_v40 = vld [vmem:[#allocation21_spill] sm:$0xff]  ;;  %v8642_v1 = vld [vmem:[#allocation24_spill] sm:$0xff] }
 0x1c3   : > { %v1938_v60 = vadd.f32 %v1937_v10, %v1936_v29  ;;  %v1947_v51 = vadd.f32 %v1946_v53, %v1945_v54  ;;  %v1956_v23 = vadd.f32 %v1955_v48, %v1954_v46  ;;  %v1874_v20 = vrot.slane %v1873_v38, 1  ;;  %v8640_v29 = vld [vmem:[#allocation22_spill] sm:$0xff]  ;;  %v8641_v46 = vld [vmem:[#allocation23_spill] sm:$0xff]  ;;  %v8643_v6 = vld [vmem:[#allocation25_spill] sm:$0xff] }
 0x1c4   : > { %v1883_v19 = vrot.slane %v1882_v26, 1  ;;  %v1892_v11 = vrot.slane %v1891_v55, 1  ;;  %v1901_v31 = vrot.slane %v1900_v41, 1  ;;  %v1930_v14 = vrot.slane %v1929_v58, 1 }
 0x1c5   : > { %v1939_v45 = vrot.slane %v1938_v60, 1  ;;  %v1948_v28 = vrot.slane %v1947_v51, 1  ;;  %v1957_v59 = vrot.slane %v1956_v23, 1  ;;  %v6443_v44 = vadd.f32 %v1874_v20, %v1873_v38  ;;  %v8638_v38 = vld [vmem:[#allocation20_spill] sm:$0xff] }
 0x1c6   : > { %v6445_v7 = vadd.f32 %v1883_v19, %v1882_v26  ;;  %v6447_v34 = vadd.f32 %v1892_v11, %v1891_v55  ;;  %v6449_v32 = vadd.f32 %v1901_v31, %v1900_v41  ;;  %v6451_v49 = vadd.f32 %v1930_v14, %v1929_v58  ;;  %v8644_v58 = vld [vmem:[#allocation26_spill] sm:$0xff] }
 0x1c7   : > { %8626 = vst [vmem:[#allocation146_spill] sm:$0xff] %v6443_v44  ;;  %v6453_v53 = vadd.f32 %v1939_v45, %v1938_v60  ;;  %v6455_v48 = vadd.f32 %v1948_v28, %v1947_v51  ;;  %v6457_v10 = vadd.f32 %v1957_v59, %v1956_v23  ;;  %v6461_v13 = vmul.f32 %v6355_v42, %v6233_v63  ;;  %v8645_v51 = vld [vmem:[#allocation27_spill] sm:$0xff] }
 0x1c8   : > { %8627 = vst [vmem:[#allocation147_spill] sm:$0xff] %v6445_v7  ;;  %8628 = vst [vmem:[#allocation148_spill] sm:$0xff] %v6447_v34  ;;  %v6465_v26 = vmul.f32 %v6357_v43, %v6233_v63  ;;  %v6469_v41 = vmul.f32 %v6359_v39, %v6233_v63  ;;  %v6473_v55 = vmul.f32 %v6361_v0, %v6233_v63  ;;  %v8659_v7 = vld [vmem:[#allocation187_spill] sm:$0xff] }
 0x1c9   : > { %8629 = vst [vmem:[#allocation149_spill] sm:$0xff] %v6449_v32  ;;  %8630 = vst [vmem:[#allocation180_spill] sm:$0xff] %v6451_v49  ;;  %v2262_v9 = vmul.f32 %v8638_v38, %v8530_v24  ;;  %v2263_v37 = vmul.f32 %v8639_v40, %v8530_v24  ;;  %v2264_v54 = vmul.f32 %v8640_v29, %v8530_v24  ;;  %v8658_v32 = vld [vmem:[#allocation186_spill] sm:$0xff] }
 0x1ca   : > { %8631 = vst [vmem:[#allocation181_spill] sm:$0xff] %v6453_v53  ;;  %8632 = vst [vmem:[#allocation182_spill] sm:$0xff] %v6455_v48  ;;  %v2265_v8 = vmul.f32 %v8641_v46, %v8530_v24  ;;  %v2709_v30 = vmul.f32 %v8642_v1, %v8530_v24  ;;  %v2710_v52 = vmul.f32 %v8643_v6, %v8530_v24  ;;  %v8657_v53 = vld [vmem:[#allocation185_spill] sm:$0xff] }
 0x1cb   : > { %8633 = vst [vmem:[#allocation183_spill] sm:$0xff] %v6457_v10  ;;  %8634 = vst [vmem:[#allocation225_spill] sm:$0xff] %v6461_v13  ;;  %v2711_v60 = vmul.f32 %v8644_v58, %v8530_v24  ;;  %v2712_v23 = vmul.f32 %v8645_v51, %v8530_v24  ;;  %v2278_v20 = vadd.f32 %v2262_v9, %v8539_v62  ;;  %v8656_v10 = vld [vmem:[#allocation184_spill] sm:$0xff] }
 0x1cc   : > { %8635 = vst [vmem:[#allocation226_spill] sm:$0xff] %v6465_v26  ;;  %8636 = vst [vmem:[#allocation227_spill] sm:$0xff] %v6469_v41  ;;  %v2279_v19 = vadd.f32 %v2263_v37, %v8539_v62  ;;  %v2280_v11 = vadd.f32 %v2264_v54, %v8539_v62  ;;  %v2281_v31 = vadd.f32 %v2265_v8, %v8539_v62 }
 0x1cd   : > { %8637 = vst [vmem:[#allocation228_spill] sm:$0xff] %v6473_v55  ;;  %v2725_v14 = vadd.f32 %v2709_v30, %v8539_v62  ;;  %v2726_v45 = vadd.f32 %v2710_v52, %v8539_v62  ;;  %v2727_v28 = vadd.f32 %v2711_v60, %v8539_v62  ;;  %v2728_v59 = vadd.f32 %v2712_v23, %v8539_v62 }
 0x1ce   : > { %v6499_v38 = vmax.f32 %v2278_v20, 0.0  ;;  %v6501_v40 = vmax.f32 %v2279_v19, 0.0  ;;  %v6503_v29 = vmax.f32 %v2280_v11, 0.0  ;;  %v6505_v9 = vmax.f32 %v2281_v31, 0.0  ;;  %v8652_v20 = vld [vmem:[#allocation150_spill] sm:$0xff]  ;;  %v8653_v11 = vld [vmem:[#allocation151_spill] sm:$0xff] }
 0x1cf   : > { %v6507_v37 = vmax.f32 %v2725_v14, 0.0  ;;  %v6509_v54 = vmax.f32 %v2726_v45, 0.0  ;;  %v6511_v46 = vmax.f32 %v2727_v28, 0.0  ;;  %v6513_v8 = vmax.f32 %v2728_v59, 0.0  ;;  %v8654_v14 = vld [vmem:[#allocation152_spill] sm:$0xff]  ;;  %v8655_v28 = vld [vmem:[#allocation153_spill] sm:$0xff] }
 0x1d0   : > { %8646 = vst [vmem:[#allocation20_spill] sm:$0xff] %v6503_v29  ;;  %8647 = vst [vmem:[#allocation21_spill] sm:$0xff] %v6505_v9  ;;  %v2310_v1 = vmul.f32 %v6499_v38, %v8540_v36  ;;  %v2311_v30 = vmul.f32 %v6501_v40, %v8540_v36  ;;  %v2312_v6 = vmul.f32 %v6503_v29, %v8540_v36 }
 0x1d1   : > { %8648 = vst [vmem:[#allocation22_spill] sm:$0xff] %v6507_v37  ;;  %8649 = vst [vmem:[#allocation23_spill] sm:$0xff] %v6509_v54  ;;  %v2313_v52 = vmul.f32 %v6505_v9, %v8540_v36  ;;  %v2366_v58 = vmul.f32 %v6499_v38, %v8541_v18  ;;  %v2367_v60 = vmul.f32 %v6501_v40, %v8541_v18 }
 0x1d2   : > { %8650 = vst [vmem:[#allocation24_spill] sm:$0xff] %v6511_v46  ;;  %8651 = vst [vmem:[#allocation25_spill] sm:$0xff] %v6513_v8  ;;  %v2368_v51 = vmul.f32 %v6503_v29, %v8541_v18  ;;  %v2369_v23 = vmul.f32 %v6505_v9, %v8541_v18  ;;  %v2316_v19 = vadd.f32 %v8652_v20, %v2310_v1 }
 0x1d3   : > { %v2325_v31 = vadd.f32 %v8653_v11, %v2311_v30  ;;  %v2334_v45 = vadd.f32 %v8654_v14, %v2312_v6  ;;  %v2343_v59 = vadd.f32 %v8655_v28, %v2313_v52  ;;  %v2372_v48 = vadd.f32 %v8656_v10, %v2366_v58 }
 0x1d4   : > { %v2381_v49 = vadd.f32 %v8657_v53, %v2367_v60  ;;  %v2390_v34 = vadd.f32 %v8658_v32, %v2368_v51  ;;  %v2399_v44 = vadd.f32 %v8659_v7, %v2369_v23  ;;  %v2317_v55 = vrot.slane %v2316_v19, 4 }
 0x1d5   : > { %v2326_v41 = vrot.slane %v2325_v31, 4  ;;  %v2335_v26 = vrot.slane %v2334_v45, 4  ;;  %v2344_v13 = vrot.slane %v2343_v59, 4  ;;  %v2373_v0 = vrot.slane %v2372_v48, 4 }
 0x1d6   : > { %v2382_v1 = vrot.slane %v2381_v49, 4  ;;  %v2391_v20 = vrot.slane %v2390_v34, 4  ;;  %v2400_v30 = vrot.slane %v2399_v44, 4  ;;  %v2318_v11 = vadd.f32 %v2317_v55, %v2316_v19 }
 0x1d7   : > { %v2327_v6 = vadd.f32 %v2326_v41, %v2325_v31  ;;  %v2336_v14 = vadd.f32 %v2335_v26, %v2334_v45  ;;  %v2345_v52 = vadd.f32 %v2344_v13, %v2343_v59  ;;  %v2374_v28 = vadd.f32 %v2373_v0, %v2372_v48 }
 0x1d8   : > { %v2383_v10 = vadd.f32 %v2382_v1, %v2381_v49  ;;  %v2392_v58 = vadd.f32 %v2391_v20, %v2390_v34  ;;  %v2401_v53 = vadd.f32 %v2400_v30, %v2399_v44  ;;  %v2319_v60 = vrot.slane %v2318_v11, 2 }
 0x1d9   : > { %v2328_v32 = vrot.slane %v2327_v6, 2  ;;  %v2337_v51 = vrot.slane %v2336_v14, 2  ;;  %v2346_v7 = vrot.slane %v2345_v52, 2  ;;  %v2375_v23 = vrot.slane %v2374_v28, 2 }
 0x1da   : > { %v2384_v39 = vrot.slane %v2383_v10, 2  ;;  %v2393_v43 = vrot.slane %v2392_v58, 2  ;;  %v2402_v42 = vrot.slane %v2401_v53, 2  ;;  %v2320_v16 = vadd.f32 %v2319_v60, %v2318_v11 }
 0x1db   : > { %v2329_v4 = vadd.f32 %v2328_v32, %v2327_v6  ;;  %v2338_v21 = vadd.f32 %v2337_v51, %v2336_v14  ;;  %v2347_v17 = vadd.f32 %v2346_v7, %v2345_v52  ;;  %v2376_v55 = vadd.f32 %v2375_v23, %v2374_v28  ;;  %v8672_v32 = vld [vmem:[#allocation154_spill] sm:$0xff]  ;;  %v8673_v7 = vld [vmem:[#allocation155_spill] sm:$0xff] }
 0x1dc   : > { %v2385_v41 = vadd.f32 %v2384_v39, %v2383_v10  ;;  %v2394_v26 = vadd.f32 %v2393_v43, %v2392_v58  ;;  %v2403_v13 = vadd.f32 %v2402_v42, %v2401_v53  ;;  %v2321_v0 = vrot.slane %v2320_v16, 1 }
 0x1dd   : > { %v2330_v49 = vrot.slane %v2329_v4, 1  ;;  %v2339_v34 = vrot.slane %v2338_v21, 1  ;;  %v2348_v44 = vrot.slane %v2347_v17, 1  ;;  %v2377_v48 = vrot.slane %v2376_v55, 1 }
 0x1de   : > { %v2386_v19 = vrot.slane %v2385_v41, 1  ;;  %v2395_v31 = vrot.slane %v2394_v26, 1  ;;  %v2404_v45 = vrot.slane %v2403_v13, 1  ;;  %v6539_v59 = vadd.f32 %v2321_v0, %v2320_v16  ;;  %v8676_v0 = vld [vmem:[#allocation188_spill] sm:$0xff] }
 0x1df   : > { %v6541_v1 = vadd.f32 %v2330_v49, %v2329_v4  ;;  %v6543_v20 = vadd.f32 %v2339_v34, %v2338_v21  ;;  %v6545_v30 = vadd.f32 %v2348_v44, %v2347_v17  ;;  %v6547_v11 = vadd.f32 %v2377_v48, %v2376_v55  ;;  %v8674_v55 = vld [vmem:[#allocation156_spill] sm:$0xff]  ;;  %v8677_v34 = vld [vmem:[#allocation189_spill] sm:$0xff]  ;;  %v8678_v48 = vld [vmem:[#allocation190_spill] sm:$0xff] }
 0x1e0   : > { %8660 = vst [vmem:[#allocation26_spill] sm:$0xff] %v6539_v59  ;;  %v6549_v43 = vadd.f32 %v2386_v19, %v2385_v41  ;;  %v6551_v42 = vadd.f32 %v2395_v31, %v2394_v26  ;;  %v6553_v39 = vadd.f32 %v2404_v45, %v2403_v13  ;;  %v6557_v6 = vmul.f32 %v6499_v38, %v6233_v63  ;;  %v8675_v26 = vld [vmem:[#allocation157_spill] sm:$0xff]  ;;  %v8679_v31 = vld [vmem:[#allocation191_spill] sm:$0xff] }
 0x1e1   : > { %8661 = vst [vmem:[#allocation27_spill] sm:$0xff] %v6541_v1  ;;  %8662 = vst [vmem:[#allocation150_spill] sm:$0xff] %v6543_v20  ;;  %v6561_v4 = vmul.f32 %v6501_v40, %v6233_v63  ;;  %v6565_v17 = vmul.f32 %v6503_v29, %v6233_v63  ;;  %v6569_v21 = vmul.f32 %v6505_v9, %v6233_v63 }
 0x1e2   : > { %8663 = vst [vmem:[#allocation151_spill] sm:$0xff] %v6545_v30  ;;  %8664 = vst [vmem:[#allocation152_spill] sm:$0xff] %v6547_v11  ;;  %v2757_v16 = vmul.f32 %v6507_v37, %v8540_v36  ;;  %v2758_v14 = vmul.f32 %v6509_v54, %v8540_v36  ;;  %v2759_v52 = vmul.f32 %v6511_v46, %v8540_v36 }
 0x1e3   : > { %8665 = vst [vmem:[#allocation153_spill] sm:$0xff] %v6549_v43  ;;  %8666 = vst [vmem:[#allocation184_spill] sm:$0xff] %v6551_v42  ;;  %v2760_v28 = vmul.f32 %v6513_v8, %v8540_v36  ;;  %v2813_v10 = vmul.f32 %v6507_v37, %v8541_v18  ;;  %v2814_v58 = vmul.f32 %v6509_v54, %v8541_v18 }
 0x1e4   : > { %8667 = vst [vmem:[#allocation185_spill] sm:$0xff] %v6553_v39  ;;  %8668 = vst [vmem:[#allocation186_spill] sm:$0xff] %v6557_v6  ;;  %v2815_v53 = vmul.f32 %v6511_v46, %v8541_v18  ;;  %v2816_v60 = vmul.f32 %v6513_v8, %v8541_v18  ;;  %v2763_v51 = vadd.f32 %v8672_v32, %v2757_v16 }
 0x1e5   : > { %8669 = vst [vmem:[#allocation187_spill] sm:$0xff] %v6561_v4  ;;  %8670 = vst [vmem:[#allocation229_spill] sm:$0xff] %v6565_v17  ;;  %v2772_v23 = vadd.f32 %v8673_v7, %v2758_v14  ;;  %v2781_v41 = vadd.f32 %v8674_v55, %v2759_v52  ;;  %v2790_v13 = vadd.f32 %v8675_v26, %v2760_v28 }
 0x1e6   : > { %8671 = vst [vmem:[#allocation230_spill] sm:$0xff] %v6569_v21  ;;  %v2819_v49 = vadd.f32 %v8676_v0, %v2813_v10  ;;  %v2828_v44 = vadd.f32 %v8677_v34, %v2814_v58  ;;  %v2837_v19 = vadd.f32 %v8678_v48, %v2815_v53  ;;  %v2846_v45 = vadd.f32 %v8679_v31, %v2816_v60 }
 0x1e7   : > { %v2764_v39 = vrot.slane %v2763_v51, 4  ;;  %v2773_v42 = vrot.slane %v2772_v23, 4  ;;  %v2782_v43 = vrot.slane %v2781_v41, 4  ;;  %v2791_v11 = vrot.slane %v2790_v13, 4 }
 0x1e8   : > { %v2820_v30 = vrot.slane %v2819_v49, 4  ;;  %v2829_v16 = vrot.slane %v2828_v44, 4  ;;  %v2838_v32 = vrot.slane %v2837_v19, 4  ;;  %v2847_v14 = vrot.slane %v2846_v45, 4 }
 0x1e9   : > { %v2765_v7 = vadd.f32 %v2764_v39, %v2763_v51  ;;  %v2774_v52 = vadd.f32 %v2773_v42, %v2772_v23  ;;  %v2783_v55 = vadd.f32 %v2782_v43, %v2781_v41  ;;  %v2792_v28 = vadd.f32 %v2791_v11, %v2790_v13 }
 0x1ea   : > { %v2821_v26 = vadd.f32 %v2820_v30, %v2819_v49  ;;  %v2830_v10 = vadd.f32 %v2829_v16, %v2828_v44  ;;  %v2839_v0 = vadd.f32 %v2838_v32, %v2837_v19  ;;  %v2848_v58 = vadd.f32 %v2847_v14, %v2846_v45 }
 0x1eb   : > { %v2766_v34 = vrot.slane %v2765_v7, 2  ;;  %v2775_v53 = vrot.slane %v2774_v52, 2  ;;  %v2784_v48 = vrot.slane %v2783_v55, 2  ;;  %v2793_v60 = vrot.slane %v2792_v28, 2 }
 0x1ec   : > { %v2822_v31 = vrot.slane %v2821_v26, 2  ;;  %v2831_v20 = vrot.slane %v2830_v10, 2  ;;  %v2840_v1 = vrot.slane %v2839_v0, 2  ;;  %v2849_v59 = vrot.slane %v2848_v58, 2 }
 0x1ed   : > { %v2767_v21 = vadd.f32 %v2766_v34, %v2765_v7  ;;  %v2776_v17 = vadd.f32 %v2775_v53, %v2774_v52  ;;  %v2785_v4 = vadd.f32 %v2784_v48, %v2783_v55  ;;  %v2794_v6 = vadd.f32 %v2793_v60, %v2792_v28  ;;  %v8693_v28 = vld [vmem:[#allocation29_spill] sm:$0xff]  ;;  %v8696_v53 = vld [vmem:[#allocation32_spill] sm:$0xff] }
 0x1ee   : > { %v2823_v39 = vadd.f32 %v2822_v31, %v2821_v26  ;;  %v2832_v42 = vadd.f32 %v2831_v20, %v2830_v10  ;;  %v2841_v43 = vadd.f32 %v2840_v1, %v2839_v0  ;;  %v2850_v11 = vadd.f32 %v2849_v59, %v2848_v58  ;;  %v8694_v10 = vld [vmem:[#allocation30_spill] sm:$0xff]  ;;  %v8695_v58 = vld [vmem:[#allocation31_spill] sm:$0xff]  ;;  %v8697_v60 = vld [vmem:[#allocation33_spill] sm:$0xff] }
 0x1ef   : > { %v2768_v30 = vrot.slane %v2767_v21, 1  ;;  %v2777_v51 = vrot.slane %v2776_v17, 1  ;;  %v2786_v23 = vrot.slane %v2785_v4, 1  ;;  %v2795_v41 = vrot.slane %v2794_v6, 1 }
 0x1f0   : > { %v2824_v13 = vrot.slane %v2823_v39, 1  ;;  %v2833_v49 = vrot.slane %v2832_v42, 1  ;;  %v2842_v44 = vrot.slane %v2841_v43, 1  ;;  %v2851_v19 = vrot.slane %v2850_v11, 1 }
 0x1f1   : > { %v6595_v45 = vadd.f32 %v2768_v30, %v2767_v21  ;;  %v6597_v16 = vadd.f32 %v2777_v51, %v2776_v17  ;;  %v6599_v32 = vadd.f32 %v2786_v23, %v2785_v4  ;;  %v6601_v14 = vadd.f32 %v2795_v41, %v2794_v6  ;;  %v8692_v21 = vld [vmem:[#allocation28_spill] sm:$0xff] }
 0x1f2   : > { %v6603_v7 = vadd.f32 %v2824_v13, %v2823_v39  ;;  %v6605_v1 = vadd.f32 %v2833_v49, %v2832_v42  ;;  %v6607_v59 = vadd.f32 %v2842_v44, %v2841_v43  ;;  %v6609_v20 = vadd.f32 %v2851_v19, %v2850_v11  ;;  %v8698_v39 = vld [vmem:[#allocation34_spill] sm:$0xff]  ;;  %v8699_v43 = vld [vmem:[#allocation35_spill] sm:$0xff] }
 0x1f3   : > { %8680 = vst [vmem:[#allocation154_spill] sm:$0xff] %v6595_v45  ;;  %8681 = vst [vmem:[#allocation155_spill] sm:$0xff] %v6597_v16  ;;  %v6613_v52 = vmul.f32 %v6507_v37, %v6233_v63  ;;  %v6617_v17 = vmul.f32 %v6509_v54, %v6233_v63  ;;  %v6621_v6 = vmul.f32 %v6511_v46, %v6233_v63 }
 0x1f4   : > { %8682 = vst [vmem:[#allocation156_spill] sm:$0xff] %v6599_v32  ;;  %8683 = vst [vmem:[#allocation157_spill] sm:$0xff] %v6601_v14  ;;  %v6625_v4 = vmul.f32 %v6513_v8, %v6233_v63  ;;  %v3156_v55 = vmul.f32 %v8692_v21, %v8530_v24  ;;  %v3157_v26 = vmul.f32 %v8693_v28, %v8530_v24  ;;  %v8707_v14 = vld [vmem:[#allocation195_spill] sm:$0xff] }
 0x1f5   : > { %8684 = vst [vmem:[#allocation188_spill] sm:$0xff] %v6603_v7  ;;  %8685 = vst [vmem:[#allocation189_spill] sm:$0xff] %v6605_v1  ;;  %v3158_v0 = vmul.f32 %v8694_v10, %v8530_v24  ;;  %v3159_v34 = vmul.f32 %v8695_v58, %v8530_v24  ;;  %v3603_v48 = vmul.f32 %v8696_v53, %v8530_v24  ;;  %v8706_v1 = vld [vmem:[#allocation194_spill] sm:$0xff] }
 0x1f6   : > { %8686 = vst [vmem:[#allocation190_spill] sm:$0xff] %v6607_v59  ;;  %8687 = vst [vmem:[#allocation191_spill] sm:$0xff] %v6609_v20  ;;  %v3604_v31 = vmul.f32 %v8697_v60, %v8530_v24  ;;  %v3605_v42 = vmul.f32 %v8698_v39, %v8530_v24  ;;  %v3606_v11 = vmul.f32 %v8699_v43, %v8530_v24  ;;  %v8700_v43 = vld [vmem:[#allocation158_spill] sm:$0xff]  ;;  %v8705_v20 = vld [vmem:[#allocation193_spill] sm:$0xff] }
 0x1f7   : > { %8688 = vst [vmem:[#allocation231_spill] sm:$0xff] %v6613_v52  ;;  %8689 = vst [vmem:[#allocation232_spill] sm:$0xff] %v6617_v17  ;;  %v3172_v30 = vadd.f32 %v3156_v55, %v8539_v62  ;;  %v3173_v51 = vadd.f32 %v3157_v26, %v8539_v62  ;;  %v3174_v23 = vadd.f32 %v3158_v0, %v8539_v62 }
 0x1f8   : > { %8690 = vst [vmem:[#allocation233_spill] sm:$0xff] %v6621_v6  ;;  %8691 = vst [vmem:[#allocation234_spill] sm:$0xff] %v6625_v4  ;;  %v3175_v41 = vadd.f32 %v3159_v34, %v8539_v62  ;;  %v3619_v13 = vadd.f32 %v3603_v48, %v8539_v62  ;;  %v3620_v49 = vadd.f32 %v3604_v31, %v8539_v62 }
 0x1f9   : > { %v3621_v44 = vadd.f32 %v3605_v42, %v8539_v62  ;;  %v3622_v19 = vadd.f32 %v3606_v11, %v8539_v62  ;;  %v6651_v21 = vmax.f32 %v3172_v30, 0.0  ;;  %v6653_v28 = vmax.f32 %v3173_v51, 0.0  ;;  %v8701_v30 = vld [vmem:[#allocation159_spill] sm:$0xff] }
 0x1fa   : > { %v6655_v24 = vmax.f32 %v3174_v23, 0.0  ;;  %v6657_v55 = vmax.f32 %v3175_v41, 0.0  ;;  %v6659_v26 = vmax.f32 %v3619_v13, 0.0  ;;  %v6661_v10 = vmax.f32 %v3620_v49, 0.0  ;;  %v8702_v23 = vld [vmem:[#allocation160_spill] sm:$0xff]  ;;  %v8703_v13 = vld [vmem:[#allocation161_spill] sm:$0xff] }
 0x1fb   : > { %v6663_v0 = vmax.f32 %v3621_v44, 0.0  ;;  %v6665_v58 = vmax.f32 %v3622_v19, 0.0  ;;  %v3204_v34 = vmul.f32 %v6651_v21, %v8540_v36  ;;  %v3205_v62 = vmul.f32 %v6653_v28, %v8540_v36  ;;  %v8704_v44 = vld [vmem:[#allocation192_spill] sm:$0xff] }
 0x1fc   : > { %v3206_v53 = vmul.f32 %v6655_v24, %v8540_v36  ;;  %v3207_v48 = vmul.f32 %v6657_v55, %v8540_v36  ;;  %v3260_v60 = vmul.f32 %v6651_v21, %v8541_v18  ;;  %v3261_v31 = vmul.f32 %v6653_v28, %v8541_v18 }
 0x1fd   : > { %v3262_v39 = vmul.f32 %v6655_v24, %v8541_v18  ;;  %v3263_v42 = vmul.f32 %v6657_v55, %v8541_v18  ;;  %v3210_v11 = vadd.f32 %v8700_v43, %v3204_v34  ;;  %v3219_v51 = vadd.f32 %v8701_v30, %v3205_v62 }
 0x1fe   : > { %v3228_v41 = vadd.f32 %v8702_v23, %v3206_v53  ;;  %v3237_v49 = vadd.f32 %v8703_v13, %v3207_v48  ;;  %v3266_v19 = vadd.f32 %v8704_v44, %v3260_v60  ;;  %v3275_v59 = vadd.f32 %v8705_v20, %v3261_v31 }
 0x1ff   : > { %v3284_v7 = vadd.f32 %v8706_v1, %v3262_v39  ;;  %v3293_v32 = vadd.f32 %v8707_v14, %v3263_v42  ;;  %v3211_v16 = vrot.slane %v3210_v11, 4  ;;  %v3220_v45 = vrot.slane %v3219_v51, 4 }
 0x200   : > { %v3229_v4 = vrot.slane %v3228_v41, 4  ;;  %v3238_v6 = vrot.slane %v3237_v49, 4  ;;  %v3267_v17 = vrot.slane %v3266_v19, 4  ;;  %v3276_v34 = vrot.slane %v3275_v59, 4 }
 0x201   : > { %v3285_v43 = vrot.slane %v3284_v7, 4  ;;  %v3294_v62 = vrot.slane %v3293_v32, 4  ;;  %v3212_v30 = vadd.f32 %v3211_v16, %v3210_v11  ;;  %v3221_v53 = vadd.f32 %v3220_v45, %v3219_v51 }
 0x202   : > { %v3230_v23 = vadd.f32 %v3229_v4, %v3228_v41  ;;  %v3239_v48 = vadd.f32 %v3238_v6, %v3237_v49  ;;  %v3268_v13 = vadd.f32 %v3267_v17, %v3266_v19  ;;  %v3277_v60 = vadd.f32 %v3276_v34, %v3275_v59 }
 0x203   : > { %v3286_v44 = vadd.f32 %v3285_v43, %v3284_v7  ;;  %v3295_v20 = vadd.f32 %v3294_v62, %v3293_v32  ;;  %v3213_v31 = vrot.slane %v3212_v30, 2  ;;  %v3222_v1 = vrot.slane %v3221_v53, 2 }
 0x204   : > { %v3231_v39 = vrot.slane %v3230_v23, 2  ;;  %v3240_v14 = vrot.slane %v3239_v48, 2  ;;  %v3269_v42 = vrot.slane %v3268_v13, 2  ;;  %v3278_v52 = vrot.slane %v3277_v60, 2 }
 0x205   : > { %v3287_v8 = vrot.slane %v3286_v44, 2  ;;  %v3296_v46 = vrot.slane %v3295_v20, 2  ;;  %v3214_v54 = vadd.f32 %v3213_v31, %v3212_v30  ;;  %v3223_v37 = vadd.f32 %v3222_v1, %v3221_v53  ;;  %v8718_v1 = vld [vmem:[#allocation162_spill] sm:$0xff] }
 0x206   : > { %v3232_v9 = vadd.f32 %v3231_v39, %v3230_v23  ;;  %v3241_v29 = vadd.f32 %v3240_v14, %v3239_v48  ;;  %v3270_v16 = vadd.f32 %v3269_v42, %v3268_v13  ;;  %v3279_v45 = vadd.f32 %v3278_v52, %v3277_v60  ;;  %v8719_v14 = vld [vmem:[#allocation163_spill] sm:$0xff] }
 0x207   : > { %v3288_v4 = vadd.f32 %v3287_v8, %v3286_v44  ;;  %v3297_v6 = vadd.f32 %v3296_v46, %v3295_v20  ;;  %v3215_v17 = vrot.slane %v3214_v54, 1  ;;  %v3224_v59 = vrot.slane %v3223_v37, 1 }
 0x208   : > { %v3233_v7 = vrot.slane %v3232_v9, 1  ;;  %v3242_v32 = vrot.slane %v3241_v29, 1  ;;  %v3271_v11 = vrot.slane %v3270_v16, 1  ;;  %v3280_v51 = vrot.slane %v3279_v45, 1 }
 0x209   : > { %v3289_v41 = vrot.slane %v3288_v4, 1  ;;  %v3298_v49 = vrot.slane %v3297_v6, 1  ;;  %v6691_v19 = vadd.f32 %v3215_v17, %v3214_v54  ;;  %v6693_v34 = vadd.f32 %v3224_v59, %v3223_v37  ;;  %v8723_v59 = vld [vmem:[#allocation197_spill] sm:$0xff] }
 0x20a   : > { %v6695_v43 = vadd.f32 %v3233_v7, %v3232_v9  ;;  %v6697_v62 = vadd.f32 %v3242_v32, %v3241_v29  ;;  %v6699_v30 = vadd.f32 %v3271_v11, %v3270_v16  ;;  %v6701_v8 = vadd.f32 %v3280_v51, %v3279_v45  ;;  %v8720_v16 = vld [vmem:[#allocation164_spill] sm:$0xff]  ;;  %v8724_v32 = vld [vmem:[#allocation198_spill] sm:$0xff]  ;;  %v8725_v51 = vld [vmem:[#allocation199_spill] sm:$0xff] }
 0x20b   : > { %8708 = vst [vmem:[#allocation28_spill] sm:$0xff] %v6691_v19  ;;  %8709 = vst [vmem:[#allocation29_spill] sm:$0xff] %v6693_v34  ;;  %v6703_v46 = vadd.f32 %v3289_v41, %v3288_v4  ;;  %v6705_v52 = vadd.f32 %v3298_v49, %v3297_v6  ;;  %v6709_v53 = vmul.f32 %v6651_v21, %v6233_v63  ;;  %v8721_v4 = vld [vmem:[#allocation165_spill] sm:$0xff]  ;;  %v8722_v6 = vld [vmem:[#allocation196_spill] sm:$0xff] }
 0x20c   : > { %8710 = vst [vmem:[#allocation30_spill] sm:$0xff] %v6695_v43  ;;  %8711 = vst [vmem:[#allocation31_spill] sm:$0xff] %v6697_v62  ;;  %v6713_v37 = vmul.f32 %v6653_v28, %v6233_v63  ;;  %v6717_v29 = vmul.f32 %v6655_v24, %v6233_v63  ;;  %v6721_v9 = vmul.f32 %v6657_v55, %v6233_v63 }
 0x20d   : > { %8712 = vst [vmem:[#allocation32_spill] sm:$0xff] %v6699_v30  ;;  %8713 = vst [vmem:[#allocation33_spill] sm:$0xff] %v6701_v8  ;;  %v3651_v54 = vmul.f32 %v6659_v26, %v8540_v36  ;;  %v3652_v23 = vmul.f32 %v6661_v10, %v8540_v36  ;;  %v3653_v48 = vmul.f32 %v6663_v0, %v8540_v36 }
 0x20e   : > { %8714 = vst [vmem:[#allocation34_spill] sm:$0xff] %v6703_v46  ;;  %8715 = vst [vmem:[#allocation35_spill] sm:$0xff] %v6705_v52  ;;  %v3654_v13 = vmul.f32 %v6665_v58, %v8540_v36  ;;  %v3707_v60 = vmul.f32 %v6659_v26, %v8541_v18  ;;  %v3708_v44 = vmul.f32 %v6661_v10, %v8541_v18 }
 0x20f   : > { %8716 = vst [vmem:[#allocation158_spill] sm:$0xff] %v6717_v29  ;;  %8717 = vst [vmem:[#allocation159_spill] sm:$0xff] %v6721_v9  ;;  %v3709_v20 = vmul.f32 %v6663_v0, %v8541_v18  ;;  %v3710_v31 = vmul.f32 %v6665_v58, %v8541_v18  ;;  %v3657_v39 = vadd.f32 %v8718_v1, %v3651_v54 }
 0x210   : > { %v3666_v42 = vadd.f32 %v8719_v14, %v3652_v23  ;;  %v3675_v45 = vadd.f32 %v8720_v16, %v3653_v48  ;;  %v3684_v36 = vadd.f32 %v8721_v4, %v3654_v13  ;;  %v3713_v17 = vadd.f32 %v8722_v6, %v3707_v60 }
 0x211   : > { %v3722_v7 = vadd.f32 %v8723_v59, %v3708_v44  ;;  %v3731_v11 = vadd.f32 %v8724_v32, %v3709_v20  ;;  %v3740_v41 = vadd.f32 %v8725_v51, %v3710_v31  ;;  %v3658_v49 = vrot.slane %v3657_v39, 4 }
 0x212   : > { %v3667_v52 = vrot.slane %v3666_v42, 4  ;;  %v3676_v46 = vrot.slane %v3675_v45, 4  ;;  %v3685_v18 = vrot.slane %v3684_v36, 4  ;;  %v3714_v8 = vrot.slane %v3713_v17, 4 }
 0x213   : > { %v3723_v54 = vrot.slane %v3722_v7, 4  ;;  %v3732_v1 = vrot.slane %v3731_v11, 4  ;;  %v3741_v23 = vrot.slane %v3740_v41, 4  ;;  %v3659_v14 = vadd.f32 %v3658_v49, %v3657_v39 }
 0x214   : > { %v3668_v48 = vadd.f32 %v3667_v52, %v3666_v42  ;;  %v3677_v16 = vadd.f32 %v3676_v46, %v3675_v45  ;;  %v3686_v13 = vadd.f32 %v3685_v18, %v3684_v36  ;;  %v3715_v4 = vadd.f32 %v3714_v8, %v3713_v17 }
 0x215   : > { %v3724_v60 = vadd.f32 %v3723_v54, %v3722_v7  ;;  %v3733_v6 = vadd.f32 %v3732_v1, %v3731_v11  ;;  %v3742_v44 = vadd.f32 %v3741_v23, %v3740_v41  ;;  %v3660_v59 = vrot.slane %v3659_v14, 2 }
 0x216   : > { %v3669_v20 = vrot.slane %v3668_v48, 2  ;;  %v3678_v32 = vrot.slane %v3677_v16, 2  ;;  %v3687_v31 = vrot.slane %v3686_v13, 2  ;;  %v3716_v51 = vrot.slane %v3715_v4, 2 }
 0x217   : > { %v3725_v30 = vrot.slane %v3724_v60, 2  ;;  %v3734_v62 = vrot.slane %v3733_v6, 2  ;;  %v3743_v43 = vrot.slane %v3742_v44, 2  ;;  %v3661_v34 = vadd.f32 %v3660_v59, %v3659_v14  ;;  %v6755_v14 = vpop.permute.xlu1 %627 }
 0x218   : > { %v3670_v19 = vadd.f32 %v3669_v20, %v3668_v48  ;;  %v3679_v9 = vadd.f32 %v3678_v32, %v3677_v16  ;;  %v3688_v29 = vadd.f32 %v3687_v31, %v3686_v13  ;;  %v3717_v39 = vadd.f32 %v3716_v51, %v3715_v4  ;;  %v8737_v32 = vld [vmem:[#allocation68_spill] sm:$0xff] }
 0x219   : > { %v3726_v52 = vadd.f32 %v3725_v30, %v3724_v60  ;;  %v3735_v46 = vadd.f32 %v3734_v62, %v3733_v6  ;;  %v3744_v42 = vadd.f32 %v3743_v43, %v3742_v44  ;;  %v3662_v8 = vrot.slane %v3661_v34, 1 }
 0x21a   : > { %v3671_v45 = vrot.slane %v3670_v19, 1  ;;  %v3680_v36 = vrot.slane %v3679_v9, 1  ;;  %v3689_v17 = vrot.slane %v3688_v29, 1  ;;  %v3718_v7 = vrot.slane %v3717_v39, 1 }
 0x21b   : > { %v3727_v11 = vrot.slane %v3726_v52, 1  ;;  %v3736_v41 = vrot.slane %v3735_v46, 1  ;;  %v3745_v49 = vrot.slane %v3744_v42, 1  ;;  %v6747_v18 = vadd.f32 %v3662_v8, %v3661_v34 }
 0x21c   : > { %v6749_v54 = vadd.f32 %v3671_v45, %v3670_v19  ;;  %v6751_v1 = vadd.f32 %v3680_v36, %v3679_v9  ;;  %v6753_v23 = vadd.f32 %v3689_v17, %v3688_v29  ;;  %v6757_v62 = vadd.f32 %v3718_v7, %v3717_v39 }
 0x21d   : > { %8726 = vst [vmem:[#allocation160_spill] sm:$0xff] %v6747_v18  ;;  %v6759_v43 = vadd.f32 %v3727_v11, %v3726_v52  ;;  %v6761_v30 = vadd.f32 %v3736_v41, %v3735_v46  ;;  %v6763_v48 = vadd.f32 %v3745_v49, %v3744_v42  ;;  %v6767_v34 = vmul.f32 %v6659_v26, %v6233_v63 }
 0x21e   : > { %8727 = vst [vmem:[#allocation161_spill] sm:$0xff] %v6749_v54  ;;  %8728 = vst [vmem:[#allocation192_spill] sm:$0xff] %v6751_v1  ;;  %v6771_v19 = vmul.f32 %v6661_v10, %v6233_v63  ;;  %v6775_v29 = vmul.f32 %v6663_v0, %v6233_v63  ;;  %v6779_v9 = vmul.f32 %v6665_v58, %v6233_v63 }
 0x21f   : > { %8729 = vst [vmem:[#allocation193_spill] sm:$0xff] %v6753_v23  ;;  %8730 = vst [vmem:[#allocation194_spill] sm:$0xff] %v6757_v62  ;;  %v642_v16 = vmul.f32 %v6755_v14, %v6193_v3  ;;  %v643_v13 = vmul.f32 %v6755_v14, %v6195_v22  ;;  %v644_v4 = vmul.f32 %v6755_v14, %v6197_v27 }
 0x220   : > { %8731 = vst [vmem:[#allocation195_spill] sm:$0xff] %v6759_v43  ;;  %8732 = vst [vmem:[#allocation162_spill] sm:$0xff] %v6761_v30  ;;  %v645_v60 = vmul.f32 %v6755_v14, %v6199_v2  ;;  %v1105_v6 = vmul.f32 %v6201_v56, %v6755_v14  ;;  %v1106_v44 = vmul.f32 %v6203_v15, %v6755_v14 }
 0x221   : > { %8733 = vst [vmem:[#allocation163_spill] sm:$0xff] %v6763_v48  ;;  %8734 = vst [vmem:[#allocation164_spill] sm:$0xff] %v6771_v19  ;;  %v1107_v63 = vmul.f32 %v6205_v47, %v6755_v14  ;;  %v1108_v3 = vmul.f32 %v6207_v25, %v6755_v14  ;;  %v648_v22 = vadd.f32 %v6026_v12, %v642_v16 }
 0x222   : > { %8735 = vst [vmem:[#allocation165_spill] sm:$0xff] %v6775_v29  ;;  %8736 = vst [vmem:[#allocation196_spill] sm:$0xff] %v6779_v9  ;;  %v657_v59 = vadd.f32 %v6029_v57, %v643_v13  ;;  %v666_v27 = vadd.f32 %v6032_v33, %v644_v4  ;;  %v675_v2 = vadd.f32 %v6035_v50, %v645_v60 }
 0x223   : > { %v1111_v20 = vadd.f32 %v6038_v35, %v1105_v6  ;;  %v1120_v56 = vadd.f32 %v6041_v5, %v1106_v44  ;;  %v1129_v15 = vadd.f32 %v6044_v61, %v1107_v63  ;;  %v1138_v31 = vadd.f32 %v8737_v32, %v1108_v3 }
 0x224   : > { %v649_v47 = vrot.slane %v648_v22, 4  ;;  %v658_v51 = vrot.slane %v657_v59, 4  ;;  %v667_v39 = vrot.slane %v666_v27, 4  ;;  %v676_v25 = vrot.slane %v675_v2, 4 }
 0x225   : > { %v1112_v52 = vrot.slane %v1111_v20, 4  ;;  %v1121_v12 = vrot.slane %v1120_v56, 4  ;;  %v1130_v46 = vrot.slane %v1129_v15, 4  ;;  %v1139_v57 = vrot.slane %v1138_v31, 4 }
 0x226   : > { %v650_v42 = vadd.f32 %v649_v47, %v648_v22  ;;  %v659_v33 = vadd.f32 %v658_v51, %v657_v59  ;;  %v668_v8 = vadd.f32 %v667_v39, %v666_v27  ;;  %v677_v50 = vadd.f32 %v676_v25, %v675_v2 }
 0x227   : > { %v1113_v45 = vadd.f32 %v1112_v52, %v1111_v20  ;;  %v1122_v35 = vadd.f32 %v1121_v12, %v1120_v56  ;;  %v1131_v36 = vadd.f32 %v1130_v46, %v1129_v15  ;;  %v1140_v5 = vadd.f32 %v1139_v57, %v1138_v31 }
 0x228   : > { %v651_v17 = vrot.slane %v650_v42, 2  ;;  %v660_v61 = vrot.slane %v659_v33, 2  ;;  %v669_v7 = vrot.slane %v668_v8, 2  ;;  %v678_v11 = vrot.slane %v677_v50, 2 }
 0x229   : > { %v1114_v41 = vrot.slane %v1113_v45, 2  ;;  %v1123_v49 = vrot.slane %v1122_v35, 2  ;;  %v1132_v16 = vrot.slane %v1131_v36, 2  ;;  %v1141_v13 = vrot.slane %v1140_v5, 2 }
 0x22a   : > { %v652_v4 = vadd.f32 %v651_v17, %v650_v42  ;;  %v661_v60 = vadd.f32 %v660_v61, %v659_v33  ;;  %v670_v6 = vadd.f32 %v669_v7, %v668_v8  ;;  %v679_v44 = vadd.f32 %v678_v11, %v677_v50  ;;  %v8746_v33 = vld [vmem:[#allocation171_spill] sm:$0xff]  ;;  %v8747_v50 = vld [vmem:[#allocation172_spill] sm:$0xff]  ;;  %v8751_v11 = vld [vmem:[#allocation13_spill] sm:$0xff] }
 0x22b   : > { %v1115_v63 = vadd.f32 %v1114_v41, %v1113_v45  ;;  %v1124_v3 = vadd.f32 %v1123_v49, %v1122_v35  ;;  %v1133_v22 = vadd.f32 %v1132_v16, %v1131_v36  ;;  %v1142_v59 = vadd.f32 %v1141_v13, %v1140_v5  ;;  %v8748_v35 = vld [vmem:[#allocation173_spill] sm:$0xff]  ;;  %v8749_v5 = vld [vmem:[#allocation174_spill] sm:$0xff]  ;;  %v8750_v61 = vld [vmem:[#allocation12_spill] sm:$0xff] }
 0x22c   : > { %v653_v27 = vrot.slane %v652_v4, 1  ;;  %v662_v2 = vrot.slane %v661_v60, 1  ;;  %v671_v20 = vrot.slane %v670_v6, 1  ;;  %v680_v56 = vrot.slane %v679_v44, 1  ;;  %v8752_v49 = vld [vmem:[#allocation14_spill] sm:$0xff]  ;;  %v8753_v13 = vld [vmem:[#allocation15_spill] sm:$0xff] }
 0x22d   : > { %v1116_v15 = vrot.slane %v1115_v63, 1  ;;  %v1125_v32 = vrot.slane %v1124_v3, 1  ;;  %v1134_v31 = vrot.slane %v1133_v22, 1  ;;  %v1143_v47 = vrot.slane %v1142_v59, 1 }
 0x22e   : > { %v6805_v51 = vadd.f32 %v653_v27, %v652_v4  ;;  %v6807_v39 = vadd.f32 %v662_v2, %v661_v60  ;;  %v6809_v25 = vadd.f32 %v671_v20, %v670_v6  ;;  %v6811_v52 = vadd.f32 %v680_v56, %v679_v44  ;;  %v8754_v60 = vld [vmem:[#allocation69_spill] sm:$0xff]  ;;  %v8755_v44 = vld [vmem:[#allocation70_spill] sm:$0xff] }
 0x22f   : > { %v6813_v12 = vadd.f32 %v1116_v15, %v1115_v63  ;;  %v6815_v46 = vadd.f32 %v1125_v32, %v1124_v3  ;;  %v6817_v57 = vadd.f32 %v1134_v31, %v1133_v22  ;;  %v6819_v42 = vadd.f32 %v1143_v47, %v1142_v59  ;;  %v8756_v3 = vld [vmem:[#allocation71_spill] sm:$0xff]  ;;  %v8757_v59 = vld [vmem:[#allocation72_spill] sm:$0xff]  ;;  %v8758_v2 = vld [vmem:[#allocation73_spill] sm:$0xff] }
 0x230   : > { %8738 = vst [vmem:[#allocation197_spill] sm:$0xff] %v6805_v51  ;;  %8739 = vst [vmem:[#allocation198_spill] sm:$0xff] %v6807_v39  ;;  %v1552_v8 = vmul.f32 %v8746_v33, %v6755_v14  ;;  %v1553_v45 = vmul.f32 %v8747_v50, %v6755_v14  ;;  %v1554_v36 = vmul.f32 %v8748_v35, %v6755_v14  ;;  %v8759_v56 = vld [vmem:[#allocation74_spill] sm:$0xff]  ;;  %v8760_v32 = vld [vmem:[#allocation75_spill] sm:$0xff] }
 0x231   : > { %8740 = vst [vmem:[#allocation199_spill] sm:$0xff] %v6809_v25  ;;  %8741 = vst [vmem:[#allocation68_spill] sm:$0xff] %v6811_v52  ;;  %v1555_v17 = vmul.f32 %v8749_v5, %v6755_v14  ;;  %v1999_v7 = vmul.f32 %v8750_v61, %v6755_v14  ;;  %v2000_v41 = vmul.f32 %v8751_v11, %v6755_v14  ;;  %v8761_v47 = vld [vmem:[#allocation76_spill] sm:$0xff] }
 0x232   : > { %8742 = vst [vmem:[#allocation235_spill] sm:$0xff] %v6813_v12  ;;  %8743 = vst [vmem:[#allocation236_spill] sm:$0xff] %v6815_v46  ;;  %v2001_v16 = vmul.f32 %v8752_v49, %v6755_v14  ;;  %v2002_v4 = vmul.f32 %v8753_v13, %v6755_v14  ;;  %v1558_v6 = vadd.f32 %v8754_v60, %v1552_v8  ;;  %v8881_v46 = vld [vmem:[#allocation48_spill] sm:$0xff]  ;;  %v8882_v12 = vld [vmem:[#allocation166_spill] sm:$0xff] }
 0x233   : > { %8744 = vst [vmem:[#allocation237_spill] sm:$0xff] %v6817_v57  ;;  %8745 = vst [vmem:[#allocation238_spill] sm:$0xff] %v6819_v42  ;;  %v1567_v63 = vadd.f32 %v8755_v44, %v1553_v45  ;;  %v1576_v22 = vadd.f32 %v8756_v3, %v1554_v36  ;;  %v1585_v27 = vadd.f32 %v8757_v59, %v1555_v17 }
 0x234   : > { %v2005_v20 = vadd.f32 %v8758_v2, %v1999_v7  ;;  %v2014_v15 = vadd.f32 %v8759_v56, %v2000_v41  ;;  %v2023_v31 = vadd.f32 %v8760_v32, %v2001_v16  ;;  %v2032_v33 = vadd.f32 %v8761_v47, %v2002_v4 }
 0x235   : > { %v1559_v50 = vrot.slane %v1558_v6, 4  ;;  %v1568_v35 = vrot.slane %v1567_v63, 4  ;;  %v1577_v5 = vrot.slane %v1576_v22, 4  ;;  %v1586_v61 = vrot.slane %v1585_v27, 4 }
 0x236   : > { %v2006_v11 = vrot.slane %v2005_v20, 4  ;;  %v2015_v8 = vrot.slane %v2014_v15, 4  ;;  %v2024_v49 = vrot.slane %v2023_v31, 4  ;;  %v2033_v45 = vrot.slane %v2032_v33, 4 }
 0x237   : > { %v1560_v13 = vadd.f32 %v1559_v50, %v1558_v6  ;;  %v1569_v36 = vadd.f32 %v1568_v35, %v1567_v63  ;;  %v1578_v60 = vadd.f32 %v1577_v5, %v1576_v22  ;;  %v1587_v17 = vadd.f32 %v1586_v61, %v1585_v27 }
 0x238   : > { %v2007_v44 = vadd.f32 %v2006_v11, %v2005_v20  ;;  %v2016_v7 = vadd.f32 %v2015_v8, %v2014_v15  ;;  %v2025_v3 = vadd.f32 %v2024_v49, %v2023_v31  ;;  %v2034_v41 = vadd.f32 %v2033_v45, %v2032_v33 }
 0x239   : > { %v1561_v59 = vrot.slane %v1560_v13, 2  ;;  %v1570_v16 = vrot.slane %v1569_v36, 2  ;;  %v1579_v2 = vrot.slane %v1578_v60, 2  ;;  %v1588_v4 = vrot.slane %v1587_v17, 2 }
 0x23a   : > { %v2008_v56 = vrot.slane %v2007_v44, 2  ;;  %v2017_v32 = vrot.slane %v2016_v7, 2  ;;  %v2026_v47 = vrot.slane %v2025_v3, 2  ;;  %v2035_v48 = vrot.slane %v2034_v41, 2 }
 0x23b   : > { %v1562_v30 = vadd.f32 %v1561_v59, %v1560_v13  ;;  %v1571_v43 = vadd.f32 %v1570_v16, %v1569_v36  ;;  %v1580_v62 = vadd.f32 %v1579_v2, %v1578_v60  ;;  %v1589_v23 = vadd.f32 %v1588_v4, %v1587_v17  ;;  %v8774_v16 = vld [vmem:[#allocation24_spill] sm:$0xff] }
 0x23c   : > { %v2009_v6 = vadd.f32 %v2008_v56, %v2007_v44  ;;  %v2018_v63 = vadd.f32 %v2017_v32, %v2016_v7  ;;  %v2027_v22 = vadd.f32 %v2026_v47, %v2025_v3  ;;  %v2036_v27 = vadd.f32 %v2035_v48, %v2034_v41  ;;  %v8772_v7 = vld [vmem:[#allocation22_spill] sm:$0xff]  ;;  %v8773_v41 = vld [vmem:[#allocation23_spill] sm:$0xff]  ;;  %v8776_v56 = vld [vmem:[#allocation77_spill] sm:$0xff] }
 0x23d   : > { %v1563_v20 = vrot.slane %v1562_v30, 1  ;;  %v1572_v15 = vrot.slane %v1571_v43, 1  ;;  %v1581_v31 = vrot.slane %v1580_v62, 1  ;;  %v1590_v33 = vrot.slane %v1589_v23, 1  ;;  %v8777_v32 = vld [vmem:[#allocation78_spill] sm:$0xff] }
 0x23e   : > { %v2010_v50 = vrot.slane %v2009_v6, 1  ;;  %v2019_v35 = vrot.slane %v2018_v63, 1  ;;  %v2028_v5 = vrot.slane %v2027_v22, 1  ;;  %v2037_v61 = vrot.slane %v2036_v27, 1 }
 0x23f   : > { %v6845_v11 = vadd.f32 %v1563_v20, %v1562_v30  ;;  %v6847_v8 = vadd.f32 %v1572_v15, %v1571_v43  ;;  %v6849_v49 = vadd.f32 %v1581_v31, %v1580_v62  ;;  %v6851_v45 = vadd.f32 %v1590_v33, %v1589_v23  ;;  %v8770_v43 = vld [vmem:[#allocation20_spill] sm:$0xff]  ;;  %v8771_v23 = vld [vmem:[#allocation21_spill] sm:$0xff] }
 0x240   : > { %v6853_v13 = vadd.f32 %v2010_v50, %v2009_v6  ;;  %v6855_v36 = vadd.f32 %v2019_v35, %v2018_v63  ;;  %v6857_v48 = vadd.f32 %v2028_v5, %v2027_v22  ;;  %v6859_v60 = vadd.f32 %v2037_v61, %v2036_v27  ;;  %v8778_v6 = vld [vmem:[#allocation216_spill] sm:$0xff]  ;;  %v8779_v22 = vld [vmem:[#allocation79_spill] sm:$0xff]  ;;  %v8781_v31 = vld [vmem:[#allocation81_spill] sm:$0xff] }
 0x241   : > { %8762 = vst [vmem:[#allocation171_spill] sm:$0xff] %v6845_v11  ;;  %8763 = vst [vmem:[#allocation172_spill] sm:$0xff] %v6847_v8  ;;  %v2446_v17 = vmul.f32 %v6499_v38, %v6755_v14  ;;  %v2447_v30 = vmul.f32 %v6501_v40, %v6755_v14  ;;  %v2448_v62 = vmul.f32 %v8770_v43, %v6755_v14  ;;  %v8775_v38 = vld [vmem:[#allocation25_spill] sm:$0xff]  ;;  %v8780_v20 = vld [vmem:[#allocation80_spill] sm:$0xff] }
 0x242   : > { %8764 = vst [vmem:[#allocation173_spill] sm:$0xff] %v6849_v49  ;;  %8765 = vst [vmem:[#allocation174_spill] sm:$0xff] %v6851_v45  ;;  %v2449_v44 = vmul.f32 %v8771_v23, %v6755_v14  ;;  %v2893_v3 = vmul.f32 %v8772_v7, %v6755_v14  ;;  %v2894_v59 = vmul.f32 %v8773_v41, %v6755_v14  ;;  %v8782_v50 = vld [vmem:[#allocation82_spill] sm:$0xff]  ;;  %v8783_v5 = vld [vmem:[#allocation83_spill] sm:$0xff] }
 0x243   : > { %8766 = vst [vmem:[#allocation12_spill] sm:$0xff] %v6853_v13  ;;  %8767 = vst [vmem:[#allocation13_spill] sm:$0xff] %v6855_v36  ;;  %v2895_v2 = vmul.f32 %v8774_v16, %v6755_v14  ;;  %v2896_v4 = vmul.f32 %v8775_v38, %v6755_v14  ;;  %v2452_v40 = vadd.f32 %v8776_v56, %v2446_v17 }
 0x244   : > { %8768 = vst [vmem:[#allocation14_spill] sm:$0xff] %v6857_v48  ;;  %8769 = vst [vmem:[#allocation15_spill] sm:$0xff] %v6859_v60  ;;  %v2461_v47 = vadd.f32 %v8777_v32, %v2447_v30  ;;  %v2470_v63 = vadd.f32 %v8778_v6, %v2448_v62  ;;  %v2479_v27 = vadd.f32 %v8779_v22, %v2449_v44 }
 0x245   : > { %v2899_v15 = vadd.f32 %v8780_v20, %v2893_v3  ;;  %v2908_v33 = vadd.f32 %v8781_v31, %v2894_v59  ;;  %v2917_v35 = vadd.f32 %v8782_v50, %v2895_v2  ;;  %v2926_v61 = vadd.f32 %v8783_v5, %v2896_v4 }
 0x246   : > { %v2453_v43 = vrot.slane %v2452_v40, 4  ;;  %v2462_v23 = vrot.slane %v2461_v47, 4  ;;  %v2471_v7 = vrot.slane %v2470_v63, 4  ;;  %v2480_v41 = vrot.slane %v2479_v27, 4 }
 0x247   : > { %v2900_v16 = vrot.slane %v2899_v15, 4  ;;  %v2909_v17 = vrot.slane %v2908_v33, 4  ;;  %v2918_v38 = vrot.slane %v2917_v35, 4  ;;  %v2927_v30 = vrot.slane %v2926_v61, 4 }
 0x248   : > { %v2454_v56 = vadd.f32 %v2453_v43, %v2452_v40  ;;  %v2463_v62 = vadd.f32 %v2462_v23, %v2461_v47  ;;  %v2472_v32 = vadd.f32 %v2471_v7, %v2470_v63  ;;  %v2481_v44 = vadd.f32 %v2480_v41, %v2479_v27 }
 0x249   : > { %v2901_v6 = vadd.f32 %v2900_v16, %v2899_v15  ;;  %v2910_v3 = vadd.f32 %v2909_v17, %v2908_v33  ;;  %v2919_v22 = vadd.f32 %v2918_v38, %v2917_v35  ;;  %v2928_v59 = vadd.f32 %v2927_v30, %v2926_v61 }
 0x24a   : > { %v2455_v20 = vrot.slane %v2454_v56, 2  ;;  %v2464_v2 = vrot.slane %v2463_v62, 2  ;;  %v2473_v31 = vrot.slane %v2472_v32, 2  ;;  %v2482_v4 = vrot.slane %v2481_v44, 2 }
 0x24b   : > { %v2902_v50 = vrot.slane %v2901_v6, 2  ;;  %v2911_v5 = vrot.slane %v2910_v3, 2  ;;  %v2920_v1 = vrot.slane %v2919_v22, 2  ;;  %v2929_v54 = vrot.slane %v2928_v59, 2 }
 0x24c   : > { %v2456_v18 = vadd.f32 %v2455_v20, %v2454_v56  ;;  %v2465_v60 = vadd.f32 %v2464_v2, %v2463_v62  ;;  %v2474_v48 = vadd.f32 %v2473_v31, %v2472_v32  ;;  %v2483_v36 = vadd.f32 %v2482_v4, %v2481_v44  ;;  %v8795_v2 = vld [vmem:[#allocation220_spill] sm:$0xff]  ;;  %v8796_v31 = vld [vmem:[#allocation221_spill] sm:$0xff] }
 0x24d   : > { %v2903_v40 = vadd.f32 %v2902_v50, %v2901_v6  ;;  %v2912_v47 = vadd.f32 %v2911_v5, %v2910_v3  ;;  %v2921_v63 = vadd.f32 %v2920_v1, %v2919_v22  ;;  %v2930_v27 = vadd.f32 %v2929_v54, %v2928_v59  ;;  %v8792_v3 = vld [vmem:[#allocation217_spill] sm:$0xff]  ;;  %v8793_v22 = vld [vmem:[#allocation218_spill] sm:$0xff]  ;;  %v8798_v5 = vld [vmem:[#allocation223_spill] sm:$0xff] }
 0x24e   : > { %v2457_v15 = vrot.slane %v2456_v18, 1  ;;  %v2466_v33 = vrot.slane %v2465_v60, 1  ;;  %v2475_v35 = vrot.slane %v2474_v48, 1  ;;  %v2484_v61 = vrot.slane %v2483_v36, 1 }
 0x24f   : > { %v2904_v43 = vrot.slane %v2903_v40, 1  ;;  %v2913_v23 = vrot.slane %v2912_v47, 1  ;;  %v2922_v7 = vrot.slane %v2921_v63, 1  ;;  %v2931_v41 = vrot.slane %v2930_v27, 1 }
 0x250   : > { %v6885_v16 = vadd.f32 %v2457_v15, %v2456_v18  ;;  %v6887_v17 = vadd.f32 %v2466_v33, %v2465_v60  ;;  %v6889_v38 = vadd.f32 %v2475_v35, %v2474_v48  ;;  %v6891_v30 = vadd.f32 %v2484_v61, %v2483_v36 }
 0x251   : > { %v6893_v56 = vadd.f32 %v2904_v43, %v2903_v40  ;;  %v6895_v1 = vadd.f32 %v2913_v23, %v2912_v47  ;;  %v6897_v54 = vadd.f32 %v2922_v7, %v2921_v63  ;;  %v6899_v62 = vadd.f32 %v2931_v41, %v2930_v27  ;;  %v8799_v40 = vld [vmem:[#allocation224_spill] sm:$0xff] }
 0x252   : > { %8784 = vst [vmem:[#allocation69_spill] sm:$0xff] %v6885_v16  ;;  %8785 = vst [vmem:[#allocation70_spill] sm:$0xff] %v6887_v17  ;;  %v3340_v32 = vmul.f32 %v6651_v21, %v6755_v14  ;;  %v3341_v18 = vmul.f32 %v6653_v28, %v6755_v14  ;;  %v3342_v48 = vmul.f32 %v6655_v24, %v6755_v14  ;;  %v8794_v24 = vld [vmem:[#allocation219_spill] sm:$0xff] }
 0x253   : > { %8786 = vst [vmem:[#allocation71_spill] sm:$0xff] %v6889_v38  ;;  %8787 = vst [vmem:[#allocation72_spill] sm:$0xff] %v6891_v30  ;;  %v3343_v36 = vmul.f32 %v6657_v55, %v6755_v14  ;;  %v3787_v60 = vmul.f32 %v6659_v26, %v6755_v14  ;;  %v3788_v44 = vmul.f32 %v6661_v10, %v6755_v14  ;;  %v8797_v26 = vld [vmem:[#allocation222_spill] sm:$0xff] }
 0x254   : > { %8788 = vst [vmem:[#allocation73_spill] sm:$0xff] %v6893_v56  ;;  %8789 = vst [vmem:[#allocation74_spill] sm:$0xff] %v6895_v1  ;;  %v3789_v6 = vmul.f32 %v6663_v0, %v6755_v14  ;;  %v3790_v21 = vmul.f32 %v6665_v58, %v6755_v14  ;;  %v3346_v28 = vadd.f32 %v8792_v3, %v3340_v32 }
 0x255   : > { %8790 = vst [vmem:[#allocation75_spill] sm:$0xff] %v6897_v54  ;;  %8791 = vst [vmem:[#allocation76_spill] sm:$0xff] %v6899_v62  ;;  %v3355_v59 = vadd.f32 %v8793_v22, %v3341_v18  ;;  %v3364_v20 = vadd.f32 %v8794_v24, %v3342_v48  ;;  %v3373_v55 = vadd.f32 %v8795_v2, %v3343_v36  ;;  %v8853_v62 = vld [vmem:[#allocation205_spill] sm:$0xff]  ;;  %v8854_v54 = vld [vmem:[#allocation206_spill] sm:$0xff] }
 0x256   : > { %v3793_v4 = vadd.f32 %v8796_v31, %v3787_v60  ;;  %v3802_v50 = vadd.f32 %v8797_v26, %v3788_v44  ;;  %v3811_v10 = vadd.f32 %v8798_v5, %v3789_v6  ;;  %v3820_v47 = vadd.f32 %v8799_v40, %v3790_v21 }
 0x257   : > { %v3347_v0 = vrot.slane %v3346_v28, 4  ;;  %v3356_v63 = vrot.slane %v3355_v59, 4  ;;  %v3365_v27 = vrot.slane %v3364_v20, 4  ;;  %v3374_v58 = vrot.slane %v3373_v55, 4 }
 0x258   : > { %v3794_v14 = vrot.slane %v3793_v4, 4  ;;  %v3803_v15 = vrot.slane %v3802_v50, 4  ;;  %v3812_v33 = vrot.slane %v3811_v10, 4  ;;  %v3821_v35 = vrot.slane %v3820_v47, 4 }
 0x259   : > { %v3348_v61 = vadd.f32 %v3347_v0, %v3346_v28  ;;  %v3357_v43 = vadd.f32 %v3356_v63, %v3355_v59  ;;  %v3366_v23 = vadd.f32 %v3365_v27, %v3364_v20  ;;  %v3375_v7 = vadd.f32 %v3374_v58, %v3373_v55  ;;  %v6925_v58 = vpop.permute.xlu1 %719 }
 0x25a   : > { %v3795_v41 = vadd.f32 %v3794_v14, %v3793_v4  ;;  %v3804_v32 = vadd.f32 %v3803_v15, %v3802_v50  ;;  %v3813_v18 = vadd.f32 %v3812_v33, %v3811_v10  ;;  %v3822_v48 = vadd.f32 %v3821_v35, %v3820_v47 }
 0x25b   : > { %v3349_v36 = vrot.slane %v3348_v61, 2  ;;  %v3358_v60 = vrot.slane %v3357_v43, 2  ;;  %v3367_v44 = vrot.slane %v3366_v23, 2  ;;  %v3376_v6 = vrot.slane %v3375_v7, 2 }
 0x25c   : > { %v3796_v21 = vrot.slane %v3795_v41, 2  ;;  %v3805_v3 = vrot.slane %v3804_v32, 2  ;;  %v3814_v22 = vrot.slane %v3813_v18, 2  ;;  %v3823_v24 = vrot.slane %v3822_v48, 2 }
 0x25d   : > { %v3350_v2 = vadd.f32 %v3349_v36, %v3348_v61  ;;  %v3359_v31 = vadd.f32 %v3358_v60, %v3357_v43  ;;  %v3368_v26 = vadd.f32 %v3367_v44, %v3366_v23  ;;  %v3377_v5 = vadd.f32 %v3376_v6, %v3375_v7  ;;  %v8810_v36 = vld [vmem:[#allocation102_spill] sm:$0xff]  ;;  %v8811_v44 = vld [vmem:[#allocation103_spill] sm:$0xff]  ;;  %v7079_v56 = vpop.permute.xlu1 %723 }
 0x25e   : > { %v3797_v28 = vadd.f32 %v3796_v21, %v3795_v41  ;;  %v3806_v59 = vadd.f32 %v3805_v3, %v3804_v32  ;;  %v3815_v20 = vadd.f32 %v3814_v22, %v3813_v18  ;;  %v3824_v55 = vadd.f32 %v3823_v24, %v3822_v48  ;;  %v8808_v41 = vld [vmem:[#allocation100_spill] sm:$0xff]  ;;  %v8809_v18 = vld [vmem:[#allocation101_spill] sm:$0xff] }
 0x25f   : > { %v3351_v4 = vrot.slane %v3350_v2, 1  ;;  %v3360_v50 = vrot.slane %v3359_v31, 1  ;;  %v3369_v10 = vrot.slane %v3368_v26, 1  ;;  %v3378_v40 = vrot.slane %v3377_v5, 1  ;;  %v8812_v21 = vld [vmem:[#allocation104_spill] sm:$0xff]  ;;  %v8813_v22 = vld [vmem:[#allocation105_spill] sm:$0xff] }
 0x260   : > { %v3798_v47 = vrot.slane %v3797_v28, 1  ;;  %v3807_v0 = vrot.slane %v3806_v59, 1  ;;  %v3816_v63 = vrot.slane %v3815_v20, 1  ;;  %v3825_v27 = vrot.slane %v3824_v55, 1 }
 0x261   : > { %v6927_v14 = vadd.f32 %v3351_v4, %v3350_v2  ;;  %v6929_v15 = vadd.f32 %v3360_v50, %v3359_v31  ;;  %v6931_v33 = vadd.f32 %v3369_v10, %v3368_v26  ;;  %v6933_v35 = vadd.f32 %v3378_v40, %v3377_v5  ;;  %v8814_v2 = vld [vmem:[#allocation106_spill] sm:$0xff]  ;;  %v8815_v26 = vld [vmem:[#allocation107_spill] sm:$0xff] }
 0x262   : > { %v6935_v61 = vadd.f32 %v3798_v47, %v3797_v28  ;;  %v6937_v43 = vadd.f32 %v3807_v0, %v3806_v59  ;;  %v6939_v23 = vadd.f32 %v3816_v63, %v3815_v20  ;;  %v6941_v7 = vadd.f32 %v3825_v27, %v3824_v55  ;;  %v8816_v28 = vld [vmem:[#allocation84_spill] sm:$0xff]  ;;  %v8817_v20 = vld [vmem:[#allocation85_spill] sm:$0xff]  ;;  %v8818_v4 = vld [vmem:[#allocation86_spill] sm:$0xff] }
 0x263   : > { %8800 = vst [vmem:[#allocation20_spill] sm:$0xff] %v6927_v14  ;;  %8801 = vst [vmem:[#allocation21_spill] sm:$0xff] %v6929_v15  ;;  %v734_v32 = vmul.f32 %v6925_v58, %v8808_v41  ;;  %v735_v48 = vmul.f32 %v6925_v58, %v8809_v18  ;;  %v736_v60 = vmul.f32 %v6925_v58, %v8810_v36  ;;  %v8819_v10 = vld [vmem:[#allocation87_spill] sm:$0xff]  ;;  %v8820_v47 = vld [vmem:[#allocation88_spill] sm:$0xff] }
 0x264   : > { %8802 = vst [vmem:[#allocation22_spill] sm:$0xff] %v6931_v33  ;;  %8803 = vst [vmem:[#allocation23_spill] sm:$0xff] %v6933_v35  ;;  %v737_v6 = vmul.f32 %v6925_v58, %v8811_v44  ;;  %v1181_v3 = vmul.f32 %v8812_v21, %v6925_v58  ;;  %v1182_v24 = vmul.f32 %v8813_v22, %v6925_v58  ;;  %v8821_v63 = vld [vmem:[#allocation89_spill] sm:$0xff]  ;;  %v8822_v41 = vld [vmem:[#allocation90_spill] sm:$0xff] }
 0x265   : > { %8804 = vst [vmem:[#allocation24_spill] sm:$0xff] %v6935_v61  ;;  %8805 = vst [vmem:[#allocation25_spill] sm:$0xff] %v6937_v43  ;;  %v1183_v31 = vmul.f32 %v8814_v2, %v6925_v58  ;;  %v1184_v5 = vmul.f32 %v8815_v26, %v6925_v58  ;;  %v6960_v59 = vadd.f32 %v734_v32, %v8816_v28  ;;  %v8823_v32 = vld [vmem:[#allocation91_spill] sm:$0xff]  ;;  %v8848_v61 = vld [vmem:[#allocation200_spill] sm:$0xff] }
 0x266   : > { %8806 = vst [vmem:[#allocation77_spill] sm:$0xff] %v6939_v23  ;;  %8807 = vst [vmem:[#allocation78_spill] sm:$0xff] %v6941_v7  ;;  %v6963_v55 = vadd.f32 %v735_v48, %v8817_v20  ;;  %v6966_v50 = vadd.f32 %v736_v60, %v8818_v4  ;;  %v6969_v40 = vadd.f32 %v737_v6, %v8819_v10  ;;  %v8824_v48 = vld [vmem:[#allocation108_spill] sm:$0xff]  ;;  %v8825_v60 = vld [vmem:[#allocation109_spill] sm:$0xff] }
 0x267   : > { %v6972_v0 = vadd.f32 %v1181_v3, %v8820_v47  ;;  %v6975_v27 = vadd.f32 %v1182_v24, %v8821_v63  ;;  %v6978_v18 = vadd.f32 %v1183_v31, %v8822_v41  ;;  %v6981_v36 = vadd.f32 %v1184_v5, %v8823_v32  ;;  %v8826_v6 = vld [vmem:[#allocation110_spill] sm:$0xff]  ;;  %v8827_v3 = vld [vmem:[#allocation111_spill] sm:$0xff]  ;;  %v8828_v24 = vld [vmem:[#allocation112_spill] sm:$0xff] }
 0x268   : > { %v1628_v44 = vmul.f32 %v8824_v48, %v6925_v58  ;;  %v1629_v21 = vmul.f32 %v8825_v60, %v6925_v58  ;;  %v1630_v22 = vmul.f32 %v8826_v6, %v6925_v58  ;;  %v1631_v2 = vmul.f32 %v8827_v3, %v6925_v58  ;;  %v8829_v31 = vld [vmem:[#allocation113_spill] sm:$0xff]  ;;  %v8830_v5 = vld [vmem:[#allocation114_spill] sm:$0xff]  ;;  %v8831_v4 = vld [vmem:[#allocation115_spill] sm:$0xff] }
 0x269   : > { %v2075_v26 = vmul.f32 %v8828_v24, %v6925_v58  ;;  %v2076_v28 = vmul.f32 %v8829_v31, %v6925_v58  ;;  %v2077_v20 = vmul.f32 %v8830_v5, %v6925_v58  ;;  %v2078_v10 = vmul.f32 %v8831_v4, %v6925_v58  ;;  %v8832_v47 = vld [vmem:[#allocation92_spill] sm:$0xff]  ;;  %v8833_v41 = vld [vmem:[#allocation93_spill] sm:$0xff]  ;;  %v8834_v48 = vld [vmem:[#allocation94_spill] sm:$0xff] }
 0x26a   : > { %v7000_v63 = vadd.f32 %v1628_v44, %v8832_v47  ;;  %v7003_v32 = vadd.f32 %v1629_v21, %v8833_v41  ;;  %v7006_v60 = vadd.f32 %v1630_v22, %v8834_v48  ;;  %v8835_v6 = vld [vmem:[#allocation95_spill] sm:$0xff]  ;;  %v8836_v24 = vld [vmem:[#allocation96_spill] sm:$0xff]  ;;  %v8837_v7 = vld [vmem:[#allocation97_spill] sm:$0xff] }
 0x26b   : > { %v7009_v3 = vadd.f32 %v1631_v2, %v8835_v6  ;;  %v7012_v31 = vadd.f32 %v2075_v26, %v8836_v24  ;;  %v7015_v5 = vadd.f32 %v2076_v28, %v8837_v7  ;;  %v8838_v23 = vld [vmem:[#allocation98_spill] sm:$0xff]  ;;  %v8839_v44 = vld [vmem:[#allocation99_spill] sm:$0xff]  ;;  %v8840_v21 = vld [vmem:[#allocation116_spill] sm:$0xff] }
 0x26c   : > { %v7018_v4 = vadd.f32 %v2077_v20, %v8838_v23  ;;  %v7021_v47 = vadd.f32 %v2078_v10, %v8839_v44  ;;  %v2522_v41 = vmul.f32 %v8840_v21, %v6925_v58  ;;  %v8841_v22 = vld [vmem:[#allocation117_spill] sm:$0xff]  ;;  %v8842_v2 = vld [vmem:[#allocation118_spill] sm:$0xff]  ;;  %v8843_v26 = vld [vmem:[#allocation119_spill] sm:$0xff] }
 0x26d   : > { %v2523_v48 = vmul.f32 %v8841_v22, %v6925_v58  ;;  %v2524_v6 = vmul.f32 %v8842_v2, %v6925_v58  ;;  %v2525_v24 = vmul.f32 %v8843_v26, %v6925_v58  ;;  %v8844_v7 = vld [vmem:[#allocation120_spill] sm:$0xff]  ;;  %v8845_v23 = vld [vmem:[#allocation121_spill] sm:$0xff]  ;;  %v8846_v10 = vld [vmem:[#allocation122_spill] sm:$0xff] }
 0x26e   : > { %v2969_v28 = vmul.f32 %v8844_v7, %v6925_v58  ;;  %v2970_v20 = vmul.f32 %v8845_v23, %v6925_v58  ;;  %v2971_v44 = vmul.f32 %v8846_v10, %v6925_v58  ;;  %v8847_v21 = vld [vmem:[#allocation123_spill] sm:$0xff]  ;;  %v7040_v22 = vadd.f32 %v2522_v41, %v8848_v61  ;;  %v8849_v35 = vld [vmem:[#allocation201_spill] sm:$0xff]  ;;  %v8850_v33 = vld [vmem:[#allocation202_spill] sm:$0xff] }
 0x26f   : > { %v2972_v43 = vmul.f32 %v8847_v21, %v6925_v58  ;;  %v7043_v2 = vadd.f32 %v2523_v48, %v8849_v35  ;;  %v7046_v26 = vadd.f32 %v2524_v6, %v8850_v33  ;;  %v8851_v15 = vld [vmem:[#allocation203_spill] sm:$0xff]  ;;  %v8852_v14 = vld [vmem:[#allocation204_spill] sm:$0xff]  ;;  %v8857_v33 = vld [vmem:[#allocation125_spill] sm:$0xff] }
 0x270   : > { %v7049_v7 = vadd.f32 %v2525_v24, %v8851_v15  ;;  %v7052_v23 = vadd.f32 %v2969_v28, %v8852_v14  ;;  %v7055_v10 = vadd.f32 %v2970_v20, %v8853_v62  ;;  %v7058_v21 = vadd.f32 %v2971_v44, %v8854_v54  ;;  %v8855_v61 = vld [vmem:[#allocation207_spill] sm:$0xff]  ;;  %v8856_v35 = vld [vmem:[#allocation124_spill] sm:$0xff]  ;;  %v8858_v15 = vld [vmem:[#allocation126_spill] sm:$0xff] }
 0x271   : > { %v7061_v41 = vadd.f32 %v2972_v43, %v8855_v61  ;;  %v3416_v48 = vmul.f32 %v8856_v35, %v6925_v58  ;;  %v3417_v6 = vmul.f32 %v8857_v33, %v6925_v58  ;;  %v3418_v24 = vmul.f32 %v8858_v15, %v6925_v58  ;;  %v8859_v14 = vld [vmem:[#allocation127_spill] sm:$0xff]  ;;  %v8860_v62 = vld [vmem:[#allocation128_spill] sm:$0xff]  ;;  %v8861_v54 = vld [vmem:[#allocation129_spill] sm:$0xff] }
 0x272   : > { %v3419_v28 = vmul.f32 %v8859_v14, %v6925_v58  ;;  %v3863_v20 = vmul.f32 %v8860_v62, %v6925_v58  ;;  %v3864_v44 = vmul.f32 %v8861_v54, %v6925_v58  ;;  %v8862_v43 = vld [vmem:[#allocation130_spill] sm:$0xff]  ;;  %v8863_v35 = vld [vmem:[#allocation131_spill] sm:$0xff]  ;;  %v8864_v33 = vld [vmem:[#allocation208_spill] sm:$0xff] }
 0x273   : > { %v3865_v61 = vmul.f32 %v8862_v43, %v6925_v58  ;;  %v3866_v1 = vmul.f32 %v8863_v35, %v6925_v58  ;;  %v7082_v30 = vadd.f32 %v3416_v48, %v8864_v33  ;;  %v8865_v15 = vld [vmem:[#allocation209_spill] sm:$0xff]  ;;  %v8866_v14 = vld [vmem:[#allocation210_spill] sm:$0xff]  ;;  %v8867_v62 = vld [vmem:[#allocation211_spill] sm:$0xff] }
 0x274   : > { %v7085_v38 = vadd.f32 %v3417_v6, %v8865_v15  ;;  %v7088_v17 = vadd.f32 %v3418_v24, %v8866_v14  ;;  %v7091_v16 = vadd.f32 %v3419_v28, %v8867_v62  ;;  %v8868_v54 = vld [vmem:[#allocation212_spill] sm:$0xff]  ;;  %v8869_v43 = vld [vmem:[#allocation213_spill] sm:$0xff]  ;;  %v8870_v58 = vld [vmem:[#allocation214_spill] sm:$0xff] }
 0x275   : > { %v7094_v13 = vadd.f32 %v3863_v20, %v8868_v54  ;;  %v7097_v45 = vadd.f32 %v3864_v44, %v8869_v43  ;;  %v7100_v35 = vadd.f32 %v3865_v61, %v8870_v58  ;;  %v8871_v48 = vld [vmem:[#allocation215_spill] sm:$0xff]  ;;  %v8872_v6 = vld [vmem:[#allocation37_spill] sm:$0xff]  ;;  %v8873_v24 = vld [vmem:[#allocation38_spill] sm:$0xff] }
 0x276   : > { %v7103_v33 = vadd.f32 %v3866_v1, %v8871_v48  ;;  %v738_v15 = vmul.f32 %v7079_v56, %v8872_v6  ;;  %v739_v14 = vmul.f32 %v7079_v56, %v8873_v24  ;;  %v8874_v28 = vld [vmem:[#allocation39_spill] sm:$0xff]  ;;  %v8875_v20 = vld [vmem:[#allocation40_spill] sm:$0xff]  ;;  %v8876_v44 = vld [vmem:[#allocation41_spill] sm:$0xff] }
 0x277   : > { %v740_v62 = vmul.f32 %v7079_v56, %v8874_v28  ;;  %v741_v54 = vmul.f32 %v7079_v56, %v8875_v20  ;;  %v1185_v43 = vmul.f32 %v8876_v44, %v7079_v56  ;;  %v8877_v61 = vld [vmem:[#allocation42_spill] sm:$0xff]  ;;  %v8878_v1 = vld [vmem:[#allocation43_spill] sm:$0xff]  ;;  %v8879_v6 = vld [vmem:[#allocation132_spill] sm:$0xff] }
 0x278   : > { %v1186_v58 = vmul.f32 %v8877_v61, %v7079_v56  ;;  %v1187_v48 = vmul.f32 %v8878_v1, %v7079_v56  ;;  %v1188_v49 = vmul.f32 %v8879_v6, %v7079_v56  ;;  %v747_v24 = vadd.f32 %v6960_v59, %v738_v15  ;;  %v8880_v1 = vld [vmem:[#allocation11_spill] sm:$0xff] }
 0x279   : > { %v756_v8 = vadd.f32 %v6963_v55, %v739_v14  ;;  %v765_v28 = vadd.f32 %v6966_v50, %v740_v62  ;;  %v774_v20 = vadd.f32 %v6969_v40, %v741_v54  ;;  %v1194_v11 = vadd.f32 %v6972_v0, %v1185_v43  ;;  %v8883_v15 = vld [vmem:[#allocation179_spill] sm:$0xff]  ;;  %v8884_v14 = vld [vmem:[#allocation138_spill] sm:$0xff]  ;;  %v8886_v54 = vld [vmem:[#allocation140_spill] sm:$0xff] }
 0x27a   : > { %v1203_v44 = vadd.f32 %v6975_v27, %v1186_v58  ;;  %v1212_v61 = vadd.f32 %v6978_v18, %v1187_v48  ;;  %v1221_v42 = vadd.f32 %v6981_v36, %v1188_v49  ;;  %v748_v57 = vadd.f32 %v747_v24, %v8880_v1  ;;  %v8885_v62 = vld [vmem:[#allocation139_spill] sm:$0xff]  ;;  %v8887_v43 = vld [vmem:[#allocation141_spill] sm:$0xff] }
 0x27b   : > { %v757_v6 = vadd.f32 %v756_v8, %v8881_v46  ;;  %v766_v59 = vadd.f32 %v765_v28, %v8882_v12  ;;  %v775_v55 = vadd.f32 %v774_v20, %v8883_v15  ;;  %v1195_v50 = vadd.f32 %v1194_v11, %v8884_v14 }
 0x27c   : > { %v1204_v40 = vadd.f32 %v1203_v44, %v8885_v62  ;;  %v1213_v0 = vadd.f32 %v1212_v61, %v8886_v54  ;;  %v1222_v27 = vadd.f32 %v1221_v42, %v8887_v43  ;;  %v749_v58 = vrot.slane %v748_v57, 4 }
 0x27d   : > { %v758_v18 = vrot.slane %v757_v6, 4  ;;  %v767_v48 = vrot.slane %v766_v59, 4  ;;  %v776_v49 = vrot.slane %v775_v55, 4  ;;  %v1196_v36 = vrot.slane %v1195_v50, 4 }
 0x27e   : > { %v1205_v24 = vrot.slane %v1204_v40, 4  ;;  %v1214_v1 = vrot.slane %v1213_v0, 4  ;;  %v1223_v46 = vrot.slane %v1222_v27, 4  ;;  %v750_v8 = vadd.f32 %v749_v58, %v748_v57 }
 0x27f   : > { %v759_v12 = vadd.f32 %v758_v18, %v757_v6  ;;  %v768_v28 = vadd.f32 %v767_v48, %v766_v59  ;;  %v777_v20 = vadd.f32 %v776_v49, %v775_v55  ;;  %v1197_v15 = vadd.f32 %v1196_v36, %v1195_v50 }
 0x280   : > { %v1206_v11 = vadd.f32 %v1205_v24, %v1204_v40  ;;  %v1215_v14 = vadd.f32 %v1214_v1, %v1213_v0  ;;  %v1224_v44 = vadd.f32 %v1223_v46, %v1222_v27  ;;  %v751_v62 = vrot.slane %v750_v8, 2 }
 0x281   : > { %v760_v61 = vrot.slane %v759_v12, 2  ;;  %v769_v54 = vrot.slane %v768_v28, 2  ;;  %v778_v42 = vrot.slane %v777_v20, 2  ;;  %v1198_v43 = vrot.slane %v1197_v15, 2 }
 0x282   : > { %v1207_v52 = vrot.slane %v1206_v11, 2  ;;  %v1216_v25 = vrot.slane %v1215_v14, 2  ;;  %v1225_v39 = vrot.slane %v1224_v44, 2  ;;  %v752_v51 = vadd.f32 %v751_v62, %v750_v8 }
 0x283   : > { %v761_v9 = vadd.f32 %v760_v61, %v759_v12  ;;  %v770_v29 = vadd.f32 %v769_v54, %v768_v28  ;;  %v779_v19 = vadd.f32 %v778_v42, %v777_v20  ;;  %v1199_v57 = vadd.f32 %v1198_v43, %v1197_v15  ;;  %v8888_v12 = vld [vmem:[#allocation44_spill] sm:$0xff]  ;;  %v8894_v61 = vld [vmem:[#allocation51_spill] sm:$0xff]  ;;  %v8895_v42 = vld [vmem:[#allocation133_spill] sm:$0xff] }
 0x284   : > { %v1208_v6 = vadd.f32 %v1207_v52, %v1206_v11  ;;  %v1217_v59 = vadd.f32 %v1216_v25, %v1215_v14  ;;  %v1226_v55 = vadd.f32 %v1225_v39, %v1224_v44  ;;  %v753_v50 = vrot.slane %v752_v51, 1  ;;  %v8892_v11 = vld [vmem:[#allocation49_spill] sm:$0xff]  ;;  %v8893_v44 = vld [vmem:[#allocation50_spill] sm:$0xff] }
 0x285   : > { %v762_v40 = vrot.slane %v761_v9, 1  ;;  %v771_v0 = vrot.slane %v770_v29, 1  ;;  %v780_v27 = vrot.slane %v779_v19, 1  ;;  %v1200_v58 = vrot.slane %v1199_v57, 1 }
 0x286   : > { %v1209_v18 = vrot.slane %v1208_v6, 1  ;;  %v1218_v48 = vrot.slane %v1217_v59, 1  ;;  %v1227_v49 = vrot.slane %v1226_v55, 1  ;;  %v7137_v36 = vadd.f32 %v753_v50, %v752_v51  ;;  %v8889_v51 = vld [vmem:[#allocation45_spill] sm:$0xff] }
 0x287   : > { %v7139_v24 = vadd.f32 %v762_v40, %v761_v9  ;;  %v7141_v1 = vadd.f32 %v771_v0, %v770_v29  ;;  %v7143_v46 = vadd.f32 %v780_v27, %v779_v19  ;;  %v7145_v8 = vadd.f32 %v1200_v58, %v1199_v57  ;;  %v8890_v9 = vld [vmem:[#allocation46_spill] sm:$0xff]  ;;  %v8891_v19 = vld [vmem:[#allocation47_spill] sm:$0xff] }
 0x288   : > { %v7147_v25 = vadd.f32 %v1209_v18, %v1208_v6  ;;  %v7149_v39 = vadd.f32 %v1218_v48, %v1217_v59  ;;  %v7151_v52 = vadd.f32 %v1227_v49, %v1226_v55  ;;  %v1632_v28 = vmul.f32 %v8888_v12, %v7079_v56  ;;  %v8896_v58 = vld [vmem:[#allocation175_spill] sm:$0xff]  ;;  %v8897_v48 = vld [vmem:[#allocation176_spill] sm:$0xff]  ;;  %v8898_v12 = vld [vmem:[#allocation177_spill] sm:$0xff] }
 0x289   : > { %v1633_v20 = vmul.f32 %v8889_v51, %v7079_v56  ;;  %v1634_v29 = vmul.f32 %v8890_v9, %v7079_v56  ;;  %v1635_v15 = vmul.f32 %v8891_v19, %v7079_v56  ;;  %v2079_v14 = vmul.f32 %v8892_v11, %v7079_v56  ;;  %v8900_v51 = vld [vmem:[#allocation225_spill] sm:$0xff]  ;;  %v8902_v9 = vld [vmem:[#allocation227_spill] sm:$0xff] }
 0x28a   : > { %v2080_v62 = vmul.f32 %v8893_v44, %v7079_v56  ;;  %v2081_v54 = vmul.f32 %v8894_v61, %v7079_v56  ;;  %v2082_v43 = vmul.f32 %v8895_v42, %v7079_v56  ;;  %v1641_v57 = vadd.f32 %v7000_v63, %v1632_v28  ;;  %v8899_v28 = vld [vmem:[#allocation178_spill] sm:$0xff] }
 0x28b   : > { %v1650_v6 = vadd.f32 %v7003_v32, %v1633_v20  ;;  %v1659_v59 = vadd.f32 %v7006_v60, %v1634_v29  ;;  %v1668_v55 = vadd.f32 %v7009_v3, %v1635_v15  ;;  %v2088_v50 = vadd.f32 %v7012_v31, %v2079_v14  ;;  %v8901_v20 = vld [vmem:[#allocation226_spill] sm:$0xff]  ;;  %v8903_v29 = vld [vmem:[#allocation228_spill] sm:$0xff] }
 0x28c   : > { %v2097_v40 = vadd.f32 %v7015_v5, %v2080_v62  ;;  %v2106_v0 = vadd.f32 %v7018_v4, %v2081_v54  ;;  %v2115_v27 = vadd.f32 %v7021_v47, %v2082_v43  ;;  %v1642_v18 = vadd.f32 %v1641_v57, %v8896_v58 }
 0x28d   : > { %v1651_v49 = vadd.f32 %v1650_v6, %v8897_v48  ;;  %v1660_v63 = vadd.f32 %v1659_v59, %v8898_v12  ;;  %v1669_v32 = vadd.f32 %v1668_v55, %v8899_v28  ;;  %v2089_v60 = vadd.f32 %v2088_v50, %v8900_v51 }
 0x28e   : > { %v2098_v3 = vadd.f32 %v2097_v40, %v8901_v20  ;;  %v2107_v31 = vadd.f32 %v2106_v0, %v8902_v9  ;;  %v2116_v5 = vadd.f32 %v2115_v27, %v8903_v29  ;;  %v1643_v19 = vrot.slane %v1642_v18, 4 }
 0x28f   : > { %v1652_v4 = vrot.slane %v1651_v49, 4  ;;  %v1661_v15 = vrot.slane %v1660_v63, 4  ;;  %v1670_v47 = vrot.slane %v1669_v32, 4  ;;  %v2090_v11 = vrot.slane %v2089_v60, 4 }
 0x290   : > { %v2099_v14 = vrot.slane %v2098_v3, 4  ;;  %v2108_v44 = vrot.slane %v2107_v31, 4  ;;  %v2117_v62 = vrot.slane %v2116_v5, 4  ;;  %v1644_v61 = vadd.f32 %v1643_v19, %v1642_v18 }
 0x291   : > { %v1653_v54 = vadd.f32 %v1652_v4, %v1651_v49  ;;  %v1662_v42 = vadd.f32 %v1661_v15, %v1660_v63  ;;  %v1671_v43 = vadd.f32 %v1670_v47, %v1669_v32  ;;  %v2091_v57 = vadd.f32 %v2090_v11, %v2089_v60 }
 0x292   : > { %v2100_v6 = vadd.f32 %v2099_v14, %v2098_v3  ;;  %v2109_v59 = vadd.f32 %v2108_v44, %v2107_v31  ;;  %v2118_v55 = vadd.f32 %v2117_v62, %v2116_v5  ;;  %v1645_v50 = vrot.slane %v1644_v61, 2 }
 0x293   : > { %v1654_v40 = vrot.slane %v1653_v54, 2  ;;  %v1663_v0 = vrot.slane %v1662_v42, 2  ;;  %v1672_v27 = vrot.slane %v1671_v43, 2  ;;  %v2092_v58 = vrot.slane %v2091_v57, 2 }
 0x294   : > { %v2101_v48 = vrot.slane %v2100_v6, 2  ;;  %v2110_v12 = vrot.slane %v2109_v59, 2  ;;  %v2119_v28 = vrot.slane %v2118_v55, 2  ;;  %v1646_v51 = vadd.f32 %v1645_v50, %v1644_v61  ;;  %v8906_v50 = vld [vmem:[#allocation54_spill] sm:$0xff] }
 0x295   : > { %v1655_v20 = vadd.f32 %v1654_v40, %v1653_v54  ;;  %v1664_v9 = vadd.f32 %v1663_v0, %v1662_v42  ;;  %v1673_v29 = vadd.f32 %v1672_v27, %v1671_v43  ;;  %v2093_v18 = vadd.f32 %v2092_v58, %v2091_v57  ;;  %v8904_v57 = vld [vmem:[#allocation52_spill] sm:$0xff]  ;;  %v8907_v0 = vld [vmem:[#allocation55_spill] sm:$0xff] }
 0x296   : > { %v2102_v49 = vadd.f32 %v2101_v48, %v2100_v6  ;;  %v2111_v63 = vadd.f32 %v2110_v12, %v2109_v59  ;;  %v2120_v32 = vadd.f32 %v2119_v28, %v2118_v55  ;;  %v1647_v60 = vrot.slane %v1646_v51, 1  ;;  %v8905_v59 = vld [vmem:[#allocation53_spill] sm:$0xff]  ;;  %v8908_v58 = vld [vmem:[#allocation56_spill] sm:$0xff] }
 0x297   : > { %v1656_v3 = vrot.slane %v1655_v20, 1  ;;  %v1665_v31 = vrot.slane %v1664_v9, 1  ;;  %v1674_v5 = vrot.slane %v1673_v29, 1  ;;  %v2094_v19 = vrot.slane %v2093_v18, 1  ;;  %v8909_v12 = vld [vmem:[#allocation57_spill] sm:$0xff] }
 0x298   : > { %v2103_v4 = vrot.slane %v2102_v49, 1  ;;  %v2112_v15 = vrot.slane %v2111_v63, 1  ;;  %v2121_v47 = vrot.slane %v2120_v32, 1  ;;  %v7185_v11 = vadd.f32 %v1647_v60, %v1646_v51  ;;  %v8910_v51 = vld [vmem:[#allocation58_spill] sm:$0xff] }
 0x299   : > { %v7187_v14 = vadd.f32 %v1656_v3, %v1655_v20  ;;  %v7189_v44 = vadd.f32 %v1665_v31, %v1664_v9  ;;  %v7191_v62 = vadd.f32 %v1674_v5, %v1673_v29  ;;  %v7193_v61 = vadd.f32 %v2094_v19, %v2093_v18  ;;  %v8911_v9 = vld [vmem:[#allocation59_spill] sm:$0xff]  ;;  %v8912_v19 = vld [vmem:[#allocation186_spill] sm:$0xff] }
 0x29a   : > { %v7195_v54 = vadd.f32 %v2103_v4, %v2102_v49  ;;  %v7197_v42 = vadd.f32 %v2112_v15, %v2111_v63  ;;  %v7199_v43 = vadd.f32 %v2121_v47, %v2120_v32  ;;  %v2526_v6 = vmul.f32 %v8904_v57, %v7079_v56  ;;  %v8913_v15 = vld [vmem:[#allocation187_spill] sm:$0xff]  ;;  %v8914_v57 = vld [vmem:[#allocation229_spill] sm:$0xff] }
 0x29b   : > { %v2527_v55 = vmul.f32 %v8905_v59, %v7079_v56  ;;  %v2528_v40 = vmul.f32 %v8906_v50, %v7079_v56  ;;  %v2529_v27 = vmul.f32 %v8907_v0, %v7079_v56  ;;  %v2973_v48 = vmul.f32 %v8908_v58, %v7079_v56  ;;  %v8916_v59 = vld [vmem:[#allocation231_spill] sm:$0xff]  ;;  %v8918_v50 = vld [vmem:[#allocation233_spill] sm:$0xff] }
 0x29c   : > { %v2974_v28 = vmul.f32 %v8909_v12, %v7079_v56  ;;  %v2975_v20 = vmul.f32 %v8910_v51, %v7079_v56  ;;  %v2976_v29 = vmul.f32 %v8911_v9, %v7079_v56  ;;  %v2535_v18 = vadd.f32 %v7040_v22, %v2526_v6  ;;  %v8915_v6 = vld [vmem:[#allocation230_spill] sm:$0xff] }
 0x29d   : > { %v2544_v49 = vadd.f32 %v7043_v2, %v2527_v55  ;;  %v2553_v63 = vadd.f32 %v7046_v26, %v2528_v40  ;;  %v2562_v32 = vadd.f32 %v7049_v7, %v2529_v27  ;;  %v2982_v60 = vadd.f32 %v7052_v23, %v2973_v48  ;;  %v8917_v55 = vld [vmem:[#allocation232_spill] sm:$0xff]  ;;  %v8919_v40 = vld [vmem:[#allocation234_spill] sm:$0xff] }
 0x29e   : > { %v2991_v3 = vadd.f32 %v7055_v10, %v2974_v28  ;;  %v3000_v31 = vadd.f32 %v7058_v21, %v2975_v20  ;;  %v3009_v5 = vadd.f32 %v7061_v41, %v2976_v29  ;;  %v2536_v4 = vadd.f32 %v2535_v18, %v8912_v19 }
 0x29f   : > { %v2545_v47 = vadd.f32 %v2544_v49, %v8913_v15  ;;  %v2554_v22 = vadd.f32 %v2553_v63, %v8914_v57  ;;  %v2563_v2 = vadd.f32 %v2562_v32, %v8915_v6  ;;  %v2983_v26 = vadd.f32 %v2982_v60, %v8916_v59 }
 0x2a0   : > { %v2992_v7 = vadd.f32 %v2991_v3, %v8917_v55  ;;  %v3001_v23 = vadd.f32 %v3000_v31, %v8918_v50  ;;  %v3010_v10 = vadd.f32 %v3009_v5, %v8919_v40  ;;  %v2537_v0 = vrot.slane %v2536_v4, 4 }
 0x2a1   : > { %v2546_v21 = vrot.slane %v2545_v47, 4  ;;  %v2555_v27 = vrot.slane %v2554_v22, 4  ;;  %v2564_v41 = vrot.slane %v2563_v2, 4  ;;  %v2984_v58 = vrot.slane %v2983_v26, 4 }
 0x2a2   : > { %v2993_v48 = vrot.slane %v2992_v7, 4  ;;  %v3002_v12 = vrot.slane %v3001_v23, 4  ;;  %v3011_v28 = vrot.slane %v3010_v10, 4  ;;  %v2538_v51 = vadd.f32 %v2537_v0, %v2536_v4 }
 0x2a3   : > { %v2547_v20 = vadd.f32 %v2546_v21, %v2545_v47  ;;  %v2556_v9 = vadd.f32 %v2555_v27, %v2554_v22  ;;  %v2565_v29 = vadd.f32 %v2564_v41, %v2563_v2  ;;  %v2985_v18 = vadd.f32 %v2984_v58, %v2983_v26 }
 0x2a4   : > { %v2994_v49 = vadd.f32 %v2993_v48, %v2992_v7  ;;  %v3003_v63 = vadd.f32 %v3002_v12, %v3001_v23  ;;  %v3012_v32 = vadd.f32 %v3011_v28, %v3010_v10  ;;  %v2539_v60 = vrot.slane %v2538_v51, 2 }
 0x2a5   : > { %v2548_v3 = vrot.slane %v2547_v20, 2  ;;  %v2557_v31 = vrot.slane %v2556_v9, 2  ;;  %v2566_v5 = vrot.slane %v2565_v29, 2  ;;  %v2986_v19 = vrot.slane %v2985_v18, 2 }
 0x2a6   : > { %v2995_v15 = vrot.slane %v2994_v49, 2  ;;  %v3004_v57 = vrot.slane %v3003_v63, 2  ;;  %v3013_v6 = vrot.slane %v3012_v32, 2  ;;  %v2540_v59 = vadd.f32 %v2539_v60, %v2538_v51  ;;  %v8922_v60 = vld [vmem:[#allocation62_spill] sm:$0xff] }
 0x2a7   : > { %v2549_v55 = vadd.f32 %v2548_v3, %v2547_v20  ;;  %v2558_v50 = vadd.f32 %v2557_v31, %v2556_v9  ;;  %v2567_v40 = vadd.f32 %v2566_v5, %v2565_v29  ;;  %v2987_v4 = vadd.f32 %v2986_v19, %v2985_v18  ;;  %v8920_v18 = vld [vmem:[#allocation60_spill] sm:$0xff]  ;;  %v8923_v31 = vld [vmem:[#allocation63_spill] sm:$0xff] }
 0x2a8   : > { %v2996_v47 = vadd.f32 %v2995_v15, %v2994_v49  ;;  %v3005_v22 = vadd.f32 %v3004_v57, %v3003_v63  ;;  %v3014_v2 = vadd.f32 %v3013_v6, %v3012_v32  ;;  %v2541_v26 = vrot.slane %v2540_v59, 1  ;;  %v8921_v63 = vld [vmem:[#allocation61_spill] sm:$0xff]  ;;  %v8924_v19 = vld [vmem:[#allocation64_spill] sm:$0xff] }
 0x2a9   : > { %v2550_v7 = vrot.slane %v2549_v55, 1  ;;  %v2559_v23 = vrot.slane %v2558_v50, 1  ;;  %v2568_v10 = vrot.slane %v2567_v40, 1  ;;  %v2988_v0 = vrot.slane %v2987_v4, 1  ;;  %v8925_v57 = vld [vmem:[#allocation65_spill] sm:$0xff] }
 0x2aa   : > { %v2997_v21 = vrot.slane %v2996_v47, 1  ;;  %v3006_v27 = vrot.slane %v3005_v22, 1  ;;  %v3015_v41 = vrot.slane %v3014_v2, 1  ;;  %v7233_v58 = vadd.f32 %v2541_v26, %v2540_v59  ;;  %v8926_v59 = vld [vmem:[#allocation66_spill] sm:$0xff] }
 0x2ab   : > { %v7235_v48 = vadd.f32 %v2550_v7, %v2549_v55  ;;  %v7237_v12 = vadd.f32 %v2559_v23, %v2558_v50  ;;  %v7239_v28 = vadd.f32 %v2568_v10, %v2567_v40  ;;  %v7241_v51 = vadd.f32 %v2988_v0, %v2987_v4  ;;  %v8927_v50 = vld [vmem:[#allocation67_spill] sm:$0xff] }
 0x2ac   : > { %v7243_v20 = vadd.f32 %v2997_v21, %v2996_v47  ;;  %v7245_v9 = vadd.f32 %v3006_v27, %v3005_v22  ;;  %v7247_v29 = vadd.f32 %v3015_v41, %v3014_v2  ;;  %v3420_v49 = vmul.f32 %v8920_v18, %v7079_v56  ;;  %v8928_v21 = vld [vmem:[#allocation158_spill] sm:$0xff]  ;;  %v8929_v27 = vld [vmem:[#allocation159_spill] sm:$0xff]  ;;  %v8930_v41 = vld [vmem:[#allocation164_spill] sm:$0xff] }
 0x2ad   : > { %v3421_v32 = vmul.f32 %v8921_v63, %v7079_v56  ;;  %v3422_v3 = vmul.f32 %v8922_v60, %v7079_v56  ;;  %v3423_v5 = vmul.f32 %v8923_v31, %v7079_v56  ;;  %v3867_v15 = vmul.f32 %v8924_v19, %v7079_v56  ;;  %v8931_v18 = vld [vmem:[#allocation165_spill] sm:$0xff] }
 0x2ae   : > { %v3868_v6 = vmul.f32 %v8925_v57, %v7079_v56  ;;  %v3869_v55 = vmul.f32 %v8926_v59, %v7079_v56  ;;  %v3870_v40 = vmul.f32 %v8927_v50, %v7079_v56  ;;  %v3429_v4 = vadd.f32 %v7082_v30, %v3420_v49  ;;  %v8932_v49 = vld [vmem:[#allocation196_spill] sm:$0xff] }
 0x2af   : > { %v3438_v47 = vadd.f32 %v7085_v38, %v3421_v32  ;;  %v3447_v22 = vadd.f32 %v7088_v17, %v3422_v3  ;;  %v3456_v2 = vadd.f32 %v7091_v16, %v3423_v5  ;;  %v3876_v26 = vadd.f32 %v7094_v13, %v3867_v15 }
 0x2b0   : > { %v3885_v7 = vadd.f32 %v7097_v45, %v3868_v6  ;;  %v3894_v23 = vadd.f32 %v7100_v35, %v3869_v55  ;;  %v3903_v10 = vadd.f32 %v7103_v33, %v3870_v40  ;;  %v3430_v0 = vadd.f32 %v3429_v4, %v6709_v53 }
 0x2b1   : > { %v3439_v56 = vadd.f32 %v3438_v47, %v6713_v37  ;;  %v3448_v30 = vadd.f32 %v3447_v22, %v8928_v21  ;;  %v3457_v38 = vadd.f32 %v3456_v2, %v8929_v27  ;;  %v3877_v17 = vadd.f32 %v3876_v26, %v6767_v34 }
 0x2b2   : > { %v3886_v16 = vadd.f32 %v3885_v7, %v8930_v41  ;;  %v3895_v13 = vadd.f32 %v3894_v23, %v8931_v18  ;;  %v3904_v45 = vadd.f32 %v3903_v10, %v8932_v49  ;;  %v3431_v63 = vrot.slane %v3430_v0, 4 }
 0x2b3   : > { %v3440_v35 = vrot.slane %v3439_v56, 4  ;;  %v3449_v32 = vrot.slane %v3448_v30, 4  ;;  %v3458_v33 = vrot.slane %v3457_v38, 4  ;;  %v3878_v60 = vrot.slane %v3877_v17, 4 }
 0x2b4   : > { %v3887_v53 = vrot.slane %v3886_v16, 4  ;;  %v3896_v3 = vrot.slane %v3895_v13, 4  ;;  %v3905_v37 = vrot.slane %v3904_v45, 4  ;;  %v3432_v31 = vadd.f32 %v3431_v63, %v3430_v0  ;;  %v7281_v63 = vpop.permute.xlu1 %511 }
 0x2b5   : > { %v3441_v5 = vadd.f32 %v3440_v35, %v3439_v56  ;;  %v3450_v19 = vadd.f32 %v3449_v32, %v3448_v30  ;;  %v3459_v15 = vadd.f32 %v3458_v33, %v3457_v38  ;;  %v3879_v57 = vadd.f32 %v3878_v60, %v3877_v17 }
 0x2b6   : > { %v3888_v34 = vadd.f32 %v3887_v53, %v3886_v16  ;;  %v3897_v6 = vadd.f32 %v3896_v3, %v3895_v13  ;;  %v3906_v59 = vadd.f32 %v3905_v37, %v3904_v45  ;;  %v3433_v55 = vrot.slane %v3432_v31, 2 }
 0x2b7   : > { %v3442_v50 = vrot.slane %v3441_v5, 2  ;;  %v3451_v40 = vrot.slane %v3450_v19, 2  ;;  %v3460_v4 = vrot.slane %v3459_v15, 2  ;;  %v3880_v47 = vrot.slane %v3879_v57, 2 }
 0x2b8   : > { %v3889_v22 = vrot.slane %v3888_v34, 2  ;;  %v3898_v2 = vrot.slane %v3897_v6, 2  ;;  %v3907_v26 = vrot.slane %v3906_v59, 2  ;;  %v3434_v7 = vadd.f32 %v3433_v55, %v3432_v31 }
 0x2b9   : > { %v3443_v23 = vadd.f32 %v3442_v50, %v3441_v5  ;;  %v3452_v10 = vadd.f32 %v3451_v40, %v3450_v19  ;;  %v3461_v21 = vadd.f32 %v3460_v4, %v3459_v15  ;;  %v3881_v0 = vadd.f32 %v3880_v47, %v3879_v57  ;;  %v8933_v5 = vld [vmem:[#allocation36_spill] sm:$0xff]  ;;  %v8937_v50 = vld [vmem:[#allocation7_spill] sm:$0xff] }
 0x2ba   : > { %v3890_v56 = vadd.f32 %v3889_v22, %v3888_v34  ;;  %v3899_v30 = vadd.f32 %v3898_v2, %v3897_v6  ;;  %v3908_v27 = vadd.f32 %v3907_v26, %v3906_v59  ;;  %v3435_v38 = vrot.slane %v3434_v7, 1  ;;  %v8934_v15 = vld [vmem:[#allocation4_spill] sm:$0xff]  ;;  %v8935_v34 = vld [vmem:[#allocation5_spill] sm:$0xff]  ;;  %v8936_v59 = vld [vmem:[#allocation6_spill] sm:$0xff] }
 0x2bb   : > { %v3444_v17 = vrot.slane %v3443_v23, 1  ;;  %v3453_v41 = vrot.slane %v3452_v10, 1  ;;  %v3462_v16 = vrot.slane %v3461_v21, 1  ;;  %v3882_v18 = vrot.slane %v3881_v0, 1  ;;  %v8938_v4 = vld [vmem:[#allocation8_spill] sm:$0xff]  ;;  %v8939_v22 = vld [vmem:[#allocation9_spill] sm:$0xff] }
 0x2bc   : > { %v3891_v13 = vrot.slane %v3890_v56, 1  ;;  %v3900_v49 = vrot.slane %v3899_v30, 1  ;;  %v3909_v45 = vrot.slane %v3908_v27, 1  ;;  %v7283_v35 = vadd.f32 %v3435_v38, %v3434_v7  ;;  %v8940_v26 = vld [vmem:[#allocation10_spill] sm:$0xff] }
 0x2bd   : > { %v7285_v32 = vadd.f32 %v3444_v17, %v3443_v23  ;;  %v7287_v33 = vadd.f32 %v3453_v41, %v3452_v10  ;;  %v7289_v60 = vadd.f32 %v3462_v16, %v3461_v21  ;;  %v7291_v53 = vadd.f32 %v3882_v18, %v3881_v0  ;;  %v8943_v17 = vld [vmem:[#allocation199_spill] sm:$0xff]  ;;  %v8944_v16 = vld [vmem:[#allocation68_spill] sm:$0xff] }
 0x2be   : > { %v7293_v3 = vadd.f32 %v3891_v13, %v3890_v56  ;;  %v7295_v37 = vadd.f32 %v3900_v49, %v3899_v30  ;;  %v7297_v31 = vadd.f32 %v3909_v45, %v3908_v27  ;;  %v514_v19 = vadd.f32 %v7281_v63, %v8933_v5  ;;  %v8941_v56 = vld [vmem:[#allocation197_spill] sm:$0xff]  ;;  %v8942_v27 = vld [vmem:[#allocation198_spill] sm:$0xff] }
 0x2bf   : > { %v515_v57 = vadd.f32 %v7281_v63, %v8934_v15  ;;  %v516_v6 = vadd.f32 %v7281_v63, %v8935_v34  ;;  %v517_v55 = vadd.f32 %v7281_v63, %v8936_v59  ;;  %v586_v40 = vadd.f32 %v8937_v50, %v7281_v63 }
 0x2c0   : > { %v587_v47 = vadd.f32 %v8938_v4, %v7281_v63  ;;  %v588_v2 = vadd.f32 %v8939_v22, %v7281_v63  ;;  %v589_v7 = vadd.f32 %v8940_v26, %v7281_v63  ;;  %v594_v23 = vrot.slane %v514_v19, 7 }
 0x2c1   : > { %v595_v10 = vrot.slane %v515_v57, 7  ;;  %v596_v21 = vrot.slane %v516_v6, 7  ;;  %v597_v0 = vrot.slane %v517_v55, 7  ;;  %v682_v30 = vadd.f32 %v8941_v56, %v7281_v63 }
 0x2c2   : > { %v683_v38 = vadd.f32 %v8942_v27, %v7281_v63  ;;  %v684_v41 = vadd.f32 %v8943_v17, %v7281_v63  ;;  %v685_v18 = vadd.f32 %v8944_v16, %v7281_v63  ;;  %vm602_vm0 = vcmp.gt.f32.partialorder %v586_v40, %v594_v23 }
 0x2c3   : > { %vm603_vm1 = vcmp.gt.f32.partialorder %v587_v47, %v595_v10  ;;  %vm604_vm2 = vcmp.gt.f32.partialorder %v588_v2, %v596_v21  ;;  %vm605_vm3 = vcmp.gt.f32.partialorder %v589_v7, %v597_v0  ;;  %v606_v13 = vsel %vm602_vm0, %v586_v40, %v594_v23 }
 0x2c4   : > { %v607_v49 = vsel %vm603_vm1, %v587_v47, %v595_v10  ;;  %v608_v45 = vsel %vm604_vm2, %v588_v2, %v596_v21  ;;  %v609_v5 = vsel %vm605_vm3, %v589_v7, %v597_v0  ;;  %v8945_v19 = vmov 0  }
 0x2c5   : > { %v610_v15 = vsel %vm602_vm0, 1, %v8945_v19  ;;  %v611_v57 = vsel %vm603_vm1, 1, %v8945_v19  ;;  %v612_v34 = vsel %vm604_vm2, 1, %v8945_v19  ;;  %v613_v6 = vsel %vm605_vm3, 1, %v8945_v19 }
 0x2c6   : > { %v690_v59 = vrot.slane %v606_v13, 7  ;;  %v691_v55 = vrot.slane %v607_v49, 7  ;;  %v692_v50 = vrot.slane %v608_v45, 7  ;;  %v693_v4 = vrot.slane %v609_v5, 7 }
 0x2c7   : > { %v706_v22 = vrot.slane %v610_v15, 7  ;;  %v707_v26 = vrot.slane %v611_v57, 7  ;;  %v708_v56 = vrot.slane %v612_v34, 7  ;;  %v709_v27 = vrot.slane %v613_v6, 7  ;;  %v8946_v6 = vld [vmem:[#allocation3_spill] sm:$0xff] }
 0x2c8   : > { %vm698_vm4 = vcmp.gt.f32.partialorder %v682_v30, %v690_v59  ;;  %vm699_vm5 = vcmp.gt.f32.partialorder %v683_v38, %v691_v55  ;;  %vm700_vm6 = vcmp.gt.f32.partialorder %v684_v41, %v692_v50  ;;  %vm701_vm7 = vcmp.gt.f32.partialorder %v685_v18, %v693_v4 }
 0x2c9   : > { %v702_v40 = vsel %vm698_vm4, %v682_v30, %v690_v59  ;;  %v703_v47 = vsel %vm699_vm5, %v683_v38, %v691_v55  ;;  %v704_v2 = vsel %vm700_vm6, %v684_v41, %v692_v50  ;;  %v705_v7 = vsel %vm701_vm7, %v685_v18, %v693_v4  ;;  %v8947_v4 = vld [vmem:[#allocation134_spill] sm:$0xff] }
 0x2ca   : > { %v710_v23 = vsel %vm698_vm4, 2, %v706_v22  ;;  %v711_v10 = vsel %vm699_vm5, 2, %v707_v26  ;;  %v712_v21 = vsel %vm700_vm6, 2, %v708_v56  ;;  %v713_v0 = vsel %vm701_vm7, 2, %v709_v27  ;;  %v8948_v26 = vld [vmem:[#allocation135_spill] sm:$0xff]  ;;  %v8949_v27 = vld [vmem:[#allocation136_spill] sm:$0xff] }
 0x2cb   : > { %v782_v17 = vadd.f32 %v7137_v36, %v7281_v63  ;;  %v783_v16 = vadd.f32 %v7139_v24, %v7281_v63  ;;  %v784_v13 = vadd.f32 %v7141_v1, %v7281_v63  ;;  %v785_v49 = vadd.f32 %v7143_v46, %v7281_v63 }
 0x2cc   : > { %v790_v30 = vrot.slane %v702_v40, 7  ;;  %v791_v38 = vrot.slane %v703_v47, 7  ;;  %v792_v41 = vrot.slane %v704_v2, 7  ;;  %v793_v18 = vrot.slane %v705_v7, 7  ;;  %v8950_v47 = vld [vmem:[#allocation137_spill] sm:$0xff]  ;;  %v8951_v7 = vld [vmem:[#allocation2_spill] sm:$0xff] }
 0x2cd   : > { %v802_v45 = vrot.slane %v710_v23, 7  ;;  %v803_v5 = vrot.slane %v711_v10, 7  ;;  %v804_v15 = vrot.slane %v712_v21, 7  ;;  %v805_v57 = vrot.slane %v713_v0, 7 }
 0x2ce   : > { %vm798_vm8 = vcmp.gt.f32.partialorder %v782_v17, %v790_v30  ;;  %vm799_vm9 = vcmp.gt.f32.partialorder %v783_v16, %v791_v38  ;;  %vm800_vm10 = vcmp.gt.f32.partialorder %v784_v13, %v792_v41  ;;  %vm801_vm11 = vcmp.gt.f32.partialorder %v785_v49, %v793_v18  ;;  %v8953_v49 = vld [vmem:[#allocation167_spill] sm:$0xff]  ;;  %v8954_v38 = vld [vmem:[#allocation168_spill] sm:$0xff]  ;;  %v8955_v18 = vld [vmem:[#allocation169_spill] sm:$0xff] }
 0x2cf   : > { %v806_v36 = vsel %vm798_vm8, 3, %v802_v45  ;;  %v807_v24 = vsel %vm799_vm9, 3, %v803_v5  ;;  %v808_v34 = vsel %vm800_vm10, 3, %v804_v15  ;;  %v809_v1 = vsel %vm801_vm11, 3, %v805_v57  ;;  %v8956_v5 = vld [vmem:[#allocation170_spill] sm:$0xff] }
 0x2d0   : > { %v813_v59 = vrot.slane %v806_v36, %v8946_v6  ;;  %v817_v46 = vrot.slane %v807_v24, %v8946_v6  ;;  %v821_v55 = vrot.slane %v808_v34, %v8946_v6  ;;  %v825_v50 = vrot.slane %v809_v1, %v8946_v6  ;;  %v8957_v1 = vld [vmem:[#allocation235_spill] sm:$0xff] }
 0x2d1   : > { %v1009_v22 = vadd.f32 %v8947_v4, %v7281_v63  ;;  %v1010_v56 = vadd.f32 %v8948_v26, %v7281_v63  ;;  %v1011_v40 = vadd.f32 %v8949_v27, %v7281_v63  ;;  %v1012_v2 = vadd.f32 %v8950_v47, %v7281_v63  ;;  %v8960_v26 = vld [vmem:[#allocation238_spill] sm:$0xff] }
 0x2d2   : > { %vm826_vm12 = vcmp.eq.s32.totalorder %v8951_v7, %v813_v59  ;;  %vm827_vm13 = vcmp.eq.s32.totalorder %v8951_v7, %v817_v46  ;;  %vm828_vm14 = vcmp.eq.s32.totalorder %v8951_v7, %v821_v55  ;;  %vm829_vm15 = vcmp.eq.s32.totalorder %v8951_v7, %v825_v50  ;;  %v8958_v46 = vld [vmem:[#allocation236_spill] sm:$0xff]  ;;  %v8959_v50 = vld [vmem:[#allocation237_spill] sm:$0xff] }
 0x2d3   : > { %v8952_v23 = vmov 0.0   ;;  %v1065_v30 = vadd.f32 %v8953_v49, %v7281_v63  ;;  %v1066_v41 = vadd.f32 %v8954_v38, %v7281_v63  ;;  %v1067_v45 = vadd.f32 %v8955_v18, %v7281_v63 }
 0x2d4   : > { %v4123_v10 = vsel %vm826_vm12, 1.0, %v8952_v23  ;;  %v4124_v21 = vsel %vm827_vm13, 1.0, %v8952_v23  ;;  %v4125_v0 = vsel %vm828_vm14, 1.0, %v8952_v23  ;;  %v4126_v17 = vsel %vm829_vm15, 1.0, %v8952_v23 }
 0x2d5   : > { %v842_v16 = vcombine.low %v4123_v10, %v4124_v21  ;;  %v843_v13 = vcombine.low %v4125_v0, %v4126_v17  ;;  %v1068_v15 = vadd.f32 %v8956_v5, %v7281_v63  ;;  %v1073_v57 = vrot.slane %v1009_v22, 7 }
 0x2d6   : > { %v1074_v36 = vrot.slane %v1010_v56, 7  ;;  %v1075_v24 = vrot.slane %v1011_v40, 7  ;;  %v1076_v34 = vrot.slane %v1012_v2, 7  ;;  %v1145_v59 = vadd.f32 %v8957_v1, %v7281_v63 }
 0x2d7   : > { %846 = vst [vmem:[%s7356_s20] sm:$0xff] %v842_v16  ;;  %847 = vst [vmem:[%s7356_s20 + $0x8] sm:$0xff] %v843_v13  ;;  %v1146_v55 = vadd.f32 %v8958_v46, %v7281_v63  ;;  %vm1081_vm0 = vcmp.gt.f32.partialorder %v1065_v30, %v1073_v57  ;;  %v1147_v4 = vadd.f32 %v8959_v50, %v7281_v63 }
 0x2d8   : > { %vm1082_vm1 = vcmp.gt.f32.partialorder %v1066_v41, %v1074_v36  ;;  %v1148_v27 = vadd.f32 %v8960_v26, %v7281_v63  ;;  %vm1083_vm2 = vcmp.gt.f32.partialorder %v1067_v45, %v1075_v24  ;;  %vm1084_vm3 = vcmp.gt.f32.partialorder %v1068_v15, %v1076_v34 }
 0x2d9   : > { %v1085_v22 = vsel %vm1081_vm0, %v1065_v30, %v1073_v57  ;;  %v1086_v56 = vsel %vm1082_vm1, %v1066_v41, %v1074_v36  ;;  %v1087_v40 = vsel %vm1083_vm2, %v1067_v45, %v1075_v24  ;;  %v1088_v47 = vsel %vm1084_vm3, %v1068_v15, %v1076_v34 }
 0x2da   : > { %v1089_v2 = vsel %vm1081_vm0, 1, %v8945_v19  ;;  %v1090_v10 = vsel %vm1082_vm1, 1, %v8945_v19  ;;  %v1091_v21 = vsel %vm1083_vm2, 1, %v8945_v19  ;;  %v1092_v0 = vsel %vm1084_vm3, 1, %v8945_v19 }
 0x2db   : > { %v1153_v17 = vrot.slane %v1085_v22, 7  ;;  %v1154_v16 = vrot.slane %v1086_v56, 7  ;;  %v1155_v13 = vrot.slane %v1087_v40, 7  ;;  %v1156_v49 = vrot.slane %v1088_v47, 7 }
 0x2dc   : > { %v1169_v38 = vrot.slane %v1089_v2, 7  ;;  %v1170_v18 = vrot.slane %v1090_v10, 7  ;;  %v1171_v30 = vrot.slane %v1091_v21, 7  ;;  %v1172_v41 = vrot.slane %v1092_v0, 7 }
 0x2dd   : > { %vm1161_vm4 = vcmp.gt.f32.partialorder %v1145_v59, %v1153_v17  ;;  %vm1162_vm5 = vcmp.gt.f32.partialorder %v1146_v55, %v1154_v16  ;;  %vm1163_vm6 = vcmp.gt.f32.partialorder %v1147_v4, %v1155_v13  ;;  %vm1164_vm7 = vcmp.gt.f32.partialorder %v1148_v27, %v1156_v49 }
 0x2de   : > { %v1165_v45 = vsel %vm1161_vm4, %v1145_v59, %v1153_v17  ;;  %v1166_v5 = vsel %vm1162_vm5, %v1146_v55, %v1154_v16  ;;  %v1167_v15 = vsel %vm1163_vm6, %v1147_v4, %v1155_v13  ;;  %v1168_v57 = vsel %vm1164_vm7, %v1148_v27, %v1156_v49  ;;  %v8961_v16 = vld [vmem:[#allocation16_spill] sm:$0xff]  ;;  %v8962_v49 = vld [vmem:[#allocation17_spill] sm:$0xff] }
 0x2df   : > { %v1173_v36 = vsel %vm1161_vm4, 2, %v1169_v38  ;;  %v1174_v24 = vsel %vm1162_vm5, 2, %v1170_v18  ;;  %v1175_v34 = vsel %vm1163_vm6, 2, %v1171_v30  ;;  %v1176_v1 = vsel %vm1164_vm7, 2, %v1172_v41  ;;  %v8963_v18 = vld [vmem:[#allocation18_spill] sm:$0xff]  ;;  %v8964_v41 = vld [vmem:[#allocation19_spill] sm:$0xff] }
 0x2e0   : > { %v1229_v46 = vadd.f32 %v7145_v8, %v7281_v63  ;;  %v1230_v50 = vadd.f32 %v7147_v25, %v7281_v63  ;;  %v1231_v26 = vadd.f32 %v7149_v39, %v7281_v63  ;;  %v1232_v22 = vadd.f32 %v7151_v52, %v7281_v63 }
 0x2e1   : > { %v1237_v59 = vrot.slane %v1165_v45, 7  ;;  %v1238_v55 = vrot.slane %v1166_v5, 7  ;;  %v1239_v4 = vrot.slane %v1167_v15, 7  ;;  %v1240_v27 = vrot.slane %v1168_v57, 7 }
 0x2e2   : > { %v1249_v56 = vrot.slane %v1173_v36, 7  ;;  %v1250_v40 = vrot.slane %v1174_v24, 7  ;;  %v1251_v47 = vrot.slane %v1175_v34, 7  ;;  %v1252_v2 = vrot.slane %v1176_v1, 7  ;;  %v8965_v34 = vld [vmem:[#allocation142_spill] sm:$0xff] }
 0x2e3   : > { %vm1245_vm8 = vcmp.gt.f32.partialorder %v1229_v46, %v1237_v59  ;;  %vm1246_vm9 = vcmp.gt.f32.partialorder %v1230_v50, %v1238_v55  ;;  %vm1247_vm10 = vcmp.gt.f32.partialorder %v1231_v26, %v1239_v4  ;;  %vm1248_vm11 = vcmp.gt.f32.partialorder %v1232_v22, %v1240_v27  ;;  %v8966_v50 = vld [vmem:[#allocation143_spill] sm:$0xff]  ;;  %v8967_v22 = vld [vmem:[#allocation144_spill] sm:$0xff]  ;;  %v8968_v55 = vld [vmem:[#allocation145_spill] sm:$0xff] }
 0x2e4   : > { %v1253_v8 = vsel %vm1245_vm8, 3, %v1249_v56  ;;  %v1254_v25 = vsel %vm1246_vm9, 3, %v1250_v40  ;;  %v1255_v10 = vsel %vm1247_vm10, 3, %v1251_v47  ;;  %v1256_v21 = vsel %vm1248_vm11, 3, %v1252_v2  ;;  %v8969_v2 = vld [vmem:[#allocation171_spill] sm:$0xff] }
 0x2e5   : > { %v1260_v39 = vrot.slane %v1253_v8, %v8946_v6  ;;  %v1264_v52 = vrot.slane %v1254_v25, %v8946_v6  ;;  %v1268_v0 = vrot.slane %v1255_v10, %v8946_v6  ;;  %v1272_v17 = vrot.slane %v1256_v21, %v8946_v6  ;;  %v8970_v25 = vld [vmem:[#allocation172_spill] sm:$0xff]  ;;  %v8971_v21 = vld [vmem:[#allocation173_spill] sm:$0xff] }
 0x2e6   : > { %v1456_v13 = vadd.f32 %v8961_v16, %v7281_v63  ;;  %v1457_v38 = vadd.f32 %v8962_v49, %v7281_v63  ;;  %v1458_v30 = vadd.f32 %v8963_v18, %v7281_v63  ;;  %v1459_v45 = vadd.f32 %v8964_v41, %v7281_v63 }
 0x2e7   : > { %vm1273_vm12 = vcmp.eq.s32.totalorder %v8951_v7, %v1260_v39  ;;  %vm1274_vm13 = vcmp.eq.s32.totalorder %v8951_v7, %v1264_v52  ;;  %vm1275_vm14 = vcmp.eq.s32.totalorder %v8951_v7, %v1268_v0  ;;  %vm1276_vm15 = vcmp.eq.s32.totalorder %v8951_v7, %v1272_v17  ;;  %v8972_v52 = vld [vmem:[#allocation174_spill] sm:$0xff] }
 0x2e8   : > { %v4131_v5 = vsel %vm1273_vm12, 1.0, %v8952_v23  ;;  %v4132_v15 = vsel %vm1274_vm13, 1.0, %v8952_v23  ;;  %v4133_v57 = vsel %vm1275_vm14, 1.0, %v8952_v23  ;;  %v4134_v36 = vsel %vm1276_vm15, 1.0, %v8952_v23 }
 0x2e9   : > { %v1289_v24 = vcombine.low %v4131_v5, %v4132_v15  ;;  %v1512_v1 = vadd.f32 %v8965_v34, %v7281_v63  ;;  %v1290_v46 = vcombine.low %v4133_v57, %v4134_v36  ;;  %v1513_v26 = vadd.f32 %v8966_v50, %v7281_v63 }
 0x2ea   : > { %v1514_v59 = vadd.f32 %v8967_v22, %v7281_v63  ;;  %v1515_v4 = vadd.f32 %v8968_v55, %v7281_v63  ;;  %v1520_v27 = vrot.slane %v1456_v13, 7  ;;  %v1521_v56 = vrot.slane %v1457_v38, 7 }
 0x2eb   : > { %1293 = vst [vmem:[%s7356_s20 + $0x10] sm:$0xff] %v1289_v24  ;;  %v1522_v40 = vrot.slane %v1458_v30, 7  ;;  %v1523_v47 = vrot.slane %v1459_v45, 7  ;;  %1294 = vst [vmem:[%s7356_s20 + $0x18] sm:$0xff] %v1290_v46  ;;  %v1592_v8 = vadd.f32 %v8969_v2, %v7281_v63  ;;  %v1593_v10 = vadd.f32 %v8970_v25, %v7281_v63 }
 0x2ec   : > { %v1594_v39 = vadd.f32 %v8971_v21, %v7281_v63  ;;  %v1595_v0 = vadd.f32 %v8972_v52, %v7281_v63  ;;  %vm1528_vm0 = vcmp.gt.f32.partialorder %v1512_v1, %v1520_v27  ;;  %vm1529_vm1 = vcmp.gt.f32.partialorder %v1513_v26, %v1521_v56 }
 0x2ed   : > { %vm1530_vm2 = vcmp.gt.f32.partialorder %v1514_v59, %v1522_v40  ;;  %vm1531_vm3 = vcmp.gt.f32.partialorder %v1515_v4, %v1523_v47  ;;  %v1532_v17 = vsel %vm1528_vm0, %v1512_v1, %v1520_v27  ;;  %v1533_v16 = vsel %vm1529_vm1, %v1513_v26, %v1521_v56 }
 0x2ee   : > { %v1534_v13 = vsel %vm1530_vm2, %v1514_v59, %v1522_v40  ;;  %v1535_v49 = vsel %vm1531_vm3, %v1515_v4, %v1523_v47  ;;  %v1536_v38 = vsel %vm1528_vm0, 1, %v8945_v19  ;;  %v1537_v18 = vsel %vm1529_vm1, 1, %v8945_v19 }
 0x2ef   : > { %v1538_v30 = vsel %vm1530_vm2, 1, %v8945_v19  ;;  %v1539_v41 = vsel %vm1531_vm3, 1, %v8945_v19  ;;  %v1600_v45 = vrot.slane %v1532_v17, 7  ;;  %v1601_v5 = vrot.slane %v1533_v16, 7 }
 0x2f0   : > { %v1602_v15 = vrot.slane %v1534_v13, 7  ;;  %v1603_v57 = vrot.slane %v1535_v49, 7  ;;  %v1616_v36 = vrot.slane %v1536_v38, 7  ;;  %v1617_v24 = vrot.slane %v1537_v18, 7  ;;  %v8973_v18 = vld [vmem:[#allocation146_spill] sm:$0xff] }
 0x2f1   : > { %v1618_v34 = vrot.slane %v1538_v30, 7  ;;  %v1619_v46 = vrot.slane %v1539_v41, 7  ;;  %vm1608_vm4 = vcmp.gt.f32.partialorder %v1592_v8, %v1600_v45  ;;  %vm1609_vm5 = vcmp.gt.f32.partialorder %v1593_v10, %v1601_v5  ;;  %v8974_v41 = vld [vmem:[#allocation147_spill] sm:$0xff] }
 0x2f2   : > { %vm1610_vm6 = vcmp.gt.f32.partialorder %v1594_v39, %v1602_v15  ;;  %vm1611_vm7 = vcmp.gt.f32.partialorder %v1595_v0, %v1603_v57  ;;  %v1612_v1 = vsel %vm1608_vm4, %v1592_v8, %v1600_v45  ;;  %v1613_v50 = vsel %vm1609_vm5, %v1593_v10, %v1601_v5  ;;  %v8975_v5 = vld [vmem:[#allocation148_spill] sm:$0xff] }
 0x2f3   : > { %v1614_v26 = vsel %vm1610_vm6, %v1594_v39, %v1602_v15  ;;  %v1615_v22 = vsel %vm1611_vm7, %v1595_v0, %v1603_v57  ;;  %v1620_v59 = vsel %vm1608_vm4, 2, %v1616_v36  ;;  %v1621_v55 = vsel %vm1609_vm5, 2, %v1617_v24  ;;  %v8976_v57 = vld [vmem:[#allocation149_spill] sm:$0xff] }
 0x2f4   : > { %v1622_v4 = vsel %vm1610_vm6, 2, %v1618_v34  ;;  %v1623_v27 = vsel %vm1611_vm7, 2, %v1619_v46  ;;  %v1676_v56 = vadd.f32 %v7185_v11, %v7281_v63  ;;  %v1677_v40 = vadd.f32 %v7187_v14, %v7281_v63 }
 0x2f5   : > { %v1678_v47 = vadd.f32 %v7189_v44, %v7281_v63  ;;  %v1679_v2 = vadd.f32 %v7191_v62, %v7281_v63  ;;  %v1684_v8 = vrot.slane %v1612_v1, 7  ;;  %v1685_v25 = vrot.slane %v1613_v50, 7 }
 0x2f6   : > { %v1686_v10 = vrot.slane %v1614_v26, 7  ;;  %v1687_v21 = vrot.slane %v1615_v22, 7  ;;  %v1696_v39 = vrot.slane %v1620_v59, 7  ;;  %v1697_v52 = vrot.slane %v1621_v55, 7  ;;  %v8977_v22 = vld [vmem:[#allocation180_spill] sm:$0xff]  ;;  %v8978_v55 = vld [vmem:[#allocation181_spill] sm:$0xff] }
 0x2f7   : > { %v1698_v0 = vrot.slane %v1622_v4, 7  ;;  %v1699_v17 = vrot.slane %v1623_v27, 7  ;;  %vm1692_vm8 = vcmp.gt.f32.partialorder %v1676_v56, %v1684_v8  ;;  %vm1693_vm9 = vcmp.gt.f32.partialorder %v1677_v40, %v1685_v25  ;;  %v8979_v27 = vld [vmem:[#allocation182_spill] sm:$0xff]  ;;  %v8980_v40 = vld [vmem:[#allocation183_spill] sm:$0xff] }
 0x2f8   : > { %vm1694_vm10 = vcmp.gt.f32.partialorder %v1678_v47, %v1686_v10  ;;  %vm1695_vm11 = vcmp.gt.f32.partialorder %v1679_v2, %v1687_v21  ;;  %v1700_v11 = vsel %vm1692_vm8, 3, %v1696_v39  ;;  %v1701_v14 = vsel %vm1693_vm9, 3, %v1697_v52  ;;  %v8981_v21 = vld [vmem:[#allocation12_spill] sm:$0xff]  ;;  %v8982_v52 = vld [vmem:[#allocation13_spill] sm:$0xff] }
 0x2f9   : > { %v1702_v16 = vsel %vm1694_vm10, 3, %v1698_v0  ;;  %v1703_v13 = vsel %vm1695_vm11, 3, %v1699_v17  ;;  %v1707_v44 = vrot.slane %v1700_v11, %v8946_v6  ;;  %v1711_v62 = vrot.slane %v1701_v14, %v8946_v6  ;;  %v8983_v17 = vld [vmem:[#allocation14_spill] sm:$0xff]  ;;  %v8984_v14 = vld [vmem:[#allocation15_spill] sm:$0xff] }
 0x2fa   : > { %v1715_v49 = vrot.slane %v1702_v16, %v8946_v6  ;;  %v1719_v38 = vrot.slane %v1703_v13, %v8946_v6  ;;  %v1903_v30 = vadd.f32 %v8973_v18, %v7281_v63  ;;  %v1904_v45 = vadd.f32 %v8974_v41, %v7281_v63 }
 0x2fb   : > { %v1905_v15 = vadd.f32 %v8975_v5, %v7281_v63  ;;  %v1906_v36 = vadd.f32 %v8976_v57, %v7281_v63  ;;  %vm1720_vm12 = vcmp.eq.s32.totalorder %v8951_v7, %v1707_v44  ;;  %vm1721_vm13 = vcmp.eq.s32.totalorder %v8951_v7, %v1711_v62 }
 0x2fc   : > { %vm1722_vm14 = vcmp.eq.s32.totalorder %v8951_v7, %v1715_v49  ;;  %vm1723_vm15 = vcmp.eq.s32.totalorder %v8951_v7, %v1719_v38  ;;  %v4139_v24 = vsel %vm1720_vm12, 1.0, %v8952_v23  ;;  %v4140_v34 = vsel %vm1721_vm13, 1.0, %v8952_v23 }
 0x2fd   : > { %v4141_v46 = vsel %vm1722_vm14, 1.0, %v8952_v23  ;;  %v4142_v1 = vsel %vm1723_vm15, 1.0, %v8952_v23  ;;  %v1736_v50 = vcombine.low %v4139_v24, %v4140_v34  ;;  %v1959_v59 = vadd.f32 %v8977_v22, %v7281_v63 }
 0x2fe   : > { %v1737_v26 = vcombine.low %v4141_v46, %v4142_v1  ;;  %v1960_v4 = vadd.f32 %v8978_v55, %v7281_v63  ;;  %v1961_v56 = vadd.f32 %v8979_v27, %v7281_v63  ;;  %v1962_v47 = vadd.f32 %v8980_v40, %v7281_v63 }
 0x2ff   : > { %v1967_v2 = vrot.slane %v1903_v30, 7  ;;  %v1968_v8 = vrot.slane %v1904_v45, 7  ;;  %1740 = vst [vmem:[%s7356_s20 + $0x20] sm:$0xff] %v1736_v50  ;;  %v1969_v25 = vrot.slane %v1905_v15, 7  ;;  %v1970_v10 = vrot.slane %v1906_v36, 7 }
 0x300   : > { %1741 = vst [vmem:[%s7356_s20 + $0x28] sm:$0xff] %v1737_v26  ;;  %v2039_v39 = vadd.f32 %v8981_v21, %v7281_v63  ;;  %v2040_v0 = vadd.f32 %v8982_v52, %v7281_v63  ;;  %v2041_v11 = vadd.f32 %v8983_v17, %v7281_v63  ;;  %v2042_v16 = vadd.f32 %v8984_v14, %v7281_v63 }
 0x301   : > { %vm1975_vm0 = vcmp.gt.f32.partialorder %v1959_v59, %v1967_v2  ;;  %vm1976_vm1 = vcmp.gt.f32.partialorder %v1960_v4, %v1968_v8  ;;  %vm1977_vm2 = vcmp.gt.f32.partialorder %v1961_v56, %v1969_v25  ;;  %vm1978_vm3 = vcmp.gt.f32.partialorder %v1962_v47, %v1970_v10 }
 0x302   : > { %v1979_v13 = vsel %vm1975_vm0, %v1959_v59, %v1967_v2  ;;  %v1980_v44 = vsel %vm1976_vm1, %v1960_v4, %v1968_v8  ;;  %v1981_v62 = vsel %vm1977_vm2, %v1961_v56, %v1969_v25  ;;  %v1982_v49 = vsel %vm1978_vm3, %v1962_v47, %v1970_v10 }
 0x303   : > { %v1983_v38 = vsel %vm1975_vm0, 1, %v8945_v19  ;;  %v1984_v18 = vsel %vm1976_vm1, 1, %v8945_v19  ;;  %v1985_v30 = vsel %vm1977_vm2, 1, %v8945_v19  ;;  %v1986_v41 = vsel %vm1978_vm3, 1, %v8945_v19 }
 0x304   : > { %v2047_v45 = vrot.slane %v1979_v13, 7  ;;  %v2048_v5 = vrot.slane %v1980_v44, 7  ;;  %v2049_v15 = vrot.slane %v1981_v62, 7  ;;  %v2050_v57 = vrot.slane %v1982_v49, 7  ;;  %v8985_v44 = vld [vmem:[#allocation26_spill] sm:$0xff]  ;;  %v8986_v49 = vld [vmem:[#allocation27_spill] sm:$0xff] }
 0x305   : > { %v2063_v36 = vrot.slane %v1983_v38, 7  ;;  %v2064_v24 = vrot.slane %v1984_v18, 7  ;;  %v2065_v34 = vrot.slane %v1985_v30, 7  ;;  %v2066_v46 = vrot.slane %v1986_v41, 7  ;;  %v8987_v18 = vld [vmem:[#allocation150_spill] sm:$0xff]  ;;  %v8988_v41 = vld [vmem:[#allocation151_spill] sm:$0xff] }
 0x306   : > { %vm2055_vm4 = vcmp.gt.f32.partialorder %v2039_v39, %v2047_v45  ;;  %vm2056_vm5 = vcmp.gt.f32.partialorder %v2040_v0, %v2048_v5  ;;  %vm2057_vm6 = vcmp.gt.f32.partialorder %v2041_v11, %v2049_v15  ;;  %vm2058_vm7 = vcmp.gt.f32.partialorder %v2042_v16, %v2050_v57 }
 0x307   : > { %v2059_v1 = vsel %vm2055_vm4, %v2039_v39, %v2047_v45  ;;  %v2060_v50 = vsel %vm2056_vm5, %v2040_v0, %v2048_v5  ;;  %v2061_v26 = vsel %vm2057_vm6, %v2041_v11, %v2049_v15  ;;  %v2062_v22 = vsel %vm2058_vm7, %v2042_v16, %v2050_v57 }
 0x308   : > { %v2067_v59 = vsel %vm2055_vm4, 2, %v2063_v36  ;;  %v2068_v55 = vsel %vm2056_vm5, 2, %v2064_v24  ;;  %v2069_v4 = vsel %vm2057_vm6, 2, %v2065_v34  ;;  %v2070_v27 = vsel %vm2058_vm7, 2, %v2066_v46  ;;  %v8989_v34 = vld [vmem:[#allocation152_spill] sm:$0xff] }
 0x309   : > { %v2123_v56 = vadd.f32 %v7193_v61, %v7281_v63  ;;  %v2124_v40 = vadd.f32 %v7195_v54, %v7281_v63  ;;  %v2125_v47 = vadd.f32 %v7197_v42, %v7281_v63  ;;  %v2126_v2 = vadd.f32 %v7199_v43, %v7281_v63 }
 0x30a   : > { %v2131_v8 = vrot.slane %v2059_v1, 7  ;;  %v2132_v25 = vrot.slane %v2060_v50, 7  ;;  %v2133_v10 = vrot.slane %v2061_v26, 7  ;;  %v2134_v21 = vrot.slane %v2062_v22, 7  ;;  %v8990_v50 = vld [vmem:[#allocation153_spill] sm:$0xff]  ;;  %v8991_v22 = vld [vmem:[#allocation184_spill] sm:$0xff] }
 0x30b   : > { %v2143_v39 = vrot.slane %v2067_v59, 7  ;;  %v2144_v52 = vrot.slane %v2068_v55, 7  ;;  %v2145_v0 = vrot.slane %v2069_v4, 7  ;;  %v2146_v17 = vrot.slane %v2070_v27, 7  ;;  %v8992_v55 = vld [vmem:[#allocation185_spill] sm:$0xff] }
 0x30c   : > { %vm2139_vm8 = vcmp.gt.f32.partialorder %v2123_v56, %v2131_v8  ;;  %vm2140_vm9 = vcmp.gt.f32.partialorder %v2124_v40, %v2132_v25  ;;  %vm2141_vm10 = vcmp.gt.f32.partialorder %v2125_v47, %v2133_v10  ;;  %vm2142_vm11 = vcmp.gt.f32.partialorder %v2126_v2, %v2134_v21  ;;  %v8993_v2 = vld [vmem:[#allocation69_spill] sm:$0xff]  ;;  %v8994_v25 = vld [vmem:[#allocation70_spill] sm:$0xff]  ;;  %v8995_v21 = vld [vmem:[#allocation71_spill] sm:$0xff] }
 0x30d   : > { %v2147_v61 = vsel %vm2139_vm8, 3, %v2143_v39  ;;  %v2148_v54 = vsel %vm2140_vm9, 3, %v2144_v52  ;;  %v2149_v11 = vsel %vm2141_vm10, 3, %v2145_v0  ;;  %v2150_v14 = vsel %vm2142_vm11, 3, %v2146_v17  ;;  %v8996_v52 = vld [vmem:[#allocation72_spill] sm:$0xff] }
 0x30e   : > { %v2154_v42 = vrot.slane %v2147_v61, %v8946_v6  ;;  %v2158_v43 = vrot.slane %v2148_v54, %v8946_v6  ;;  %v2162_v16 = vrot.slane %v2149_v11, %v8946_v6  ;;  %v2166_v13 = vrot.slane %v2150_v14, %v8946_v6 }
 0x30f   : > { %v2350_v62 = vadd.f32 %v8985_v44, %v7281_v63  ;;  %v2351_v38 = vadd.f32 %v8986_v49, %v7281_v63  ;;  %v2352_v30 = vadd.f32 %v8987_v18, %v7281_v63  ;;  %v2353_v45 = vadd.f32 %v8988_v41, %v7281_v63 }
 0x310   : > { %vm2167_vm12 = vcmp.eq.s32.totalorder %v8951_v7, %v2154_v42  ;;  %vm2168_vm13 = vcmp.eq.s32.totalorder %v8951_v7, %v2158_v43  ;;  %vm2169_vm14 = vcmp.eq.s32.totalorder %v8951_v7, %v2162_v16  ;;  %vm2170_vm15 = vcmp.eq.s32.totalorder %v8951_v7, %v2166_v13 }
 0x311   : > { %v4147_v5 = vsel %vm2167_vm12, 1.0, %v8952_v23  ;;  %v4148_v15 = vsel %vm2168_vm13, 1.0, %v8952_v23  ;;  %v4149_v57 = vsel %vm2169_vm14, 1.0, %v8952_v23  ;;  %v4150_v36 = vsel %vm2170_vm15, 1.0, %v8952_v23 }
 0x312   : > { %v2183_v24 = vcombine.low %v4147_v5, %v4148_v15  ;;  %v2406_v46 = vadd.f32 %v8989_v34, %v7281_v63  ;;  %v2184_v1 = vcombine.low %v4149_v57, %v4150_v36  ;;  %v2407_v26 = vadd.f32 %v8990_v50, %v7281_v63 }
 0x313   : > { %v2408_v59 = vadd.f32 %v8991_v22, %v7281_v63  ;;  %v2409_v4 = vadd.f32 %v8992_v55, %v7281_v63  ;;  %v2414_v27 = vrot.slane %v2350_v62, 7  ;;  %v2415_v56 = vrot.slane %v2351_v38, 7 }
 0x314   : > { %2187 = vst [vmem:[%s7356_s20 + $0x30] sm:$0xff] %v2183_v24  ;;  %v2416_v40 = vrot.slane %v2352_v30, 7  ;;  %v2417_v47 = vrot.slane %v2353_v45, 7  ;;  %2188 = vst [vmem:[%s7356_s20 + $0x38] sm:$0xff] %v2184_v1  ;;  %v2486_v8 = vadd.f32 %v8993_v2, %v7281_v63  ;;  %v2487_v10 = vadd.f32 %v8994_v25, %v7281_v63 }
 0x315   : > { %v2488_v39 = vadd.f32 %v8995_v21, %v7281_v63  ;;  %v2489_v0 = vadd.f32 %v8996_v52, %v7281_v63  ;;  %vm2422_vm0 = vcmp.gt.f32.partialorder %v2406_v46, %v2414_v27  ;;  %vm2423_vm1 = vcmp.gt.f32.partialorder %v2407_v26, %v2415_v56 }
 0x316   : > { %vm2424_vm2 = vcmp.gt.f32.partialorder %v2408_v59, %v2416_v40  ;;  %vm2425_vm3 = vcmp.gt.f32.partialorder %v2409_v4, %v2417_v47  ;;  %v2426_v17 = vsel %vm2422_vm0, %v2406_v46, %v2414_v27  ;;  %v2427_v61 = vsel %vm2423_vm1, %v2407_v26, %v2415_v56 }
 0x317   : > { %v2428_v54 = vsel %vm2424_vm2, %v2408_v59, %v2416_v40  ;;  %v2429_v11 = vsel %vm2425_vm3, %v2409_v4, %v2417_v47  ;;  %v2430_v14 = vsel %vm2422_vm0, 1, %v8945_v19  ;;  %v2431_v42 = vsel %vm2423_vm1, 1, %v8945_v19 }
 0x318   : > { %v2432_v43 = vsel %vm2424_vm2, 1, %v8945_v19  ;;  %v2433_v16 = vsel %vm2425_vm3, 1, %v8945_v19  ;;  %v2494_v13 = vrot.slane %v2426_v17, 7  ;;  %v2495_v44 = vrot.slane %v2427_v61, 7  ;;  %v8999_v61 = vld [vmem:[#allocation156_spill] sm:$0xff] }
 0x319   : > { %v2496_v62 = vrot.slane %v2428_v54, 7  ;;  %v2497_v49 = vrot.slane %v2429_v11, 7  ;;  %v2510_v38 = vrot.slane %v2430_v14, 7  ;;  %v2511_v18 = vrot.slane %v2431_v42, 7  ;;  %v9000_v11 = vld [vmem:[#allocation157_spill] sm:$0xff] }
 0x31a   : > { %v2512_v30 = vrot.slane %v2432_v43, 7  ;;  %v2513_v41 = vrot.slane %v2433_v16, 7  ;;  %vm2502_vm4 = vcmp.gt.f32.partialorder %v2486_v8, %v2494_v13  ;;  %vm2503_vm5 = vcmp.gt.f32.partialorder %v2487_v10, %v2495_v44 }
 0x31b   : > { %vm2504_vm6 = vcmp.gt.f32.partialorder %v2488_v39, %v2496_v62  ;;  %vm2505_vm7 = vcmp.gt.f32.partialorder %v2489_v0, %v2497_v49  ;;  %v2506_v45 = vsel %vm2502_vm4, %v2486_v8, %v2494_v13  ;;  %v2507_v5 = vsel %vm2503_vm5, %v2487_v10, %v2495_v44 }
 0x31c   : > { %v2508_v15 = vsel %vm2504_vm6, %v2488_v39, %v2496_v62  ;;  %v2509_v57 = vsel %vm2505_vm7, %v2489_v0, %v2497_v49  ;;  %v2514_v36 = vsel %vm2502_vm4, 2, %v2510_v38  ;;  %v2515_v24 = vsel %vm2503_vm5, 2, %v2511_v18  ;;  %v8997_v39 = vld [vmem:[#allocation154_spill] sm:$0xff]  ;;  %v8998_v0 = vld [vmem:[#allocation155_spill] sm:$0xff]  ;;  %v9001_v49 = vld [vmem:[#allocation188_spill] sm:$0xff] }
 0x31d   : > { %v2516_v34 = vsel %vm2504_vm6, 2, %v2512_v30  ;;  %v2517_v46 = vsel %vm2505_vm7, 2, %v2513_v41  ;;  %v2570_v1 = vadd.f32 %v7233_v58, %v7281_v63  ;;  %v2571_v50 = vadd.f32 %v7235_v48, %v7281_v63  ;;  %v9002_v18 = vld [vmem:[#allocation189_spill] sm:$0xff]  ;;  %v9003_v41 = vld [vmem:[#allocation190_spill] sm:$0xff] }
 0x31e   : > { %v2572_v26 = vadd.f32 %v7237_v12, %v7281_v63  ;;  %v2573_v22 = vadd.f32 %v7239_v28, %v7281_v63  ;;  %v2578_v59 = vrot.slane %v2506_v45, 7  ;;  %v2579_v55 = vrot.slane %v2507_v5, 7  ;;  %v9004_v5 = vld [vmem:[#allocation191_spill] sm:$0xff] }
 0x31f   : > { %v2580_v4 = vrot.slane %v2508_v15, 7  ;;  %v2581_v27 = vrot.slane %v2509_v57, 7  ;;  %v2590_v56 = vrot.slane %v2514_v36, 7  ;;  %v2591_v40 = vrot.slane %v2515_v24, 7 }
 0x320   : > { %v2592_v47 = vrot.slane %v2516_v34, 7  ;;  %v2593_v2 = vrot.slane %v2517_v46, 7  ;;  %vm2586_vm8 = vcmp.gt.f32.partialorder %v2570_v1, %v2578_v59  ;;  %vm2587_vm9 = vcmp.gt.f32.partialorder %v2571_v50, %v2579_v55  ;;  %v9005_v46 = vld [vmem:[#allocation73_spill] sm:$0xff]  ;;  %v9006_v50 = vld [vmem:[#allocation74_spill] sm:$0xff]  ;;  %v9008_v55 = vld [vmem:[#allocation76_spill] sm:$0xff] }
 0x321   : > { %vm2588_vm10 = vcmp.gt.f32.partialorder %v2572_v26, %v2580_v4  ;;  %vm2589_vm11 = vcmp.gt.f32.partialorder %v2573_v22, %v2581_v27  ;;  %v2594_v58 = vsel %vm2586_vm8, 3, %v2590_v56  ;;  %v2595_v48 = vsel %vm2587_vm9, 3, %v2591_v40  ;;  %v9007_v22 = vld [vmem:[#allocation75_spill] sm:$0xff] }
 0x322   : > { %v2596_v8 = vsel %vm2588_vm10, 3, %v2592_v47  ;;  %v2597_v25 = vsel %vm2589_vm11, 3, %v2593_v2  ;;  %v2601_v12 = vrot.slane %v2594_v58, %v8946_v6  ;;  %v2605_v28 = vrot.slane %v2595_v48, %v8946_v6 }
 0x323   : > { %v2609_v10 = vrot.slane %v2596_v8, %v8946_v6  ;;  %v2613_v21 = vrot.slane %v2597_v25, %v8946_v6  ;;  %v2797_v52 = vadd.f32 %v8997_v39, %v7281_v63  ;;  %v2798_v17 = vadd.f32 %v8998_v0, %v7281_v63 }
 0x324   : > { %v2799_v54 = vadd.f32 %v8999_v61, %v7281_v63  ;;  %v2800_v14 = vadd.f32 %v9000_v11, %v7281_v63  ;;  %vm2614_vm12 = vcmp.eq.s32.totalorder %v8951_v7, %v2601_v12  ;;  %vm2615_vm13 = vcmp.eq.s32.totalorder %v8951_v7, %v2605_v28 }
 0x325   : > { %vm2616_vm14 = vcmp.eq.s32.totalorder %v8951_v7, %v2609_v10  ;;  %vm2617_vm15 = vcmp.eq.s32.totalorder %v8951_v7, %v2613_v21  ;;  %v4155_v42 = vsel %vm2614_vm12, 1.0, %v8952_v23  ;;  %v4156_v43 = vsel %vm2615_vm13, 1.0, %v8952_v23 }
 0x326   : > { %v4157_v16 = vsel %vm2616_vm14, 1.0, %v8952_v23  ;;  %v4158_v13 = vsel %vm2617_vm15, 1.0, %v8952_v23  ;;  %v2630_v44 = vcombine.low %v4155_v42, %v4156_v43  ;;  %v2853_v38 = vadd.f32 %v9001_v49, %v7281_v63 }
 0x327   : > { %v2631_v62 = vcombine.low %v4157_v16, %v4158_v13  ;;  %v2854_v30 = vadd.f32 %v9002_v18, %v7281_v63  ;;  %v2855_v45 = vadd.f32 %v9003_v41, %v7281_v63  ;;  %v2856_v15 = vadd.f32 %v9004_v5, %v7281_v63 }
 0x328   : > { %v2861_v57 = vrot.slane %v2797_v52, 7  ;;  %v2862_v36 = vrot.slane %v2798_v17, 7  ;;  %2634 = vst [vmem:[%s7356_s20 + $0x40] sm:$0xff] %v2630_v44  ;;  %v2863_v24 = vrot.slane %v2799_v54, 7  ;;  %v2864_v34 = vrot.slane %v2800_v14, 7 }
 0x329   : > { %2635 = vst [vmem:[%s7356_s20 + $0x48] sm:$0xff] %v2631_v62  ;;  %v2933_v1 = vadd.f32 %v9005_v46, %v7281_v63  ;;  %v2934_v26 = vadd.f32 %v9006_v50, %v7281_v63  ;;  %v2935_v59 = vadd.f32 %v9007_v22, %v7281_v63  ;;  %v2936_v4 = vadd.f32 %v9008_v55, %v7281_v63 }
 0x32a   : > { %vm2869_vm0 = vcmp.gt.f32.partialorder %v2853_v38, %v2861_v57  ;;  %vm2870_vm1 = vcmp.gt.f32.partialorder %v2854_v30, %v2862_v36  ;;  %vm2871_vm2 = vcmp.gt.f32.partialorder %v2855_v45, %v2863_v24  ;;  %vm2872_vm3 = vcmp.gt.f32.partialorder %v2856_v15, %v2864_v34 }
 0x32b   : > { %v2873_v27 = vsel %vm2869_vm0, %v2853_v38, %v2861_v57  ;;  %v2874_v56 = vsel %vm2870_vm1, %v2854_v30, %v2862_v36  ;;  %v2875_v40 = vsel %vm2871_vm2, %v2855_v45, %v2863_v24  ;;  %v2876_v47 = vsel %vm2872_vm3, %v2856_v15, %v2864_v34 }
 0x32c   : > { %v2877_v2 = vsel %vm2869_vm0, 1, %v8945_v19  ;;  %v2878_v58 = vsel %vm2870_vm1, 1, %v8945_v19  ;;  %v2879_v48 = vsel %vm2871_vm2, 1, %v8945_v19  ;;  %v2880_v8 = vsel %vm2872_vm3, 1, %v8945_v19 }
 0x32d   : > { %v2941_v25 = vrot.slane %v2873_v27, 7  ;;  %v2942_v12 = vrot.slane %v2874_v56, 7  ;;  %v2943_v28 = vrot.slane %v2875_v40, 7  ;;  %v2944_v10 = vrot.slane %v2876_v47, 7 }
 0x32e   : > { %v2957_v21 = vrot.slane %v2877_v2, 7  ;;  %v2958_v39 = vrot.slane %v2878_v58, 7  ;;  %v2959_v52 = vrot.slane %v2879_v48, 7  ;;  %v2960_v0 = vrot.slane %v2880_v8, 7  ;;  %v9013_v48 = vld [vmem:[#allocation32_spill] sm:$0xff] }
 0x32f   : > { %vm2949_vm4 = vcmp.gt.f32.partialorder %v2933_v1, %v2941_v25  ;;  %vm2950_vm5 = vcmp.gt.f32.partialorder %v2934_v26, %v2942_v12  ;;  %vm2951_vm6 = vcmp.gt.f32.partialorder %v2935_v59, %v2943_v28  ;;  %vm2952_vm7 = vcmp.gt.f32.partialorder %v2936_v4, %v2944_v10 }
 0x330   : > { %v2953_v17 = vsel %vm2949_vm4, %v2933_v1, %v2941_v25  ;;  %v2954_v61 = vsel %vm2950_vm5, %v2934_v26, %v2942_v12  ;;  %v2955_v54 = vsel %vm2951_vm6, %v2935_v59, %v2943_v28  ;;  %v2956_v11 = vsel %vm2952_vm7, %v2936_v4, %v2944_v10  ;;  %v9009_v1 = vld [vmem:[#allocation28_spill] sm:$0xff]  ;;  %v9010_v26 = vld [vmem:[#allocation29_spill] sm:$0xff]  ;;  %v9011_v59 = vld [vmem:[#allocation30_spill] sm:$0xff] }
 0x331   : > { %v2961_v14 = vsel %vm2949_vm4, 2, %v2957_v21  ;;  %v2962_v42 = vsel %vm2950_vm5, 2, %v2958_v39  ;;  %v2963_v43 = vsel %vm2951_vm6, 2, %v2959_v52  ;;  %v2964_v16 = vsel %vm2952_vm7, 2, %v2960_v0  ;;  %v9012_v4 = vld [vmem:[#allocation31_spill] sm:$0xff]  ;;  %v9014_v12 = vld [vmem:[#allocation33_spill] sm:$0xff] }
 0x332   : > { %v3017_v13 = vadd.f32 %v7241_v51, %v7281_v63  ;;  %v3018_v44 = vadd.f32 %v7243_v20, %v7281_v63  ;;  %v3019_v62 = vadd.f32 %v7245_v9, %v7281_v63  ;;  %v3020_v49 = vadd.f32 %v7247_v29, %v7281_v63  ;;  %v9015_v10 = vld [vmem:[#allocation34_spill] sm:$0xff]  ;;  %v9016_v39 = vld [vmem:[#allocation35_spill] sm:$0xff] }
 0x333   : > { %v3025_v38 = vrot.slane %v2953_v17, 7  ;;  %v3026_v18 = vrot.slane %v2954_v61, 7  ;;  %v3027_v30 = vrot.slane %v2955_v54, 7  ;;  %v3028_v41 = vrot.slane %v2956_v11, 7  ;;  %v9017_v11 = vld [vmem:[#allocation20_spill] sm:$0xff] }
 0x334   : > { %v3037_v45 = vrot.slane %v2961_v14, 7  ;;  %v3038_v5 = vrot.slane %v2962_v42, 7  ;;  %v3039_v15 = vrot.slane %v2963_v43, 7  ;;  %v3040_v57 = vrot.slane %v2964_v16, 7  ;;  %v9018_v42 = vld [vmem:[#allocation21_spill] sm:$0xff]  ;;  %v9019_v16 = vld [vmem:[#allocation22_spill] sm:$0xff] }
 0x335   : > { %vm3033_vm8 = vcmp.gt.f32.partialorder %v3017_v13, %v3025_v38  ;;  %vm3034_vm9 = vcmp.gt.f32.partialorder %v3018_v44, %v3026_v18  ;;  %vm3035_vm10 = vcmp.gt.f32.partialorder %v3019_v62, %v3027_v30  ;;  %vm3036_vm11 = vcmp.gt.f32.partialorder %v3020_v49, %v3028_v41  ;;  %v9020_v44 = vld [vmem:[#allocation23_spill] sm:$0xff] }
 0x336   : > { %v3041_v51 = vsel %vm3033_vm8, 3, %v3037_v45  ;;  %v3042_v20 = vsel %vm3034_vm9, 3, %v3038_v5  ;;  %v3043_v36 = vsel %vm3035_vm10, 3, %v3039_v15  ;;  %v3044_v24 = vsel %vm3036_vm11, 3, %v3040_v57 }
 0x337   : > { %v3048_v9 = vrot.slane %v3041_v51, %v8946_v6  ;;  %v3052_v29 = vrot.slane %v3042_v20, %v8946_v6  ;;  %v3056_v34 = vrot.slane %v3043_v36, %v8946_v6  ;;  %v3060_v46 = vrot.slane %v3044_v24, %v8946_v6 }
 0x338   : > { %v3244_v50 = vadd.f32 %v9009_v1, %v7281_v63  ;;  %v3245_v22 = vadd.f32 %v9010_v26, %v7281_v63  ;;  %v3246_v55 = vadd.f32 %v9011_v59, %v7281_v63  ;;  %v3247_v27 = vadd.f32 %v9012_v4, %v7281_v63 }
 0x339   : > { %vm3061_vm12 = vcmp.eq.s32.totalorder %v8951_v7, %v3048_v9  ;;  %vm3062_vm13 = vcmp.eq.s32.totalorder %v8951_v7, %v3052_v29  ;;  %vm3063_vm14 = vcmp.eq.s32.totalorder %v8951_v7, %v3056_v34  ;;  %vm3064_vm15 = vcmp.eq.s32.totalorder %v8951_v7, %v3060_v46 }
 0x33a   : > { %v4163_v56 = vsel %vm3061_vm12, 1.0, %v8952_v23  ;;  %v4164_v40 = vsel %vm3062_vm13, 1.0, %v8952_v23  ;;  %v4165_v47 = vsel %vm3063_vm14, 1.0, %v8952_v23  ;;  %v4166_v2 = vsel %vm3064_vm15, 1.0, %v8952_v23 }
 0x33b   : > { %v3077_v58 = vcombine.low %v4163_v56, %v4164_v40  ;;  %v3300_v8 = vadd.f32 %v9013_v48, %v7281_v63  ;;  %v3078_v25 = vcombine.low %v4165_v47, %v4166_v2  ;;  %v3301_v28 = vadd.f32 %v9014_v12, %v7281_v63 }
 0x33c   : > { %v3302_v21 = vadd.f32 %v9015_v10, %v7281_v63  ;;  %v3303_v52 = vadd.f32 %v9016_v39, %v7281_v63  ;;  %v3308_v0 = vrot.slane %v3244_v50, 7  ;;  %v3309_v17 = vrot.slane %v3245_v22, 7 }
 0x33d   : > { %3081 = vst [vmem:[%s7356_s20 + $0x50] sm:$0xff] %v3077_v58  ;;  %v3310_v61 = vrot.slane %v3246_v55, 7  ;;  %v3311_v54 = vrot.slane %v3247_v27, 7  ;;  %3082 = vst [vmem:[%s7356_s20 + $0x58] sm:$0xff] %v3078_v25  ;;  %v3380_v14 = vadd.f32 %v9017_v11, %v7281_v63  ;;  %v3381_v43 = vadd.f32 %v9018_v42, %v7281_v63 }
 0x33e   : > { %v3382_v13 = vadd.f32 %v9019_v16, %v7281_v63  ;;  %v3383_v62 = vadd.f32 %v9020_v44, %v7281_v63  ;;  %vm3316_vm0 = vcmp.gt.f32.partialorder %v3300_v8, %v3308_v0  ;;  %vm3317_vm1 = vcmp.gt.f32.partialorder %v3301_v28, %v3309_v17 }
 0x33f   : > { %vm3318_vm2 = vcmp.gt.f32.partialorder %v3302_v21, %v3310_v61  ;;  %vm3319_vm3 = vcmp.gt.f32.partialorder %v3303_v52, %v3311_v54  ;;  %v3320_v49 = vsel %vm3316_vm0, %v3300_v8, %v3308_v0  ;;  %v3321_v38 = vsel %vm3317_vm1, %v3301_v28, %v3309_v17  ;;  %v9021_v17 = vld [vmem:[#allocation160_spill] sm:$0xff] }
 0x340   : > { %v3322_v18 = vsel %vm3318_vm2, %v3302_v21, %v3310_v61  ;;  %v3323_v30 = vsel %vm3319_vm3, %v3303_v52, %v3311_v54  ;;  %v3324_v41 = vsel %vm3316_vm0, 1, %v8945_v19  ;;  %v3325_v45 = vsel %vm3317_vm1, 1, %v8945_v19  ;;  %v9022_v54 = vld [vmem:[#allocation161_spill] sm:$0xff] }
 0x341   : > { %v3326_v5 = vsel %vm3318_vm2, 1, %v8945_v19  ;;  %v3327_v15 = vsel %vm3319_vm3, 1, %v8945_v19  ;;  %v3388_v57 = vrot.slane %v3320_v49, 7  ;;  %v3389_v51 = vrot.slane %v3321_v38, 7 }
 0x342   : > { %v3390_v20 = vrot.slane %v3322_v18, 7  ;;  %v3391_v36 = vrot.slane %v3323_v30, 7  ;;  %v3404_v24 = vrot.slane %v3324_v41, 7  ;;  %v3405_v9 = vrot.slane %v3325_v45, 7  ;;  %v9025_v30 = vld [vmem:[#allocation194_spill] sm:$0xff]  ;;  %v9026_v45 = vld [vmem:[#allocation195_spill] sm:$0xff] }
 0x343   : > { %v3406_v29 = vrot.slane %v3326_v5, 7  ;;  %v3407_v34 = vrot.slane %v3327_v15, 7  ;;  %vm3396_vm4 = vcmp.gt.f32.partialorder %v3380_v14, %v3388_v57  ;;  %vm3397_vm5 = vcmp.gt.f32.partialorder %v3381_v43, %v3389_v51  ;;  %v9027_v15 = vld [vmem:[#allocation162_spill] sm:$0xff] }
 0x344   : > { %vm3398_vm6 = vcmp.gt.f32.partialorder %v3382_v13, %v3390_v20  ;;  %vm3399_vm7 = vcmp.gt.f32.partialorder %v3383_v62, %v3391_v36  ;;  %v3400_v46 = vsel %vm3396_vm4, %v3380_v14, %v3388_v57  ;;  %v3401_v1 = vsel %vm3397_vm5, %v3381_v43, %v3389_v51  ;;  %v9023_v14 = vld [vmem:[#allocation192_spill] sm:$0xff]  ;;  %v9024_v43 = vld [vmem:[#allocation193_spill] sm:$0xff]  ;;  %v9028_v51 = vld [vmem:[#allocation163_spill] sm:$0xff] }
 0x345   : > { %v3402_v50 = vsel %vm3398_vm6, %v3382_v13, %v3390_v20  ;;  %v3403_v26 = vsel %vm3399_vm7, %v3383_v62, %v3391_v36  ;;  %v3408_v22 = vsel %vm3396_vm4, 2, %v3404_v24  ;;  %v3409_v59 = vsel %vm3397_vm5, 2, %v3405_v9 }
 0x346   : > { %v3410_v55 = vsel %vm3398_vm6, 2, %v3406_v29  ;;  %v3411_v4 = vsel %vm3399_vm7, 2, %v3407_v34  ;;  %v3464_v27 = vadd.f32 %v7283_v35, %v7281_v63  ;;  %v3465_v56 = vadd.f32 %v7285_v32, %v7281_v63  ;;  %v9029_v34 = vld [vmem:[#allocation24_spill] sm:$0xff] }
 0x347   : > { %v3466_v40 = vadd.f32 %v7287_v33, %v7281_v63  ;;  %v3467_v47 = vadd.f32 %v7289_v60, %v7281_v63  ;;  %v3472_v2 = vrot.slane %v3400_v46, 7  ;;  %v3473_v58 = vrot.slane %v3401_v1, 7  ;;  %v9030_v1 = vld [vmem:[#allocation25_spill] sm:$0xff] }
 0x348   : > { %v3474_v48 = vrot.slane %v3402_v50, 7  ;;  %v3475_v8 = vrot.slane %v3403_v26, 7  ;;  %v3484_v25 = vrot.slane %v3408_v22, 7  ;;  %v3485_v12 = vrot.slane %v3409_v59, 7  ;;  %v9031_v26 = vld [vmem:[#allocation77_spill] sm:$0xff]  ;;  %v9032_v59 = vld [vmem:[#allocation78_spill] sm:$0xff] }
 0x349   : > { %v3486_v28 = vrot.slane %v3410_v55, 7  ;;  %v3487_v10 = vrot.slane %v3411_v4, 7  ;;  %vm3480_vm8 = vcmp.gt.f32.partialorder %v3464_v27, %v3472_v2  ;;  %vm3481_vm9 = vcmp.gt.f32.partialorder %v3465_v56, %v3473_v58 }
 0x34a   : > { %vm3482_vm10 = vcmp.gt.f32.partialorder %v3466_v40, %v3474_v48  ;;  %vm3483_vm11 = vcmp.gt.f32.partialorder %v3467_v47, %v3475_v8  ;;  %v3488_v35 = vsel %vm3480_vm8, 3, %v3484_v25  ;;  %v3489_v32 = vsel %vm3481_vm9, 3, %v3485_v12 }
 0x34b   : > { %v3490_v21 = vsel %vm3482_vm10, 3, %v3486_v28  ;;  %v3491_v39 = vsel %vm3483_vm11, 3, %v3487_v10  ;;  %v3495_v33 = vrot.slane %v3488_v35, %v8946_v6  ;;  %v3499_v60 = vrot.slane %v3489_v32, %v8946_v6 }
 0x34c   : > { %v3503_v52 = vrot.slane %v3490_v21, %v8946_v6  ;;  %v3507_v0 = vrot.slane %v3491_v39, %v8946_v6  ;;  %v3691_v61 = vadd.f32 %v9021_v17, %v7281_v63  ;;  %v3692_v11 = vadd.f32 %v9022_v54, %v7281_v63 }
 0x34d   : > { %v3693_v42 = vadd.f32 %v9023_v14, %v7281_v63  ;;  %v3694_v16 = vadd.f32 %v9024_v43, %v7281_v63  ;;  %vm3508_vm12 = vcmp.eq.s32.totalorder %v8951_v7, %v3495_v33  ;;  %vm3509_vm13 = vcmp.eq.s32.totalorder %v8951_v7, %v3499_v60 }
 0x34e   : > { %vm3510_vm14 = vcmp.eq.s32.totalorder %v8951_v7, %v3503_v52  ;;  %vm3511_vm15 = vcmp.eq.s32.totalorder %v8951_v7, %v3507_v0  ;;  %v4171_v13 = vsel %vm3508_vm12, 1.0, %v8952_v23  ;;  %v4172_v44 = vsel %vm3509_vm13, 1.0, %v8952_v23 }
 0x34f   : > { %v4173_v62 = vsel %vm3510_vm14, 1.0, %v8952_v23  ;;  %v4174_v49 = vsel %vm3511_vm15, 1.0, %v8952_v23  ;;  %v3524_v38 = vcombine.low %v4171_v13, %v4172_v44  ;;  %v3747_v41 = vadd.f32 %v9025_v30, %v7281_v63 }
 0x350   : > { %v3525_v18 = vcombine.low %v4173_v62, %v4174_v49  ;;  %v3748_v5 = vadd.f32 %v9026_v45, %v7281_v63  ;;  %v3749_v57 = vadd.f32 %v9027_v15, %v7281_v63  ;;  %v3750_v20 = vadd.f32 %v9028_v51, %v7281_v63 }
 0x351   : > { %v3755_v36 = vrot.slane %v3691_v61, 7  ;;  %v3756_v24 = vrot.slane %v3692_v11, 7  ;;  %3528 = vst [vmem:[%s7356_s20 + $0x60] sm:$0xff] %v3524_v38  ;;  %v3757_v9 = vrot.slane %v3693_v42, 7  ;;  %v3758_v29 = vrot.slane %v3694_v16, 7 }
 0x352   : > { %3529 = vst [vmem:[%s7356_s20 + $0x68] sm:$0xff] %v3525_v18  ;;  %v3827_v46 = vadd.f32 %v9029_v34, %v7281_v63  ;;  %v3828_v50 = vadd.f32 %v9030_v1, %v7281_v63  ;;  %v3829_v22 = vadd.f32 %v9031_v26, %v7281_v63  ;;  %v3830_v55 = vadd.f32 %v9032_v59, %v7281_v63 }
 0x353   : > { %vm3763_vm0 = vcmp.gt.f32.partialorder %v3747_v41, %v3755_v36  ;;  %vm3764_vm1 = vcmp.gt.f32.partialorder %v3748_v5, %v3756_v24  ;;  %vm3765_vm2 = vcmp.gt.f32.partialorder %v3749_v57, %v3757_v9  ;;  %vm3766_vm3 = vcmp.gt.f32.partialorder %v3750_v20, %v3758_v29 }
 0x354   : > { %v3767_v4 = vsel %vm3763_vm0, %v3747_v41, %v3755_v36  ;;  %v3768_v27 = vsel %vm3764_vm1, %v3748_v5, %v3756_v24  ;;  %v3769_v56 = vsel %vm3765_vm2, %v3749_v57, %v3757_v9  ;;  %v3770_v40 = vsel %vm3766_vm3, %v3750_v20, %v3758_v29 }
 0x355   : > { %v3771_v47 = vsel %vm3763_vm0, 1, %v8945_v19  ;;  %v3772_v2 = vsel %vm3764_vm1, 1, %v8945_v19  ;;  %v3773_v58 = vsel %vm3765_vm2, 1, %v8945_v19  ;;  %v3774_v48 = vsel %vm3766_vm3, 1, %v8945_v19 }
 0x356   : > { %v3835_v8 = vrot.slane %v3767_v4, 7  ;;  %v3836_v25 = vrot.slane %v3768_v27, 7  ;;  %v3837_v12 = vrot.slane %v3769_v56, 7  ;;  %v3838_v28 = vrot.slane %v3770_v40, 7 }
 0x357   : > { %v3851_v10 = vrot.slane %v3771_v47, 7  ;;  %v3852_v35 = vrot.slane %v3772_v2, 7  ;;  %v3853_v32 = vrot.slane %v3773_v58, 7  ;;  %v3854_v21 = vrot.slane %v3774_v48, 7 }
 0x358   : > { %vm3843_vm4 = vcmp.gt.f32.partialorder %v3827_v46, %v3835_v8  ;;  %vm3844_vm5 = vcmp.gt.f32.partialorder %v3828_v50, %v3836_v25  ;;  %vm3845_vm6 = vcmp.gt.f32.partialorder %v3829_v22, %v3837_v12  ;;  %vm3846_vm7 = vcmp.gt.f32.partialorder %v3830_v55, %v3838_v28 }
 0x359   : > { %v3847_v39 = vsel %vm3843_vm4, %v3827_v46, %v3835_v8  ;;  %v3848_v33 = vsel %vm3844_vm5, %v3828_v50, %v3836_v25  ;;  %v3849_v60 = vsel %vm3845_vm6, %v3829_v22, %v3837_v12  ;;  %v3850_v52 = vsel %vm3846_vm7, %v3830_v55, %v3838_v28 }
 0x35a   : > { %v3855_v0 = vsel %vm3843_vm4, 2, %v3851_v10  ;;  %v3856_v17 = vsel %vm3844_vm5, 2, %v3852_v35  ;;  %v3857_v61 = vsel %vm3845_vm6, 2, %v3853_v32  ;;  %v3858_v19 = vsel %vm3846_vm7, 2, %v3854_v21 }
 0x35b   : > { %v3911_v54 = vadd.f32 %v7291_v53, %v7281_v63  ;;  %v3912_v11 = vadd.f32 %v7293_v3, %v7281_v63  ;;  %v3913_v14 = vadd.f32 %v7295_v37, %v7281_v63  ;;  %v3914_v42 = vadd.f32 %v7297_v31, %v7281_v63 }
 0x35c   : > { %v3919_v43 = vrot.slane %v3847_v39, 7  ;;  %v3920_v16 = vrot.slane %v3848_v33, 7  ;;  %v3921_v13 = vrot.slane %v3849_v60, 7  ;;  %v3922_v44 = vrot.slane %v3850_v52, 7 }
 0x35d   : > { %v3931_v62 = vrot.slane %v3855_v0, 7  ;;  %v3932_v49 = vrot.slane %v3856_v17, 7  ;;  %v3933_v38 = vrot.slane %v3857_v61, 7  ;;  %v3934_v18 = vrot.slane %v3858_v19, 7 }
 0x35e   : > { %vm3927_vm8 = vcmp.gt.f32.partialorder %v3911_v54, %v3919_v43  ;;  %vm3928_vm9 = vcmp.gt.f32.partialorder %v3912_v11, %v3920_v16  ;;  %vm3929_vm10 = vcmp.gt.f32.partialorder %v3913_v14, %v3921_v13  ;;  %vm3930_vm11 = vcmp.gt.f32.partialorder %v3914_v42, %v3922_v44 }
 0x35f   : > { %v3935_v53 = vsel %vm3927_vm8, 3, %v3931_v62  ;;  %v3936_v3 = vsel %vm3928_vm9, 3, %v3932_v49  ;;  %v3937_v30 = vsel %vm3929_vm10, 3, %v3933_v38  ;;  %v3938_v37 = vsel %vm3930_vm11, 3, %v3934_v18 }
 0x360   : > { %v3942_v63 = vrot.slane %v3935_v53, %v8946_v6  ;;  %v3946_v31 = vrot.slane %v3936_v3, %v8946_v6  ;;  %v3950_v41 = vrot.slane %v3937_v30, %v8946_v6  ;;  %v3954_v45 = vrot.slane %v3938_v37, %v8946_v6 }
 0x362   : > { %vm3955_vm12 = vcmp.eq.s32.totalorder %v8951_v7, %v3942_v63  ;;  %vm3956_vm13 = vcmp.eq.s32.totalorder %v8951_v7, %v3946_v31  ;;  %vm3957_vm14 = vcmp.eq.s32.totalorder %v8951_v7, %v3950_v41  ;;  %vm3958_vm15 = vcmp.eq.s32.totalorder %v8951_v7, %v3954_v45 }
 0x363   : > { %v4179_v5 = vsel %vm3955_vm12, 1.0, %v8952_v23  ;;  %v4180_v15 = vsel %vm3956_vm13, 1.0, %v8952_v23  ;;  %v4181_v57 = vsel %vm3957_vm14, 1.0, %v8952_v23  ;;  %v4182_v51 = vsel %vm3958_vm15, 1.0, %v8952_v23 }
 0x364   : > { %v3971_v20 = vcombine.low %v4179_v5, %v4180_v15  ;;  %v3972_v36 = vcombine.low %v4181_v57, %v4182_v51 }
 0x366   : > { %3975 = vst [vmem:[%s7356_s20 + $0x70] sm:$0xff] %v3971_v20  ;;  %3976 = vst [vmem:[%s7356_s20 + $0x78] sm:$0xff] %v3972_v36 }
 0x367 PF: > { %s18_s24 = sadd.s32 1, %s4219_s24  }
 0x368   : > { %p15_p4 = scmp.ge.s32.totalorder %s18_s24, 4  }
 0x36a   :  { %17 = sbr.rel (!%p15_p4) target bundleno = 1 (0x1), region = 89 }

</bundles_post_ra>
